<compile_context>
chip_gen: v7x
topology: tpu7x:2x2x1
jax: 0.10.0
libtpu: 0.0.40
codegen_flags: <defaults>
</compile_context>

<pallas_src>
import functools

import numpy as np
import jax
import jax.numpy as jnp
from jax import lax
from jax.experimental import pallas as pl
from jax.experimental.pallas import tpu as pltpu


C_PAD = 128   # lane-dense padding for the final head output only


# ------------------------------ elementwise ------------------------------

def _erf(x):
    # Abramowitz & Stegun 7.1.26 rational approximation (|err| <= 1.5e-7).
    # Used instead of lax.erf so the kernel relies only on exp / mul / add.
    z = jnp.abs(x)
    t = 1.0 / (1.0 + 0.3275911 * z)
    poly = t * (0.254829592 + t * (-0.284496736 + t * (1.421413741
               + t * (-1.453152027 + t * 1.061405429))))
    e = 1.0 - poly * jnp.exp(-z * z)
    return jnp.where(x >= 0.0, e, -e)


def _gelu(x):
    # erf-based GELU (matches PyTorch F.gelu default, not the tanh variant).
    return 0.5 * x * (1.0 + _erf(x * 0.7071067811865476))


def _sigmoid(x):
    return 1.0 / (1.0 + jnp.exp(-x))


def _const_spec(shape):
    zeros = (0,) * len(shape)
    return pl.BlockSpec(tuple(shape), lambda i, _z=zeros: _z)


# ------------------------- truncated rDFT matrices -------------------------

def dft_matrices_tm(L, B, modes):
    """Per-batch forward/inverse truncated real-DFT matrices, zero-embedded so
    they act directly on a time-major (L*B, Hf) activation (row = t*B + b)."""
    assert modes <= L // 2 + 1, "modes must satisfy modes <= L//2 + 1"
    t = np.arange(L)[:, None].astype(np.float64)
    k = np.arange(modes)[None, :].astype(np.float64)
    ang = 2.0 * np.pi * t * k / L                           # (L, M)
    cos, sin = np.cos(ang), np.sin(ang)
    c = np.where((k == 0) | (2 * k == L), 1.0, 2.0)         # rfft symmetry weights
    LB = L * B
    fwd = np.zeros((B, 2 * modes, LB), np.float64)          # rows [cos | -sin]
    ire = np.zeros((B, LB, modes), np.float64)
    iim = np.zeros((B, LB, modes), np.float64)
    for b in range(B):
        fwd[b, :modes, b::B] = cos.T
        fwd[b, modes:, b::B] = -sin.T
        ire[b, b::B, :] = c * cos / L
        iim[b, b::B, :] = -c * sin / L
    return (jnp.asarray(fwd, jnp.float32),
            jnp.asarray(ire, jnp.float32),
            jnp.asarray(iim, jnp.float32))


# ------------------------------ fused kernel ------------------------------

def _make_fused_kernel(B, L, modes, n_fno_blocks, Hf, n_gru_layers, Hg):
    M, NB, NG = modes, n_fno_blocks, n_gru_layers
    LB = L * B
    dn_bmm = (((2,), (1,)), ((0,), (0,)))   # batch over mode axis, contract Hf

    def kernel(x_ref, posb_ref, w1x_ref, w2_ref, b2_ref,
               dftf_ref, idre_ref, idim_ref, wcat_ref, wsk_ref, bsk_ref,
               wp1_ref, bp1_ref, wp2_ref, bp2_ref, *rest):
        gru = [rest[4 * l: 4 * l + 4] for l in range(NG)]
        wlin_ref, blin_ref = rest[4 * NG], rest[4 * NG + 1]
        o_ref = rest[4 * NG + 2]
        hseq = rest[4 * NG + 3: 4 * NG + 3 + NG]
        f32 = jnp.float32

        # ---------------- FNO lifting (rows are time-major: t*B + b) --------
        h = _gelu(jnp.dot(x_ref[...], w1x_ref[...], preferred_element_type=f32)
                  + posb_ref[...])                                         # (LB, 2Hf)
        h = jnp.dot(h, w2_ref[...], preferred_element_type=f32) + b2_ref[...]  # (LB, Hf)

        # Per-batch DFT operators (small, hoisted once).
        dftf = [dftf_ref[b] for b in range(B)]    # (2M, LB), rows [re | im]
        idre = [idre_ref[b] for b in range(B)]    # (LB, M)
        idim = [idim_ref[b] for b in range(B)]    # (LB, M)

        # ---------------- FNO spectral blocks -------------------------------
        for li in range(NB):
            wcat = wcat_ref[li]                   # (M, Hf, 2Hf) = [W_re | W_im]
            spec = jnp.zeros((LB, Hf), f32)
            for b in range(B):
                xf = jnp.dot(dftf[b], h, preferred_element_type=f32)      # (2M, Hf)
                xre = xf[:M][:, None, :]                                   # (M, 1, Hf)
                xim = xf[M:][:, None, :]
                pre = lax.dot_general(xre, wcat, dn_bmm,
                                      preferred_element_type=f32)[:, 0, :]  # (M, 2Hf)
                pim = lax.dot_general(xim, wcat, dn_bmm,
                                      preferred_element_type=f32)[:, 0, :]
                ore = pre[:, :Hf] - pim[:, Hf:]                            # Re(X * W)
                oim = pre[:, Hf:] + pim[:, :Hf]                            # Im(X * W)
                spec = (spec
                        + jnp.dot(idre[b], ore, preferred_element_type=f32)
                        + jnp.dot(idim[b], oim, preferred_element_type=f32))
            h = spec + jnp.dot(h, wsk_ref[li], preferred_element_type=f32) + bsk_ref[li]
            if li < NB - 1:
                h = _gelu(h)

        # ---------------- FNO projection (Cout stays narrow internally) -----
        h = _gelu(jnp.dot(h, wp1_ref[...], preferred_element_type=f32) + bp1_ref[...])
        seq = jnp.dot(h, wp2_ref[...], preferred_element_type=f32) + bp2_ref[...]   # (LB, Cout)

        # ---------------- GRU stack (batch folded into the hidden state) ----
        for l in range(NG):
            wih_ref, bih_ref, whh_ref, bhn_ref = gru[l]
            # Hoisted input projections for all timesteps & batches (register value).
            gx = jnp.dot(seq, wih_ref[...], preferred_element_type=f32) + bih_ref[...]  # (LB, 3Hg)
            whh = whh_ref[...]                    # (Hg, 3Hg), gates packed [r | z | n]
            bhn = bhn_ref[...]                    # (1, Hg)
            hst = jnp.zeros((B, Hg), f32)
            for t in range(L):                    # unrolled serial recurrence
                gh = jnp.dot(hst, whh, preferred_element_type=f32)        # (B, 3Hg)
                gxt = gx[t * B:(t + 1) * B, :]                            # (B, 3Hg)
                r = _sigmoid(gxt[:, :Hg] + gh[:, :Hg])
                z = _sigmoid(gxt[:, Hg:2 * Hg] + gh[:, Hg:2 * Hg])
                n = jnp.tanh(gxt[:, 2 * Hg:] + r * (gh[:, 2 * Hg:] + bhn))
                hst = (1.0 - z) * n + z * hst
                hseq[l][t * B:(t + 1) * B, :] = hst
            seq = hseq[l][...]                    # (LB, Hg), time-major

        # ---------------- Linear head (lane-dense, C_PAD wide) --------------
        o_ref[...] = jnp.dot(seq, wlin_ref[...], preferred_element_type=f32) + blin_ref[...]

    return kernel


# ------------------------------ wrapper ------------------------------

def fno_gru_net(x, params, *, modes, output_channel):
    B, L, Cin = x.shape
    fp, gp = params["fno"], params["gru"]
    H2 = fp["w1x"].shape[1]
    Hf = fp["w2"].shape[1]
    NB = fp["wcat"].shape[0]
    Cf = fp["wp2"].shape[1]                 # FNO out channels (== GRU layer-0 input)
    NG = len(gp)
    Hg = gp[0][2].shape[0]
    CPAD = params["wlin"].shape[1]
    LB = L * B

    # Time-major flattening: row index = t*B + b.
    x_tm = jnp.transpose(x, (1, 0, 2)).reshape(LB, Cin)

    # Lifting bias with the positional grid channel folded in (precomputed).
    pos = jnp.asarray(np.linspace(0.0, 1.0, L, dtype=np.float32)[:, None])
    posb = jnp.repeat(pos @ fp["w1p"] + fp["b1"], B, axis=0)              # (LB, H2)

    dftf, idre, idim = dft_matrices_tm(L, B, modes)

    args = [x_tm, posb, fp["w1x"], fp["w2"], fp["b2"],
            dftf, idre, idim, fp["wcat"], fp["wsk"], fp["bsk"],
            fp["wp1"], fp["bp1"], fp["wp2"], fp["bp2"]]
    for layer in gp:
        args.extend(layer)
    args += [params["wlin"], params["blin"]]

    # Advisory cost estimate (matmul-dominated).
    mm = lambda m, k, n: 2 * m * k * n
    flops = mm(LB, Cin, H2) + mm(LB, H2, Hf)
    flops += NB * (B * (mm(2 * modes, LB, Hf) + 2 * mm(modes, Hf, 2 * Hf)
                        + 2 * mm(LB, modes, Hf)) + mm(LB, Hf, Hf))
    flops += mm(LB, Hf, H2) + mm(LB, H2, Cf)
    cin_l = Cf
    for _ in range(NG):
        flops += mm(LB, cin_l, 3 * Hg) + L * mm(B, Hg, 3 * Hg)
        cin_l = Hg
    flops += mm(LB, Hg, CPAD)
    transc = 2 * LB * H2 + (NB - 1) * LB * Hf + NG * L * 3 * B * Hg
    bytes_acc = sum(int(np.prod(a.shape)) * 4 for a in args) + LB * CPAD * 4
    ce = pl.CostEstimate(flops=int(flops), transcendentals=int(transc),
                         bytes_accessed=int(bytes_acc))

    y_pad = pl.pallas_call(
        _make_fused_kernel(B, L, modes, NB, Hf, NG, Hg),
        out_shape=jax.ShapeDtypeStruct((LB, CPAD), jnp.float32),
        grid=(1,),
        in_specs=[_const_spec(a.shape) for a in args],
        out_specs=pl.BlockSpec((LB, CPAD), lambda i: (0, 0)),
        scratch_shapes=[pltpu.VMEM((LB, Hg), jnp.float32) for _ in range(NG)],
        compiler_params=pltpu.CompilerParams(
            dimension_semantics=("arbitrary",),
            vmem_limit_bytes=32 * 1024 * 1024),
        cost_estimate=ce,
    )(*args)

    # (LB, CPAD) time-major -> (B, L, Cout)
    return y_pad.reshape(L, B, CPAD).transpose(1, 0, 2)[..., :output_channel]


# ------------------------------ parameters ------------------------------

def init_params(key, *, fno_num_layers, gru_num_layers, fno_hidden_size,
                gru_hidden_size, modes, input_channel, output_channel):
    keys = iter(jax.random.split(key, 256))

    def dense(kin, kout):
        w = jax.random.normal(next(keys), (kin, kout), jnp.float32) / np.sqrt(kin)
        b = 0.01 * jax.random.normal(next(keys), (1, kout), jnp.float32)
        return w, b

    Hf, Hg, Cout = fno_hidden_size, gru_hidden_size, output_channel
    H2 = 2 * Hf

    # --- FNO -----------------------------------------------------------------
    # TODO(synk): neuraloperator's FNO1d lifting/projection/skip internals vary
    # by version; the classic FNO structure (2-layer lifting/projection MLP,
    # linear skip, GELU between blocks, positional grid channel) is used here.
    w1, b1 = dense(input_channel + 1, H2)            # +1 positional grid channel
    fp = {"w1x": w1[:input_channel], "w1p": w1[input_channel:], "b1": b1}
    fp["w2"], fp["b2"] = dense(H2, Hf)
    scale = 1.0 / (Hf * Hf)
    wcat, wsk, bsk = [], [], []
    for _ in range(fno_num_layers):
        wre = scale * jax.random.normal(next(keys), (modes, Hf, Hf), jnp.float32)
        wim = scale * jax.random.normal(next(keys), (modes, Hf, Hf), jnp.float32)
        wcat.append(jnp.concatenate([wre, wim], axis=-1))    # (M, Hf, 2Hf)
        w_s, b_s = dense(Hf, Hf)
        wsk.append(w_s); bsk.append(b_s)
    fp["wcat"] = jnp.stack(wcat)
    fp["wsk"], fp["bsk"] = jnp.stack(wsk), jnp.stack(bsk)
    fp["wp1"], fp["bp1"] = dense(Hf, H2)
    fp["wp2"], fp["bp2"] = dense(H2, Cout)            # narrow FNO output (no padding)

    # --- GRU (PyTorch nn.GRU gate math; gates packed [r | z | n];
    #     r/z hidden biases merged into the input bias, b_hn kept separate) ----
    gp = []
    cin = Cout
    for _ in range(gru_num_layers):
        wir, bir = dense(cin, Hg); wiz, biz = dense(cin, Hg); win, bin_ = dense(cin, Hg)
        whr, bhr = dense(Hg, Hg); whz, bhz = dense(Hg, Hg); whn, bhn = dense(Hg, Hg)
        w_ih3 = jnp.concatenate([wir, wiz, win], axis=1)               # (cin, 3Hg)
        b_ih3 = jnp.concatenate([bir + bhr, biz + bhz, bin_], axis=1)  # (1, 3Hg)
        w_hh3 = jnp.concatenate([whr, whz, whn], axis=1)               # (Hg, 3Hg)
        gp.append((w_ih3, b_ih3, w_hh3, bhn))
        cin = Hg

    wlin, blin = dense(Hg, Cout)
    pad_c = C_PAD - Cout
    wlin = jnp.pad(wlin, ((0, 0), (0, pad_c)))        # lane-dense head output
    blin = jnp.pad(blin, ((0, 0), (0, pad_c)))
    return {"fno": fp, "gru": gp, "wlin": wlin, "blin": blin}


# ------------------------------ main ------------------------------

if __name__ == "__main__":
    B, L = 2, 16
    input_channel, output_channel = 4, 4
    fno_num_layers, gru_num_layers = 2, 2
    fno_hidden_size, gru_hidden_size = 32, 32
    modes = 8

    key = jax.random.PRNGKey(0)
    pkey, xkey = jax.random.split(key)
    params = init_params(
        pkey,
        fno_num_layers=fno_num_layers, gru_num_layers=gru_num_layers,
        fno_hidden_size=fno_hidden_size, gru_hidden_size=gru_hidden_size,
        modes=modes, input_channel=input_channel, output_channel=output_channel)

    x = jax.random.normal(xkey, (B, L, input_channel), jnp.float32)

    fwd = jax.jit(functools.partial(
        fno_gru_net, modes=modes, output_channel=output_channel))
    y = fwd(x, params)
    jax.block_until_ready(y)
    assert y.shape == (B, L, output_channel) and y.dtype == jnp.float32
    assert bool(jnp.all(jnp.isfinite(y)))
    print("KERNEL_OK")
</pallas_src>

<mosaic_0001>
module attributes {stable_mosaic.version = 11 : i64} {
  func.func @kernel(%arg0: i32, %arg1: memref<32x4xf32, #tpu.memory_space<vmem>>, %arg2: memref<32x64xf32, #tpu.memory_space<vmem>>, %arg3: memref<4x64xf32, #tpu.memory_space<vmem>>, %arg4: memref<64x32xf32, #tpu.memory_space<vmem>>, %arg5: memref<1x32xf32, #tpu.memory_space<vmem>>, %arg6: memref<2x16x32xf32, #tpu.memory_space<vmem>>, %arg7: memref<2x32x8xf32, #tpu.memory_space<vmem>>, %arg8: memref<2x32x8xf32, #tpu.memory_space<vmem>>, %arg9: memref<2x8x32x64xf32, #tpu.memory_space<vmem>>, %arg10: memref<2x32x32xf32, #tpu.memory_space<vmem>>, %arg11: memref<2x1x32xf32, #tpu.memory_space<vmem>>, %arg12: memref<32x64xf32, #tpu.memory_space<vmem>>, %arg13: memref<1x64xf32, #tpu.memory_space<vmem>>, %arg14: memref<64x4xf32, #tpu.memory_space<vmem>>, %arg15: memref<1x4xf32, #tpu.memory_space<vmem>>, %arg16: memref<4x96xf32, #tpu.memory_space<vmem>>, %arg17: memref<1x96xf32, #tpu.memory_space<vmem>>, %arg18: memref<32x96xf32, #tpu.memory_space<vmem>>, %arg19: memref<1x32xf32, #tpu.memory_space<vmem>>, %arg20: memref<32x96xf32, #tpu.memory_space<vmem>>, %arg21: memref<1x96xf32, #tpu.memory_space<vmem>>, %arg22: memref<32x96xf32, #tpu.memory_space<vmem>>, %arg23: memref<1x32xf32, #tpu.memory_space<vmem>>, %arg24: memref<32x128xf32, #tpu.memory_space<vmem>>, %arg25: memref<1x128xf32, #tpu.memory_space<vmem>>, %arg26: memref<32x128xf32, #tpu.memory_space<vmem>>, %arg27: memref<32x32xf32, #tpu.memory_space<vmem>>, %arg28: memref<32x32xf32, #tpu.memory_space<vmem>>) attributes {dimension_semantics = [#tpu.dimension_semantics<arbitrary>], iteration_bounds = array<i64: 1>, scalar_prefetch = 0 : i64, scratch_operands = 2 : i64, tpu.core_type = #tpu.core_type<tc>, window_params = [{pipeline_mode = #tpu.pipeline_mode<synchronous>, transform_indices = @transform_0, window_bounds = array<i64: 32, 4>}, {pipeline_mode = #tpu.pipeline_mode<synchronous>, transform_indices = @transform_1, window_bounds = array<i64: 32, 64>}, {pipeline_mode = #tpu.pipeline_mode<synchronous>, transform_indices = @transform_2, window_bounds = array<i64: 4, 64>}, {pipeline_mode = #tpu.pipeline_mode<synchronous>, transform_indices = @transform_3, window_bounds = array<i64: 64, 32>}, {pipeline_mode = #tpu.pipeline_mode<synchronous>, transform_indices = @transform_4, window_bounds = array<i64: 1, 32>}, {pipeline_mode = #tpu.pipeline_mode<synchronous>, transform_indices = @transform_5, window_bounds = array<i64: 2, 16, 32>}, {pipeline_mode = #tpu.pipeline_mode<synchronous>, transform_indices = @transform_6, window_bounds = array<i64: 2, 32, 8>}, {pipeline_mode = #tpu.pipeline_mode<synchronous>, transform_indices = @transform_7, window_bounds = array<i64: 2, 32, 8>}, {pipeline_mode = #tpu.pipeline_mode<synchronous>, transform_indices = @transform_8, window_bounds = array<i64: 2, 8, 32, 64>}, {pipeline_mode = #tpu.pipeline_mode<synchronous>, transform_indices = @transform_9, window_bounds = array<i64: 2, 32, 32>}, {pipeline_mode = #tpu.pipeline_mode<synchronous>, transform_indices = @transform_10, window_bounds = array<i64: 2, 1, 32>}, {pipeline_mode = #tpu.pipeline_mode<synchronous>, transform_indices = @transform_11, window_bounds = array<i64: 32, 64>}, {pipeline_mode = #tpu.pipeline_mode<synchronous>, transform_indices = @transform_12, window_bounds = array<i64: 1, 64>}, {pipeline_mode = #tpu.pipeline_mode<synchronous>, transform_indices = @transform_13, window_bounds = array<i64: 64, 4>}, {pipeline_mode = #tpu.pipeline_mode<synchronous>, transform_indices = @transform_14, window_bounds = array<i64: 1, 4>}, {pipeline_mode = #tpu.pipeline_mode<synchronous>, transform_indices = @transform_15, window_bounds = array<i64: 4, 96>}, {pipeline_mode = #tpu.pipeline_mode<synchronous>, transform_indices = @transform_16, window_bounds = array<i64: 1, 96>}, {pipeline_mode = #tpu.pipeline_mode<synchronous>, transform_indices = @transform_17, window_bounds = array<i64: 32, 96>}, {pipeline_mode = #tpu.pipeline_mode<synchronous>, transform_indices = @transform_18, window_bounds = array<i64: 1, 32>}, {pipeline_mode = #tpu.pipeline_mode<synchronous>, transform_indices = @transform_19, window_bounds = array<i64: 32, 96>}, {pipeline_mode = #tpu.pipeline_mode<synchronous>, transform_indices = @transform_20, window_bounds = array<i64: 1, 96>}, {pipeline_mode = #tpu.pipeline_mode<synchronous>, transform_indices = @transform_21, window_bounds = array<i64: 32, 96>}, {pipeline_mode = #tpu.pipeline_mode<synchronous>, transform_indices = @transform_22, window_bounds = array<i64: 1, 32>}, {pipeline_mode = #tpu.pipeline_mode<synchronous>, transform_indices = @transform_23, window_bounds = array<i64: 32, 128>}, {pipeline_mode = #tpu.pipeline_mode<synchronous>, transform_indices = @transform_24, window_bounds = array<i64: 1, 128>}, {pipeline_mode = #tpu.pipeline_mode<synchronous>, transform_indices = @transform_25, window_bounds = array<i64: 32, 128>}]} {
    %c0 = arith.constant 0 : index
    %c0_0 = arith.constant 0 : index
    %0 = vector.load %arg1[%c0, %c0_0] : memref<32x4xf32, #tpu.memory_space<vmem>>, vector<32x4xf32>
    %c0_1 = arith.constant 0 : index
    %c0_2 = arith.constant 0 : index
    %1 = vector.load %arg3[%c0_1, %c0_2] : memref<4x64xf32, #tpu.memory_space<vmem>>, vector<4x64xf32>
    %cst = arith.constant dense<0.000000e+00> : vector<32x64xf32>
    %2 = tpu.matmul %0, %1, %cst {dimension_numbers = #tpu.dot_dimension_numbers<[1], [0], [0], [1], [0, 0, 1, 1], [], []>} : vector<32x4xf32>, vector<4x64xf32>, vector<32x64xf32> -> vector<32x64xf32>
    %c0_3 = arith.constant 0 : index
    %c0_4 = arith.constant 0 : index
    %3 = vector.load %arg2[%c0_3, %c0_4] : memref<32x64xf32, #tpu.memory_space<vmem>>, vector<32x64xf32>
    %4 = arith.addf %2, %3 : vector<32x64xf32>
    %cst_5 = arith.constant 5.000000e-01 : f32
    %5 = vector.broadcast %cst_5 : f32 to vector<32x64xf32>
    %6 = arith.mulf %5, %4 : vector<32x64xf32>
    %cst_6 = arith.constant 0.707106769 : f32
    %7 = vector.broadcast %cst_6 : f32 to vector<32x64xf32>
    %8 = arith.mulf %4, %7 : vector<32x64xf32>
    %9 = math.absf %8 : vector<32x64xf32>
    %cst_7 = arith.constant 0.327591091 : f32
    %10 = vector.broadcast %cst_7 : f32 to vector<32x64xf32>
    %11 = arith.mulf %10, %9 : vector<32x64xf32>
    %cst_8 = arith.constant 1.000000e+00 : f32
    %12 = vector.broadcast %cst_8 : f32 to vector<32x64xf32>
    %13 = arith.addf %12, %11 : vector<32x64xf32>
    %cst_9 = arith.constant 1.000000e+00 : f32
    %14 = vector.broadcast %cst_9 : f32 to vector<32x64xf32>
    %15 = arith.divf %14, %13 : vector<32x64xf32>
    %cst_10 = arith.constant 1.06140542 : f32
    %16 = vector.broadcast %cst_10 : f32 to vector<32x64xf32>
    %17 = arith.mulf %15, %16 : vector<32x64xf32>
    %cst_11 = arith.constant -1.45315206 : f32
    %18 = vector.broadcast %cst_11 : f32 to vector<32x64xf32>
    %19 = arith.addf %18, %17 : vector<32x64xf32>
    %20 = arith.mulf %15, %19 : vector<32x64xf32>
    %cst_12 = arith.constant 1.42141378 : f32
    %21 = vector.broadcast %cst_12 : f32 to vector<32x64xf32>
    %22 = arith.addf %21, %20 : vector<32x64xf32>
    %23 = arith.mulf %15, %22 : vector<32x64xf32>
    %cst_13 = arith.constant -0.284496725 : f32
    %24 = vector.broadcast %cst_13 : f32 to vector<32x64xf32>
    %25 = arith.addf %24, %23 : vector<32x64xf32>
    %26 = arith.mulf %15, %25 : vector<32x64xf32>
    %cst_14 = arith.constant 0.254829586 : f32
    %27 = vector.broadcast %cst_14 : f32 to vector<32x64xf32>
    %28 = arith.addf %27, %26 : vector<32x64xf32>
    %29 = arith.mulf %15, %28 : vector<32x64xf32>
    %cst_15 = arith.constant 0.000000e+00 : f32
    %30 = vector.broadcast %cst_15 : f32 to vector<32x64xf32>
    %31 = arith.subf %30, %9 : vector<32x64xf32>
    %32 = arith.mulf %31, %9 : vector<32x64xf32>
    %33 = math.exp %32 : vector<32x64xf32>
    %34 = arith.mulf %29, %33 : vector<32x64xf32>
    %cst_16 = arith.constant 1.000000e+00 : f32
    %35 = vector.broadcast %cst_16 : f32 to vector<32x64xf32>
    %36 = arith.subf %35, %34 : vector<32x64xf32>
    %cst_17 = arith.constant 0.000000e+00 : f32
    %37 = vector.broadcast %cst_17 : f32 to vector<32x64xf32>
    %38 = arith.cmpf oge, %8, %37 : vector<32x64xf32>
    %cst_18 = arith.constant 0.000000e+00 : f32
    %39 = vector.broadcast %cst_18 : f32 to vector<32x64xf32>
    %40 = arith.subf %39, %36 : vector<32x64xf32>
    %41 = arith.select %38, %36, %40 : vector<32x64xi1>, vector<32x64xf32>
    %cst_19 = arith.constant 1.000000e+00 : f32
    %42 = vector.broadcast %cst_19 : f32 to vector<32x64xf32>
    %43 = arith.addf %42, %41 : vector<32x64xf32>
    %44 = arith.mulf %6, %43 : vector<32x64xf32>
    %c0_20 = arith.constant 0 : index
    %c0_21 = arith.constant 0 : index
    %45 = vector.load %arg4[%c0_20, %c0_21] : memref<64x32xf32, #tpu.memory_space<vmem>>, vector<64x32xf32>
    %cst_22 = arith.constant dense<0.000000e+00> : vector<32x32xf32>
    %46 = tpu.matmul %44, %45, %cst_22 {dimension_numbers = #tpu.dot_dimension_numbers<[1], [0], [0], [1], [0, 0, 1, 1], [], []>} : vector<32x64xf32>, vector<64x32xf32>, vector<32x32xf32> -> vector<32x32xf32>
    %c0_23 = arith.constant 0 : index
    %c0_24 = arith.constant 0 : index
    %47 = vector.load %arg5[%c0_23, %c0_24] : memref<1x32xf32, #tpu.memory_space<vmem>>, vector<1x32xf32>
    %48 = vector.broadcast %47 : vector<1x32xf32> to vector<32x32xf32>
    %49 = arith.addf %46, %48 : vector<32x32xf32>
    %c0_25 = arith.constant 0 : index
    %c0_26 = arith.constant 0 : index
    %c0_27 = arith.constant 0 : index
    %50 = vector.load %arg6[%c0_25, %c0_26, %c0_27] : memref<2x16x32xf32, #tpu.memory_space<vmem>>, vector<1x16x32xf32>
    %51 = vector.shape_cast %50 : vector<1x16x32xf32> to vector<16x32xf32>
    %c1 = arith.constant 1 : index
    %c0_28 = arith.constant 0 : index
    %c0_29 = arith.constant 0 : index
    %52 = vector.load %arg6[%c1, %c0_28, %c0_29] : memref<2x16x32xf32, #tpu.memory_space<vmem>>, vector<1x16x32xf32>
    %53 = vector.shape_cast %52 : vector<1x16x32xf32> to vector<16x32xf32>
    %c0_30 = arith.constant 0 : index
    %c0_31 = arith.constant 0 : index
    %c0_32 = arith.constant 0 : index
    %54 = vector.load %arg7[%c0_30, %c0_31, %c0_32] : memref<2x32x8xf32, #tpu.memory_space<vmem>>, vector<1x32x8xf32>
    %55 = vector.shape_cast %54 : vector<1x32x8xf32> to vector<32x8xf32>
    %c1_33 = arith.constant 1 : index
    %c0_34 = arith.constant 0 : index
    %c0_35 = arith.constant 0 : index
    %56 = vector.load %arg7[%c1_33, %c0_34, %c0_35] : memref<2x32x8xf32, #tpu.memory_space<vmem>>, vector<1x32x8xf32>
    %57 = vector.shape_cast %56 : vector<1x32x8xf32> to vector<32x8xf32>
    %c0_36 = arith.constant 0 : index
    %c0_37 = arith.constant 0 : index
    %c0_38 = arith.constant 0 : index
    %58 = vector.load %arg8[%c0_36, %c0_37, %c0_38] : memref<2x32x8xf32, #tpu.memory_space<vmem>>, vector<1x32x8xf32>
    %59 = vector.shape_cast %58 : vector<1x32x8xf32> to vector<32x8xf32>
    %c1_39 = arith.constant 1 : index
    %c0_40 = arith.constant 0 : index
    %c0_41 = arith.constant 0 : index
    %60 = vector.load %arg8[%c1_39, %c0_40, %c0_41] : memref<2x32x8xf32, #tpu.memory_space<vmem>>, vector<1x32x8xf32>
    %61 = vector.shape_cast %60 : vector<1x32x8xf32> to vector<32x8xf32>
    %c0_42 = arith.constant 0 : index
    %c0_43 = arith.constant 0 : index
    %c0_44 = arith.constant 0 : index
    %c0_45 = arith.constant 0 : index
    %62 = vector.load %arg9[%c0_42, %c0_43, %c0_44, %c0_45] : memref<2x8x32x64xf32, #tpu.memory_space<vmem>>, vector<1x8x32x64xf32>
    %63 = vector.shape_cast %62 : vector<1x8x32x64xf32> to vector<8x32x64xf32>
    %cst_46 = arith.constant 0.000000e+00 : f32
    %64 = vector.broadcast %cst_46 : f32 to vector<32x32xf32>
    %cst_47 = arith.constant dense<0.000000e+00> : vector<16x32xf32>
    %65 = tpu.matmul %51, %49, %cst_47 {dimension_numbers = #tpu.dot_dimension_numbers<[1], [0], [0], [1], [0, 0, 1, 1], [], []>} : vector<16x32xf32>, vector<32x32xf32>, vector<16x32xf32> -> vector<16x32xf32>
    %66 = vector.extract_strided_slice %65 {offsets = [0, 0], sizes = [8, 32], strides = [1, 1]} : vector<16x32xf32> to vector<8x32xf32>
    %67 = vector.shape_cast %66 : vector<8x32xf32> to vector<8x1x32xf32>
    %68 = vector.extract_strided_slice %65 {offsets = [8, 0], sizes = [8, 32], strides = [1, 1]} : vector<16x32xf32> to vector<8x32xf32>
    %69 = vector.shape_cast %68 : vector<8x32xf32> to vector<8x1x32xf32>
    %cst_48 = arith.constant dense<0.000000e+00> : vector<8x1x64xf32>
    %70 = tpu.matmul %67, %63, %cst_48 {dimension_numbers = #tpu.dot_dimension_numbers<[2], [1], [1], [2], [0, 0, 0, 1, 1, 2], [0], [0]>} : vector<8x1x32xf32>, vector<8x32x64xf32>, vector<8x1x64xf32> -> vector<8x1x64xf32>
    %71 = vector.shape_cast %70 : vector<8x1x64xf32> to vector<8x64xf32>
    %cst_49 = arith.constant dense<0.000000e+00> : vector<8x1x64xf32>
    %72 = tpu.matmul %69, %63, %cst_49 {dimension_numbers = #tpu.dot_dimension_numbers<[2], [1], [1], [2], [0, 0, 0, 1, 1, 2], [0], [0]>} : vector<8x1x32xf32>, vector<8x32x64xf32>, vector<8x1x64xf32> -> vector<8x1x64xf32>
    %73 = vector.shape_cast %72 : vector<8x1x64xf32> to vector<8x64xf32>
    %74 = vector.extract_strided_slice %71 {offsets = [0, 0], sizes = [8, 32], strides = [1, 1]} : vector<8x64xf32> to vector<8x32xf32>
    %75 = vector.extract_strided_slice %73 {offsets = [0, 32], sizes = [8, 32], strides = [1, 1]} : vector<8x64xf32> to vector<8x32xf32>
    %76 = arith.subf %74, %75 : vector<8x32xf32>
    %77 = vector.extract_strided_slice %71 {offsets = [0, 32], sizes = [8, 32], strides = [1, 1]} : vector<8x64xf32> to vector<8x32xf32>
    %78 = vector.extract_strided_slice %73 {offsets = [0, 0], sizes = [8, 32], strides = [1, 1]} : vector<8x64xf32> to vector<8x32xf32>
    %79 = arith.addf %77, %78 : vector<8x32xf32>
    %cst_50 = arith.constant dense<0.000000e+00> : vector<32x32xf32>
    %80 = tpu.matmul %55, %76, %cst_50 {dimension_numbers = #tpu.dot_dimension_numbers<[1], [0], [0], [1], [0, 0, 1, 1], [], []>} : vector<32x8xf32>, vector<8x32xf32>, vector<32x32xf32> -> vector<32x32xf32>
    %81 = arith.addf %64, %80 : vector<32x32xf32>
    %cst_51 = arith.constant dense<0.000000e+00> : vector<32x32xf32>
    %82 = tpu.matmul %59, %79, %cst_51 {dimension_numbers = #tpu.dot_dimension_numbers<[1], [0], [0], [1], [0, 0, 1, 1], [], []>} : vector<32x8xf32>, vector<8x32xf32>, vector<32x32xf32> -> vector<32x32xf32>
    %83 = arith.addf %81, %82 : vector<32x32xf32>
    %cst_52 = arith.constant dense<0.000000e+00> : vector<16x32xf32>
    %84 = tpu.matmul %53, %49, %cst_52 {dimension_numbers = #tpu.dot_dimension_numbers<[1], [0], [0], [1], [0, 0, 1, 1], [], []>} : vector<16x32xf32>, vector<32x32xf32>, vector<16x32xf32> -> vector<16x32xf32>
    %85 = vector.extract_strided_slice %84 {offsets = [0, 0], sizes = [8, 32], strides = [1, 1]} : vector<16x32xf32> to vector<8x32xf32>
    %86 = vector.shape_cast %85 : vector<8x32xf32> to vector<8x1x32xf32>
    %87 = vector.extract_strided_slice %84 {offsets = [8, 0], sizes = [8, 32], strides = [1, 1]} : vector<16x32xf32> to vector<8x32xf32>
    %88 = vector.shape_cast %87 : vector<8x32xf32> to vector<8x1x32xf32>
    %cst_53 = arith.constant dense<0.000000e+00> : vector<8x1x64xf32>
    %89 = tpu.matmul %86, %63, %cst_53 {dimension_numbers = #tpu.dot_dimension_numbers<[2], [1], [1], [2], [0, 0, 0, 1, 1, 2], [0], [0]>} : vector<8x1x32xf32>, vector<8x32x64xf32>, vector<8x1x64xf32> -> vector<8x1x64xf32>
    %90 = vector.shape_cast %89 : vector<8x1x64xf32> to vector<8x64xf32>
    %cst_54 = arith.constant dense<0.000000e+00> : vector<8x1x64xf32>
    %91 = tpu.matmul %88, %63, %cst_54 {dimension_numbers = #tpu.dot_dimension_numbers<[2], [1], [1], [2], [0, 0, 0, 1, 1, 2], [0], [0]>} : vector<8x1x32xf32>, vector<8x32x64xf32>, vector<8x1x64xf32> -> vector<8x1x64xf32>
    %92 = vector.shape_cast %91 : vector<8x1x64xf32> to vector<8x64xf32>
    %93 = vector.extract_strided_slice %90 {offsets = [0, 0], sizes = [8, 32], strides = [1, 1]} : vector<8x64xf32> to vector<8x32xf32>
    %94 = vector.extract_strided_slice %92 {offsets = [0, 32], sizes = [8, 32], strides = [1, 1]} : vector<8x64xf32> to vector<8x32xf32>
    %95 = arith.subf %93, %94 : vector<8x32xf32>
    %96 = vector.extract_strided_slice %90 {offsets = [0, 32], sizes = [8, 32], strides = [1, 1]} : vector<8x64xf32> to vector<8x32xf32>
    %97 = vector.extract_strided_slice %92 {offsets = [0, 0], sizes = [8, 32], strides = [1, 1]} : vector<8x64xf32> to vector<8x32xf32>
    %98 = arith.addf %96, %97 : vector<8x32xf32>
    %cst_55 = arith.constant dense<0.000000e+00> : vector<32x32xf32>
    %99 = tpu.matmul %57, %95, %cst_55 {dimension_numbers = #tpu.dot_dimension_numbers<[1], [0], [0], [1], [0, 0, 1, 1], [], []>} : vector<32x8xf32>, vector<8x32xf32>, vector<32x32xf32> -> vector<32x32xf32>
    %100 = arith.addf %83, %99 : vector<32x32xf32>
    %cst_56 = arith.constant dense<0.000000e+00> : vector<32x32xf32>
    %101 = tpu.matmul %61, %98, %cst_56 {dimension_numbers = #tpu.dot_dimension_numbers<[1], [0], [0], [1], [0, 0, 1, 1], [], []>} : vector<32x8xf32>, vector<8x32xf32>, vector<32x32xf32> -> vector<32x32xf32>
    %102 = arith.addf %100, %101 : vector<32x32xf32>
    %c0_57 = arith.constant 0 : index
    %c0_58 = arith.constant 0 : index
    %c0_59 = arith.constant 0 : index
    %103 = vector.load %arg10[%c0_57, %c0_58, %c0_59] : memref<2x32x32xf32, #tpu.memory_space<vmem>>, vector<1x32x32xf32>
    %104 = vector.shape_cast %103 : vector<1x32x32xf32> to vector<32x32xf32>
    %cst_60 = arith.constant dense<0.000000e+00> : vector<32x32xf32>
    %105 = tpu.matmul %49, %104, %cst_60 {dimension_numbers = #tpu.dot_dimension_numbers<[1], [0], [0], [1], [0, 0, 1, 1], [], []>} : vector<32x32xf32>, vector<32x32xf32>, vector<32x32xf32> -> vector<32x32xf32>
    %106 = arith.addf %102, %105 : vector<32x32xf32>
    %c0_61 = arith.constant 0 : index
    %c0_62 = arith.constant 0 : index
    %c0_63 = arith.constant 0 : index
    %107 = vector.load %arg11[%c0_61, %c0_62, %c0_63] : memref<2x1x32xf32, #tpu.memory_space<vmem>>, vector<1x1x32xf32>
    %108 = vector.shape_cast %107 : vector<1x1x32xf32> to vector<1x32xf32>
    %109 = vector.broadcast %108 : vector<1x32xf32> to vector<32x32xf32>
    %110 = arith.addf %106, %109 : vector<32x32xf32>
    %cst_64 = arith.constant 5.000000e-01 : f32
    %111 = vector.broadcast %cst_64 : f32 to vector<32x32xf32>
    %112 = arith.mulf %111, %110 : vector<32x32xf32>
    %cst_65 = arith.constant 0.707106769 : f32
    %113 = vector.broadcast %cst_65 : f32 to vector<32x32xf32>
    %114 = arith.mulf %110, %113 : vector<32x32xf32>
    %115 = math.absf %114 : vector<32x32xf32>
    %cst_66 = arith.constant 0.327591091 : f32
    %116 = vector.broadcast %cst_66 : f32 to vector<32x32xf32>
    %117 = arith.mulf %116, %115 : vector<32x32xf32>
    %cst_67 = arith.constant 1.000000e+00 : f32
    %118 = vector.broadcast %cst_67 : f32 to vector<32x32xf32>
    %119 = arith.addf %118, %117 : vector<32x32xf32>
    %cst_68 = arith.constant 1.000000e+00 : f32
    %120 = vector.broadcast %cst_68 : f32 to vector<32x32xf32>
    %121 = arith.divf %120, %119 : vector<32x32xf32>
    %cst_69 = arith.constant 1.06140542 : f32
    %122 = vector.broadcast %cst_69 : f32 to vector<32x32xf32>
    %123 = arith.mulf %121, %122 : vector<32x32xf32>
    %cst_70 = arith.constant -1.45315206 : f32
    %124 = vector.broadcast %cst_70 : f32 to vector<32x32xf32>
    %125 = arith.addf %124, %123 : vector<32x32xf32>
    %126 = arith.mulf %121, %125 : vector<32x32xf32>
    %cst_71 = arith.constant 1.42141378 : f32
    %127 = vector.broadcast %cst_71 : f32 to vector<32x32xf32>
    %128 = arith.addf %127, %126 : vector<32x32xf32>
    %129 = arith.mulf %121, %128 : vector<32x32xf32>
    %cst_72 = arith.constant -0.284496725 : f32
    %130 = vector.broadcast %cst_72 : f32 to vector<32x32xf32>
    %131 = arith.addf %130, %129 : vector<32x32xf32>
    %132 = arith.mulf %121, %131 : vector<32x32xf32>
    %cst_73 = arith.constant 0.254829586 : f32
    %133 = vector.broadcast %cst_73 : f32 to vector<32x32xf32>
    %134 = arith.addf %133, %132 : vector<32x32xf32>
    %135 = arith.mulf %121, %134 : vector<32x32xf32>
    %cst_74 = arith.constant 0.000000e+00 : f32
    %136 = vector.broadcast %cst_74 : f32 to vector<32x32xf32>
    %137 = arith.subf %136, %115 : vector<32x32xf32>
    %138 = arith.mulf %137, %115 : vector<32x32xf32>
    %139 = math.exp %138 : vector<32x32xf32>
    %140 = arith.mulf %135, %139 : vector<32x32xf32>
    %cst_75 = arith.constant 1.000000e+00 : f32
    %141 = vector.broadcast %cst_75 : f32 to vector<32x32xf32>
    %142 = arith.subf %141, %140 : vector<32x32xf32>
    %cst_76 = arith.constant 0.000000e+00 : f32
    %143 = vector.broadcast %cst_76 : f32 to vector<32x32xf32>
    %144 = arith.cmpf oge, %114, %143 : vector<32x32xf32>
    %cst_77 = arith.constant 0.000000e+00 : f32
    %145 = vector.broadcast %cst_77 : f32 to vector<32x32xf32>
    %146 = arith.subf %145, %142 : vector<32x32xf32>
    %147 = arith.select %144, %142, %146 : vector<32x32xi1>, vector<32x32xf32>
    %cst_78 = arith.constant 1.000000e+00 : f32
    %148 = vector.broadcast %cst_78 : f32 to vector<32x32xf32>
    %149 = arith.addf %148, %147 : vector<32x32xf32>
    %150 = arith.mulf %112, %149 : vector<32x32xf32>
    %c1_79 = arith.constant 1 : index
    %c0_80 = arith.constant 0 : index
    %c0_81 = arith.constant 0 : index
    %c0_82 = arith.constant 0 : index
    %151 = vector.load %arg9[%c1_79, %c0_80, %c0_81, %c0_82] : memref<2x8x32x64xf32, #tpu.memory_space<vmem>>, vector<1x8x32x64xf32>
    %152 = vector.shape_cast %151 : vector<1x8x32x64xf32> to vector<8x32x64xf32>
    %cst_83 = arith.constant 0.000000e+00 : f32
    %153 = vector.broadcast %cst_83 : f32 to vector<32x32xf32>
    %cst_84 = arith.constant dense<0.000000e+00> : vector<16x32xf32>
    %154 = tpu.matmul %51, %150, %cst_84 {dimension_numbers = #tpu.dot_dimension_numbers<[1], [0], [0], [1], [0, 0, 1, 1], [], []>} : vector<16x32xf32>, vector<32x32xf32>, vector<16x32xf32> -> vector<16x32xf32>
    %155 = vector.extract_strided_slice %154 {offsets = [0, 0], sizes = [8, 32], strides = [1, 1]} : vector<16x32xf32> to vector<8x32xf32>
    %156 = vector.shape_cast %155 : vector<8x32xf32> to vector<8x1x32xf32>
    %157 = vector.extract_strided_slice %154 {offsets = [8, 0], sizes = [8, 32], strides = [1, 1]} : vector<16x32xf32> to vector<8x32xf32>
    %158 = vector.shape_cast %157 : vector<8x32xf32> to vector<8x1x32xf32>
    %cst_85 = arith.constant dense<0.000000e+00> : vector<8x1x64xf32>
    %159 = tpu.matmul %156, %152, %cst_85 {dimension_numbers = #tpu.dot_dimension_numbers<[2], [1], [1], [2], [0, 0, 0, 1, 1, 2], [0], [0]>} : vector<8x1x32xf32>, vector<8x32x64xf32>, vector<8x1x64xf32> -> vector<8x1x64xf32>
    %160 = vector.shape_cast %159 : vector<8x1x64xf32> to vector<8x64xf32>
    %cst_86 = arith.constant dense<0.000000e+00> : vector<8x1x64xf32>
    %161 = tpu.matmul %158, %152, %cst_86 {dimension_numbers = #tpu.dot_dimension_numbers<[2], [1], [1], [2], [0, 0, 0, 1, 1, 2], [0], [0]>} : vector<8x1x32xf32>, vector<8x32x64xf32>, vector<8x1x64xf32> -> vector<8x1x64xf32>
    %162 = vector.shape_cast %161 : vector<8x1x64xf32> to vector<8x64xf32>
    %163 = vector.extract_strided_slice %160 {offsets = [0, 0], sizes = [8, 32], strides = [1, 1]} : vector<8x64xf32> to vector<8x32xf32>
    %164 = vector.extract_strided_slice %162 {offsets = [0, 32], sizes = [8, 32], strides = [1, 1]} : vector<8x64xf32> to vector<8x32xf32>
    %165 = arith.subf %163, %164 : vector<8x32xf32>
    %166 = vector.extract_strided_slice %160 {offsets = [0, 32], sizes = [8, 32], strides = [1, 1]} : vector<8x64xf32> to vector<8x32xf32>
    %167 = vector.extract_strided_slice %162 {offsets = [0, 0], sizes = [8, 32], strides = [1, 1]} : vector<8x64xf32> to vector<8x32xf32>
    %168 = arith.addf %166, %167 : vector<8x32xf32>
    %cst_87 = arith.constant dense<0.000000e+00> : vector<32x32xf32>
    %169 = tpu.matmul %55, %165, %cst_87 {dimension_numbers = #tpu.dot_dimension_numbers<[1], [0], [0], [1], [0, 0, 1, 1], [], []>} : vector<32x8xf32>, vector<8x32xf32>, vector<32x32xf32> -> vector<32x32xf32>
    %170 = arith.addf %153, %169 : vector<32x32xf32>
    %cst_88 = arith.constant dense<0.000000e+00> : vector<32x32xf32>
    %171 = tpu.matmul %59, %168, %cst_88 {dimension_numbers = #tpu.dot_dimension_numbers<[1], [0], [0], [1], [0, 0, 1, 1], [], []>} : vector<32x8xf32>, vector<8x32xf32>, vector<32x32xf32> -> vector<32x32xf32>
    %172 = arith.addf %170, %171 : vector<32x32xf32>
    %cst_89 = arith.constant dense<0.000000e+00> : vector<16x32xf32>
    %173 = tpu.matmul %53, %150, %cst_89 {dimension_numbers = #tpu.dot_dimension_numbers<[1], [0], [0], [1], [0, 0, 1, 1], [], []>} : vector<16x32xf32>, vector<32x32xf32>, vector<16x32xf32> -> vector<16x32xf32>
    %174 = vector.extract_strided_slice %173 {offsets = [0, 0], sizes = [8, 32], strides = [1, 1]} : vector<16x32xf32> to vector<8x32xf32>
    %175 = vector.shape_cast %174 : vector<8x32xf32> to vector<8x1x32xf32>
    %176 = vector.extract_strided_slice %173 {offsets = [8, 0], sizes = [8, 32], strides = [1, 1]} : vector<16x32xf32> to vector<8x32xf32>
    %177 = vector.shape_cast %176 : vector<8x32xf32> to vector<8x1x32xf32>
    %cst_90 = arith.constant dense<0.000000e+00> : vector<8x1x64xf32>
    %178 = tpu.matmul %175, %152, %cst_90 {dimension_numbers = #tpu.dot_dimension_numbers<[2], [1], [1], [2], [0, 0, 0, 1, 1, 2], [0], [0]>} : vector<8x1x32xf32>, vector<8x32x64xf32>, vector<8x1x64xf32> -> vector<8x1x64xf32>
    %179 = vector.shape_cast %178 : vector<8x1x64xf32> to vector<8x64xf32>
    %cst_91 = arith.constant dense<0.000000e+00> : vector<8x1x64xf32>
    %180 = tpu.matmul %177, %152, %cst_91 {dimension_numbers = #tpu.dot_dimension_numbers<[2], [1], [1], [2], [0, 0, 0, 1, 1, 2], [0], [0]>} : vector<8x1x32xf32>, vector<8x32x64xf32>, vector<8x1x64xf32> -> vector<8x1x64xf32>
    %181 = vector.shape_cast %180 : vector<8x1x64xf32> to vector<8x64xf32>
    %182 = vector.extract_strided_slice %179 {offsets = [0, 0], sizes = [8, 32], strides = [1, 1]} : vector<8x64xf32> to vector<8x32xf32>
    %183 = vector.extract_strided_slice %181 {offsets = [0, 32], sizes = [8, 32], strides = [1, 1]} : vector<8x64xf32> to vector<8x32xf32>
    %184 = arith.subf %182, %183 : vector<8x32xf32>
    %185 = vector.extract_strided_slice %179 {offsets = [0, 32], sizes = [8, 32], strides = [1, 1]} : vector<8x64xf32> to vector<8x32xf32>
    %186 = vector.extract_strided_slice %181 {offsets = [0, 0], sizes = [8, 32], strides = [1, 1]} : vector<8x64xf32> to vector<8x32xf32>
    %187 = arith.addf %185, %186 : vector<8x32xf32>
    %cst_92 = arith.constant dense<0.000000e+00> : vector<32x32xf32>
    %188 = tpu.matmul %57, %184, %cst_92 {dimension_numbers = #tpu.dot_dimension_numbers<[1], [0], [0], [1], [0, 0, 1, 1], [], []>} : vector<32x8xf32>, vector<8x32xf32>, vector<32x32xf32> -> vector<32x32xf32>
    %189 = arith.addf %172, %188 : vector<32x32xf32>
    %cst_93 = arith.constant dense<0.000000e+00> : vector<32x32xf32>
    %190 = tpu.matmul %61, %187, %cst_93 {dimension_numbers = #tpu.dot_dimension_numbers<[1], [0], [0], [1], [0, 0, 1, 1], [], []>} : vector<32x8xf32>, vector<8x32xf32>, vector<32x32xf32> -> vector<32x32xf32>
    %191 = arith.addf %189, %190 : vector<32x32xf32>
    %c1_94 = arith.constant 1 : index
    %c0_95 = arith.constant 0 : index
    %c0_96 = arith.constant 0 : index
    %192 = vector.load %arg10[%c1_94, %c0_95, %c0_96] : memref<2x32x32xf32, #tpu.memory_space<vmem>>, vector<1x32x32xf32>
    %193 = vector.shape_cast %192 : vector<1x32x32xf32> to vector<32x32xf32>
    %cst_97 = arith.constant dense<0.000000e+00> : vector<32x32xf32>
    %194 = tpu.matmul %150, %193, %cst_97 {dimension_numbers = #tpu.dot_dimension_numbers<[1], [0], [0], [1], [0, 0, 1, 1], [], []>} : vector<32x32xf32>, vector<32x32xf32>, vector<32x32xf32> -> vector<32x32xf32>
    %195 = arith.addf %191, %194 : vector<32x32xf32>
    %c1_98 = arith.constant 1 : index
    %c0_99 = arith.constant 0 : index
    %c0_100 = arith.constant 0 : index
    %196 = vector.load %arg11[%c1_98, %c0_99, %c0_100] : memref<2x1x32xf32, #tpu.memory_space<vmem>>, vector<1x1x32xf32>
    %197 = vector.shape_cast %196 : vector<1x1x32xf32> to vector<1x32xf32>
    %198 = vector.broadcast %197 : vector<1x32xf32> to vector<32x32xf32>
    %199 = arith.addf %195, %198 : vector<32x32xf32>
    %c0_101 = arith.constant 0 : index
    %c0_102 = arith.constant 0 : index
    %200 = vector.load %arg12[%c0_101, %c0_102] : memref<32x64xf32, #tpu.memory_space<vmem>>, vector<32x64xf32>
    %cst_103 = arith.constant dense<0.000000e+00> : vector<32x64xf32>
    %201 = tpu.matmul %199, %200, %cst_103 {dimension_numbers = #tpu.dot_dimension_numbers<[1], [0], [0], [1], [0, 0, 1, 1], [], []>} : vector<32x32xf32>, vector<32x64xf32>, vector<32x64xf32> -> vector<32x64xf32>
    %c0_104 = arith.constant 0 : index
    %c0_105 = arith.constant 0 : index
    %202 = vector.load %arg13[%c0_104, %c0_105] : memref<1x64xf32, #tpu.memory_space<vmem>>, vector<1x64xf32>
    %203 = vector.broadcast %202 : vector<1x64xf32> to vector<32x64xf32>
    %204 = arith.addf %201, %203 : vector<32x64xf32>
    %cst_106 = arith.constant 5.000000e-01 : f32
    %205 = vector.broadcast %cst_106 : f32 to vector<32x64xf32>
    %206 = arith.mulf %205, %204 : vector<32x64xf32>
    %cst_107 = arith.constant 0.707106769 : f32
    %207 = vector.broadcast %cst_107 : f32 to vector<32x64xf32>
    %208 = arith.mulf %204, %207 : vector<32x64xf32>
    %209 = math.absf %208 : vector<32x64xf32>
    %cst_108 = arith.constant 0.327591091 : f32
    %210 = vector.broadcast %cst_108 : f32 to vector<32x64xf32>
    %211 = arith.mulf %210, %209 : vector<32x64xf32>
    %cst_109 = arith.constant 1.000000e+00 : f32
    %212 = vector.broadcast %cst_109 : f32 to vector<32x64xf32>
    %213 = arith.addf %212, %211 : vector<32x64xf32>
    %cst_110 = arith.constant 1.000000e+00 : f32
    %214 = vector.broadcast %cst_110 : f32 to vector<32x64xf32>
    %215 = arith.divf %214, %213 : vector<32x64xf32>
    %cst_111 = arith.constant 1.06140542 : f32
    %216 = vector.broadcast %cst_111 : f32 to vector<32x64xf32>
    %217 = arith.mulf %215, %216 : vector<32x64xf32>
    %cst_112 = arith.constant -1.45315206 : f32
    %218 = vector.broadcast %cst_112 : f32 to vector<32x64xf32>
    %219 = arith.addf %218, %217 : vector<32x64xf32>
    %220 = arith.mulf %215, %219 : vector<32x64xf32>
    %cst_113 = arith.constant 1.42141378 : f32
    %221 = vector.broadcast %cst_113 : f32 to vector<32x64xf32>
    %222 = arith.addf %221, %220 : vector<32x64xf32>
    %223 = arith.mulf %215, %222 : vector<32x64xf32>
    %cst_114 = arith.constant -0.284496725 : f32
    %224 = vector.broadcast %cst_114 : f32 to vector<32x64xf32>
    %225 = arith.addf %224, %223 : vector<32x64xf32>
    %226 = arith.mulf %215, %225 : vector<32x64xf32>
    %cst_115 = arith.constant 0.254829586 : f32
    %227 = vector.broadcast %cst_115 : f32 to vector<32x64xf32>
    %228 = arith.addf %227, %226 : vector<32x64xf32>
    %229 = arith.mulf %215, %228 : vector<32x64xf32>
    %cst_116 = arith.constant 0.000000e+00 : f32
    %230 = vector.broadcast %cst_116 : f32 to vector<32x64xf32>
    %231 = arith.subf %230, %209 : vector<32x64xf32>
    %232 = arith.mulf %231, %209 : vector<32x64xf32>
    %233 = math.exp %232 : vector<32x64xf32>
    %234 = arith.mulf %229, %233 : vector<32x64xf32>
    %cst_117 = arith.constant 1.000000e+00 : f32
    %235 = vector.broadcast %cst_117 : f32 to vector<32x64xf32>
    %236 = arith.subf %235, %234 : vector<32x64xf32>
    %cst_118 = arith.constant 0.000000e+00 : f32
    %237 = vector.broadcast %cst_118 : f32 to vector<32x64xf32>
    %238 = arith.cmpf oge, %208, %237 : vector<32x64xf32>
    %cst_119 = arith.constant 0.000000e+00 : f32
    %239 = vector.broadcast %cst_119 : f32 to vector<32x64xf32>
    %240 = arith.subf %239, %236 : vector<32x64xf32>
    %241 = arith.select %238, %236, %240 : vector<32x64xi1>, vector<32x64xf32>
    %cst_120 = arith.constant 1.000000e+00 : f32
    %242 = vector.broadcast %cst_120 : f32 to vector<32x64xf32>
    %243 = arith.addf %242, %241 : vector<32x64xf32>
    %244 = arith.mulf %206, %243 : vector<32x64xf32>
    %c0_121 = arith.constant 0 : index
    %c0_122 = arith.constant 0 : index
    %245 = vector.load %arg14[%c0_121, %c0_122] : memref<64x4xf32, #tpu.memory_space<vmem>>, vector<64x4xf32>
    %cst_123 = arith.constant dense<0.000000e+00> : vector<32x4xf32>
    %246 = tpu.matmul %244, %245, %cst_123 {dimension_numbers = #tpu.dot_dimension_numbers<[1], [0], [0], [1], [0, 0, 1, 1], [], []>} : vector<32x64xf32>, vector<64x4xf32>, vector<32x4xf32> -> vector<32x4xf32>
    %c0_124 = arith.constant 0 : index
    %c0_125 = arith.constant 0 : index
    %247 = vector.load %arg15[%c0_124, %c0_125] : memref<1x4xf32, #tpu.memory_space<vmem>>, vector<1x4xf32>
    %248 = vector.broadcast %247 : vector<1x4xf32> to vector<32x4xf32>
    %249 = arith.addf %246, %248 : vector<32x4xf32>
    %c0_126 = arith.constant 0 : index
    %c0_127 = arith.constant 0 : index
    %250 = vector.load %arg16[%c0_126, %c0_127] : memref<4x96xf32, #tpu.memory_space<vmem>>, vector<4x96xf32>
    %cst_128 = arith.constant dense<0.000000e+00> : vector<32x96xf32>
    %251 = tpu.matmul %249, %250, %cst_128 {dimension_numbers = #tpu.dot_dimension_numbers<[1], [0], [0], [1], [0, 0, 1, 1], [], []>} : vector<32x4xf32>, vector<4x96xf32>, vector<32x96xf32> -> vector<32x96xf32>
    %c0_129 = arith.constant 0 : index
    %c0_130 = arith.constant 0 : index
    %252 = vector.load %arg17[%c0_129, %c0_130] : memref<1x96xf32, #tpu.memory_space<vmem>>, vector<1x96xf32>
    %253 = vector.broadcast %252 : vector<1x96xf32> to vector<32x96xf32>
    %254 = arith.addf %251, %253 : vector<32x96xf32>
    %c0_131 = arith.constant 0 : index
    %c0_132 = arith.constant 0 : index
    %255 = vector.load %arg18[%c0_131, %c0_132] : memref<32x96xf32, #tpu.memory_space<vmem>>, vector<32x96xf32>
    %c0_133 = arith.constant 0 : index
    %c0_134 = arith.constant 0 : index
    %256 = vector.load %arg19[%c0_133, %c0_134] : memref<1x32xf32, #tpu.memory_space<vmem>>, vector<1x32xf32>
    %cst_135 = arith.constant 0.000000e+00 : f32
    %257 = vector.broadcast %cst_135 : f32 to vector<2x32xf32>
    %cst_136 = arith.constant dense<0.000000e+00> : vector<2x96xf32>
    %258 = tpu.matmul %257, %255, %cst_136 {dimension_numbers = #tpu.dot_dimension_numbers<[1], [0], [0], [1], [0, 0, 1, 1], [], []>} : vector<2x32xf32>, vector<32x96xf32>, vector<2x96xf32> -> vector<2x96xf32>
    %259 = vector.extract_strided_slice %254 {offsets = [0, 0], sizes = [2, 96], strides = [1, 1]} : vector<32x96xf32> to vector<2x96xf32>
    %260 = vector.extract_strided_slice %259 {offsets = [0, 0], sizes = [2, 32], strides = [1, 1]} : vector<2x96xf32> to vector<2x32xf32>
    %261 = vector.extract_strided_slice %258 {offsets = [0, 0], sizes = [2, 32], strides = [1, 1]} : vector<2x96xf32> to vector<2x32xf32>
    %262 = arith.addf %260, %261 : vector<2x32xf32>
    %cst_137 = arith.constant 0.000000e+00 : f32
    %263 = vector.broadcast %cst_137 : f32 to vector<2x32xf32>
    %264 = arith.subf %263, %262 : vector<2x32xf32>
    %265 = math.exp %264 : vector<2x32xf32>
    %cst_138 = arith.constant 1.000000e+00 : f32
    %266 = vector.broadcast %cst_138 : f32 to vector<2x32xf32>
    %267 = arith.addf %266, %265 : vector<2x32xf32>
    %cst_139 = arith.constant 1.000000e+00 : f32
    %268 = vector.broadcast %cst_139 : f32 to vector<2x32xf32>
    %269 = arith.divf %268, %267 : vector<2x32xf32>
    %270 = vector.extract_strided_slice %259 {offsets = [0, 32], sizes = [2, 32], strides = [1, 1]} : vector<2x96xf32> to vector<2x32xf32>
    %271 = vector.extract_strided_slice %258 {offsets = [0, 32], sizes = [2, 32], strides = [1, 1]} : vector<2x96xf32> to vector<2x32xf32>
    %272 = arith.addf %270, %271 : vector<2x32xf32>
    %cst_140 = arith.constant 0.000000e+00 : f32
    %273 = vector.broadcast %cst_140 : f32 to vector<2x32xf32>
    %274 = arith.subf %273, %272 : vector<2x32xf32>
    %275 = math.exp %274 : vector<2x32xf32>
    %cst_141 = arith.constant 1.000000e+00 : f32
    %276 = vector.broadcast %cst_141 : f32 to vector<2x32xf32>
    %277 = arith.addf %276, %275 : vector<2x32xf32>
    %cst_142 = arith.constant 1.000000e+00 : f32
    %278 = vector.broadcast %cst_142 : f32 to vector<2x32xf32>
    %279 = arith.divf %278, %277 : vector<2x32xf32>
    %280 = vector.extract_strided_slice %259 {offsets = [0, 64], sizes = [2, 32], strides = [1, 1]} : vector<2x96xf32> to vector<2x32xf32>
    %281 = vector.extract_strided_slice %258 {offsets = [0, 64], sizes = [2, 32], strides = [1, 1]} : vector<2x96xf32> to vector<2x32xf32>
    %282 = vector.broadcast %256 : vector<1x32xf32> to vector<2x32xf32>
    %283 = arith.addf %281, %282 : vector<2x32xf32>
    %284 = arith.mulf %269, %283 : vector<2x32xf32>
    %285 = arith.addf %280, %284 : vector<2x32xf32>
    %286 = math.tanh %285 : vector<2x32xf32>
    %cst_143 = arith.constant 1.000000e+00 : f32
    %287 = vector.broadcast %cst_143 : f32 to vector<2x32xf32>
    %288 = arith.subf %287, %279 : vector<2x32xf32>
    %289 = arith.mulf %288, %286 : vector<2x32xf32>
    %290 = arith.mulf %279, %257 : vector<2x32xf32>
    %291 = arith.addf %289, %290 : vector<2x32xf32>
    %c0_144 = arith.constant 0 : index
    %c0_145 = arith.constant 0 : index
    %292 = vector.load %arg27[%c0_144, %c0_145] : memref<32x32xf32, #tpu.memory_space<vmem>>, vector<2x32xf32>
    tpu.vector_store %arg27[%c0_144, %c0_145], %291 {strides = array<i32>} : memref<32x32xf32, #tpu.memory_space<vmem>>, vector<2x32xf32>,
    %cst_146 = arith.constant dense<0.000000e+00> : vector<2x96xf32>
    %293 = tpu.matmul %291, %255, %cst_146 {dimension_numbers = #tpu.dot_dimension_numbers<[1], [0], [0], [1], [0, 0, 1, 1], [], []>} : vector<2x32xf32>, vector<32x96xf32>, vector<2x96xf32> -> vector<2x96xf32>
    %294 = vector.extract_strided_slice %254 {offsets = [2, 0], sizes = [2, 96], strides = [1, 1]} : vector<32x96xf32> to vector<2x96xf32>
    %295 = vector.extract_strided_slice %294 {offsets = [0, 0], sizes = [2, 32], strides = [1, 1]} : vector<2x96xf32> to vector<2x32xf32>
    %296 = vector.extract_strided_slice %293 {offsets = [0, 0], sizes = [2, 32], strides = [1, 1]} : vector<2x96xf32> to vector<2x32xf32>
    %297 = arith.addf %295, %296 : vector<2x32xf32>
    %cst_147 = arith.constant 0.000000e+00 : f32
    %298 = vector.broadcast %cst_147 : f32 to vector<2x32xf32>
    %299 = arith.subf %298, %297 : vector<2x32xf32>
    %300 = math.exp %299 : vector<2x32xf32>
    %cst_148 = arith.constant 1.000000e+00 : f32
    %301 = vector.broadcast %cst_148 : f32 to vector<2x32xf32>
    %302 = arith.addf %301, %300 : vector<2x32xf32>
    %cst_149 = arith.constant 1.000000e+00 : f32
    %303 = vector.broadcast %cst_149 : f32 to vector<2x32xf32>
    %304 = arith.divf %303, %302 : vector<2x32xf32>
    %305 = vector.extract_strided_slice %294 {offsets = [0, 32], sizes = [2, 32], strides = [1, 1]} : vector<2x96xf32> to vector<2x32xf32>
    %306 = vector.extract_strided_slice %293 {offsets = [0, 32], sizes = [2, 32], strides = [1, 1]} : vector<2x96xf32> to vector<2x32xf32>
    %307 = arith.addf %305, %306 : vector<2x32xf32>
    %cst_150 = arith.constant 0.000000e+00 : f32
    %308 = vector.broadcast %cst_150 : f32 to vector<2x32xf32>
    %309 = arith.subf %308, %307 : vector<2x32xf32>
    %310 = math.exp %309 : vector<2x32xf32>
    %cst_151 = arith.constant 1.000000e+00 : f32
    %311 = vector.broadcast %cst_151 : f32 to vector<2x32xf32>
    %312 = arith.addf %311, %310 : vector<2x32xf32>
    %cst_152 = arith.constant 1.000000e+00 : f32
    %313 = vector.broadcast %cst_152 : f32 to vector<2x32xf32>
    %314 = arith.divf %313, %312 : vector<2x32xf32>
    %315 = vector.extract_strided_slice %294 {offsets = [0, 64], sizes = [2, 32], strides = [1, 1]} : vector<2x96xf32> to vector<2x32xf32>
    %316 = vector.extract_strided_slice %293 {offsets = [0, 64], sizes = [2, 32], strides = [1, 1]} : vector<2x96xf32> to vector<2x32xf32>
    %317 = vector.broadcast %256 : vector<1x32xf32> to vector<2x32xf32>
    %318 = arith.addf %316, %317 : vector<2x32xf32>
    %319 = arith.mulf %304, %318 : vector<2x32xf32>
    %320 = arith.addf %315, %319 : vector<2x32xf32>
    %321 = math.tanh %320 : vector<2x32xf32>
    %cst_153 = arith.constant 1.000000e+00 : f32
    %322 = vector.broadcast %cst_153 : f32 to vector<2x32xf32>
    %323 = arith.subf %322, %314 : vector<2x32xf32>
    %324 = arith.mulf %323, %321 : vector<2x32xf32>
    %325 = arith.mulf %314, %291 : vector<2x32xf32>
    %326 = arith.addf %324, %325 : vector<2x32xf32>
    %c2 = arith.constant 2 : index
    %c0_154 = arith.constant 0 : index
    %327 = vector.load %arg27[%c2, %c0_154] : memref<32x32xf32, #tpu.memory_space<vmem>>, vector<2x32xf32>
    tpu.vector_store %arg27[%c2, %c0_154], %326 {strides = array<i32>} : memref<32x32xf32, #tpu.memory_space<vmem>>, vector<2x32xf32>,
    %cst_155 = arith.constant dense<0.000000e+00> : vector<2x96xf32>
    %328 = tpu.matmul %326, %255, %cst_155 {dimension_numbers = #tpu.dot_dimension_numbers<[1], [0], [0], [1], [0, 0, 1, 1], [], []>} : vector<2x32xf32>, vector<32x96xf32>, vector<2x96xf32> -> vector<2x96xf32>
    %329 = vector.extract_strided_slice %254 {offsets = [4, 0], sizes = [2, 96], strides = [1, 1]} : vector<32x96xf32> to vector<2x96xf32>
    %330 = vector.extract_strided_slice %329 {offsets = [0, 0], sizes = [2, 32], strides = [1, 1]} : vector<2x96xf32> to vector<2x32xf32>
    %331 = vector.extract_strided_slice %328 {offsets = [0, 0], sizes = [2, 32], strides = [1, 1]} : vector<2x96xf32> to vector<2x32xf32>
    %332 = arith.addf %330, %331 : vector<2x32xf32>
    %cst_156 = arith.constant 0.000000e+00 : f32
    %333 = vector.broadcast %cst_156 : f32 to vector<2x32xf32>
    %334 = arith.subf %333, %332 : vector<2x32xf32>
    %335 = math.exp %334 : vector<2x32xf32>
    %cst_157 = arith.constant 1.000000e+00 : f32
    %336 = vector.broadcast %cst_157 : f32 to vector<2x32xf32>
    %337 = arith.addf %336, %335 : vector<2x32xf32>
    %cst_158 = arith.constant 1.000000e+00 : f32
    %338 = vector.broadcast %cst_158 : f32 to vector<2x32xf32>
    %339 = arith.divf %338, %337 : vector<2x32xf32>
    %340 = vector.extract_strided_slice %329 {offsets = [0, 32], sizes = [2, 32], strides = [1, 1]} : vector<2x96xf32> to vector<2x32xf32>
    %341 = vector.extract_strided_slice %328 {offsets = [0, 32], sizes = [2, 32], strides = [1, 1]} : vector<2x96xf32> to vector<2x32xf32>
    %342 = arith.addf %340, %341 : vector<2x32xf32>
    %cst_159 = arith.constant 0.000000e+00 : f32
    %343 = vector.broadcast %cst_159 : f32 to vector<2x32xf32>
    %344 = arith.subf %343, %342 : vector<2x32xf32>
    %345 = math.exp %344 : vector<2x32xf32>
    %cst_160 = arith.constant 1.000000e+00 : f32
    %346 = vector.broadcast %cst_160 : f32 to vector<2x32xf32>
    %347 = arith.addf %346, %345 : vector<2x32xf32>
    %cst_161 = arith.constant 1.000000e+00 : f32
    %348 = vector.broadcast %cst_161 : f32 to vector<2x32xf32>
    %349 = arith.divf %348, %347 : vector<2x32xf32>
    %350 = vector.extract_strided_slice %329 {offsets = [0, 64], sizes = [2, 32], strides = [1, 1]} : vector<2x96xf32> to vector<2x32xf32>
    %351 = vector.extract_strided_slice %328 {offsets = [0, 64], sizes = [2, 32], strides = [1, 1]} : vector<2x96xf32> to vector<2x32xf32>
    %352 = vector.broadcast %256 : vector<1x32xf32> to vector<2x32xf32>
    %353 = arith.addf %351, %352 : vector<2x32xf32>
    %354 = arith.mulf %339, %353 : vector<2x32xf32>
    %355 = arith.addf %350, %354 : vector<2x32xf32>
    %356 = math.tanh %355 : vector<2x32xf32>
    %cst_162 = arith.constant 1.000000e+00 : f32
    %357 = vector.broadcast %cst_162 : f32 to vector<2x32xf32>
    %358 = arith.subf %357, %349 : vector<2x32xf32>
    %359 = arith.mulf %358, %356 : vector<2x32xf32>
    %360 = arith.mulf %349, %326 : vector<2x32xf32>
    %361 = arith.addf %359, %360 : vector<2x32xf32>
    %c4 = arith.constant 4 : index
    %c0_163 = arith.constant 0 : index
    %362 = vector.load %arg27[%c4, %c0_163] : memref<32x32xf32, #tpu.memory_space<vmem>>, vector<2x32xf32>
    tpu.vector_store %arg27[%c4, %c0_163], %361 {strides = array<i32>} : memref<32x32xf32, #tpu.memory_space<vmem>>, vector<2x32xf32>,
    %cst_164 = arith.constant dense<0.000000e+00> : vector<2x96xf32>
    %363 = tpu.matmul %361, %255, %cst_164 {dimension_numbers = #tpu.dot_dimension_numbers<[1], [0], [0], [1], [0, 0, 1, 1], [], []>} : vector<2x32xf32>, vector<32x96xf32>, vector<2x96xf32> -> vector<2x96xf32>
    %364 = vector.extract_strided_slice %254 {offsets = [6, 0], sizes = [2, 96], strides = [1, 1]} : vector<32x96xf32> to vector<2x96xf32>
    %365 = vector.extract_strided_slice %364 {offsets = [0, 0], sizes = [2, 32], strides = [1, 1]} : vector<2x96xf32> to vector<2x32xf32>
    %366 = vector.extract_strided_slice %363 {offsets = [0, 0], sizes = [2, 32], strides = [1, 1]} : vector<2x96xf32> to vector<2x32xf32>
    %367 = arith.addf %365, %366 : vector<2x32xf32>
    %cst_165 = arith.constant 0.000000e+00 : f32
    %368 = vector.broadcast %cst_165 : f32 to vector<2x32xf32>
    %369 = arith.subf %368, %367 : vector<2x32xf32>
    %370 = math.exp %369 : vector<2x32xf32>
    %cst_166 = arith.constant 1.000000e+00 : f32
    %371 = vector.broadcast %cst_166 : f32 to vector<2x32xf32>
    %372 = arith.addf %371, %370 : vector<2x32xf32>
    %cst_167 = arith.constant 1.000000e+00 : f32
    %373 = vector.broadcast %cst_167 : f32 to vector<2x32xf32>
    %374 = arith.divf %373, %372 : vector<2x32xf32>
    %375 = vector.extract_strided_slice %364 {offsets = [0, 32], sizes = [2, 32], strides = [1, 1]} : vector<2x96xf32> to vector<2x32xf32>
    %376 = vector.extract_strided_slice %363 {offsets = [0, 32], sizes = [2, 32], strides = [1, 1]} : vector<2x96xf32> to vector<2x32xf32>
    %377 = arith.addf %375, %376 : vector<2x32xf32>
    %cst_168 = arith.constant 0.000000e+00 : f32
    %378 = vector.broadcast %cst_168 : f32 to vector<2x32xf32>
    %379 = arith.subf %378, %377 : vector<2x32xf32>
    %380 = math.exp %379 : vector<2x32xf32>
    %cst_169 = arith.constant 1.000000e+00 : f32
    %381 = vector.broadcast %cst_169 : f32 to vector<2x32xf32>
    %382 = arith.addf %381, %380 : vector<2x32xf32>
    %cst_170 = arith.constant 1.000000e+00 : f32
    %383 = vector.broadcast %cst_170 : f32 to vector<2x32xf32>
    %384 = arith.divf %383, %382 : vector<2x32xf32>
    %385 = vector.extract_strided_slice %364 {offsets = [0, 64], sizes = [2, 32], strides = [1, 1]} : vector<2x96xf32> to vector<2x32xf32>
    %386 = vector.extract_strided_slice %363 {offsets = [0, 64], sizes = [2, 32], strides = [1, 1]} : vector<2x96xf32> to vector<2x32xf32>
    %387 = vector.broadcast %256 : vector<1x32xf32> to vector<2x32xf32>
    %388 = arith.addf %386, %387 : vector<2x32xf32>
    %389 = arith.mulf %374, %388 : vector<2x32xf32>
    %390 = arith.addf %385, %389 : vector<2x32xf32>
    %391 = math.tanh %390 : vector<2x32xf32>
    %cst_171 = arith.constant 1.000000e+00 : f32
    %392 = vector.broadcast %cst_171 : f32 to vector<2x32xf32>
    %393 = arith.subf %392, %384 : vector<2x32xf32>
    %394 = arith.mulf %393, %391 : vector<2x32xf32>
    %395 = arith.mulf %384, %361 : vector<2x32xf32>
    %396 = arith.addf %394, %395 : vector<2x32xf32>
    %c6 = arith.constant 6 : index
    %c0_172 = arith.constant 0 : index
    %397 = vector.load %arg27[%c6, %c0_172] : memref<32x32xf32, #tpu.memory_space<vmem>>, vector<2x32xf32>
    tpu.vector_store %arg27[%c6, %c0_172], %396 {strides = array<i32>} : memref<32x32xf32, #tpu.memory_space<vmem>>, vector<2x32xf32>,
    %cst_173 = arith.constant dense<0.000000e+00> : vector<2x96xf32>
    %398 = tpu.matmul %396, %255, %cst_173 {dimension_numbers = #tpu.dot_dimension_numbers<[1], [0], [0], [1], [0, 0, 1, 1], [], []>} : vector<2x32xf32>, vector<32x96xf32>, vector<2x96xf32> -> vector<2x96xf32>
    %399 = vector.extract_strided_slice %254 {offsets = [8, 0], sizes = [2, 96], strides = [1, 1]} : vector<32x96xf32> to vector<2x96xf32>
    %400 = vector.extract_strided_slice %399 {offsets = [0, 0], sizes = [2, 32], strides = [1, 1]} : vector<2x96xf32> to vector<2x32xf32>
    %401 = vector.extract_strided_slice %398 {offsets = [0, 0], sizes = [2, 32], strides = [1, 1]} : vector<2x96xf32> to vector<2x32xf32>
    %402 = arith.addf %400, %401 : vector<2x32xf32>
    %cst_174 = arith.constant 0.000000e+00 : f32
    %403 = vector.broadcast %cst_174 : f32 to vector<2x32xf32>
    %404 = arith.subf %403, %402 : vector<2x32xf32>
    %405 = math.exp %404 : vector<2x32xf32>
    %cst_175 = arith.constant 1.000000e+00 : f32
    %406 = vector.broadcast %cst_175 : f32 to vector<2x32xf32>
    %407 = arith.addf %406, %405 : vector<2x32xf32>
    %cst_176 = arith.constant 1.000000e+00 : f32
    %408 = vector.broadcast %cst_176 : f32 to vector<2x32xf32>
    %409 = arith.divf %408, %407 : vector<2x32xf32>
    %410 = vector.extract_strided_slice %399 {offsets = [0, 32], sizes = [2, 32], strides = [1, 1]} : vector<2x96xf32> to vector<2x32xf32>
    %411 = vector.extract_strided_slice %398 {offsets = [0, 32], sizes = [2, 32], strides = [1, 1]} : vector<2x96xf32> to vector<2x32xf32>
    %412 = arith.addf %410, %411 : vector<2x32xf32>
    %cst_177 = arith.constant 0.000000e+00 : f32
    %413 = vector.broadcast %cst_177 : f32 to vector<2x32xf32>
    %414 = arith.subf %413, %412 : vector<2x32xf32>
    %415 = math.exp %414 : vector<2x32xf32>
    %cst_178 = arith.constant 1.000000e+00 : f32
    %416 = vector.broadcast %cst_178 : f32 to vector<2x32xf32>
    %417 = arith.addf %416, %415 : vector<2x32xf32>
    %cst_179 = arith.constant 1.000000e+00 : f32
    %418 = vector.broadcast %cst_179 : f32 to vector<2x32xf32>
    %419 = arith.divf %418, %417 : vector<2x32xf32>
    %420 = vector.extract_strided_slice %399 {offsets = [0, 64], sizes = [2, 32], strides = [1, 1]} : vector<2x96xf32> to vector<2x32xf32>
    %421 = vector.extract_strided_slice %398 {offsets = [0, 64], sizes = [2, 32], strides = [1, 1]} : vector<2x96xf32> to vector<2x32xf32>
    %422 = vector.broadcast %256 : vector<1x32xf32> to vector<2x32xf32>
    %423 = arith.addf %421, %422 : vector<2x32xf32>
    %424 = arith.mulf %409, %423 : vector<2x32xf32>
    %425 = arith.addf %420, %424 : vector<2x32xf32>
    %426 = math.tanh %425 : vector<2x32xf32>
    %cst_180 = arith.constant 1.000000e+00 : f32
    %427 = vector.broadcast %cst_180 : f32 to vector<2x32xf32>
    %428 = arith.subf %427, %419 : vector<2x32xf32>
    %429 = arith.mulf %428, %426 : vector<2x32xf32>
    %430 = arith.mulf %419, %396 : vector<2x32xf32>
    %431 = arith.addf %429, %430 : vector<2x32xf32>
    %c8 = arith.constant 8 : index
    %c0_181 = arith.constant 0 : index
    %432 = vector.load %arg27[%c8, %c0_181] : memref<32x32xf32, #tpu.memory_space<vmem>>, vector<2x32xf32>
    tpu.vector_store %arg27[%c8, %c0_181], %431 {strides = array<i32>} : memref<32x32xf32, #tpu.memory_space<vmem>>, vector<2x32xf32>,
    %cst_182 = arith.constant dense<0.000000e+00> : vector<2x96xf32>
    %433 = tpu.matmul %431, %255, %cst_182 {dimension_numbers = #tpu.dot_dimension_numbers<[1], [0], [0], [1], [0, 0, 1, 1], [], []>} : vector<2x32xf32>, vector<32x96xf32>, vector<2x96xf32> -> vector<2x96xf32>
    %434 = vector.extract_strided_slice %254 {offsets = [10, 0], sizes = [2, 96], strides = [1, 1]} : vector<32x96xf32> to vector<2x96xf32>
    %435 = vector.extract_strided_slice %434 {offsets = [0, 0], sizes = [2, 32], strides = [1, 1]} : vector<2x96xf32> to vector<2x32xf32>
    %436 = vector.extract_strided_slice %433 {offsets = [0, 0], sizes = [2, 32], strides = [1, 1]} : vector<2x96xf32> to vector<2x32xf32>
    %437 = arith.addf %435, %436 : vector<2x32xf32>
    %cst_183 = arith.constant 0.000000e+00 : f32
    %438 = vector.broadcast %cst_183 : f32 to vector<2x32xf32>
    %439 = arith.subf %438, %437 : vector<2x32xf32>
    %440 = math.exp %439 : vector<2x32xf32>
    %cst_184 = arith.constant 1.000000e+00 : f32
    %441 = vector.broadcast %cst_184 : f32 to vector<2x32xf32>
    %442 = arith.addf %441, %440 : vector<2x32xf32>
    %cst_185 = arith.constant 1.000000e+00 : f32
    %443 = vector.broadcast %cst_185 : f32 to vector<2x32xf32>
    %444 = arith.divf %443, %442 : vector<2x32xf32>
    %445 = vector.extract_strided_slice %434 {offsets = [0, 32], sizes = [2, 32], strides = [1, 1]} : vector<2x96xf32> to vector<2x32xf32>
    %446 = vector.extract_strided_slice %433 {offsets = [0, 32], sizes = [2, 32], strides = [1, 1]} : vector<2x96xf32> to vector<2x32xf32>
    %447 = arith.addf %445, %446 : vector<2x32xf32>
    %cst_186 = arith.constant 0.000000e+00 : f32
    %448 = vector.broadcast %cst_186 : f32 to vector<2x32xf32>
    %449 = arith.subf %448, %447 : vector<2x32xf32>
    %450 = math.exp %449 : vector<2x32xf32>
    %cst_187 = arith.constant 1.000000e+00 : f32
    %451 = vector.broadcast %cst_187 : f32 to vector<2x32xf32>
    %452 = arith.addf %451, %450 : vector<2x32xf32>
    %cst_188 = arith.constant 1.000000e+00 : f32
    %453 = vector.broadcast %cst_188 : f32 to vector<2x32xf32>
    %454 = arith.divf %453, %452 : vector<2x32xf32>
    %455 = vector.extract_strided_slice %434 {offsets = [0, 64], sizes = [2, 32], strides = [1, 1]} : vector<2x96xf32> to vector<2x32xf32>
    %456 = vector.extract_strided_slice %433 {offsets = [0, 64], sizes = [2, 32], strides = [1, 1]} : vector<2x96xf32> to vector<2x32xf32>
    %457 = vector.broadcast %256 : vector<1x32xf32> to vector<2x32xf32>
    %458 = arith.addf %456, %457 : vector<2x32xf32>
    %459 = arith.mulf %444, %458 : vector<2x32xf32>
    %460 = arith.addf %455, %459 : vector<2x32xf32>
    %461 = math.tanh %460 : vector<2x32xf32>
    %cst_189 = arith.constant 1.000000e+00 : f32
    %462 = vector.broadcast %cst_189 : f32 to vector<2x32xf32>
    %463 = arith.subf %462, %454 : vector<2x32xf32>
    %464 = arith.mulf %463, %461 : vector<2x32xf32>
    %465 = arith.mulf %454, %431 : vector<2x32xf32>
    %466 = arith.addf %464, %465 : vector<2x32xf32>
    %c10 = arith.constant 10 : index
    %c0_190 = arith.constant 0 : index
    %467 = vector.load %arg27[%c10, %c0_190] : memref<32x32xf32, #tpu.memory_space<vmem>>, vector<2x32xf32>
    tpu.vector_store %arg27[%c10, %c0_190], %466 {strides = array<i32>} : memref<32x32xf32, #tpu.memory_space<vmem>>, vector<2x32xf32>,
    %cst_191 = arith.constant dense<0.000000e+00> : vector<2x96xf32>
    %468 = tpu.matmul %466, %255, %cst_191 {dimension_numbers = #tpu.dot_dimension_numbers<[1], [0], [0], [1], [0, 0, 1, 1], [], []>} : vector<2x32xf32>, vector<32x96xf32>, vector<2x96xf32> -> vector<2x96xf32>
    %469 = vector.extract_strided_slice %254 {offsets = [12, 0], sizes = [2, 96], strides = [1, 1]} : vector<32x96xf32> to vector<2x96xf32>
    %470 = vector.extract_strided_slice %469 {offsets = [0, 0], sizes = [2, 32], strides = [1, 1]} : vector<2x96xf32> to vector<2x32xf32>
    %471 = vector.extract_strided_slice %468 {offsets = [0, 0], sizes = [2, 32], strides = [1, 1]} : vector<2x96xf32> to vector<2x32xf32>
    %472 = arith.addf %470, %471 : vector<2x32xf32>
    %cst_192 = arith.constant 0.000000e+00 : f32
    %473 = vector.broadcast %cst_192 : f32 to vector<2x32xf32>
    %474 = arith.subf %473, %472 : vector<2x32xf32>
    %475 = math.exp %474 : vector<2x32xf32>
    %cst_193 = arith.constant 1.000000e+00 : f32
    %476 = vector.broadcast %cst_193 : f32 to vector<2x32xf32>
    %477 = arith.addf %476, %475 : vector<2x32xf32>
    %cst_194 = arith.constant 1.000000e+00 : f32
    %478 = vector.broadcast %cst_194 : f32 to vector<2x32xf32>
    %479 = arith.divf %478, %477 : vector<2x32xf32>
    %480 = vector.extract_strided_slice %469 {offsets = [0, 32], sizes = [2, 32], strides = [1, 1]} : vector<2x96xf32> to vector<2x32xf32>
    %481 = vector.extract_strided_slice %468 {offsets = [0, 32], sizes = [2, 32], strides = [1, 1]} : vector<2x96xf32> to vector<2x32xf32>
    %482 = arith.addf %480, %481 : vector<2x32xf32>
    %cst_195 = arith.constant 0.000000e+00 : f32
    %483 = vector.broadcast %cst_195 : f32 to vector<2x32xf32>
    %484 = arith.subf %483, %482 : vector<2x32xf32>
    %485 = math.exp %484 : vector<2x32xf32>
    %cst_196 = arith.constant 1.000000e+00 : f32
    %486 = vector.broadcast %cst_196 : f32 to vector<2x32xf32>
    %487 = arith.addf %486, %485 : vector<2x32xf32>
    %cst_197 = arith.constant 1.000000e+00 : f32
    %488 = vector.broadcast %cst_197 : f32 to vector<2x32xf32>
    %489 = arith.divf %488, %487 : vector<2x32xf32>
    %490 = vector.extract_strided_slice %469 {offsets = [0, 64], sizes = [2, 32], strides = [1, 1]} : vector<2x96xf32> to vector<2x32xf32>
    %491 = vector.extract_strided_slice %468 {offsets = [0, 64], sizes = [2, 32], strides = [1, 1]} : vector<2x96xf32> to vector<2x32xf32>
    %492 = vector.broadcast %256 : vector<1x32xf32> to vector<2x32xf32>
    %493 = arith.addf %491, %492 : vector<2x32xf32>
    %494 = arith.mulf %479, %493 : vector<2x32xf32>
    %495 = arith.addf %490, %494 : vector<2x32xf32>
    %496 = math.tanh %495 : vector<2x32xf32>
    %cst_198 = arith.constant 1.000000e+00 : f32
    %497 = vector.broadcast %cst_198 : f32 to vector<2x32xf32>
    %498 = arith.subf %497, %489 : vector<2x32xf32>
    %499 = arith.mulf %498, %496 : vector<2x32xf32>
    %500 = arith.mulf %489, %466 : vector<2x32xf32>
    %501 = arith.addf %499, %500 : vector<2x32xf32>
    %c12 = arith.constant 12 : index
    %c0_199 = arith.constant 0 : index
    %502 = vector.load %arg27[%c12, %c0_199] : memref<32x32xf32, #tpu.memory_space<vmem>>, vector<2x32xf32>
    tpu.vector_store %arg27[%c12, %c0_199], %501 {strides = array<i32>} : memref<32x32xf32, #tpu.memory_space<vmem>>, vector<2x32xf32>,
    %cst_200 = arith.constant dense<0.000000e+00> : vector<2x96xf32>
    %503 = tpu.matmul %501, %255, %cst_200 {dimension_numbers = #tpu.dot_dimension_numbers<[1], [0], [0], [1], [0, 0, 1, 1], [], []>} : vector<2x32xf32>, vector<32x96xf32>, vector<2x96xf32> -> vector<2x96xf32>
    %504 = vector.extract_strided_slice %254 {offsets = [14, 0], sizes = [2, 96], strides = [1, 1]} : vector<32x96xf32> to vector<2x96xf32>
    %505 = vector.extract_strided_slice %504 {offsets = [0, 0], sizes = [2, 32], strides = [1, 1]} : vector<2x96xf32> to vector<2x32xf32>
    %506 = vector.extract_strided_slice %503 {offsets = [0, 0], sizes = [2, 32], strides = [1, 1]} : vector<2x96xf32> to vector<2x32xf32>
    %507 = arith.addf %505, %506 : vector<2x32xf32>
    %cst_201 = arith.constant 0.000000e+00 : f32
    %508 = vector.broadcast %cst_201 : f32 to vector<2x32xf32>
    %509 = arith.subf %508, %507 : vector<2x32xf32>
    %510 = math.exp %509 : vector<2x32xf32>
    %cst_202 = arith.constant 1.000000e+00 : f32
    %511 = vector.broadcast %cst_202 : f32 to vector<2x32xf32>
    %512 = arith.addf %511, %510 : vector<2x32xf32>
    %cst_203 = arith.constant 1.000000e+00 : f32
    %513 = vector.broadcast %cst_203 : f32 to vector<2x32xf32>
    %514 = arith.divf %513, %512 : vector<2x32xf32>
    %515 = vector.extract_strided_slice %504 {offsets = [0, 32], sizes = [2, 32], strides = [1, 1]} : vector<2x96xf32> to vector<2x32xf32>
    %516 = vector.extract_strided_slice %503 {offsets = [0, 32], sizes = [2, 32], strides = [1, 1]} : vector<2x96xf32> to vector<2x32xf32>
    %517 = arith.addf %515, %516 : vector<2x32xf32>
    %cst_204 = arith.constant 0.000000e+00 : f32
    %518 = vector.broadcast %cst_204 : f32 to vector<2x32xf32>
    %519 = arith.subf %518, %517 : vector<2x32xf32>
    %520 = math.exp %519 : vector<2x32xf32>
    %cst_205 = arith.constant 1.000000e+00 : f32
    %521 = vector.broadcast %cst_205 : f32 to vector<2x32xf32>
    %522 = arith.addf %521, %520 : vector<2x32xf32>
    %cst_206 = arith.constant 1.000000e+00 : f32
    %523 = vector.broadcast %cst_206 : f32 to vector<2x32xf32>
    %524 = arith.divf %523, %522 : vector<2x32xf32>
    %525 = vector.extract_strided_slice %504 {offsets = [0, 64], sizes = [2, 32], strides = [1, 1]} : vector<2x96xf32> to vector<2x32xf32>
    %526 = vector.extract_strided_slice %503 {offsets = [0, 64], sizes = [2, 32], strides = [1, 1]} : vector<2x96xf32> to vector<2x32xf32>
    %527 = vector.broadcast %256 : vector<1x32xf32> to vector<2x32xf32>
    %528 = arith.addf %526, %527 : vector<2x32xf32>
    %529 = arith.mulf %514, %528 : vector<2x32xf32>
    %530 = arith.addf %525, %529 : vector<2x32xf32>
    %531 = math.tanh %530 : vector<2x32xf32>
    %cst_207 = arith.constant 1.000000e+00 : f32
    %532 = vector.broadcast %cst_207 : f32 to vector<2x32xf32>
    %533 = arith.subf %532, %524 : vector<2x32xf32>
    %534 = arith.mulf %533, %531 : vector<2x32xf32>
    %535 = arith.mulf %524, %501 : vector<2x32xf32>
    %536 = arith.addf %534, %535 : vector<2x32xf32>
    %c14 = arith.constant 14 : index
    %c0_208 = arith.constant 0 : index
    %537 = vector.load %arg27[%c14, %c0_208] : memref<32x32xf32, #tpu.memory_space<vmem>>, vector<2x32xf32>
    tpu.vector_store %arg27[%c14, %c0_208], %536 {strides = array<i32>} : memref<32x32xf32, #tpu.memory_space<vmem>>, vector<2x32xf32>,
    %cst_209 = arith.constant dense<0.000000e+00> : vector<2x96xf32>
    %538 = tpu.matmul %536, %255, %cst_209 {dimension_numbers = #tpu.dot_dimension_numbers<[1], [0], [0], [1], [0, 0, 1, 1], [], []>} : vector<2x32xf32>, vector<32x96xf32>, vector<2x96xf32> -> vector<2x96xf32>
    %539 = vector.extract_strided_slice %254 {offsets = [16, 0], sizes = [2, 96], strides = [1, 1]} : vector<32x96xf32> to vector<2x96xf32>
    %540 = vector.extract_strided_slice %539 {offsets = [0, 0], sizes = [2, 32], strides = [1, 1]} : vector<2x96xf32> to vector<2x32xf32>
    %541 = vector.extract_strided_slice %538 {offsets = [0, 0], sizes = [2, 32], strides = [1, 1]} : vector<2x96xf32> to vector<2x32xf32>
    %542 = arith.addf %540, %541 : vector<2x32xf32>
    %cst_210 = arith.constant 0.000000e+00 : f32
    %543 = vector.broadcast %cst_210 : f32 to vector<2x32xf32>
    %544 = arith.subf %543, %542 : vector<2x32xf32>
    %545 = math.exp %544 : vector<2x32xf32>
    %cst_211 = arith.constant 1.000000e+00 : f32
    %546 = vector.broadcast %cst_211 : f32 to vector<2x32xf32>
    %547 = arith.addf %546, %545 : vector<2x32xf32>
    %cst_212 = arith.constant 1.000000e+00 : f32
    %548 = vector.broadcast %cst_212 : f32 to vector<2x32xf32>
    %549 = arith.divf %548, %547 : vector<2x32xf32>
    %550 = vector.extract_strided_slice %539 {offsets = [0, 32], sizes = [2, 32], strides = [1, 1]} : vector<2x96xf32> to vector<2x32xf32>
    %551 = vector.extract_strided_slice %538 {offsets = [0, 32], sizes = [2, 32], strides = [1, 1]} : vector<2x96xf32> to vector<2x32xf32>
    %552 = arith.addf %550, %551 : vector<2x32xf32>
    %cst_213 = arith.constant 0.000000e+00 : f32
    %553 = vector.broadcast %cst_213 : f32 to vector<2x32xf32>
    %554 = arith.subf %553, %552 : vector<2x32xf32>
    %555 = math.exp %554 : vector<2x32xf32>
    %cst_214 = arith.constant 1.000000e+00 : f32
    %556 = vector.broadcast %cst_214 : f32 to vector<2x32xf32>
    %557 = arith.addf %556, %555 : vector<2x32xf32>
    %cst_215 = arith.constant 1.000000e+00 : f32
    %558 = vector.broadcast %cst_215 : f32 to vector<2x32xf32>
    %559 = arith.divf %558, %557 : vector<2x32xf32>
    %560 = vector.extract_strided_slice %539 {offsets = [0, 64], sizes = [2, 32], strides = [1, 1]} : vector<2x96xf32> to vector<2x32xf32>
    %561 = vector.extract_strided_slice %538 {offsets = [0, 64], sizes = [2, 32], strides = [1, 1]} : vector<2x96xf32> to vector<2x32xf32>
    %562 = vector.broadcast %256 : vector<1x32xf32> to vector<2x32xf32>
    %563 = arith.addf %561, %562 : vector<2x32xf32>
    %564 = arith.mulf %549, %563 : vector<2x32xf32>
    %565 = arith.addf %560, %564 : vector<2x32xf32>
    %566 = math.tanh %565 : vector<2x32xf32>
    %cst_216 = arith.constant 1.000000e+00 : f32
    %567 = vector.broadcast %cst_216 : f32 to vector<2x32xf32>
    %568 = arith.subf %567, %559 : vector<2x32xf32>
    %569 = arith.mulf %568, %566 : vector<2x32xf32>
    %570 = arith.mulf %559, %536 : vector<2x32xf32>
    %571 = arith.addf %569, %570 : vector<2x32xf32>
    %c16 = arith.constant 16 : index
    %c0_217 = arith.constant 0 : index
    %572 = vector.load %arg27[%c16, %c0_217] : memref<32x32xf32, #tpu.memory_space<vmem>>, vector<2x32xf32>
    tpu.vector_store %arg27[%c16, %c0_217], %571 {strides = array<i32>} : memref<32x32xf32, #tpu.memory_space<vmem>>, vector<2x32xf32>,
    %cst_218 = arith.constant dense<0.000000e+00> : vector<2x96xf32>
    %573 = tpu.matmul %571, %255, %cst_218 {dimension_numbers = #tpu.dot_dimension_numbers<[1], [0], [0], [1], [0, 0, 1, 1], [], []>} : vector<2x32xf32>, vector<32x96xf32>, vector<2x96xf32> -> vector<2x96xf32>
    %574 = vector.extract_strided_slice %254 {offsets = [18, 0], sizes = [2, 96], strides = [1, 1]} : vector<32x96xf32> to vector<2x96xf32>
    %575 = vector.extract_strided_slice %574 {offsets = [0, 0], sizes = [2, 32], strides = [1, 1]} : vector<2x96xf32> to vector<2x32xf32>
    %576 = vector.extract_strided_slice %573 {offsets = [0, 0], sizes = [2, 32], strides = [1, 1]} : vector<2x96xf32> to vector<2x32xf32>
    %577 = arith.addf %575, %576 : vector<2x32xf32>
    %cst_219 = arith.constant 0.000000e+00 : f32
    %578 = vector.broadcast %cst_219 : f32 to vector<2x32xf32>
    %579 = arith.subf %578, %577 : vector<2x32xf32>
    %580 = math.exp %579 : vector<2x32xf32>
    %cst_220 = arith.constant 1.000000e+00 : f32
    %581 = vector.broadcast %cst_220 : f32 to vector<2x32xf32>
    %582 = arith.addf %581, %580 : vector<2x32xf32>
    %cst_221 = arith.constant 1.000000e+00 : f32
    %583 = vector.broadcast %cst_221 : f32 to vector<2x32xf32>
    %584 = arith.divf %583, %582 : vector<2x32xf32>
    %585 = vector.extract_strided_slice %574 {offsets = [0, 32], sizes = [2, 32], strides = [1, 1]} : vector<2x96xf32> to vector<2x32xf32>
    %586 = vector.extract_strided_slice %573 {offsets = [0, 32], sizes = [2, 32], strides = [1, 1]} : vector<2x96xf32> to vector<2x32xf32>
    %587 = arith.addf %585, %586 : vector<2x32xf32>
    %cst_222 = arith.constant 0.000000e+00 : f32
    %588 = vector.broadcast %cst_222 : f32 to vector<2x32xf32>
    %589 = arith.subf %588, %587 : vector<2x32xf32>
    %590 = math.exp %589 : vector<2x32xf32>
    %cst_223 = arith.constant 1.000000e+00 : f32
    %591 = vector.broadcast %cst_223 : f32 to vector<2x32xf32>
    %592 = arith.addf %591, %590 : vector<2x32xf32>
    %cst_224 = arith.constant 1.000000e+00 : f32
    %593 = vector.broadcast %cst_224 : f32 to vector<2x32xf32>
    %594 = arith.divf %593, %592 : vector<2x32xf32>
    %595 = vector.extract_strided_slice %574 {offsets = [0, 64], sizes = [2, 32], strides = [1, 1]} : vector<2x96xf32> to vector<2x32xf32>
    %596 = vector.extract_strided_slice %573 {offsets = [0, 64], sizes = [2, 32], strides = [1, 1]} : vector<2x96xf32> to vector<2x32xf32>
    %597 = vector.broadcast %256 : vector<1x32xf32> to vector<2x32xf32>
    %598 = arith.addf %596, %597 : vector<2x32xf32>
    %599 = arith.mulf %584, %598 : vector<2x32xf32>
    %600 = arith.addf %595, %599 : vector<2x32xf32>
    %601 = math.tanh %600 : vector<2x32xf32>
    %cst_225 = arith.constant 1.000000e+00 : f32
    %602 = vector.broadcast %cst_225 : f32 to vector<2x32xf32>
    %603 = arith.subf %602, %594 : vector<2x32xf32>
    %604 = arith.mulf %603, %601 : vector<2x32xf32>
    %605 = arith.mulf %594, %571 : vector<2x32xf32>
    %606 = arith.addf %604, %605 : vector<2x32xf32>
    %c18 = arith.constant 18 : index
    %c0_226 = arith.constant 0 : index
    %607 = vector.load %arg27[%c18, %c0_226] : memref<32x32xf32, #tpu.memory_space<vmem>>, vector<2x32xf32>
    tpu.vector_store %arg27[%c18, %c0_226], %606 {strides = array<i32>} : memref<32x32xf32, #tpu.memory_space<vmem>>, vector<2x32xf32>,
    %cst_227 = arith.constant dense<0.000000e+00> : vector<2x96xf32>
    %608 = tpu.matmul %606, %255, %cst_227 {dimension_numbers = #tpu.dot_dimension_numbers<[1], [0], [0], [1], [0, 0, 1, 1], [], []>} : vector<2x32xf32>, vector<32x96xf32>, vector<2x96xf32> -> vector<2x96xf32>
    %609 = vector.extract_strided_slice %254 {offsets = [20, 0], sizes = [2, 96], strides = [1, 1]} : vector<32x96xf32> to vector<2x96xf32>
    %610 = vector.extract_strided_slice %609 {offsets = [0, 0], sizes = [2, 32], strides = [1, 1]} : vector<2x96xf32> to vector<2x32xf32>
    %611 = vector.extract_strided_slice %608 {offsets = [0, 0], sizes = [2, 32], strides = [1, 1]} : vector<2x96xf32> to vector<2x32xf32>
    %612 = arith.addf %610, %611 : vector<2x32xf32>
    %cst_228 = arith.constant 0.000000e+00 : f32
    %613 = vector.broadcast %cst_228 : f32 to vector<2x32xf32>
    %614 = arith.subf %613, %612 : vector<2x32xf32>
    %615 = math.exp %614 : vector<2x32xf32>
    %cst_229 = arith.constant 1.000000e+00 : f32
    %616 = vector.broadcast %cst_229 : f32 to vector<2x32xf32>
    %617 = arith.addf %616, %615 : vector<2x32xf32>
    %cst_230 = arith.constant 1.000000e+00 : f32
    %618 = vector.broadcast %cst_230 : f32 to vector<2x32xf32>
    %619 = arith.divf %618, %617 : vector<2x32xf32>
    %620 = vector.extract_strided_slice %609 {offsets = [0, 32], sizes = [2, 32], strides = [1, 1]} : vector<2x96xf32> to vector<2x32xf32>
    %621 = vector.extract_strided_slice %608 {offsets = [0, 32], sizes = [2, 32], strides = [1, 1]} : vector<2x96xf32> to vector<2x32xf32>
    %622 = arith.addf %620, %621 : vector<2x32xf32>
    %cst_231 = arith.constant 0.000000e+00 : f32
    %623 = vector.broadcast %cst_231 : f32 to vector<2x32xf32>
    %624 = arith.subf %623, %622 : vector<2x32xf32>
    %625 = math.exp %624 : vector<2x32xf32>
    %cst_232 = arith.constant 1.000000e+00 : f32
    %626 = vector.broadcast %cst_232 : f32 to vector<2x32xf32>
    %627 = arith.addf %626, %625 : vector<2x32xf32>
    %cst_233 = arith.constant 1.000000e+00 : f32
    %628 = vector.broadcast %cst_233 : f32 to vector<2x32xf32>
    %629 = arith.divf %628, %627 : vector<2x32xf32>
    %630 = vector.extract_strided_slice %609 {offsets = [0, 64], sizes = [2, 32], strides = [1, 1]} : vector<2x96xf32> to vector<2x32xf32>
    %631 = vector.extract_strided_slice %608 {offsets = [0, 64], sizes = [2, 32], strides = [1, 1]} : vector<2x96xf32> to vector<2x32xf32>
    %632 = vector.broadcast %256 : vector<1x32xf32> to vector<2x32xf32>
    %633 = arith.addf %631, %632 : vector<2x32xf32>
    %634 = arith.mulf %619, %633 : vector<2x32xf32>
    %635 = arith.addf %630, %634 : vector<2x32xf32>
    %636 = math.tanh %635 : vector<2x32xf32>
    %cst_234 = arith.constant 1.000000e+00 : f32
    %637 = vector.broadcast %cst_234 : f32 to vector<2x32xf32>
    %638 = arith.subf %637, %629 : vector<2x32xf32>
    %639 = arith.mulf %638, %636 : vector<2x32xf32>
    %640 = arith.mulf %629, %606 : vector<2x32xf32>
    %641 = arith.addf %639, %640 : vector<2x32xf32>
    %c20 = arith.constant 20 : index
    %c0_235 = arith.constant 0 : index
    %642 = vector.load %arg27[%c20, %c0_235] : memref<32x32xf32, #tpu.memory_space<vmem>>, vector<2x32xf32>
    tpu.vector_store %arg27[%c20, %c0_235], %641 {strides = array<i32>} : memref<32x32xf32, #tpu.memory_space<vmem>>, vector<2x32xf32>,
    %cst_236 = arith.constant dense<0.000000e+00> : vector<2x96xf32>
    %643 = tpu.matmul %641, %255, %cst_236 {dimension_numbers = #tpu.dot_dimension_numbers<[1], [0], [0], [1], [0, 0, 1, 1], [], []>} : vector<2x32xf32>, vector<32x96xf32>, vector<2x96xf32> -> vector<2x96xf32>
    %644 = vector.extract_strided_slice %254 {offsets = [22, 0], sizes = [2, 96], strides = [1, 1]} : vector<32x96xf32> to vector<2x96xf32>
    %645 = vector.extract_strided_slice %644 {offsets = [0, 0], sizes = [2, 32], strides = [1, 1]} : vector<2x96xf32> to vector<2x32xf32>
    %646 = vector.extract_strided_slice %643 {offsets = [0, 0], sizes = [2, 32], strides = [1, 1]} : vector<2x96xf32> to vector<2x32xf32>
    %647 = arith.addf %645, %646 : vector<2x32xf32>
    %cst_237 = arith.constant 0.000000e+00 : f32
    %648 = vector.broadcast %cst_237 : f32 to vector<2x32xf32>
    %649 = arith.subf %648, %647 : vector<2x32xf32>
    %650 = math.exp %649 : vector<2x32xf32>
    %cst_238 = arith.constant 1.000000e+00 : f32
    %651 = vector.broadcast %cst_238 : f32 to vector<2x32xf32>
    %652 = arith.addf %651, %650 : vector<2x32xf32>
    %cst_239 = arith.constant 1.000000e+00 : f32
    %653 = vector.broadcast %cst_239 : f32 to vector<2x32xf32>
    %654 = arith.divf %653, %652 : vector<2x32xf32>
    %655 = vector.extract_strided_slice %644 {offsets = [0, 32], sizes = [2, 32], strides = [1, 1]} : vector<2x96xf32> to vector<2x32xf32>
    %656 = vector.extract_strided_slice %643 {offsets = [0, 32], sizes = [2, 32], strides = [1, 1]} : vector<2x96xf32> to vector<2x32xf32>
    %657 = arith.addf %655, %656 : vector<2x32xf32>
    %cst_240 = arith.constant 0.000000e+00 : f32
    %658 = vector.broadcast %cst_240 : f32 to vector<2x32xf32>
    %659 = arith.subf %658, %657 : vector<2x32xf32>
    %660 = math.exp %659 : vector<2x32xf32>
    %cst_241 = arith.constant 1.000000e+00 : f32
    %661 = vector.broadcast %cst_241 : f32 to vector<2x32xf32>
    %662 = arith.addf %661, %660 : vector<2x32xf32>
    %cst_242 = arith.constant 1.000000e+00 : f32
    %663 = vector.broadcast %cst_242 : f32 to vector<2x32xf32>
    %664 = arith.divf %663, %662 : vector<2x32xf32>
    %665 = vector.extract_strided_slice %644 {offsets = [0, 64], sizes = [2, 32], strides = [1, 1]} : vector<2x96xf32> to vector<2x32xf32>
    %666 = vector.extract_strided_slice %643 {offsets = [0, 64], sizes = [2, 32], strides = [1, 1]} : vector<2x96xf32> to vector<2x32xf32>
    %667 = vector.broadcast %256 : vector<1x32xf32> to vector<2x32xf32>
    %668 = arith.addf %666, %667 : vector<2x32xf32>
    %669 = arith.mulf %654, %668 : vector<2x32xf32>
    %670 = arith.addf %665, %669 : vector<2x32xf32>
    %671 = math.tanh %670 : vector<2x32xf32>
    %cst_243 = arith.constant 1.000000e+00 : f32
    %672 = vector.broadcast %cst_243 : f32 to vector<2x32xf32>
    %673 = arith.subf %672, %664 : vector<2x32xf32>
    %674 = arith.mulf %673, %671 : vector<2x32xf32>
    %675 = arith.mulf %664, %641 : vector<2x32xf32>
    %676 = arith.addf %674, %675 : vector<2x32xf32>
    %c22 = arith.constant 22 : index
    %c0_244 = arith.constant 0 : index
    %677 = vector.load %arg27[%c22, %c0_244] : memref<32x32xf32, #tpu.memory_space<vmem>>, vector<2x32xf32>
    tpu.vector_store %arg27[%c22, %c0_244], %676 {strides = array<i32>} : memref<32x32xf32, #tpu.memory_space<vmem>>, vector<2x32xf32>,
    %cst_245 = arith.constant dense<0.000000e+00> : vector<2x96xf32>
    %678 = tpu.matmul %676, %255, %cst_245 {dimension_numbers = #tpu.dot_dimension_numbers<[1], [0], [0], [1], [0, 0, 1, 1], [], []>} : vector<2x32xf32>, vector<32x96xf32>, vector<2x96xf32> -> vector<2x96xf32>
    %679 = vector.extract_strided_slice %254 {offsets = [24, 0], sizes = [2, 96], strides = [1, 1]} : vector<32x96xf32> to vector<2x96xf32>
    %680 = vector.extract_strided_slice %679 {offsets = [0, 0], sizes = [2, 32], strides = [1, 1]} : vector<2x96xf32> to vector<2x32xf32>
    %681 = vector.extract_strided_slice %678 {offsets = [0, 0], sizes = [2, 32], strides = [1, 1]} : vector<2x96xf32> to vector<2x32xf32>
    %682 = arith.addf %680, %681 : vector<2x32xf32>
    %cst_246 = arith.constant 0.000000e+00 : f32
    %683 = vector.broadcast %cst_246 : f32 to vector<2x32xf32>
    %684 = arith.subf %683, %682 : vector<2x32xf32>
    %685 = math.exp %684 : vector<2x32xf32>
    %cst_247 = arith.constant 1.000000e+00 : f32
    %686 = vector.broadcast %cst_247 : f32 to vector<2x32xf32>
    %687 = arith.addf %686, %685 : vector<2x32xf32>
    %cst_248 = arith.constant 1.000000e+00 : f32
    %688 = vector.broadcast %cst_248 : f32 to vector<2x32xf32>
    %689 = arith.divf %688, %687 : vector<2x32xf32>
    %690 = vector.extract_strided_slice %679 {offsets = [0, 32], sizes = [2, 32], strides = [1, 1]} : vector<2x96xf32> to vector<2x32xf32>
    %691 = vector.extract_strided_slice %678 {offsets = [0, 32], sizes = [2, 32], strides = [1, 1]} : vector<2x96xf32> to vector<2x32xf32>
    %692 = arith.addf %690, %691 : vector<2x32xf32>
    %cst_249 = arith.constant 0.000000e+00 : f32
    %693 = vector.broadcast %cst_249 : f32 to vector<2x32xf32>
    %694 = arith.subf %693, %692 : vector<2x32xf32>
    %695 = math.exp %694 : vector<2x32xf32>
    %cst_250 = arith.constant 1.000000e+00 : f32
    %696 = vector.broadcast %cst_250 : f32 to vector<2x32xf32>
    %697 = arith.addf %696, %695 : vector<2x32xf32>
    %cst_251 = arith.constant 1.000000e+00 : f32
    %698 = vector.broadcast %cst_251 : f32 to vector<2x32xf32>
    %699 = arith.divf %698, %697 : vector<2x32xf32>
    %700 = vector.extract_strided_slice %679 {offsets = [0, 64], sizes = [2, 32], strides = [1, 1]} : vector<2x96xf32> to vector<2x32xf32>
    %701 = vector.extract_strided_slice %678 {offsets = [0, 64], sizes = [2, 32], strides = [1, 1]} : vector<2x96xf32> to vector<2x32xf32>
    %702 = vector.broadcast %256 : vector<1x32xf32> to vector<2x32xf32>
    %703 = arith.addf %701, %702 : vector<2x32xf32>
    %704 = arith.mulf %689, %703 : vector<2x32xf32>
    %705 = arith.addf %700, %704 : vector<2x32xf32>
    %706 = math.tanh %705 : vector<2x32xf32>
    %cst_252 = arith.constant 1.000000e+00 : f32
    %707 = vector.broadcast %cst_252 : f32 to vector<2x32xf32>
    %708 = arith.subf %707, %699 : vector<2x32xf32>
    %709 = arith.mulf %708, %706 : vector<2x32xf32>
    %710 = arith.mulf %699, %676 : vector<2x32xf32>
    %711 = arith.addf %709, %710 : vector<2x32xf32>
    %c24 = arith.constant 24 : index
    %c0_253 = arith.constant 0 : index
    %712 = vector.load %arg27[%c24, %c0_253] : memref<32x32xf32, #tpu.memory_space<vmem>>, vector<2x32xf32>
    tpu.vector_store %arg27[%c24, %c0_253], %711 {strides = array<i32>} : memref<32x32xf32, #tpu.memory_space<vmem>>, vector<2x32xf32>,
    %cst_254 = arith.constant dense<0.000000e+00> : vector<2x96xf32>
    %713 = tpu.matmul %711, %255, %cst_254 {dimension_numbers = #tpu.dot_dimension_numbers<[1], [0], [0], [1], [0, 0, 1, 1], [], []>} : vector<2x32xf32>, vector<32x96xf32>, vector<2x96xf32> -> vector<2x96xf32>
    %714 = vector.extract_strided_slice %254 {offsets = [26, 0], sizes = [2, 96], strides = [1, 1]} : vector<32x96xf32> to vector<2x96xf32>
    %715 = vector.extract_strided_slice %714 {offsets = [0, 0], sizes = [2, 32], strides = [1, 1]} : vector<2x96xf32> to vector<2x32xf32>
    %716 = vector.extract_strided_slice %713 {offsets = [0, 0], sizes = [2, 32], strides = [1, 1]} : vector<2x96xf32> to vector<2x32xf32>
    %717 = arith.addf %715, %716 : vector<2x32xf32>
    %cst_255 = arith.constant 0.000000e+00 : f32
    %718 = vector.broadcast %cst_255 : f32 to vector<2x32xf32>
    %719 = arith.subf %718, %717 : vector<2x32xf32>
    %720 = math.exp %719 : vector<2x32xf32>
    %cst_256 = arith.constant 1.000000e+00 : f32
    %721 = vector.broadcast %cst_256 : f32 to vector<2x32xf32>
    %722 = arith.addf %721, %720 : vector<2x32xf32>
    %cst_257 = arith.constant 1.000000e+00 : f32
    %723 = vector.broadcast %cst_257 : f32 to vector<2x32xf32>
    %724 = arith.divf %723, %722 : vector<2x32xf32>
    %725 = vector.extract_strided_slice %714 {offsets = [0, 32], sizes = [2, 32], strides = [1, 1]} : vector<2x96xf32> to vector<2x32xf32>
    %726 = vector.extract_strided_slice %713 {offsets = [0, 32], sizes = [2, 32], strides = [1, 1]} : vector<2x96xf32> to vector<2x32xf32>
    %727 = arith.addf %725, %726 : vector<2x32xf32>
    %cst_258 = arith.constant 0.000000e+00 : f32
    %728 = vector.broadcast %cst_258 : f32 to vector<2x32xf32>
    %729 = arith.subf %728, %727 : vector<2x32xf32>
    %730 = math.exp %729 : vector<2x32xf32>
    %cst_259 = arith.constant 1.000000e+00 : f32
    %731 = vector.broadcast %cst_259 : f32 to vector<2x32xf32>
    %732 = arith.addf %731, %730 : vector<2x32xf32>
    %cst_260 = arith.constant 1.000000e+00 : f32
    %733 = vector.broadcast %cst_260 : f32 to vector<2x32xf32>
    %734 = arith.divf %733, %732 : vector<2x32xf32>
    %735 = vector.extract_strided_slice %714 {offsets = [0, 64], sizes = [2, 32], strides = [1, 1]} : vector<2x96xf32> to vector<2x32xf32>
    %736 = vector.extract_strided_slice %713 {offsets = [0, 64], sizes = [2, 32], strides = [1, 1]} : vector<2x96xf32> to vector<2x32xf32>
    %737 = vector.broadcast %256 : vector<1x32xf32> to vector<2x32xf32>
    %738 = arith.addf %736, %737 : vector<2x32xf32>
    %739 = arith.mulf %724, %738 : vector<2x32xf32>
    %740 = arith.addf %735, %739 : vector<2x32xf32>
    %741 = math.tanh %740 : vector<2x32xf32>
    %cst_261 = arith.constant 1.000000e+00 : f32
    %742 = vector.broadcast %cst_261 : f32 to vector<2x32xf32>
    %743 = arith.subf %742, %734 : vector<2x32xf32>
    %744 = arith.mulf %743, %741 : vector<2x32xf32>
    %745 = arith.mulf %734, %711 : vector<2x32xf32>
    %746 = arith.addf %744, %745 : vector<2x32xf32>
    %c26 = arith.constant 26 : index
    %c0_262 = arith.constant 0 : index
    %747 = vector.load %arg27[%c26, %c0_262] : memref<32x32xf32, #tpu.memory_space<vmem>>, vector<2x32xf32>
    tpu.vector_store %arg27[%c26, %c0_262], %746 {strides = array<i32>} : memref<32x32xf32, #tpu.memory_space<vmem>>, vector<2x32xf32>,
    %cst_263 = arith.constant dense<0.000000e+00> : vector<2x96xf32>
    %748 = tpu.matmul %746, %255, %cst_263 {dimension_numbers = #tpu.dot_dimension_numbers<[1], [0], [0], [1], [0, 0, 1, 1], [], []>} : vector<2x32xf32>, vector<32x96xf32>, vector<2x96xf32> -> vector<2x96xf32>
    %749 = vector.extract_strided_slice %254 {offsets = [28, 0], sizes = [2, 96], strides = [1, 1]} : vector<32x96xf32> to vector<2x96xf32>
    %750 = vector.extract_strided_slice %749 {offsets = [0, 0], sizes = [2, 32], strides = [1, 1]} : vector<2x96xf32> to vector<2x32xf32>
    %751 = vector.extract_strided_slice %748 {offsets = [0, 0], sizes = [2, 32], strides = [1, 1]} : vector<2x96xf32> to vector<2x32xf32>
    %752 = arith.addf %750, %751 : vector<2x32xf32>
    %cst_264 = arith.constant 0.000000e+00 : f32
    %753 = vector.broadcast %cst_264 : f32 to vector<2x32xf32>
    %754 = arith.subf %753, %752 : vector<2x32xf32>
    %755 = math.exp %754 : vector<2x32xf32>
    %cst_265 = arith.constant 1.000000e+00 : f32
    %756 = vector.broadcast %cst_265 : f32 to vector<2x32xf32>
    %757 = arith.addf %756, %755 : vector<2x32xf32>
    %cst_266 = arith.constant 1.000000e+00 : f32
    %758 = vector.broadcast %cst_266 : f32 to vector<2x32xf32>
    %759 = arith.divf %758, %757 : vector<2x32xf32>
    %760 = vector.extract_strided_slice %749 {offsets = [0, 32], sizes = [2, 32], strides = [1, 1]} : vector<2x96xf32> to vector<2x32xf32>
    %761 = vector.extract_strided_slice %748 {offsets = [0, 32], sizes = [2, 32], strides = [1, 1]} : vector<2x96xf32> to vector<2x32xf32>
    %762 = arith.addf %760, %761 : vector<2x32xf32>
    %cst_267 = arith.constant 0.000000e+00 : f32
    %763 = vector.broadcast %cst_267 : f32 to vector<2x32xf32>
    %764 = arith.subf %763, %762 : vector<2x32xf32>
    %765 = math.exp %764 : vector<2x32xf32>
    %cst_268 = arith.constant 1.000000e+00 : f32
    %766 = vector.broadcast %cst_268 : f32 to vector<2x32xf32>
    %767 = arith.addf %766, %765 : vector<2x32xf32>
    %cst_269 = arith.constant 1.000000e+00 : f32
    %768 = vector.broadcast %cst_269 : f32 to vector<2x32xf32>
    %769 = arith.divf %768, %767 : vector<2x32xf32>
    %770 = vector.extract_strided_slice %749 {offsets = [0, 64], sizes = [2, 32], strides = [1, 1]} : vector<2x96xf32> to vector<2x32xf32>
    %771 = vector.extract_strided_slice %748 {offsets = [0, 64], sizes = [2, 32], strides = [1, 1]} : vector<2x96xf32> to vector<2x32xf32>
    %772 = vector.broadcast %256 : vector<1x32xf32> to vector<2x32xf32>
    %773 = arith.addf %771, %772 : vector<2x32xf32>
    %774 = arith.mulf %759, %773 : vector<2x32xf32>
    %775 = arith.addf %770, %774 : vector<2x32xf32>
    %776 = math.tanh %775 : vector<2x32xf32>
    %cst_270 = arith.constant 1.000000e+00 : f32
    %777 = vector.broadcast %cst_270 : f32 to vector<2x32xf32>
    %778 = arith.subf %777, %769 : vector<2x32xf32>
    %779 = arith.mulf %778, %776 : vector<2x32xf32>
    %780 = arith.mulf %769, %746 : vector<2x32xf32>
    %781 = arith.addf %779, %780 : vector<2x32xf32>
    %c28 = arith.constant 28 : index
    %c0_271 = arith.constant 0 : index
    %782 = vector.load %arg27[%c28, %c0_271] : memref<32x32xf32, #tpu.memory_space<vmem>>, vector<2x32xf32>
    tpu.vector_store %arg27[%c28, %c0_271], %781 {strides = array<i32>} : memref<32x32xf32, #tpu.memory_space<vmem>>, vector<2x32xf32>,
    %cst_272 = arith.constant dense<0.000000e+00> : vector<2x96xf32>
    %783 = tpu.matmul %781, %255, %cst_272 {dimension_numbers = #tpu.dot_dimension_numbers<[1], [0], [0], [1], [0, 0, 1, 1], [], []>} : vector<2x32xf32>, vector<32x96xf32>, vector<2x96xf32> -> vector<2x96xf32>
    %784 = vector.extract_strided_slice %254 {offsets = [30, 0], sizes = [2, 96], strides = [1, 1]} : vector<32x96xf32> to vector<2x96xf32>
    %785 = vector.extract_strided_slice %784 {offsets = [0, 0], sizes = [2, 32], strides = [1, 1]} : vector<2x96xf32> to vector<2x32xf32>
    %786 = vector.extract_strided_slice %783 {offsets = [0, 0], sizes = [2, 32], strides = [1, 1]} : vector<2x96xf32> to vector<2x32xf32>
    %787 = arith.addf %785, %786 : vector<2x32xf32>
    %cst_273 = arith.constant 0.000000e+00 : f32
    %788 = vector.broadcast %cst_273 : f32 to vector<2x32xf32>
    %789 = arith.subf %788, %787 : vector<2x32xf32>
    %790 = math.exp %789 : vector<2x32xf32>
    %cst_274 = arith.constant 1.000000e+00 : f32
    %791 = vector.broadcast %cst_274 : f32 to vector<2x32xf32>
    %792 = arith.addf %791, %790 : vector<2x32xf32>
    %cst_275 = arith.constant 1.000000e+00 : f32
    %793 = vector.broadcast %cst_275 : f32 to vector<2x32xf32>
    %794 = arith.divf %793, %792 : vector<2x32xf32>
    %795 = vector.extract_strided_slice %784 {offsets = [0, 32], sizes = [2, 32], strides = [1, 1]} : vector<2x96xf32> to vector<2x32xf32>
    %796 = vector.extract_strided_slice %783 {offsets = [0, 32], sizes = [2, 32], strides = [1, 1]} : vector<2x96xf32> to vector<2x32xf32>
    %797 = arith.addf %795, %796 : vector<2x32xf32>
    %cst_276 = arith.constant 0.000000e+00 : f32
    %798 = vector.broadcast %cst_276 : f32 to vector<2x32xf32>
    %799 = arith.subf %798, %797 : vector<2x32xf32>
    %800 = math.exp %799 : vector<2x32xf32>
    %cst_277 = arith.constant 1.000000e+00 : f32
    %801 = vector.broadcast %cst_277 : f32 to vector<2x32xf32>
    %802 = arith.addf %801, %800 : vector<2x32xf32>
    %cst_278 = arith.constant 1.000000e+00 : f32
    %803 = vector.broadcast %cst_278 : f32 to vector<2x32xf32>
    %804 = arith.divf %803, %802 : vector<2x32xf32>
    %805 = vector.extract_strided_slice %784 {offsets = [0, 64], sizes = [2, 32], strides = [1, 1]} : vector<2x96xf32> to vector<2x32xf32>
    %806 = vector.extract_strided_slice %783 {offsets = [0, 64], sizes = [2, 32], strides = [1, 1]} : vector<2x96xf32> to vector<2x32xf32>
    %807 = vector.broadcast %256 : vector<1x32xf32> to vector<2x32xf32>
    %808 = arith.addf %806, %807 : vector<2x32xf32>
    %809 = arith.mulf %794, %808 : vector<2x32xf32>
    %810 = arith.addf %805, %809 : vector<2x32xf32>
    %811 = math.tanh %810 : vector<2x32xf32>
    %cst_279 = arith.constant 1.000000e+00 : f32
    %812 = vector.broadcast %cst_279 : f32 to vector<2x32xf32>
    %813 = arith.subf %812, %804 : vector<2x32xf32>
    %814 = arith.mulf %813, %811 : vector<2x32xf32>
    %815 = arith.mulf %804, %781 : vector<2x32xf32>
    %816 = arith.addf %814, %815 : vector<2x32xf32>
    %c30 = arith.constant 30 : index
    %c0_280 = arith.constant 0 : index
    %817 = vector.load %arg27[%c30, %c0_280] : memref<32x32xf32, #tpu.memory_space<vmem>>, vector<2x32xf32>
    tpu.vector_store %arg27[%c30, %c0_280], %816 {strides = array<i32>} : memref<32x32xf32, #tpu.memory_space<vmem>>, vector<2x32xf32>,
    %c0_281 = arith.constant 0 : index
    %c0_282 = arith.constant 0 : index
    %818 = vector.load %arg27[%c0_281, %c0_282] : memref<32x32xf32, #tpu.memory_space<vmem>>, vector<32x32xf32>
    %c0_283 = arith.constant 0 : index
    %c0_284 = arith.constant 0 : index
    %819 = vector.load %arg20[%c0_283, %c0_284] : memref<32x96xf32, #tpu.memory_space<vmem>>, vector<32x96xf32>
    %cst_285 = arith.constant dense<0.000000e+00> : vector<32x96xf32>
    %820 = tpu.matmul %818, %819, %cst_285 {dimension_numbers = #tpu.dot_dimension_numbers<[1], [0], [0], [1], [0, 0, 1, 1], [], []>} : vector<32x32xf32>, vector<32x96xf32>, vector<32x96xf32> -> vector<32x96xf32>
    %c0_286 = arith.constant 0 : index
    %c0_287 = arith.constant 0 : index
    %821 = vector.load %arg21[%c0_286, %c0_287] : memref<1x96xf32, #tpu.memory_space<vmem>>, vector<1x96xf32>
    %822 = vector.broadcast %821 : vector<1x96xf32> to vector<32x96xf32>
    %823 = arith.addf %820, %822 : vector<32x96xf32>
    %c0_288 = arith.constant 0 : index
    %c0_289 = arith.constant 0 : index
    %824 = vector.load %arg22[%c0_288, %c0_289] : memref<32x96xf32, #tpu.memory_space<vmem>>, vector<32x96xf32>
    %c0_290 = arith.constant 0 : index
    %c0_291 = arith.constant 0 : index
    %825 = vector.load %arg23[%c0_290, %c0_291] : memref<1x32xf32, #tpu.memory_space<vmem>>, vector<1x32xf32>
    %cst_292 = arith.constant 0.000000e+00 : f32
    %826 = vector.broadcast %cst_292 : f32 to vector<2x32xf32>
    %cst_293 = arith.constant dense<0.000000e+00> : vector<2x96xf32>
    %827 = tpu.matmul %826, %824, %cst_293 {dimension_numbers = #tpu.dot_dimension_numbers<[1], [0], [0], [1], [0, 0, 1, 1], [], []>} : vector<2x32xf32>, vector<32x96xf32>, vector<2x96xf32> -> vector<2x96xf32>
    %828 = vector.extract_strided_slice %823 {offsets = [0, 0], sizes = [2, 96], strides = [1, 1]} : vector<32x96xf32> to vector<2x96xf32>
    %829 = vector.extract_strided_slice %828 {offsets = [0, 0], sizes = [2, 32], strides = [1, 1]} : vector<2x96xf32> to vector<2x32xf32>
    %830 = vector.extract_strided_slice %827 {offsets = [0, 0], sizes = [2, 32], strides = [1, 1]} : vector<2x96xf32> to vector<2x32xf32>
    %831 = arith.addf %829, %830 : vector<2x32xf32>
    %cst_294 = arith.constant 0.000000e+00 : f32
    %832 = vector.broadcast %cst_294 : f32 to vector<2x32xf32>
    %833 = arith.subf %832, %831 : vector<2x32xf32>
    %834 = math.exp %833 : vector<2x32xf32>
    %cst_295 = arith.constant 1.000000e+00 : f32
    %835 = vector.broadcast %cst_295 : f32 to vector<2x32xf32>
    %836 = arith.addf %835, %834 : vector<2x32xf32>
    %cst_296 = arith.constant 1.000000e+00 : f32
    %837 = vector.broadcast %cst_296 : f32 to vector<2x32xf32>
    %838 = arith.divf %837, %836 : vector<2x32xf32>
    %839 = vector.extract_strided_slice %828 {offsets = [0, 32], sizes = [2, 32], strides = [1, 1]} : vector<2x96xf32> to vector<2x32xf32>
    %840 = vector.extract_strided_slice %827 {offsets = [0, 32], sizes = [2, 32], strides = [1, 1]} : vector<2x96xf32> to vector<2x32xf32>
    %841 = arith.addf %839, %840 : vector<2x32xf32>
    %cst_297 = arith.constant 0.000000e+00 : f32
    %842 = vector.broadcast %cst_297 : f32 to vector<2x32xf32>
    %843 = arith.subf %842, %841 : vector<2x32xf32>
    %844 = math.exp %843 : vector<2x32xf32>
    %cst_298 = arith.constant 1.000000e+00 : f32
    %845 = vector.broadcast %cst_298 : f32 to vector<2x32xf32>
    %846 = arith.addf %845, %844 : vector<2x32xf32>
    %cst_299 = arith.constant 1.000000e+00 : f32
    %847 = vector.broadcast %cst_299 : f32 to vector<2x32xf32>
    %848 = arith.divf %847, %846 : vector<2x32xf32>
    %849 = vector.extract_strided_slice %828 {offsets = [0, 64], sizes = [2, 32], strides = [1, 1]} : vector<2x96xf32> to vector<2x32xf32>
    %850 = vector.extract_strided_slice %827 {offsets = [0, 64], sizes = [2, 32], strides = [1, 1]} : vector<2x96xf32> to vector<2x32xf32>
    %851 = vector.broadcast %825 : vector<1x32xf32> to vector<2x32xf32>
    %852 = arith.addf %850, %851 : vector<2x32xf32>
    %853 = arith.mulf %838, %852 : vector<2x32xf32>
    %854 = arith.addf %849, %853 : vector<2x32xf32>
    %855 = math.tanh %854 : vector<2x32xf32>
    %cst_300 = arith.constant 1.000000e+00 : f32
    %856 = vector.broadcast %cst_300 : f32 to vector<2x32xf32>
    %857 = arith.subf %856, %848 : vector<2x32xf32>
    %858 = arith.mulf %857, %855 : vector<2x32xf32>
    %859 = arith.mulf %848, %826 : vector<2x32xf32>
    %860 = arith.addf %858, %859 : vector<2x32xf32>
    %c0_301 = arith.constant 0 : index
    %c0_302 = arith.constant 0 : index
    %861 = vector.load %arg28[%c0_301, %c0_302] : memref<32x32xf32, #tpu.memory_space<vmem>>, vector<2x32xf32>
    tpu.vector_store %arg28[%c0_301, %c0_302], %860 {strides = array<i32>} : memref<32x32xf32, #tpu.memory_space<vmem>>, vector<2x32xf32>,
    %cst_303 = arith.constant dense<0.000000e+00> : vector<2x96xf32>
    %862 = tpu.matmul %860, %824, %cst_303 {dimension_numbers = #tpu.dot_dimension_numbers<[1], [0], [0], [1], [0, 0, 1, 1], [], []>} : vector<2x32xf32>, vector<32x96xf32>, vector<2x96xf32> -> vector<2x96xf32>
    %863 = vector.extract_strided_slice %823 {offsets = [2, 0], sizes = [2, 96], strides = [1, 1]} : vector<32x96xf32> to vector<2x96xf32>
    %864 = vector.extract_strided_slice %863 {offsets = [0, 0], sizes = [2, 32], strides = [1, 1]} : vector<2x96xf32> to vector<2x32xf32>
    %865 = vector.extract_strided_slice %862 {offsets = [0, 0], sizes = [2, 32], strides = [1, 1]} : vector<2x96xf32> to vector<2x32xf32>
    %866 = arith.addf %864, %865 : vector<2x32xf32>
    %cst_304 = arith.constant 0.000000e+00 : f32
    %867 = vector.broadcast %cst_304 : f32 to vector<2x32xf32>
    %868 = arith.subf %867, %866 : vector<2x32xf32>
    %869 = math.exp %868 : vector<2x32xf32>
    %cst_305 = arith.constant 1.000000e+00 : f32
    %870 = vector.broadcast %cst_305 : f32 to vector<2x32xf32>
    %871 = arith.addf %870, %869 : vector<2x32xf32>
    %cst_306 = arith.constant 1.000000e+00 : f32
    %872 = vector.broadcast %cst_306 : f32 to vector<2x32xf32>
    %873 = arith.divf %872, %871 : vector<2x32xf32>
    %874 = vector.extract_strided_slice %863 {offsets = [0, 32], sizes = [2, 32], strides = [1, 1]} : vector<2x96xf32> to vector<2x32xf32>
    %875 = vector.extract_strided_slice %862 {offsets = [0, 32], sizes = [2, 32], strides = [1, 1]} : vector<2x96xf32> to vector<2x32xf32>
    %876 = arith.addf %874, %875 : vector<2x32xf32>
    %cst_307 = arith.constant 0.000000e+00 : f32
    %877 = vector.broadcast %cst_307 : f32 to vector<2x32xf32>
    %878 = arith.subf %877, %876 : vector<2x32xf32>
    %879 = math.exp %878 : vector<2x32xf32>
    %cst_308 = arith.constant 1.000000e+00 : f32
    %880 = vector.broadcast %cst_308 : f32 to vector<2x32xf32>
    %881 = arith.addf %880, %879 : vector<2x32xf32>
    %cst_309 = arith.constant 1.000000e+00 : f32
    %882 = vector.broadcast %cst_309 : f32 to vector<2x32xf32>
    %883 = arith.divf %882, %881 : vector<2x32xf32>
    %884 = vector.extract_strided_slice %863 {offsets = [0, 64], sizes = [2, 32], strides = [1, 1]} : vector<2x96xf32> to vector<2x32xf32>
    %885 = vector.extract_strided_slice %862 {offsets = [0, 64], sizes = [2, 32], strides = [1, 1]} : vector<2x96xf32> to vector<2x32xf32>
    %886 = vector.broadcast %825 : vector<1x32xf32> to vector<2x32xf32>
    %887 = arith.addf %885, %886 : vector<2x32xf32>
    %888 = arith.mulf %873, %887 : vector<2x32xf32>
    %889 = arith.addf %884, %888 : vector<2x32xf32>
    %890 = math.tanh %889 : vector<2x32xf32>
    %cst_310 = arith.constant 1.000000e+00 : f32
    %891 = vector.broadcast %cst_310 : f32 to vector<2x32xf32>
    %892 = arith.subf %891, %883 : vector<2x32xf32>
    %893 = arith.mulf %892, %890 : vector<2x32xf32>
    %894 = arith.mulf %883, %860 : vector<2x32xf32>
    %895 = arith.addf %893, %894 : vector<2x32xf32>
    %c2_311 = arith.constant 2 : index
    %c0_312 = arith.constant 0 : index
    %896 = vector.load %arg28[%c2_311, %c0_312] : memref<32x32xf32, #tpu.memory_space<vmem>>, vector<2x32xf32>
    tpu.vector_store %arg28[%c2_311, %c0_312], %895 {strides = array<i32>} : memref<32x32xf32, #tpu.memory_space<vmem>>, vector<2x32xf32>,
    %cst_313 = arith.constant dense<0.000000e+00> : vector<2x96xf32>
    %897 = tpu.matmul %895, %824, %cst_313 {dimension_numbers = #tpu.dot_dimension_numbers<[1], [0], [0], [1], [0, 0, 1, 1], [], []>} : vector<2x32xf32>, vector<32x96xf32>, vector<2x96xf32> -> vector<2x96xf32>
    %898 = vector.extract_strided_slice %823 {offsets = [4, 0], sizes = [2, 96], strides = [1, 1]} : vector<32x96xf32> to vector<2x96xf32>
    %899 = vector.extract_strided_slice %898 {offsets = [0, 0], sizes = [2, 32], strides = [1, 1]} : vector<2x96xf32> to vector<2x32xf32>
    %900 = vector.extract_strided_slice %897 {offsets = [0, 0], sizes = [2, 32], strides = [1, 1]} : vector<2x96xf32> to vector<2x32xf32>
    %901 = arith.addf %899, %900 : vector<2x32xf32>
    %cst_314 = arith.constant 0.000000e+00 : f32
    %902 = vector.broadcast %cst_314 : f32 to vector<2x32xf32>
    %903 = arith.subf %902, %901 : vector<2x32xf32>
    %904 = math.exp %903 : vector<2x32xf32>
    %cst_315 = arith.constant 1.000000e+00 : f32
    %905 = vector.broadcast %cst_315 : f32 to vector<2x32xf32>
    %906 = arith.addf %905, %904 : vector<2x32xf32>
    %cst_316 = arith.constant 1.000000e+00 : f32
    %907 = vector.broadcast %cst_316 : f32 to vector<2x32xf32>
    %908 = arith.divf %907, %906 : vector<2x32xf32>
    %909 = vector.extract_strided_slice %898 {offsets = [0, 32], sizes = [2, 32], strides = [1, 1]} : vector<2x96xf32> to vector<2x32xf32>
    %910 = vector.extract_strided_slice %897 {offsets = [0, 32], sizes = [2, 32], strides = [1, 1]} : vector<2x96xf32> to vector<2x32xf32>
    %911 = arith.addf %909, %910 : vector<2x32xf32>
    %cst_317 = arith.constant 0.000000e+00 : f32
    %912 = vector.broadcast %cst_317 : f32 to vector<2x32xf32>
    %913 = arith.subf %912, %911 : vector<2x32xf32>
    %914 = math.exp %913 : vector<2x32xf32>
    %cst_318 = arith.constant 1.000000e+00 : f32
    %915 = vector.broadcast %cst_318 : f32 to vector<2x32xf32>
    %916 = arith.addf %915, %914 : vector<2x32xf32>
    %cst_319 = arith.constant 1.000000e+00 : f32
    %917 = vector.broadcast %cst_319 : f32 to vector<2x32xf32>
    %918 = arith.divf %917, %916 : vector<2x32xf32>
    %919 = vector.extract_strided_slice %898 {offsets = [0, 64], sizes = [2, 32], strides = [1, 1]} : vector<2x96xf32> to vector<2x32xf32>
    %920 = vector.extract_strided_slice %897 {offsets = [0, 64], sizes = [2, 32], strides = [1, 1]} : vector<2x96xf32> to vector<2x32xf32>
    %921 = vector.broadcast %825 : vector<1x32xf32> to vector<2x32xf32>
    %922 = arith.addf %920, %921 : vector<2x32xf32>
    %923 = arith.mulf %908, %922 : vector<2x32xf32>
    %924 = arith.addf %919, %923 : vector<2x32xf32>
    %925 = math.tanh %924 : vector<2x32xf32>
    %cst_320 = arith.constant 1.000000e+00 : f32
    %926 = vector.broadcast %cst_320 : f32 to vector<2x32xf32>
    %927 = arith.subf %926, %918 : vector<2x32xf32>
    %928 = arith.mulf %927, %925 : vector<2x32xf32>
    %929 = arith.mulf %918, %895 : vector<2x32xf32>
    %930 = arith.addf %928, %929 : vector<2x32xf32>
    %c4_321 = arith.constant 4 : index
    %c0_322 = arith.constant 0 : index
    %931 = vector.load %arg28[%c4_321, %c0_322] : memref<32x32xf32, #tpu.memory_space<vmem>>, vector<2x32xf32>
    tpu.vector_store %arg28[%c4_321, %c0_322], %930 {strides = array<i32>} : memref<32x32xf32, #tpu.memory_space<vmem>>, vector<2x32xf32>,
    %cst_323 = arith.constant dense<0.000000e+00> : vector<2x96xf32>
    %932 = tpu.matmul %930, %824, %cst_323 {dimension_numbers = #tpu.dot_dimension_numbers<[1], [0], [0], [1], [0, 0, 1, 1], [], []>} : vector<2x32xf32>, vector<32x96xf32>, vector<2x96xf32> -> vector<2x96xf32>
    %933 = vector.extract_strided_slice %823 {offsets = [6, 0], sizes = [2, 96], strides = [1, 1]} : vector<32x96xf32> to vector<2x96xf32>
    %934 = vector.extract_strided_slice %933 {offsets = [0, 0], sizes = [2, 32], strides = [1, 1]} : vector<2x96xf32> to vector<2x32xf32>
    %935 = vector.extract_strided_slice %932 {offsets = [0, 0], sizes = [2, 32], strides = [1, 1]} : vector<2x96xf32> to vector<2x32xf32>
    %936 = arith.addf %934, %935 : vector<2x32xf32>
    %cst_324 = arith.constant 0.000000e+00 : f32
    %937 = vector.broadcast %cst_324 : f32 to vector<2x32xf32>
    %938 = arith.subf %937, %936 : vector<2x32xf32>
    %939 = math.exp %938 : vector<2x32xf32>
    %cst_325 = arith.constant 1.000000e+00 : f32
    %940 = vector.broadcast %cst_325 : f32 to vector<2x32xf32>
    %941 = arith.addf %940, %939 : vector<2x32xf32>
    %cst_326 = arith.constant 1.000000e+00 : f32
    %942 = vector.broadcast %cst_326 : f32 to vector<2x32xf32>
    %943 = arith.divf %942, %941 : vector<2x32xf32>
    %944 = vector.extract_strided_slice %933 {offsets = [0, 32], sizes = [2, 32], strides = [1, 1]} : vector<2x96xf32> to vector<2x32xf32>
    %945 = vector.extract_strided_slice %932 {offsets = [0, 32], sizes = [2, 32], strides = [1, 1]} : vector<2x96xf32> to vector<2x32xf32>
    %946 = arith.addf %944, %945 : vector<2x32xf32>
    %cst_327 = arith.constant 0.000000e+00 : f32
    %947 = vector.broadcast %cst_327 : f32 to vector<2x32xf32>
    %948 = arith.subf %947, %946 : vector<2x32xf32>
    %949 = math.exp %948 : vector<2x32xf32>
    %cst_328 = arith.constant 1.000000e+00 : f32
    %950 = vector.broadcast %cst_328 : f32 to vector<2x32xf32>
    %951 = arith.addf %950, %949 : vector<2x32xf32>
    %cst_329 = arith.constant 1.000000e+00 : f32
    %952 = vector.broadcast %cst_329 : f32 to vector<2x32xf32>
    %953 = arith.divf %952, %951 : vector<2x32xf32>
    %954 = vector.extract_strided_slice %933 {offsets = [0, 64], sizes = [2, 32], strides = [1, 1]} : vector<2x96xf32> to vector<2x32xf32>
    %955 = vector.extract_strided_slice %932 {offsets = [0, 64], sizes = [2, 32], strides = [1, 1]} : vector<2x96xf32> to vector<2x32xf32>
    %956 = vector.broadcast %825 : vector<1x32xf32> to vector<2x32xf32>
    %957 = arith.addf %955, %956 : vector<2x32xf32>
    %958 = arith.mulf %943, %957 : vector<2x32xf32>
    %959 = arith.addf %954, %958 : vector<2x32xf32>
    %960 = math.tanh %959 : vector<2x32xf32>
    %cst_330 = arith.constant 1.000000e+00 : f32
    %961 = vector.broadcast %cst_330 : f32 to vector<2x32xf32>
    %962 = arith.subf %961, %953 : vector<2x32xf32>
    %963 = arith.mulf %962, %960 : vector<2x32xf32>
    %964 = arith.mulf %953, %930 : vector<2x32xf32>
    %965 = arith.addf %963, %964 : vector<2x32xf32>
    %c6_331 = arith.constant 6 : index
    %c0_332 = arith.constant 0 : index
    %966 = vector.load %arg28[%c6_331, %c0_332] : memref<32x32xf32, #tpu.memory_space<vmem>>, vector<2x32xf32>
    tpu.vector_store %arg28[%c6_331, %c0_332], %965 {strides = array<i32>} : memref<32x32xf32, #tpu.memory_space<vmem>>, vector<2x32xf32>,
    %cst_333 = arith.constant dense<0.000000e+00> : vector<2x96xf32>
    %967 = tpu.matmul %965, %824, %cst_333 {dimension_numbers = #tpu.dot_dimension_numbers<[1], [0], [0], [1], [0, 0, 1, 1], [], []>} : vector<2x32xf32>, vector<32x96xf32>, vector<2x96xf32> -> vector<2x96xf32>
    %968 = vector.extract_strided_slice %823 {offsets = [8, 0], sizes = [2, 96], strides = [1, 1]} : vector<32x96xf32> to vector<2x96xf32>
    %969 = vector.extract_strided_slice %968 {offsets = [0, 0], sizes = [2, 32], strides = [1, 1]} : vector<2x96xf32> to vector<2x32xf32>
    %970 = vector.extract_strided_slice %967 {offsets = [0, 0], sizes = [2, 32], strides = [1, 1]} : vector<2x96xf32> to vector<2x32xf32>
    %971 = arith.addf %969, %970 : vector<2x32xf32>
    %cst_334 = arith.constant 0.000000e+00 : f32
    %972 = vector.broadcast %cst_334 : f32 to vector<2x32xf32>
    %973 = arith.subf %972, %971 : vector<2x32xf32>
    %974 = math.exp %973 : vector<2x32xf32>
    %cst_335 = arith.constant 1.000000e+00 : f32
    %975 = vector.broadcast %cst_335 : f32 to vector<2x32xf32>
    %976 = arith.addf %975, %974 : vector<2x32xf32>
    %cst_336 = arith.constant 1.000000e+00 : f32
    %977 = vector.broadcast %cst_336 : f32 to vector<2x32xf32>
    %978 = arith.divf %977, %976 : vector<2x32xf32>
    %979 = vector.extract_strided_slice %968 {offsets = [0, 32], sizes = [2, 32], strides = [1, 1]} : vector<2x96xf32> to vector<2x32xf32>
    %980 = vector.extract_strided_slice %967 {offsets = [0, 32], sizes = [2, 32], strides = [1, 1]} : vector<2x96xf32> to vector<2x32xf32>
    %981 = arith.addf %979, %980 : vector<2x32xf32>
    %cst_337 = arith.constant 0.000000e+00 : f32
    %982 = vector.broadcast %cst_337 : f32 to vector<2x32xf32>
    %983 = arith.subf %982, %981 : vector<2x32xf32>
    %984 = math.exp %983 : vector<2x32xf32>
    %cst_338 = arith.constant 1.000000e+00 : f32
    %985 = vector.broadcast %cst_338 : f32 to vector<2x32xf32>
    %986 = arith.addf %985, %984 : vector<2x32xf32>
    %cst_339 = arith.constant 1.000000e+00 : f32
    %987 = vector.broadcast %cst_339 : f32 to vector<2x32xf32>
    %988 = arith.divf %987, %986 : vector<2x32xf32>
    %989 = vector.extract_strided_slice %968 {offsets = [0, 64], sizes = [2, 32], strides = [1, 1]} : vector<2x96xf32> to vector<2x32xf32>
    %990 = vector.extract_strided_slice %967 {offsets = [0, 64], sizes = [2, 32], strides = [1, 1]} : vector<2x96xf32> to vector<2x32xf32>
    %991 = vector.broadcast %825 : vector<1x32xf32> to vector<2x32xf32>
    %992 = arith.addf %990, %991 : vector<2x32xf32>
    %993 = arith.mulf %978, %992 : vector<2x32xf32>
    %994 = arith.addf %989, %993 : vector<2x32xf32>
    %995 = math.tanh %994 : vector<2x32xf32>
    %cst_340 = arith.constant 1.000000e+00 : f32
    %996 = vector.broadcast %cst_340 : f32 to vector<2x32xf32>
    %997 = arith.subf %996, %988 : vector<2x32xf32>
    %998 = arith.mulf %997, %995 : vector<2x32xf32>
    %999 = arith.mulf %988, %965 : vector<2x32xf32>
    %1000 = arith.addf %998, %999 : vector<2x32xf32>
    %c8_341 = arith.constant 8 : index
    %c0_342 = arith.constant 0 : index
    %1001 = vector.load %arg28[%c8_341, %c0_342] : memref<32x32xf32, #tpu.memory_space<vmem>>, vector<2x32xf32>
    tpu.vector_store %arg28[%c8_341, %c0_342], %1000 {strides = array<i32>} : memref<32x32xf32, #tpu.memory_space<vmem>>, vector<2x32xf32>,
    %cst_343 = arith.constant dense<0.000000e+00> : vector<2x96xf32>
    %1002 = tpu.matmul %1000, %824, %cst_343 {dimension_numbers = #tpu.dot_dimension_numbers<[1], [0], [0], [1], [0, 0, 1, 1], [], []>} : vector<2x32xf32>, vector<32x96xf32>, vector<2x96xf32> -> vector<2x96xf32>
    %1003 = vector.extract_strided_slice %823 {offsets = [10, 0], sizes = [2, 96], strides = [1, 1]} : vector<32x96xf32> to vector<2x96xf32>
    %1004 = vector.extract_strided_slice %1003 {offsets = [0, 0], sizes = [2, 32], strides = [1, 1]} : vector<2x96xf32> to vector<2x32xf32>
    %1005 = vector.extract_strided_slice %1002 {offsets = [0, 0], sizes = [2, 32], strides = [1, 1]} : vector<2x96xf32> to vector<2x32xf32>
    %1006 = arith.addf %1004, %1005 : vector<2x32xf32>
    %cst_344 = arith.constant 0.000000e+00 : f32
    %1007 = vector.broadcast %cst_344 : f32 to vector<2x32xf32>
    %1008 = arith.subf %1007, %1006 : vector<2x32xf32>
    %1009 = math.exp %1008 : vector<2x32xf32>
    %cst_345 = arith.constant 1.000000e+00 : f32
    %1010 = vector.broadcast %cst_345 : f32 to vector<2x32xf32>
    %1011 = arith.addf %1010, %1009 : vector<2x32xf32>
    %cst_346 = arith.constant 1.000000e+00 : f32
    %1012 = vector.broadcast %cst_346 : f32 to vector<2x32xf32>
    %1013 = arith.divf %1012, %1011 : vector<2x32xf32>
    %1014 = vector.extract_strided_slice %1003 {offsets = [0, 32], sizes = [2, 32], strides = [1, 1]} : vector<2x96xf32> to vector<2x32xf32>
    %1015 = vector.extract_strided_slice %1002 {offsets = [0, 32], sizes = [2, 32], strides = [1, 1]} : vector<2x96xf32> to vector<2x32xf32>
    %1016 = arith.addf %1014, %1015 : vector<2x32xf32>
    %cst_347 = arith.constant 0.000000e+00 : f32
    %1017 = vector.broadcast %cst_347 : f32 to vector<2x32xf32>
    %1018 = arith.subf %1017, %1016 : vector<2x32xf32>
    %1019 = math.exp %1018 : vector<2x32xf32>
    %cst_348 = arith.constant 1.000000e+00 : f32
    %1020 = vector.broadcast %cst_348 : f32 to vector<2x32xf32>
    %1021 = arith.addf %1020, %1019 : vector<2x32xf32>
    %cst_349 = arith.constant 1.000000e+00 : f32
    %1022 = vector.broadcast %cst_349 : f32 to vector<2x32xf32>
    %1023 = arith.divf %1022, %1021 : vector<2x32xf32>
    %1024 = vector.extract_strided_slice %1003 {offsets = [0, 64], sizes = [2, 32], strides = [1, 1]} : vector<2x96xf32> to vector<2x32xf32>
    %1025 = vector.extract_strided_slice %1002 {offsets = [0, 64], sizes = [2, 32], strides = [1, 1]} : vector<2x96xf32> to vector<2x32xf32>
    %1026 = vector.broadcast %825 : vector<1x32xf32> to vector<2x32xf32>
    %1027 = arith.addf %1025, %1026 : vector<2x32xf32>
    %1028 = arith.mulf %1013, %1027 : vector<2x32xf32>
    %1029 = arith.addf %1024, %1028 : vector<2x32xf32>
    %1030 = math.tanh %1029 : vector<2x32xf32>
    %cst_350 = arith.constant 1.000000e+00 : f32
    %1031 = vector.broadcast %cst_350 : f32 to vector<2x32xf32>
    %1032 = arith.subf %1031, %1023 : vector<2x32xf32>
    %1033 = arith.mulf %1032, %1030 : vector<2x32xf32>
    %1034 = arith.mulf %1023, %1000 : vector<2x32xf32>
    %1035 = arith.addf %1033, %1034 : vector<2x32xf32>
    %c10_351 = arith.constant 10 : index
    %c0_352 = arith.constant 0 : index
    %1036 = vector.load %arg28[%c10_351, %c0_352] : memref<32x32xf32, #tpu.memory_space<vmem>>, vector<2x32xf32>
    tpu.vector_store %arg28[%c10_351, %c0_352], %1035 {strides = array<i32>} : memref<32x32xf32, #tpu.memory_space<vmem>>, vector<2x32xf32>,
    %cst_353 = arith.constant dense<0.000000e+00> : vector<2x96xf32>
    %1037 = tpu.matmul %1035, %824, %cst_353 {dimension_numbers = #tpu.dot_dimension_numbers<[1], [0], [0], [1], [0, 0, 1, 1], [], []>} : vector<2x32xf32>, vector<32x96xf32>, vector<2x96xf32> -> vector<2x96xf32>
    %1038 = vector.extract_strided_slice %823 {offsets = [12, 0], sizes = [2, 96], strides = [1, 1]} : vector<32x96xf32> to vector<2x96xf32>
    %1039 = vector.extract_strided_slice %1038 {offsets = [0, 0], sizes = [2, 32], strides = [1, 1]} : vector<2x96xf32> to vector<2x32xf32>
    %1040 = vector.extract_strided_slice %1037 {offsets = [0, 0], sizes = [2, 32], strides = [1, 1]} : vector<2x96xf32> to vector<2x32xf32>
    %1041 = arith.addf %1039, %1040 : vector<2x32xf32>
    %cst_354 = arith.constant 0.000000e+00 : f32
    %1042 = vector.broadcast %cst_354 : f32 to vector<2x32xf32>
    %1043 = arith.subf %1042, %1041 : vector<2x32xf32>
    %1044 = math.exp %1043 : vector<2x32xf32>
    %cst_355 = arith.constant 1.000000e+00 : f32
    %1045 = vector.broadcast %cst_355 : f32 to vector<2x32xf32>
    %1046 = arith.addf %1045, %1044 : vector<2x32xf32>
    %cst_356 = arith.constant 1.000000e+00 : f32
    %1047 = vector.broadcast %cst_356 : f32 to vector<2x32xf32>
    %1048 = arith.divf %1047, %1046 : vector<2x32xf32>
    %1049 = vector.extract_strided_slice %1038 {offsets = [0, 32], sizes = [2, 32], strides = [1, 1]} : vector<2x96xf32> to vector<2x32xf32>
    %1050 = vector.extract_strided_slice %1037 {offsets = [0, 32], sizes = [2, 32], strides = [1, 1]} : vector<2x96xf32> to vector<2x32xf32>
    %1051 = arith.addf %1049, %1050 : vector<2x32xf32>
    %cst_357 = arith.constant 0.000000e+00 : f32
    %1052 = vector.broadcast %cst_357 : f32 to vector<2x32xf32>
    %1053 = arith.subf %1052, %1051 : vector<2x32xf32>
    %1054 = math.exp %1053 : vector<2x32xf32>
    %cst_358 = arith.constant 1.000000e+00 : f32
    %1055 = vector.broadcast %cst_358 : f32 to vector<2x32xf32>
    %1056 = arith.addf %1055, %1054 : vector<2x32xf32>
    %cst_359 = arith.constant 1.000000e+00 : f32
    %1057 = vector.broadcast %cst_359 : f32 to vector<2x32xf32>
    %1058 = arith.divf %1057, %1056 : vector<2x32xf32>
    %1059 = vector.extract_strided_slice %1038 {offsets = [0, 64], sizes = [2, 32], strides = [1, 1]} : vector<2x96xf32> to vector<2x32xf32>
    %1060 = vector.extract_strided_slice %1037 {offsets = [0, 64], sizes = [2, 32], strides = [1, 1]} : vector<2x96xf32> to vector<2x32xf32>
    %1061 = vector.broadcast %825 : vector<1x32xf32> to vector<2x32xf32>
    %1062 = arith.addf %1060, %1061 : vector<2x32xf32>
    %1063 = arith.mulf %1048, %1062 : vector<2x32xf32>
    %1064 = arith.addf %1059, %1063 : vector<2x32xf32>
    %1065 = math.tanh %1064 : vector<2x32xf32>
    %cst_360 = arith.constant 1.000000e+00 : f32
    %1066 = vector.broadcast %cst_360 : f32 to vector<2x32xf32>
    %1067 = arith.subf %1066, %1058 : vector<2x32xf32>
    %1068 = arith.mulf %1067, %1065 : vector<2x32xf32>
    %1069 = arith.mulf %1058, %1035 : vector<2x32xf32>
    %1070 = arith.addf %1068, %1069 : vector<2x32xf32>
    %c12_361 = arith.constant 12 : index
    %c0_362 = arith.constant 0 : index
    %1071 = vector.load %arg28[%c12_361, %c0_362] : memref<32x32xf32, #tpu.memory_space<vmem>>, vector<2x32xf32>
    tpu.vector_store %arg28[%c12_361, %c0_362], %1070 {strides = array<i32>} : memref<32x32xf32, #tpu.memory_space<vmem>>, vector<2x32xf32>,
    %cst_363 = arith.constant dense<0.000000e+00> : vector<2x96xf32>
    %1072 = tpu.matmul %1070, %824, %cst_363 {dimension_numbers = #tpu.dot_dimension_numbers<[1], [0], [0], [1], [0, 0, 1, 1], [], []>} : vector<2x32xf32>, vector<32x96xf32>, vector<2x96xf32> -> vector<2x96xf32>
    %1073 = vector.extract_strided_slice %823 {offsets = [14, 0], sizes = [2, 96], strides = [1, 1]} : vector<32x96xf32> to vector<2x96xf32>
    %1074 = vector.extract_strided_slice %1073 {offsets = [0, 0], sizes = [2, 32], strides = [1, 1]} : vector<2x96xf32> to vector<2x32xf32>
    %1075 = vector.extract_strided_slice %1072 {offsets = [0, 0], sizes = [2, 32], strides = [1, 1]} : vector<2x96xf32> to vector<2x32xf32>
    %1076 = arith.addf %1074, %1075 : vector<2x32xf32>
    %cst_364 = arith.constant 0.000000e+00 : f32
    %1077 = vector.broadcast %cst_364 : f32 to vector<2x32xf32>
    %1078 = arith.subf %1077, %1076 : vector<2x32xf32>
    %1079 = math.exp %1078 : vector<2x32xf32>
    %cst_365 = arith.constant 1.000000e+00 : f32
    %1080 = vector.broadcast %cst_365 : f32 to vector<2x32xf32>
    %1081 = arith.addf %1080, %1079 : vector<2x32xf32>
    %cst_366 = arith.constant 1.000000e+00 : f32
    %1082 = vector.broadcast %cst_366 : f32 to vector<2x32xf32>
    %1083 = arith.divf %1082, %1081 : vector<2x32xf32>
    %1084 = vector.extract_strided_slice %1073 {offsets = [0, 32], sizes = [2, 32], strides = [1, 1]} : vector<2x96xf32> to vector<2x32xf32>
    %1085 = vector.extract_strided_slice %1072 {offsets = [0, 32], sizes = [2, 32], strides = [1, 1]} : vector<2x96xf32> to vector<2x32xf32>
    %1086 = arith.addf %1084, %1085 : vector<2x32xf32>
    %cst_367 = arith.constant 0.000000e+00 : f32
    %1087 = vector.broadcast %cst_367 : f32 to vector<2x32xf32>
    %1088 = arith.subf %1087, %1086 : vector<2x32xf32>
    %1089 = math.exp %1088 : vector<2x32xf32>
    %cst_368 = arith.constant 1.000000e+00 : f32
    %1090 = vector.broadcast %cst_368 : f32 to vector<2x32xf32>
    %1091 = arith.addf %1090, %1089 : vector<2x32xf32>
    %cst_369 = arith.constant 1.000000e+00 : f32
    %1092 = vector.broadcast %cst_369 : f32 to vector<2x32xf32>
    %1093 = arith.divf %1092, %1091 : vector<2x32xf32>
    %1094 = vector.extract_strided_slice %1073 {offsets = [0, 64], sizes = [2, 32], strides = [1, 1]} : vector<2x96xf32> to vector<2x32xf32>
    %1095 = vector.extract_strided_slice %1072 {offsets = [0, 64], sizes = [2, 32], strides = [1, 1]} : vector<2x96xf32> to vector<2x32xf32>
    %1096 = vector.broadcast %825 : vector<1x32xf32> to vector<2x32xf32>
    %1097 = arith.addf %1095, %1096 : vector<2x32xf32>
    %1098 = arith.mulf %1083, %1097 : vector<2x32xf32>
    %1099 = arith.addf %1094, %1098 : vector<2x32xf32>
    %1100 = math.tanh %1099 : vector<2x32xf32>
    %cst_370 = arith.constant 1.000000e+00 : f32
    %1101 = vector.broadcast %cst_370 : f32 to vector<2x32xf32>
    %1102 = arith.subf %1101, %1093 : vector<2x32xf32>
    %1103 = arith.mulf %1102, %1100 : vector<2x32xf32>
    %1104 = arith.mulf %1093, %1070 : vector<2x32xf32>
    %1105 = arith.addf %1103, %1104 : vector<2x32xf32>
    %c14_371 = arith.constant 14 : index
    %c0_372 = arith.constant 0 : index
    %1106 = vector.load %arg28[%c14_371, %c0_372] : memref<32x32xf32, #tpu.memory_space<vmem>>, vector<2x32xf32>
    tpu.vector_store %arg28[%c14_371, %c0_372], %1105 {strides = array<i32>} : memref<32x32xf32, #tpu.memory_space<vmem>>, vector<2x32xf32>,
    %cst_373 = arith.constant dense<0.000000e+00> : vector<2x96xf32>
    %1107 = tpu.matmul %1105, %824, %cst_373 {dimension_numbers = #tpu.dot_dimension_numbers<[1], [0], [0], [1], [0, 0, 1, 1], [], []>} : vector<2x32xf32>, vector<32x96xf32>, vector<2x96xf32> -> vector<2x96xf32>
    %1108 = vector.extract_strided_slice %823 {offsets = [16, 0], sizes = [2, 96], strides = [1, 1]} : vector<32x96xf32> to vector<2x96xf32>
    %1109 = vector.extract_strided_slice %1108 {offsets = [0, 0], sizes = [2, 32], strides = [1, 1]} : vector<2x96xf32> to vector<2x32xf32>
    %1110 = vector.extract_strided_slice %1107 {offsets = [0, 0], sizes = [2, 32], strides = [1, 1]} : vector<2x96xf32> to vector<2x32xf32>
    %1111 = arith.addf %1109, %1110 : vector<2x32xf32>
    %cst_374 = arith.constant 0.000000e+00 : f32
    %1112 = vector.broadcast %cst_374 : f32 to vector<2x32xf32>
    %1113 = arith.subf %1112, %1111 : vector<2x32xf32>
    %1114 = math.exp %1113 : vector<2x32xf32>
    %cst_375 = arith.constant 1.000000e+00 : f32
    %1115 = vector.broadcast %cst_375 : f32 to vector<2x32xf32>
    %1116 = arith.addf %1115, %1114 : vector<2x32xf32>
    %cst_376 = arith.constant 1.000000e+00 : f32
    %1117 = vector.broadcast %cst_376 : f32 to vector<2x32xf32>
    %1118 = arith.divf %1117, %1116 : vector<2x32xf32>
    %1119 = vector.extract_strided_slice %1108 {offsets = [0, 32], sizes = [2, 32], strides = [1, 1]} : vector<2x96xf32> to vector<2x32xf32>
    %1120 = vector.extract_strided_slice %1107 {offsets = [0, 32], sizes = [2, 32], strides = [1, 1]} : vector<2x96xf32> to vector<2x32xf32>
    %1121 = arith.addf %1119, %1120 : vector<2x32xf32>
    %cst_377 = arith.constant 0.000000e+00 : f32
    %1122 = vector.broadcast %cst_377 : f32 to vector<2x32xf32>
    %1123 = arith.subf %1122, %1121 : vector<2x32xf32>
    %1124 = math.exp %1123 : vector<2x32xf32>
    %cst_378 = arith.constant 1.000000e+00 : f32
    %1125 = vector.broadcast %cst_378 : f32 to vector<2x32xf32>
    %1126 = arith.addf %1125, %1124 : vector<2x32xf32>
    %cst_379 = arith.constant 1.000000e+00 : f32
    %1127 = vector.broadcast %cst_379 : f32 to vector<2x32xf32>
    %1128 = arith.divf %1127, %1126 : vector<2x32xf32>
    %1129 = vector.extract_strided_slice %1108 {offsets = [0, 64], sizes = [2, 32], strides = [1, 1]} : vector<2x96xf32> to vector<2x32xf32>
    %1130 = vector.extract_strided_slice %1107 {offsets = [0, 64], sizes = [2, 32], strides = [1, 1]} : vector<2x96xf32> to vector<2x32xf32>
    %1131 = vector.broadcast %825 : vector<1x32xf32> to vector<2x32xf32>
    %1132 = arith.addf %1130, %1131 : vector<2x32xf32>
    %1133 = arith.mulf %1118, %1132 : vector<2x32xf32>
    %1134 = arith.addf %1129, %1133 : vector<2x32xf32>
    %1135 = math.tanh %1134 : vector<2x32xf32>
    %cst_380 = arith.constant 1.000000e+00 : f32
    %1136 = vector.broadcast %cst_380 : f32 to vector<2x32xf32>
    %1137 = arith.subf %1136, %1128 : vector<2x32xf32>
    %1138 = arith.mulf %1137, %1135 : vector<2x32xf32>
    %1139 = arith.mulf %1128, %1105 : vector<2x32xf32>
    %1140 = arith.addf %1138, %1139 : vector<2x32xf32>
    %c16_381 = arith.constant 16 : index
    %c0_382 = arith.constant 0 : index
    %1141 = vector.load %arg28[%c16_381, %c0_382] : memref<32x32xf32, #tpu.memory_space<vmem>>, vector<2x32xf32>
    tpu.vector_store %arg28[%c16_381, %c0_382], %1140 {strides = array<i32>} : memref<32x32xf32, #tpu.memory_space<vmem>>, vector<2x32xf32>,
    %cst_383 = arith.constant dense<0.000000e+00> : vector<2x96xf32>
    %1142 = tpu.matmul %1140, %824, %cst_383 {dimension_numbers = #tpu.dot_dimension_numbers<[1], [0], [0], [1], [0, 0, 1, 1], [], []>} : vector<2x32xf32>, vector<32x96xf32>, vector<2x96xf32> -> vector<2x96xf32>
    %1143 = vector.extract_strided_slice %823 {offsets = [18, 0], sizes = [2, 96], strides = [1, 1]} : vector<32x96xf32> to vector<2x96xf32>
    %1144 = vector.extract_strided_slice %1143 {offsets = [0, 0], sizes = [2, 32], strides = [1, 1]} : vector<2x96xf32> to vector<2x32xf32>
    %1145 = vector.extract_strided_slice %1142 {offsets = [0, 0], sizes = [2, 32], strides = [1, 1]} : vector<2x96xf32> to vector<2x32xf32>
    %1146 = arith.addf %1144, %1145 : vector<2x32xf32>
    %cst_384 = arith.constant 0.000000e+00 : f32
    %1147 = vector.broadcast %cst_384 : f32 to vector<2x32xf32>
    %1148 = arith.subf %1147, %1146 : vector<2x32xf32>
    %1149 = math.exp %1148 : vector<2x32xf32>
    %cst_385 = arith.constant 1.000000e+00 : f32
    %1150 = vector.broadcast %cst_385 : f32 to vector<2x32xf32>
    %1151 = arith.addf %1150, %1149 : vector<2x32xf32>
    %cst_386 = arith.constant 1.000000e+00 : f32
    %1152 = vector.broadcast %cst_386 : f32 to vector<2x32xf32>
    %1153 = arith.divf %1152, %1151 : vector<2x32xf32>
    %1154 = vector.extract_strided_slice %1143 {offsets = [0, 32], sizes = [2, 32], strides = [1, 1]} : vector<2x96xf32> to vector<2x32xf32>
    %1155 = vector.extract_strided_slice %1142 {offsets = [0, 32], sizes = [2, 32], strides = [1, 1]} : vector<2x96xf32> to vector<2x32xf32>
    %1156 = arith.addf %1154, %1155 : vector<2x32xf32>
    %cst_387 = arith.constant 0.000000e+00 : f32
    %1157 = vector.broadcast %cst_387 : f32 to vector<2x32xf32>
    %1158 = arith.subf %1157, %1156 : vector<2x32xf32>
    %1159 = math.exp %1158 : vector<2x32xf32>
    %cst_388 = arith.constant 1.000000e+00 : f32
    %1160 = vector.broadcast %cst_388 : f32 to vector<2x32xf32>
    %1161 = arith.addf %1160, %1159 : vector<2x32xf32>
    %cst_389 = arith.constant 1.000000e+00 : f32
    %1162 = vector.broadcast %cst_389 : f32 to vector<2x32xf32>
    %1163 = arith.divf %1162, %1161 : vector<2x32xf32>
    %1164 = vector.extract_strided_slice %1143 {offsets = [0, 64], sizes = [2, 32], strides = [1, 1]} : vector<2x96xf32> to vector<2x32xf32>
    %1165 = vector.extract_strided_slice %1142 {offsets = [0, 64], sizes = [2, 32], strides = [1, 1]} : vector<2x96xf32> to vector<2x32xf32>
    %1166 = vector.broadcast %825 : vector<1x32xf32> to vector<2x32xf32>
    %1167 = arith.addf %1165, %1166 : vector<2x32xf32>
    %1168 = arith.mulf %1153, %1167 : vector<2x32xf32>
    %1169 = arith.addf %1164, %1168 : vector<2x32xf32>
    %1170 = math.tanh %1169 : vector<2x32xf32>
    %cst_390 = arith.constant 1.000000e+00 : f32
    %1171 = vector.broadcast %cst_390 : f32 to vector<2x32xf32>
    %1172 = arith.subf %1171, %1163 : vector<2x32xf32>
    %1173 = arith.mulf %1172, %1170 : vector<2x32xf32>
    %1174 = arith.mulf %1163, %1140 : vector<2x32xf32>
    %1175 = arith.addf %1173, %1174 : vector<2x32xf32>
    %c18_391 = arith.constant 18 : index
    %c0_392 = arith.constant 0 : index
    %1176 = vector.load %arg28[%c18_391, %c0_392] : memref<32x32xf32, #tpu.memory_space<vmem>>, vector<2x32xf32>
    tpu.vector_store %arg28[%c18_391, %c0_392], %1175 {strides = array<i32>} : memref<32x32xf32, #tpu.memory_space<vmem>>, vector<2x32xf32>,
    %cst_393 = arith.constant dense<0.000000e+00> : vector<2x96xf32>
    %1177 = tpu.matmul %1175, %824, %cst_393 {dimension_numbers = #tpu.dot_dimension_numbers<[1], [0], [0], [1], [0, 0, 1, 1], [], []>} : vector<2x32xf32>, vector<32x96xf32>, vector<2x96xf32> -> vector<2x96xf32>
    %1178 = vector.extract_strided_slice %823 {offsets = [20, 0], sizes = [2, 96], strides = [1, 1]} : vector<32x96xf32> to vector<2x96xf32>
    %1179 = vector.extract_strided_slice %1178 {offsets = [0, 0], sizes = [2, 32], strides = [1, 1]} : vector<2x96xf32> to vector<2x32xf32>
    %1180 = vector.extract_strided_slice %1177 {offsets = [0, 0], sizes = [2, 32], strides = [1, 1]} : vector<2x96xf32> to vector<2x32xf32>
    %1181 = arith.addf %1179, %1180 : vector<2x32xf32>
    %cst_394 = arith.constant 0.000000e+00 : f32
    %1182 = vector.broadcast %cst_394 : f32 to vector<2x32xf32>
    %1183 = arith.subf %1182, %1181 : vector<2x32xf32>
    %1184 = math.exp %1183 : vector<2x32xf32>
    %cst_395 = arith.constant 1.000000e+00 : f32
    %1185 = vector.broadcast %cst_395 : f32 to vector<2x32xf32>
    %1186 = arith.addf %1185, %1184 : vector<2x32xf32>
    %cst_396 = arith.constant 1.000000e+00 : f32
    %1187 = vector.broadcast %cst_396 : f32 to vector<2x32xf32>
    %1188 = arith.divf %1187, %1186 : vector<2x32xf32>
    %1189 = vector.extract_strided_slice %1178 {offsets = [0, 32], sizes = [2, 32], strides = [1, 1]} : vector<2x96xf32> to vector<2x32xf32>
    %1190 = vector.extract_strided_slice %1177 {offsets = [0, 32], sizes = [2, 32], strides = [1, 1]} : vector<2x96xf32> to vector<2x32xf32>
    %1191 = arith.addf %1189, %1190 : vector<2x32xf32>
    %cst_397 = arith.constant 0.000000e+00 : f32
    %1192 = vector.broadcast %cst_397 : f32 to vector<2x32xf32>
    %1193 = arith.subf %1192, %1191 : vector<2x32xf32>
    %1194 = math.exp %1193 : vector<2x32xf32>
    %cst_398 = arith.constant 1.000000e+00 : f32
    %1195 = vector.broadcast %cst_398 : f32 to vector<2x32xf32>
    %1196 = arith.addf %1195, %1194 : vector<2x32xf32>
    %cst_399 = arith.constant 1.000000e+00 : f32
    %1197 = vector.broadcast %cst_399 : f32 to vector<2x32xf32>
    %1198 = arith.divf %1197, %1196 : vector<2x32xf32>
    %1199 = vector.extract_strided_slice %1178 {offsets = [0, 64], sizes = [2, 32], strides = [1, 1]} : vector<2x96xf32> to vector<2x32xf32>
    %1200 = vector.extract_strided_slice %1177 {offsets = [0, 64], sizes = [2, 32], strides = [1, 1]} : vector<2x96xf32> to vector<2x32xf32>
    %1201 = vector.broadcast %825 : vector<1x32xf32> to vector<2x32xf32>
    %1202 = arith.addf %1200, %1201 : vector<2x32xf32>
    %1203 = arith.mulf %1188, %1202 : vector<2x32xf32>
    %1204 = arith.addf %1199, %1203 : vector<2x32xf32>
    %1205 = math.tanh %1204 : vector<2x32xf32>
    %cst_400 = arith.constant 1.000000e+00 : f32
    %1206 = vector.broadcast %cst_400 : f32 to vector<2x32xf32>
    %1207 = arith.subf %1206, %1198 : vector<2x32xf32>
    %1208 = arith.mulf %1207, %1205 : vector<2x32xf32>
    %1209 = arith.mulf %1198, %1175 : vector<2x32xf32>
    %1210 = arith.addf %1208, %1209 : vector<2x32xf32>
    %c20_401 = arith.constant 20 : index
    %c0_402 = arith.constant 0 : index
    %1211 = vector.load %arg28[%c20_401, %c0_402] : memref<32x32xf32, #tpu.memory_space<vmem>>, vector<2x32xf32>
    tpu.vector_store %arg28[%c20_401, %c0_402], %1210 {strides = array<i32>} : memref<32x32xf32, #tpu.memory_space<vmem>>, vector<2x32xf32>,
    %cst_403 = arith.constant dense<0.000000e+00> : vector<2x96xf32>
    %1212 = tpu.matmul %1210, %824, %cst_403 {dimension_numbers = #tpu.dot_dimension_numbers<[1], [0], [0], [1], [0, 0, 1, 1], [], []>} : vector<2x32xf32>, vector<32x96xf32>, vector<2x96xf32> -> vector<2x96xf32>
    %1213 = vector.extract_strided_slice %823 {offsets = [22, 0], sizes = [2, 96], strides = [1, 1]} : vector<32x96xf32> to vector<2x96xf32>
    %1214 = vector.extract_strided_slice %1213 {offsets = [0, 0], sizes = [2, 32], strides = [1, 1]} : vector<2x96xf32> to vector<2x32xf32>
    %1215 = vector.extract_strided_slice %1212 {offsets = [0, 0], sizes = [2, 32], strides = [1, 1]} : vector<2x96xf32> to vector<2x32xf32>
    %1216 = arith.addf %1214, %1215 : vector<2x32xf32>
    %cst_404 = arith.constant 0.000000e+00 : f32
    %1217 = vector.broadcast %cst_404 : f32 to vector<2x32xf32>
    %1218 = arith.subf %1217, %1216 : vector<2x32xf32>
    %1219 = math.exp %1218 : vector<2x32xf32>
    %cst_405 = arith.constant 1.000000e+00 : f32
    %1220 = vector.broadcast %cst_405 : f32 to vector<2x32xf32>
    %1221 = arith.addf %1220, %1219 : vector<2x32xf32>
    %cst_406 = arith.constant 1.000000e+00 : f32
    %1222 = vector.broadcast %cst_406 : f32 to vector<2x32xf32>
    %1223 = arith.divf %1222, %1221 : vector<2x32xf32>
    %1224 = vector.extract_strided_slice %1213 {offsets = [0, 32], sizes = [2, 32], strides = [1, 1]} : vector<2x96xf32> to vector<2x32xf32>
    %1225 = vector.extract_strided_slice %1212 {offsets = [0, 32], sizes = [2, 32], strides = [1, 1]} : vector<2x96xf32> to vector<2x32xf32>
    %1226 = arith.addf %1224, %1225 : vector<2x32xf32>
    %cst_407 = arith.constant 0.000000e+00 : f32
    %1227 = vector.broadcast %cst_407 : f32 to vector<2x32xf32>
    %1228 = arith.subf %1227, %1226 : vector<2x32xf32>
    %1229 = math.exp %1228 : vector<2x32xf32>
    %cst_408 = arith.constant 1.000000e+00 : f32
    %1230 = vector.broadcast %cst_408 : f32 to vector<2x32xf32>
    %1231 = arith.addf %1230, %1229 : vector<2x32xf32>
    %cst_409 = arith.constant 1.000000e+00 : f32
    %1232 = vector.broadcast %cst_409 : f32 to vector<2x32xf32>
    %1233 = arith.divf %1232, %1231 : vector<2x32xf32>
    %1234 = vector.extract_strided_slice %1213 {offsets = [0, 64], sizes = [2, 32], strides = [1, 1]} : vector<2x96xf32> to vector<2x32xf32>
    %1235 = vector.extract_strided_slice %1212 {offsets = [0, 64], sizes = [2, 32], strides = [1, 1]} : vector<2x96xf32> to vector<2x32xf32>
    %1236 = vector.broadcast %825 : vector<1x32xf32> to vector<2x32xf32>
    %1237 = arith.addf %1235, %1236 : vector<2x32xf32>
    %1238 = arith.mulf %1223, %1237 : vector<2x32xf32>
    %1239 = arith.addf %1234, %1238 : vector<2x32xf32>
    %1240 = math.tanh %1239 : vector<2x32xf32>
    %cst_410 = arith.constant 1.000000e+00 : f32
    %1241 = vector.broadcast %cst_410 : f32 to vector<2x32xf32>
    %1242 = arith.subf %1241, %1233 : vector<2x32xf32>
    %1243 = arith.mulf %1242, %1240 : vector<2x32xf32>
    %1244 = arith.mulf %1233, %1210 : vector<2x32xf32>
    %1245 = arith.addf %1243, %1244 : vector<2x32xf32>
    %c22_411 = arith.constant 22 : index
    %c0_412 = arith.constant 0 : index
    %1246 = vector.load %arg28[%c22_411, %c0_412] : memref<32x32xf32, #tpu.memory_space<vmem>>, vector<2x32xf32>
    tpu.vector_store %arg28[%c22_411, %c0_412], %1245 {strides = array<i32>} : memref<32x32xf32, #tpu.memory_space<vmem>>, vector<2x32xf32>,
    %cst_413 = arith.constant dense<0.000000e+00> : vector<2x96xf32>
    %1247 = tpu.matmul %1245, %824, %cst_413 {dimension_numbers = #tpu.dot_dimension_numbers<[1], [0], [0], [1], [0, 0, 1, 1], [], []>} : vector<2x32xf32>, vector<32x96xf32>, vector<2x96xf32> -> vector<2x96xf32>
    %1248 = vector.extract_strided_slice %823 {offsets = [24, 0], sizes = [2, 96], strides = [1, 1]} : vector<32x96xf32> to vector<2x96xf32>
    %1249 = vector.extract_strided_slice %1248 {offsets = [0, 0], sizes = [2, 32], strides = [1, 1]} : vector<2x96xf32> to vector<2x32xf32>
    %1250 = vector.extract_strided_slice %1247 {offsets = [0, 0], sizes = [2, 32], strides = [1, 1]} : vector<2x96xf32> to vector<2x32xf32>
    %1251 = arith.addf %1249, %1250 : vector<2x32xf32>
    %cst_414 = arith.constant 0.000000e+00 : f32
    %1252 = vector.broadcast %cst_414 : f32 to vector<2x32xf32>
    %1253 = arith.subf %1252, %1251 : vector<2x32xf32>
    %1254 = math.exp %1253 : vector<2x32xf32>
    %cst_415 = arith.constant 1.000000e+00 : f32
    %1255 = vector.broadcast %cst_415 : f32 to vector<2x32xf32>
    %1256 = arith.addf %1255, %1254 : vector<2x32xf32>
    %cst_416 = arith.constant 1.000000e+00 : f32
    %1257 = vector.broadcast %cst_416 : f32 to vector<2x32xf32>
    %1258 = arith.divf %1257, %1256 : vector<2x32xf32>
    %1259 = vector.extract_strided_slice %1248 {offsets = [0, 32], sizes = [2, 32], strides = [1, 1]} : vector<2x96xf32> to vector<2x32xf32>
    %1260 = vector.extract_strided_slice %1247 {offsets = [0, 32], sizes = [2, 32], strides = [1, 1]} : vector<2x96xf32> to vector<2x32xf32>
    %1261 = arith.addf %1259, %1260 : vector<2x32xf32>
    %cst_417 = arith.constant 0.000000e+00 : f32
    %1262 = vector.broadcast %cst_417 : f32 to vector<2x32xf32>
    %1263 = arith.subf %1262, %1261 : vector<2x32xf32>
    %1264 = math.exp %1263 : vector<2x32xf32>
    %cst_418 = arith.constant 1.000000e+00 : f32
    %1265 = vector.broadcast %cst_418 : f32 to vector<2x32xf32>
    %1266 = arith.addf %1265, %1264 : vector<2x32xf32>
    %cst_419 = arith.constant 1.000000e+00 : f32
    %1267 = vector.broadcast %cst_419 : f32 to vector<2x32xf32>
    %1268 = arith.divf %1267, %1266 : vector<2x32xf32>
    %1269 = vector.extract_strided_slice %1248 {offsets = [0, 64], sizes = [2, 32], strides = [1, 1]} : vector<2x96xf32> to vector<2x32xf32>
    %1270 = vector.extract_strided_slice %1247 {offsets = [0, 64], sizes = [2, 32], strides = [1, 1]} : vector<2x96xf32> to vector<2x32xf32>
    %1271 = vector.broadcast %825 : vector<1x32xf32> to vector<2x32xf32>
    %1272 = arith.addf %1270, %1271 : vector<2x32xf32>
    %1273 = arith.mulf %1258, %1272 : vector<2x32xf32>
    %1274 = arith.addf %1269, %1273 : vector<2x32xf32>
    %1275 = math.tanh %1274 : vector<2x32xf32>
    %cst_420 = arith.constant 1.000000e+00 : f32
    %1276 = vector.broadcast %cst_420 : f32 to vector<2x32xf32>
    %1277 = arith.subf %1276, %1268 : vector<2x32xf32>
    %1278 = arith.mulf %1277, %1275 : vector<2x32xf32>
    %1279 = arith.mulf %1268, %1245 : vector<2x32xf32>
    %1280 = arith.addf %1278, %1279 : vector<2x32xf32>
    %c24_421 = arith.constant 24 : index
    %c0_422 = arith.constant 0 : index
    %1281 = vector.load %arg28[%c24_421, %c0_422] : memref<32x32xf32, #tpu.memory_space<vmem>>, vector<2x32xf32>
    tpu.vector_store %arg28[%c24_421, %c0_422], %1280 {strides = array<i32>} : memref<32x32xf32, #tpu.memory_space<vmem>>, vector<2x32xf32>,
    %cst_423 = arith.constant dense<0.000000e+00> : vector<2x96xf32>
    %1282 = tpu.matmul %1280, %824, %cst_423 {dimension_numbers = #tpu.dot_dimension_numbers<[1], [0], [0], [1], [0, 0, 1, 1], [], []>} : vector<2x32xf32>, vector<32x96xf32>, vector<2x96xf32> -> vector<2x96xf32>
    %1283 = vector.extract_strided_slice %823 {offsets = [26, 0], sizes = [2, 96], strides = [1, 1]} : vector<32x96xf32> to vector<2x96xf32>
    %1284 = vector.extract_strided_slice %1283 {offsets = [0, 0], sizes = [2, 32], strides = [1, 1]} : vector<2x96xf32> to vector<2x32xf32>
    %1285 = vector.extract_strided_slice %1282 {offsets = [0, 0], sizes = [2, 32], strides = [1, 1]} : vector<2x96xf32> to vector<2x32xf32>
    %1286 = arith.addf %1284, %1285 : vector<2x32xf32>
    %cst_424 = arith.constant 0.000000e+00 : f32
    %1287 = vector.broadcast %cst_424 : f32 to vector<2x32xf32>
    %1288 = arith.subf %1287, %1286 : vector<2x32xf32>
    %1289 = math.exp %1288 : vector<2x32xf32>
    %cst_425 = arith.constant 1.000000e+00 : f32
    %1290 = vector.broadcast %cst_425 : f32 to vector<2x32xf32>
    %1291 = arith.addf %1290, %1289 : vector<2x32xf32>
    %cst_426 = arith.constant 1.000000e+00 : f32
    %1292 = vector.broadcast %cst_426 : f32 to vector<2x32xf32>
    %1293 = arith.divf %1292, %1291 : vector<2x32xf32>
    %1294 = vector.extract_strided_slice %1283 {offsets = [0, 32], sizes = [2, 32], strides = [1, 1]} : vector<2x96xf32> to vector<2x32xf32>
    %1295 = vector.extract_strided_slice %1282 {offsets = [0, 32], sizes = [2, 32], strides = [1, 1]} : vector<2x96xf32> to vector<2x32xf32>
    %1296 = arith.addf %1294, %1295 : vector<2x32xf32>
    %cst_427 = arith.constant 0.000000e+00 : f32
    %1297 = vector.broadcast %cst_427 : f32 to vector<2x32xf32>
    %1298 = arith.subf %1297, %1296 : vector<2x32xf32>
    %1299 = math.exp %1298 : vector<2x32xf32>
    %cst_428 = arith.constant 1.000000e+00 : f32
    %1300 = vector.broadcast %cst_428 : f32 to vector<2x32xf32>
    %1301 = arith.addf %1300, %1299 : vector<2x32xf32>
    %cst_429 = arith.constant 1.000000e+00 : f32
    %1302 = vector.broadcast %cst_429 : f32 to vector<2x32xf32>
    %1303 = arith.divf %1302, %1301 : vector<2x32xf32>
    %1304 = vector.extract_strided_slice %1283 {offsets = [0, 64], sizes = [2, 32], strides = [1, 1]} : vector<2x96xf32> to vector<2x32xf32>
    %1305 = vector.extract_strided_slice %1282 {offsets = [0, 64], sizes = [2, 32], strides = [1, 1]} : vector<2x96xf32> to vector<2x32xf32>
    %1306 = vector.broadcast %825 : vector<1x32xf32> to vector<2x32xf32>
    %1307 = arith.addf %1305, %1306 : vector<2x32xf32>
    %1308 = arith.mulf %1293, %1307 : vector<2x32xf32>
    %1309 = arith.addf %1304, %1308 : vector<2x32xf32>
    %1310 = math.tanh %1309 : vector<2x32xf32>
    %cst_430 = arith.constant 1.000000e+00 : f32
    %1311 = vector.broadcast %cst_430 : f32 to vector<2x32xf32>
    %1312 = arith.subf %1311, %1303 : vector<2x32xf32>
    %1313 = arith.mulf %1312, %1310 : vector<2x32xf32>
    %1314 = arith.mulf %1303, %1280 : vector<2x32xf32>
    %1315 = arith.addf %1313, %1314 : vector<2x32xf32>
    %c26_431 = arith.constant 26 : index
    %c0_432 = arith.constant 0 : index
    %1316 = vector.load %arg28[%c26_431, %c0_432] : memref<32x32xf32, #tpu.memory_space<vmem>>, vector<2x32xf32>
    tpu.vector_store %arg28[%c26_431, %c0_432], %1315 {strides = array<i32>} : memref<32x32xf32, #tpu.memory_space<vmem>>, vector<2x32xf32>,
    %cst_433 = arith.constant dense<0.000000e+00> : vector<2x96xf32>
    %1317 = tpu.matmul %1315, %824, %cst_433 {dimension_numbers = #tpu.dot_dimension_numbers<[1], [0], [0], [1], [0, 0, 1, 1], [], []>} : vector<2x32xf32>, vector<32x96xf32>, vector<2x96xf32> -> vector<2x96xf32>
    %1318 = vector.extract_strided_slice %823 {offsets = [28, 0], sizes = [2, 96], strides = [1, 1]} : vector<32x96xf32> to vector<2x96xf32>
    %1319 = vector.extract_strided_slice %1318 {offsets = [0, 0], sizes = [2, 32], strides = [1, 1]} : vector<2x96xf32> to vector<2x32xf32>
    %1320 = vector.extract_strided_slice %1317 {offsets = [0, 0], sizes = [2, 32], strides = [1, 1]} : vector<2x96xf32> to vector<2x32xf32>
    %1321 = arith.addf %1319, %1320 : vector<2x32xf32>
    %cst_434 = arith.constant 0.000000e+00 : f32
    %1322 = vector.broadcast %cst_434 : f32 to vector<2x32xf32>
    %1323 = arith.subf %1322, %1321 : vector<2x32xf32>
    %1324 = math.exp %1323 : vector<2x32xf32>
    %cst_435 = arith.constant 1.000000e+00 : f32
    %1325 = vector.broadcast %cst_435 : f32 to vector<2x32xf32>
    %1326 = arith.addf %1325, %1324 : vector<2x32xf32>
    %cst_436 = arith.constant 1.000000e+00 : f32
    %1327 = vector.broadcast %cst_436 : f32 to vector<2x32xf32>
    %1328 = arith.divf %1327, %1326 : vector<2x32xf32>
    %1329 = vector.extract_strided_slice %1318 {offsets = [0, 32], sizes = [2, 32], strides = [1, 1]} : vector<2x96xf32> to vector<2x32xf32>
    %1330 = vector.extract_strided_slice %1317 {offsets = [0, 32], sizes = [2, 32], strides = [1, 1]} : vector<2x96xf32> to vector<2x32xf32>
    %1331 = arith.addf %1329, %1330 : vector<2x32xf32>
    %cst_437 = arith.constant 0.000000e+00 : f32
    %1332 = vector.broadcast %cst_437 : f32 to vector<2x32xf32>
    %1333 = arith.subf %1332, %1331 : vector<2x32xf32>
    %1334 = math.exp %1333 : vector<2x32xf32>
    %cst_438 = arith.constant 1.000000e+00 : f32
    %1335 = vector.broadcast %cst_438 : f32 to vector<2x32xf32>
    %1336 = arith.addf %1335, %1334 : vector<2x32xf32>
    %cst_439 = arith.constant 1.000000e+00 : f32
    %1337 = vector.broadcast %cst_439 : f32 to vector<2x32xf32>
    %1338 = arith.divf %1337, %1336 : vector<2x32xf32>
    %1339 = vector.extract_strided_slice %1318 {offsets = [0, 64], sizes = [2, 32], strides = [1, 1]} : vector<2x96xf32> to vector<2x32xf32>
    %1340 = vector.extract_strided_slice %1317 {offsets = [0, 64], sizes = [2, 32], strides = [1, 1]} : vector<2x96xf32> to vector<2x32xf32>
    %1341 = vector.broadcast %825 : vector<1x32xf32> to vector<2x32xf32>
    %1342 = arith.addf %1340, %1341 : vector<2x32xf32>
    %1343 = arith.mulf %1328, %1342 : vector<2x32xf32>
    %1344 = arith.addf %1339, %1343 : vector<2x32xf32>
    %1345 = math.tanh %1344 : vector<2x32xf32>
    %cst_440 = arith.constant 1.000000e+00 : f32
    %1346 = vector.broadcast %cst_440 : f32 to vector<2x32xf32>
    %1347 = arith.subf %1346, %1338 : vector<2x32xf32>
    %1348 = arith.mulf %1347, %1345 : vector<2x32xf32>
    %1349 = arith.mulf %1338, %1315 : vector<2x32xf32>
    %1350 = arith.addf %1348, %1349 : vector<2x32xf32>
    %c28_441 = arith.constant 28 : index
    %c0_442 = arith.constant 0 : index
    %1351 = vector.load %arg28[%c28_441, %c0_442] : memref<32x32xf32, #tpu.memory_space<vmem>>, vector<2x32xf32>
    tpu.vector_store %arg28[%c28_441, %c0_442], %1350 {strides = array<i32>} : memref<32x32xf32, #tpu.memory_space<vmem>>, vector<2x32xf32>,
    %cst_443 = arith.constant dense<0.000000e+00> : vector<2x96xf32>
    %1352 = tpu.matmul %1350, %824, %cst_443 {dimension_numbers = #tpu.dot_dimension_numbers<[1], [0], [0], [1], [0, 0, 1, 1], [], []>} : vector<2x32xf32>, vector<32x96xf32>, vector<2x96xf32> -> vector<2x96xf32>
    %1353 = vector.extract_strided_slice %823 {offsets = [30, 0], sizes = [2, 96], strides = [1, 1]} : vector<32x96xf32> to vector<2x96xf32>
    %1354 = vector.extract_strided_slice %1353 {offsets = [0, 0], sizes = [2, 32], strides = [1, 1]} : vector<2x96xf32> to vector<2x32xf32>
    %1355 = vector.extract_strided_slice %1352 {offsets = [0, 0], sizes = [2, 32], strides = [1, 1]} : vector<2x96xf32> to vector<2x32xf32>
    %1356 = arith.addf %1354, %1355 : vector<2x32xf32>
    %cst_444 = arith.constant 0.000000e+00 : f32
    %1357 = vector.broadcast %cst_444 : f32 to vector<2x32xf32>
    %1358 = arith.subf %1357, %1356 : vector<2x32xf32>
    %1359 = math.exp %1358 : vector<2x32xf32>
    %cst_445 = arith.constant 1.000000e+00 : f32
    %1360 = vector.broadcast %cst_445 : f32 to vector<2x32xf32>
    %1361 = arith.addf %1360, %1359 : vector<2x32xf32>
    %cst_446 = arith.constant 1.000000e+00 : f32
    %1362 = vector.broadcast %cst_446 : f32 to vector<2x32xf32>
    %1363 = arith.divf %1362, %1361 : vector<2x32xf32>
    %1364 = vector.extract_strided_slice %1353 {offsets = [0, 32], sizes = [2, 32], strides = [1, 1]} : vector<2x96xf32> to vector<2x32xf32>
    %1365 = vector.extract_strided_slice %1352 {offsets = [0, 32], sizes = [2, 32], strides = [1, 1]} : vector<2x96xf32> to vector<2x32xf32>
    %1366 = arith.addf %1364, %1365 : vector<2x32xf32>
    %cst_447 = arith.constant 0.000000e+00 : f32
    %1367 = vector.broadcast %cst_447 : f32 to vector<2x32xf32>
    %1368 = arith.subf %1367, %1366 : vector<2x32xf32>
    %1369 = math.exp %1368 : vector<2x32xf32>
    %cst_448 = arith.constant 1.000000e+00 : f32
    %1370 = vector.broadcast %cst_448 : f32 to vector<2x32xf32>
    %1371 = arith.addf %1370, %1369 : vector<2x32xf32>
    %cst_449 = arith.constant 1.000000e+00 : f32
    %1372 = vector.broadcast %cst_449 : f32 to vector<2x32xf32>
    %1373 = arith.divf %1372, %1371 : vector<2x32xf32>
    %1374 = vector.extract_strided_slice %1353 {offsets = [0, 64], sizes = [2, 32], strides = [1, 1]} : vector<2x96xf32> to vector<2x32xf32>
    %1375 = vector.extract_strided_slice %1352 {offsets = [0, 64], sizes = [2, 32], strides = [1, 1]} : vector<2x96xf32> to vector<2x32xf32>
    %1376 = vector.broadcast %825 : vector<1x32xf32> to vector<2x32xf32>
    %1377 = arith.addf %1375, %1376 : vector<2x32xf32>
    %1378 = arith.mulf %1363, %1377 : vector<2x32xf32>
    %1379 = arith.addf %1374, %1378 : vector<2x32xf32>
    %1380 = math.tanh %1379 : vector<2x32xf32>
    %cst_450 = arith.constant 1.000000e+00 : f32
    %1381 = vector.broadcast %cst_450 : f32 to vector<2x32xf32>
    %1382 = arith.subf %1381, %1373 : vector<2x32xf32>
    %1383 = arith.mulf %1382, %1380 : vector<2x32xf32>
    %1384 = arith.mulf %1373, %1350 : vector<2x32xf32>
    %1385 = arith.addf %1383, %1384 : vector<2x32xf32>
    %c30_451 = arith.constant 30 : index
    %c0_452 = arith.constant 0 : index
    %1386 = vector.load %arg28[%c30_451, %c0_452] : memref<32x32xf32, #tpu.memory_space<vmem>>, vector<2x32xf32>
    tpu.vector_store %arg28[%c30_451, %c0_452], %1385 {strides = array<i32>} : memref<32x32xf32, #tpu.memory_space<vmem>>, vector<2x32xf32>,
    %c0_453 = arith.constant 0 : index
    %c0_454 = arith.constant 0 : index
    %1387 = vector.load %arg28[%c0_453, %c0_454] : memref<32x32xf32, #tpu.memory_space<vmem>>, vector<32x32xf32>
    %c0_455 = arith.constant 0 : index
    %c0_456 = arith.constant 0 : index
    %1388 = vector.load %arg24[%c0_455, %c0_456] : memref<32x128xf32, #tpu.memory_space<vmem>>, vector<32x128xf32>
    %cst_457 = arith.constant dense<0.000000e+00> : vector<32x128xf32>
    %1389 = tpu.matmul %1387, %1388, %cst_457 {dimension_numbers = #tpu.dot_dimension_numbers<[1], [0], [0], [1], [0, 0, 1, 1], [], []>} : vector<32x32xf32>, vector<32x128xf32>, vector<32x128xf32> -> vector<32x128xf32>
    %c0_458 = arith.constant 0 : index
    %c0_459 = arith.constant 0 : index
    %1390 = vector.load %arg25[%c0_458, %c0_459] : memref<1x128xf32, #tpu.memory_space<vmem>>, vector<1x128xf32>
    %1391 = vector.broadcast %1390 : vector<1x128xf32> to vector<32x128xf32>
    %1392 = arith.addf %1389, %1391 : vector<32x128xf32>
    %c0_460 = arith.constant 0 : index
    %c0_461 = arith.constant 0 : index
    %1393 = vector.load %arg26[%c0_460, %c0_461] : memref<32x128xf32, #tpu.memory_space<vmem>>, vector<32x128xf32>
    tpu.vector_store %arg26[%c0_460, %c0_461], %1392 {strides = array<i32>} : memref<32x128xf32, #tpu.memory_space<vmem>>, vector<32x128xf32>,
    return
  }
  func.func @transform_0(%arg0: i32) -> (i32, i32) {
    %c0_i32 = arith.constant 0 : i32
    %c0_i32_0 = arith.constant 0 : i32
    %c0_i32_1 = arith.constant 0 : i32
    return %c0_i32, %c0_i32_0 : i32, i32
  }
  func.func @transform_1(%arg0: i32) -> (i32, i32) {
    %c0_i32 = arith.constant 0 : i32
    %c0_i32_0 = arith.constant 0 : i32
    %c0_i32_1 = arith.constant 0 : i32
    return %c0_i32, %c0_i32_0 : i32, i32
  }
  func.func @transform_2(%arg0: i32) -> (i32, i32) {
    %c0_i32 = arith.constant 0 : i32
    %c0_i32_0 = arith.constant 0 : i32
    %c0_i32_1 = arith.constant 0 : i32
    return %c0_i32, %c0_i32_0 : i32, i32
  }
  func.func @transform_3(%arg0: i32) -> (i32, i32) {
    %c0_i32 = arith.constant 0 : i32
    %c0_i32_0 = arith.constant 0 : i32
    %c0_i32_1 = arith.constant 0 : i32
    return %c0_i32, %c0_i32_0 : i32, i32
  }
  func.func @transform_4(%arg0: i32) -> (i32, i32) {
    %c0_i32 = arith.constant 0 : i32
    %c0_i32_0 = arith.constant 0 : i32
    %c0_i32_1 = arith.constant 0 : i32
    return %c0_i32, %c0_i32_0 : i32, i32
  }
  func.func @transform_5(%arg0: i32) -> (i32, i32, i32) {
    %c0_i32 = arith.constant 0 : i32
    %c0_i32_0 = arith.constant 0 : i32
    %c0_i32_1 = arith.constant 0 : i32
    %c0_i32_2 = arith.constant 0 : i32
    return %c0_i32, %c0_i32_0, %c0_i32_1 : i32, i32, i32
  }
  func.func @transform_6(%arg0: i32) -> (i32, i32, i32) {
    %c0_i32 = arith.constant 0 : i32
    %c0_i32_0 = arith.constant 0 : i32
    %c0_i32_1 = arith.constant 0 : i32
    %c0_i32_2 = arith.constant 0 : i32
    return %c0_i32, %c0_i32_0, %c0_i32_1 : i32, i32, i32
  }
  func.func @transform_7(%arg0: i32) -> (i32, i32, i32) {
    %c0_i32 = arith.constant 0 : i32
    %c0_i32_0 = arith.constant 0 : i32
    %c0_i32_1 = arith.constant 0 : i32
    %c0_i32_2 = arith.constant 0 : i32
    return %c0_i32, %c0_i32_0, %c0_i32_1 : i32, i32, i32
  }
  func.func @transform_8(%arg0: i32) -> (i32, i32, i32, i32) {
    %c0_i32 = arith.constant 0 : i32
    %c0_i32_0 = arith.constant 0 : i32
    %c0_i32_1 = arith.constant 0 : i32
    %c0_i32_2 = arith.constant 0 : i32
    %c0_i32_3 = arith.constant 0 : i32
    return %c0_i32, %c0_i32_0, %c0_i32_1, %c0_i32_2 : i32, i32, i32, i32
  }
  func.func @transform_9(%arg0: i32) -> (i32, i32, i32) {
    %c0_i32 = arith.constant 0 : i32
    %c0_i32_0 = arith.constant 0 : i32
    %c0_i32_1 = arith.constant 0 : i32
    %c0_i32_2 = arith.constant 0 : i32
    return %c0_i32, %c0_i32_0, %c0_i32_1 : i32, i32, i32
  }
  func.func @transform_10(%arg0: i32) -> (i32, i32, i32) {
    %c0_i32 = arith.constant 0 : i32
    %c0_i32_0 = arith.constant 0 : i32
    %c0_i32_1 = arith.constant 0 : i32
    %c0_i32_2 = arith.constant 0 : i32
    return %c0_i32, %c0_i32_0, %c0_i32_1 : i32, i32, i32
  }
  func.func @transform_11(%arg0: i32) -> (i32, i32) {
    %c0_i32 = arith.constant 0 : i32
    %c0_i32_0 = arith.constant 0 : i32
    %c0_i32_1 = arith.constant 0 : i32
    return %c0_i32, %c0_i32_0 : i32, i32
  }
  func.func @transform_12(%arg0: i32) -> (i32, i32) {
    %c0_i32 = arith.constant 0 : i32
    %c0_i32_0 = arith.constant 0 : i32
    %c0_i32_1 = arith.constant 0 : i32
    return %c0_i32, %c0_i32_0 : i32, i32
  }
  func.func @transform_13(%arg0: i32) -> (i32, i32) {
    %c0_i32 = arith.constant 0 : i32
    %c0_i32_0 = arith.constant 0 : i32
    %c0_i32_1 = arith.constant 0 : i32
    return %c0_i32, %c0_i32_0 : i32, i32
  }
  func.func @transform_14(%arg0: i32) -> (i32, i32) {
    %c0_i32 = arith.constant 0 : i32
    %c0_i32_0 = arith.constant 0 : i32
    %c0_i32_1 = arith.constant 0 : i32
    return %c0_i32, %c0_i32_0 : i32, i32
  }
  func.func @transform_15(%arg0: i32) -> (i32, i32) {
    %c0_i32 = arith.constant 0 : i32
    %c0_i32_0 = arith.constant 0 : i32
    %c0_i32_1 = arith.constant 0 : i32
    return %c0_i32, %c0_i32_0 : i32, i32
  }
  func.func @transform_16(%arg0: i32) -> (i32, i32) {
    %c0_i32 = arith.constant 0 : i32
    %c0_i32_0 = arith.constant 0 : i32
    %c0_i32_1 = arith.constant 0 : i32
    return %c0_i32, %c0_i32_0 : i32, i32
  }
  func.func @transform_17(%arg0: i32) -> (i32, i32) {
    %c0_i32 = arith.constant 0 : i32
    %c0_i32_0 = arith.constant 0 : i32
    %c0_i32_1 = arith.constant 0 : i32
    return %c0_i32, %c0_i32_0 : i32, i32
  }
  func.func @transform_18(%arg0: i32) -> (i32, i32) {
    %c0_i32 = arith.constant 0 : i32
    %c0_i32_0 = arith.constant 0 : i32
    %c0_i32_1 = arith.constant 0 : i32
    return %c0_i32, %c0_i32_0 : i32, i32
  }
  func.func @transform_19(%arg0: i32) -> (i32, i32) {
    %c0_i32 = arith.constant 0 : i32
    %c0_i32_0 = arith.constant 0 : i32
    %c0_i32_1 = arith.constant 0 : i32
    return %c0_i32, %c0_i32_0 : i32, i32
  }
  func.func @transform_20(%arg0: i32) -> (i32, i32) {
    %c0_i32 = arith.constant 0 : i32
    %c0_i32_0 = arith.constant 0 : i32
    %c0_i32_1 = arith.constant 0 : i32
    return %c0_i32, %c0_i32_0 : i32, i32
  }
  func.func @transform_21(%arg0: i32) -> (i32, i32) {
    %c0_i32 = arith.constant 0 : i32
    %c0_i32_0 = arith.constant 0 : i32
    %c0_i32_1 = arith.constant 0 : i32
    return %c0_i32, %c0_i32_0 : i32, i32
  }
  func.func @transform_22(%arg0: i32) -> (i32, i32) {
    %c0_i32 = arith.constant 0 : i32
    %c0_i32_0 = arith.constant 0 : i32
    %c0_i32_1 = arith.constant 0 : i32
    return %c0_i32, %c0_i32_0 : i32, i32
  }
  func.func @transform_23(%arg0: i32) -> (i32, i32) {
    %c0_i32 = arith.constant 0 : i32
    %c0_i32_0 = arith.constant 0 : i32
    %c0_i32_1 = arith.constant 0 : i32
    return %c0_i32, %c0_i32_0 : i32, i32
  }
  func.func @transform_24(%arg0: i32) -> (i32, i32) {
    %c0_i32 = arith.constant 0 : i32
    %c0_i32_0 = arith.constant 0 : i32
    %c0_i32_1 = arith.constant 0 : i32
    return %c0_i32, %c0_i32_0 : i32, i32
  }
  func.func @transform_25(%arg0: i32) -> (i32, i32) {
    %c0_i32 = arith.constant 0 : i32
    %c0_i32_0 = arith.constant 0 : i32
    %c0_i32_1 = arith.constant 0 : i32
    return %c0_i32, %c0_i32_0 : i32, i32
  }
}

</mosaic_0001>

<bundles_post_ra>
// kernel: fno_gru_net.1
= control target key start
LH: loop header
LB: loop body
LE: loop exit
PB: predicated region body
PF: predicated region fallthrough
CT: control target
= control target key end

     0   :  { %s17573_s0 = inlined_call_operand.vmem [shape: f32[32,4], index: 0, kind: input, shape index: {}]   ;;  %s17574_s1 = inlined_call_operand.vmem [shape: f32[32,64], index: 1, kind: input, shape index: {}]   ;;  %s17575_s2 = inlined_call_operand.hbm [shape: f32[4,64], index: 2, kind: input, shape index: {}]   ;;  %s17576_s3 = inlined_call_operand.vmem [shape: f32[64,32], index: 3, kind: input, shape index: {}]   ;;  %s17577_s4 = inlined_call_operand.hbm [shape: f32[1,32], index: 4, kind: input, shape index: {}]   ;;  %s17578_s5 = inlined_call_operand.vmem [shape: f32[2,16,32], index: 5, kind: input, shape index: {}]   ;;  %s17579_s6 = inlined_call_operand.vmem [shape: f32[2,32,8], index: 6, kind: input, shape index: {}]   ;;  %s17580_s7 = inlined_call_operand.vmem [shape: f32[2,32,8], index: 7, kind: input, shape index: {}]   ;;  %s17581_s8 = inlined_call_operand.hbm [shape: f32[2,8,32,64], index: 8, kind: input, shape index: {}]   ;;  %s17582_s9 = inlined_call_operand.vmem [shape: f32[2,32,32], index: 9, kind: input, shape index: {}]   ;;  %s17583_s10 = inlined_call_operand.hbm [shape: f32[2,1,32], index: 10, kind: input, shape index: {}]   ;;  %s17584_s11 = inlined_call_operand.vmem [shape: f32[32,64], index: 11, kind: input, shape index: {}]   ;;  %s17585_s12 = inlined_call_operand.hbm [shape: f32[1,64], index: 12, kind: input, shape index: {}]   ;;  %s17586_s13 = inlined_call_operand.vmem [shape: f32[64,4], index: 13, kind: input, shape index: {}]   ;;  %s17587_s14 = inlined_call_operand.hbm [shape: f32[1,4], index: 14, kind: input, shape index: {}]   ;;  %s17588_s15 = inlined_call_operand.hbm [shape: f32[4,96], index: 15, kind: input, shape index: {}]   ;;  %s17589_s16 = inlined_call_operand.hbm [shape: f32[1,96], index: 16, kind: input, shape index: {}]   ;;  %s17590_s17 = inlined_call_operand.vmem [shape: f32[32,96], index: 17, kind: input, shape index: {}]   ;;  %s17591_s18 = inlined_call_operand.hbm [shape: f32[1,32], index: 18, kind: input, shape index: {}]   ;;  %s17592_s19 = inlined_call_operand.vmem [shape: f32[32,96], index: 19, kind: input, shape index: {}]   ;;  %s17593_s20 = inlined_call_operand.hbm [shape: f32[1,96], index: 20, kind: input, shape index: {}]   ;;  %s17594_s21 = inlined_call_operand.vmem [shape: f32[32,96], index: 21, kind: input, shape index: {}]   ;;  %s17595_s22 = inlined_call_operand.hbm [shape: f32[1,32], index: 22, kind: input, shape index: {}]   ;;  %s17596_s23 = inlined_call_operand.hbm [shape: f32[32,128], index: 23, kind: input, shape index: {}]   ;;  %s17597_s24 = inlined_call_operand.hbm [shape: f32[1,128], index: 24, kind: input, shape index: {}]   ;;  %s17598_s25 = inlined_call_operand.vmem [shape: f32[32,128], index: 25, kind: output, shape index: {}]  }
   0x1   :  { %17610 = sst [smem:[#allocation31_spill]] %s17573_s0 }
   0x2   :  { %17611 = sst [smem:[#allocation32_spill]] %s17574_s1 }
   0x3   :  { %17612 = sst [smem:[#allocation33_spill]] %s17575_s2 }
   0x4   :  { %17613 = sst [smem:[#allocation34_spill]] %s17576_s3 }
   0x5   :  { %17614 = sst [smem:[#allocation35_spill]] %s17577_s4 }
   0x6   :  { %17615 = sst [smem:[#allocation36_spill]] %s17578_s5 }
   0x7   :  { %17616 = sst [smem:[#allocation37_spill]] %s17579_s6 }
   0x8   :  { %17617 = sst [smem:[#allocation38_spill]] %s17580_s7 }
   0x9   :  { %17618 = sst [smem:[#allocation39_spill]] %s17581_s8 }
   0xa   :  { %17619 = sst [smem:[#allocation40_spill]] %s17582_s9 }
   0xb   :  { %17620 = sst [smem:[#allocation41_spill]] %s17598_s25 }
   0xc   :  { %30 = vsyncpa [#allocation5], 0 }
   0xd   :  { %31 = vsyncpa [#allocation7], 0 }
   0xe   :  { %32 = vsyncpa [#allocation10], 0 }
   0xf   :  { %33 = vsyncpa [#allocation13], 0 }
  0x10   :  { %34 = vsyncpa [#allocation16], 0 }
  0x11   :  { %35 = vsyncpa [#allocation19], 0 }
  0x12   :  { %36 = vsyncpa [#allocation22], 0  ;;  %s15202_s29 = smov [#allocation6]   ;;  %s15203_s6 = smov [#allocation9]  }
  0x13   :  { %s59_s2 = sshll.u32 %s15202_s29, 4  ;;  %s88_s30 = sshll.u32 %s15203_s6, 4  ;;  %s60_s2 = int_to_ptr.vmem [resolvable:$true] %s59_s2  ;;  %s15356_s30 = int_to_ptr.vmem [resolvable:$true] %s88_s30 }
  0x14   :  { %s17621_s26 = sld [smem:[#allocation35_spill]] }
  0x1a   :  { %s14902_s1 = scalar_lea.hbm %s17621_s26, 16 }
  0x1b   :  { %p14903_p0 = scmp.ne.s32.totalorder %s17621_s26, %s14902_s1  ;;  %p14906_p1 = scmp.lt.u32.totalorder %s14902_s1, %s17621_s26 }
  0x1d   :  { %p14908_p2 = pnand %p14906_p1, %p14903_p0 }
  0x1f   :  { %14911 = shalt.err (!%p14908_p2)
}
  0x20   :  { %s14912_s9 = scalar_lea.vmem %s60_s2, 16  ;;  %s14916_s5 = scalar_lea.vmem %s60_s2, 32 }
  0x21   :  { %p14913_p3 = scmp.ne.s32.totalorder %s60_s2, %s14912_s9  ;;  %p14917_p4 = scmp.lt.s32.totalorder %s60_s2, %s60_s2 }
  0x22   :  { %p14918_p5 = scmp.lt.s32.totalorder %s14916_s5, %s14912_s9 }
  0x24   :  { %p14919_p6 = por %p14918_p5, %p14917_p4 }
  0x26   :  { %p14920_p7 = pnand %p14919_p6, %p14913_p3 }
  0x28   :  { %14923 = shalt.err (!%p14920_p7)
}
  0x29   :  { %62 = dma.hbm_to_vmem [thread:$0]  %s17621_s26, 16, %s60_s2, [#allocation7]  }
  0x2a   :  { %s14924_s3 = scalar_lea.hbm %s17583_s10, 32 }
  0x2b   :  { %p14925_p8 = scmp.ne.s32.totalorder %s17583_s10, %s14924_s3  ;;  %p14928_p9 = scmp.lt.u32.totalorder %s14924_s3, %s17583_s10 }
  0x2d   :  { %p14930_p10 = pnand %p14928_p9, %p14925_p8 }
  0x2f   :  { %14933 = shalt.err (!%p14930_p10)
}
  0x30   :  { %s14934_s28 = scalar_lea.vmem %s15356_s30, 32  ;;  %p14939_p12 = scmp.lt.s32.totalorder %s15356_s30, %s15356_s30 }
  0x31   :  { %p14935_p11 = scmp.ne.s32.totalorder %s15356_s30, %s14934_s28  ;;  %p14940_p13 = scmp.lt.s32.totalorder %s14934_s28, %s14934_s28 }
  0x33   :  { %p14941_p0 = por %p14940_p13, %p14939_p12 }
  0x35   :  { %p14942_p1 = pnand %p14941_p0, %p14935_p11 }
  0x37   :  { %14945 = shalt.err (!%p14942_p1)
}
  0x38   :  { %s15204_s2 = smov 16   ;;  %s15205_s26 = smov 1  }
  0x39   :  { %94 = dma.hbm_to_vmem [thread:$0]  %s17583_s10, 32, %s15356_s30, [#allocation10], %s15204_s2, %s15204_s2, %s15205_s26  }
  0x3a   :  { %s15206_s0 = smov [#allocation12]   ;;  %s15207_s6 = smov [#allocation15]  }
  0x3b   :  { %s115_s29 = sshll.u32 %s15206_s0, 4  ;;  %s135_s7 = sshll.u32 %s15207_s6, 4  ;;  %s116_s29 = int_to_ptr.vmem [resolvable:$true] %s115_s29  ;;  %s136_s7 = int_to_ptr.vmem [resolvable:$true] %s135_s7 }
  0x3c   :  { %s14946_s1 = scalar_lea.hbm %s17587_s14, 16 }
  0x3d   :  { %p14947_p2 = scmp.ne.s32.totalorder %s17587_s14, %s14946_s1  ;;  %p14950_p3 = scmp.lt.u32.totalorder %s14946_s1, %s17587_s14 }
  0x3f   :  { %p14952_p4 = pnand %p14950_p3, %p14947_p2 }
  0x41   :  { %14955 = shalt.err (!%p14952_p4)
}
  0x42   :  { %s14956_s10 = scalar_lea.vmem %s116_s29, 16  ;;  %s14960_s30 = scalar_lea.vmem %s116_s29, 32 }
  0x43   :  { %p14957_p5 = scmp.ne.s32.totalorder %s116_s29, %s14956_s10  ;;  %p14961_p6 = scmp.lt.s32.totalorder %s116_s29, %s116_s29 }
  0x44   :  { %p14962_p7 = scmp.lt.s32.totalorder %s14960_s30, %s14956_s10 }
  0x46   :  { %p14963_p8 = por %p14962_p7, %p14961_p6 }
  0x48   :  { %p14964_p9 = pnand %p14963_p8, %p14957_p5 }
  0x4a   :  { %14967 = shalt.err (!%p14964_p9)
}
  0x4b   :  { %118 = dma.hbm_to_vmem [thread:$0]  %s17587_s14, 16, %s116_s29, [#allocation13]  }
  0x4c   :  { %s14968_s0 = scalar_lea.hbm %s17589_s16, 16 }
  0x4d   :  { %p14969_p10 = scmp.ne.s32.totalorder %s17589_s16, %s14968_s0  ;;  %p14972_p11 = scmp.lt.u32.totalorder %s14968_s0, %s17589_s16 }
  0x4f   :  { %p14974_p12 = pnand %p14972_p11, %p14969_p10 }
  0x51   :  { %14977 = shalt.err (!%p14974_p12)
}
  0x52   :  { %s14978_s1 = scalar_lea.vmem %s136_s7, 16  ;;  %s14982_s27 = scalar_lea.vmem %s136_s7, 32 }
  0x53   :  { %p14979_p13 = scmp.ne.s32.totalorder %s136_s7, %s14978_s1  ;;  %p14983_p0 = scmp.lt.s32.totalorder %s136_s7, %s136_s7 }
  0x54   :  { %p14984_p1 = scmp.lt.s32.totalorder %s14982_s27, %s14978_s1 }
  0x56   :  { %p14985_p2 = por %p14984_p1, %p14983_p0 }
  0x58   :  { %p14986_p3 = pnand %p14985_p2, %p14979_p13 }
  0x5a   :  { %14989 = shalt.err (!%p14986_p3)
}
  0x5b   :  { %138 = dma.hbm_to_vmem [thread:$0]  %s17589_s16, 16, %s136_s7, [#allocation16]  }
  0x5c   :  { %s15208_s4 = smov [#allocation18]   ;;  %s14990_s2 = scalar_lea.hbm %s17593_s20, 16 }
  0x5d   :  { %s159_s28 = sshll.u32 %s15208_s4, 4  ;;  %p14991_p4 = scmp.ne.s32.totalorder %s17593_s20, %s14990_s2  ;;  %s160_s28 = int_to_ptr.vmem [resolvable:$true] %s159_s28 }
  0x5e   :  { %p14994_p5 = scmp.lt.u32.totalorder %s14990_s2, %s17593_s20 }
  0x60   :  { %p14996_p6 = pnand %p14994_p5, %p14991_p4 }
  0x62   :  { %14999 = shalt.err (!%p14996_p6)
}
  0x63   :  { %s15000_s25 = scalar_lea.vmem %s160_s28, 16  ;;  %s15004_s16 = scalar_lea.vmem %s160_s28, 32 }
  0x64   :  { %p15001_p7 = scmp.ne.s32.totalorder %s160_s28, %s15000_s25  ;;  %p15005_p8 = scmp.lt.s32.totalorder %s160_s28, %s160_s28 }
  0x65   :  { %p15006_p9 = scmp.lt.s32.totalorder %s15004_s16, %s15000_s25 }
  0x67   :  { %p15007_p10 = por %p15006_p9, %p15005_p8 }
  0x69   :  { %p15008_p11 = pnand %p15007_p10, %p15001_p7 }
  0x6b   :  { %15011 = shalt.err (!%p15008_p11)
}
  0x6c   :  { %162 = dma.hbm_to_vmem [thread:$0]  %s17593_s20, 16, %s160_s28, [#allocation19]  }
  0x6d   :  { %s15209_s3 = smov [#allocation21]   ;;  %s15210_s1 = smov [#allocation4]  }
  0x6e   :  { %s180_s8 = sshll.u32 %s15209_s3, 4  ;;  %s47_s27 = sshll.u32 %s15210_s1, 4  ;;  %s181_s8 = int_to_ptr.vmem [resolvable:$true] %s180_s8  ;;  %s48_s27 = int_to_ptr.vmem [resolvable:$true] %s47_s27 }
  0x6f   :  { %s15012_s4 = scalar_lea.hbm %s17596_s23, 512 }
  0x70   :  { %p15013_p12 = scmp.ne.s32.totalorder %s17596_s23, %s15012_s4  ;;  %p15016_p13 = scmp.lt.u32.totalorder %s15012_s4, %s17596_s23 }
  0x72   :  { %p15018_p0 = pnand %p15016_p13, %p15013_p12 }
  0x74   :  { %15021 = shalt.err (!%p15018_p0)
}
  0x75   :  { %s15022_s20 = scalar_lea.vmem %s181_s8, 512  ;;  %p15027_p2 = scmp.lt.s32.totalorder %s181_s8, %s181_s8 }
  0x76   :  { %p15023_p1 = scmp.ne.s32.totalorder %s181_s8, %s15022_s20  ;;  %p15028_p3 = scmp.lt.s32.totalorder %s15022_s20, %s15022_s20 }
  0x78   :  { %p15029_p4 = por %p15028_p3, %p15027_p2 }
  0x7a   :  { %p15030_p5 = pnand %p15029_p4, %p15023_p1 }
  0x7c   :  { %15033 = shalt.err (!%p15030_p5)
}
  0x7d   :  { %s15211_s28 = smov 128   ;;  %s15212_s9 = smov 8  }
  0x7e   :  { %186 = dma.hbm_to_vmem [thread:$0]  %s17596_s23, 512, %s181_s8, [#allocation22], %s15211_s28, %s15211_s28, %s15212_s9  }
  0x7f   :  { %s17622_s7 = sld [smem:[#allocation33_spill]] }
  0x85   :  { %s15034_s6 = scalar_lea.hbm %s17622_s7, 64 }
  0x86   :  { %p15035_p6 = scmp.ne.s32.totalorder %s17622_s7, %s15034_s6  ;;  %p15038_p7 = scmp.lt.u32.totalorder %s15034_s6, %s17622_s7 }
  0x88   :  { %p15040_p8 = pnand %p15038_p7, %p15035_p6 }
  0x8a   :  { %15043 = shalt.err (!%p15040_p8)
}
  0x8b   :  { %s15044_s4 = scalar_lea.vmem %s48_s27, 64  ;;  %p15049_p10 = scmp.lt.s32.totalorder %s48_s27, %s48_s27 }
  0x8c   :  { %p15045_p9 = scmp.ne.s32.totalorder %s48_s27, %s15044_s4  ;;  %p15050_p11 = scmp.lt.s32.totalorder %s15044_s4, %s15044_s4 }
  0x8e   :  { %p15051_p12 = por %p15050_p11, %p15049_p10 }
  0x90   :  { %p15052_p13 = pnand %p15051_p12, %p15045_p9 }
  0x92   :  { %15055 = shalt.err (!%p15052_p13)
}
  0x93   :  { %50 = dma.hbm_to_vmem [thread:$0]  %s17622_s7, 64, %s48_s27, [#allocation5]  }
  0x94   :  { %s15213_s10 = smov [#allocation8]   ;;  %s15214_s2 = smov [#allocation11]  }
  0x95   :  { %s74_s30 = sshll.u32 %s15213_s10, 4  ;;  %s103_s26 = sshll.u32 %s15214_s2, 4  ;;  %s75_s30 = int_to_ptr.vmem [resolvable:$true] %s74_s30  ;;  %s104_s26 = int_to_ptr.vmem [resolvable:$true] %s103_s26 }
  0x96   :  { %s17623_s0 = sld [smem:[#allocation39_spill]] }
  0x9c   :  { %s15056_s25 = scalar_lea.hbm %s17623_s0, 8192 }
  0x9d   :  { %p15057_p0 = scmp.ne.s32.totalorder %s17623_s0, %s15056_s25  ;;  %p15060_p1 = scmp.lt.u32.totalorder %s15056_s25, %s17623_s0 }
  0x9f   :  { %p15062_p2 = pnand %p15060_p1, %p15057_p0 }
  0xa1   :  { %15065 = shalt.err (!%p15062_p2)
}
  0xa2   :  { %s15066_s27 = scalar_lea.vmem %s75_s30, 8192  ;;  %p15071_p4 = scmp.lt.s32.totalorder %s75_s30, %s75_s30 }
  0xa3   :  { %p15067_p3 = scmp.ne.s32.totalorder %s75_s30, %s15066_s27  ;;  %p15072_p5 = scmp.lt.s32.totalorder %s15066_s27, %s15066_s27 }
  0xa5   :  { %p15073_p6 = por %p15072_p5, %p15071_p4 }
  0xa7   :  { %p15074_p7 = pnand %p15073_p6, %p15067_p3 }
  0xa9   :  { %15077 = shalt.err (!%p15074_p7)
}
  0xaa   :  { %80 = dma.hbm_to_vmem [thread:$0]  %s17623_s0, 8192, %s75_s30, [#allocation7], %s15211_s28, %s15211_s28, %s15212_s9  }
  0xab   :  { %s15078_s23 = scalar_lea.hbm %s17585_s12, 16 }
  0xac   :  { %p15079_p8 = scmp.ne.s32.totalorder %s17585_s12, %s15078_s23  ;;  %p15082_p9 = scmp.lt.u32.totalorder %s15078_s23, %s17585_s12 }
  0xae   :  { %p15084_p10 = pnand %p15082_p9, %p15079_p8 }
  0xb0   :  { %15087 = shalt.err (!%p15084_p10)
}
  0xb1   :  { %s15088_s5 = scalar_lea.vmem %s104_s26, 16  ;;  %s15092_s25 = scalar_lea.vmem %s104_s26, 32 }
  0xb2   :  { %p15089_p11 = scmp.ne.s32.totalorder %s104_s26, %s15088_s5  ;;  %p15093_p12 = scmp.lt.s32.totalorder %s104_s26, %s104_s26 }
  0xb3   :  { %p15094_p13 = scmp.lt.s32.totalorder %s15092_s25, %s15088_s5 }
  0xb5   :  { %p15095_p0 = por %p15094_p13, %p15093_p12 }
  0xb7   :  { %p15096_p1 = pnand %p15095_p0, %p15089_p11 }
  0xb9   :  { %15099 = shalt.err (!%p15096_p1)
}
  0xba   :  { %106 = dma.hbm_to_vmem [thread:$0]  %s17585_s12, 16, %s104_s26, [#allocation10]  }
  0xbb   :  { %s15215_s30 = smov [#allocation14]   ;;  %s15216_s16 = smov [#allocation17]  }
  0xbc   :  { %s125_s0 = sshll.u32 %s15215_s30, 4  ;;  %s147_s6 = sshll.u32 %s15216_s16, 4  ;;  %s126_s0 = int_to_ptr.vmem [resolvable:$true] %s125_s0  ;;  %s148_s6 = int_to_ptr.vmem [resolvable:$true] %s147_s6 }
  0xbd   :  { %s15100_s27 = scalar_lea.hbm %s17588_s15, 64 }
  0xbe   :  { %p15101_p2 = scmp.ne.s32.totalorder %s17588_s15, %s15100_s27  ;;  %p15104_p3 = scmp.lt.u32.totalorder %s15100_s27, %s17588_s15 }
  0xc0   :  { %p15106_p4 = pnand %p15104_p3, %p15101_p2 }
  0xc2   :  { %15109 = shalt.err (!%p15106_p4)
}
  0xc3   :  { %s15110_s12 = scalar_lea.vmem %s126_s0, 64  ;;  %p15115_p6 = scmp.lt.s32.totalorder %s126_s0, %s126_s0 }
  0xc4   :  { %p15111_p5 = scmp.ne.s32.totalorder %s126_s0, %s15110_s12  ;;  %p15116_p7 = scmp.lt.s32.totalorder %s15110_s12, %s15110_s12 }
  0xc6   :  { %p15117_p8 = por %p15116_p7, %p15115_p6 }
  0xc8   :  { %p15118_p9 = pnand %p15117_p8, %p15111_p5 }
  0xca   :  { %15121 = shalt.err (!%p15118_p9)
}
  0xcb   :  { %128 = dma.hbm_to_vmem [thread:$0]  %s17588_s15, 64, %s126_s0, [#allocation13]  }
  0xcc   :  { %s15122_s2 = scalar_lea.hbm %s17591_s18, 16 }
  0xcd   :  { %p15123_p10 = scmp.ne.s32.totalorder %s17591_s18, %s15122_s2  ;;  %p15126_p11 = scmp.lt.u32.totalorder %s15122_s2, %s17591_s18 }
  0xcf   :  { %p15128_p12 = pnand %p15126_p11, %p15123_p10 }
  0xd1   :  { %15131 = shalt.err (!%p15128_p12)
}
  0xd2   :  { %s15132_s9 = scalar_lea.vmem %s148_s6, 16  ;;  %s15136_s30 = scalar_lea.vmem %s148_s6, 32 }
  0xd3   :  { %p15133_p13 = scmp.ne.s32.totalorder %s148_s6, %s15132_s9  ;;  %p15137_p0 = scmp.lt.s32.totalorder %s148_s6, %s148_s6 }
  0xd4   :  { %p15138_p1 = scmp.lt.s32.totalorder %s15136_s30, %s15132_s9 }
  0xd6   :  { %p15139_p2 = por %p15138_p1, %p15137_p0 }
  0xd8   :  { %p15140_p3 = pnand %p15139_p2, %p15133_p13 }
  0xda   :  { %15143 = shalt.err (!%p15140_p3)
}
  0xdb   :  { %150 = dma.hbm_to_vmem [thread:$0]  %s17591_s18, 16, %s148_s6, [#allocation16]  }
  0xdc   :  { %s15217_s16 = smov [#allocation20]   ;;  %s15218_s1 = smov [#allocation23]  }
  0xdd   :  { %s171_s3 = sshll.u32 %s15217_s16, 4  ;;  %s193_s27 = sshll.u32 %s15218_s1, 4  ;;  %s172_s3 = int_to_ptr.vmem [resolvable:$true] %s171_s3  ;;  %s194_s27 = int_to_ptr.vmem [resolvable:$true] %s193_s27 }
  0xde   :  { %s15144_s29 = scalar_lea.hbm %s17595_s22, 16 }
  0xdf   :  { %p15145_p4 = scmp.ne.s32.totalorder %s17595_s22, %s15144_s29  ;;  %p15148_p5 = scmp.lt.u32.totalorder %s15144_s29, %s17595_s22 }
  0xe1   :  { %p15150_p6 = pnand %p15148_p5, %p15145_p4 }
  0xe3   :  { %15153 = shalt.err (!%p15150_p6)
}
  0xe4   :  { %s15154_s18 = scalar_lea.vmem %s172_s3, 16  ;;  %s15158_s6 = scalar_lea.vmem %s172_s3, 32 }
  0xe5   :  { %p15155_p7 = scmp.ne.s32.totalorder %s172_s3, %s15154_s18  ;;  %p15159_p8 = scmp.lt.s32.totalorder %s172_s3, %s172_s3 }
  0xe6   :  { %p15160_p9 = scmp.lt.s32.totalorder %s15158_s6, %s15154_s18 }
  0xe8   :  { %p15161_p10 = por %p15160_p9, %p15159_p8 }
  0xea   :  { %p15162_p11 = pnand %p15161_p10, %p15155_p7 }
  0xec   :  { %15165 = shalt.err (!%p15162_p11)
}
  0xed   :  { %174 = dma.hbm_to_vmem [thread:$0]  %s17595_s22, 16, %s172_s3, [#allocation19]  }
  0xee   :  { %s15166_s5 = scalar_lea.hbm %s17597_s24, 16 }
  0xef   :  { %p15167_p12 = scmp.ne.s32.totalorder %s17597_s24, %s15166_s5  ;;  %p15170_p13 = scmp.lt.u32.totalorder %s15166_s5, %s17597_s24 }
  0xf1   :  { %p15172_p0 = pnand %p15170_p13, %p15167_p12 }
  0xf3   :  { %15175 = shalt.err (!%p15172_p0)
}
  0xf4   :  { %s15176_s15 = scalar_lea.vmem %s194_s27, 16  ;;  %s15180_s0 = scalar_lea.vmem %s194_s27, 32 }
  0xf5   :  { %p15177_p1 = scmp.ne.s32.totalorder %s194_s27, %s15176_s15  ;;  %p15181_p2 = scmp.lt.s32.totalorder %s194_s27, %s194_s27 }
  0xf6   :  { %p15182_p3 = scmp.lt.s32.totalorder %s15180_s0, %s15176_s15 }
  0xf8   :  { %p15183_p4 = por %p15182_p3, %p15181_p2 }
  0xfa   :  { %p15184_p5 = pnand %p15183_p4, %p15177_p1 }
  0xfc   :  { %15187 = shalt.err (!%p15184_p5)
}
  0xfd   :  { %196 = dma.hbm_to_vmem [thread:$0]  %s17597_s24, 16, %s194_s27, [#allocation22]  }
  0xfe   :  { %15188 = dma.done.wait [#allocation5], 64  }
  0xff   :  { %15189 = vsyncadd [#allocation5], 4294967232 }
 0x100   :  { %15190 = dma.done.wait [#allocation7], 8208  }
 0x101   :  { %15191 = vsyncadd [#allocation7], 4294959088 }
 0x102   :  { %15192 = dma.done.wait [#allocation10], 48  }
 0x103   :  { %15193 = vsyncadd [#allocation10], 4294967248 }
 0x104   :  { %15194 = dma.done.wait [#allocation13], 80  }
 0x105   :  { %15195 = vsyncadd [#allocation13], 4294967216 }
 0x106   :  { %15196 = dma.done.wait [#allocation16], 32  }
 0x107   :  { %15197 = vsyncadd [#allocation16], 4294967264 }
 0x108   :  { %15198 = dma.done.wait [#allocation19], 32  }
 0x109   :  { %15199 = vsyncadd [#allocation19], 4294967264 }
 0x10a   :  { %15200 = dma.done.wait [#allocation22], 528  }
 0x10b   :  { %15201 = vsyncadd [#allocation22], 4294966768  ;;  %vm258_vm0 = vcmask 1043456   ;;  %vm245_vm1 = vcmask 31744   ;;  %v240_v0 = vld [vmem:[#allocation4] sm:$0xf] }
 0x10c   :  { %s17624_s24 = sld [smem:[#allocation31_spill]]  ;;  %12613 = vmatprep.subr.msk.mxu1 %vm258_vm0, %v240_v0  ;;  %s17625_s18 = sld [smem:[#allocation34_spill]]  ;;  %vm470_vm5 = vcmask 523264   ;;  %vm623_vm7 = vcmask 261120   ;;  %vm15220_vm8 = vmmov 0   ;;  %vm2038_vm9 = vcmask 1041409  }
 0x10d   :  { %12614 = vmatpush3.msk.msra.mxu1 %vm258_vm0, %v240_v0  ;;  %s15223_s25 = smov 32   ;;  %s15224_s28 = smov 96   ;;  %vm2041_vm10 = vcmask 1042434   ;;  %vm2044_vm11 = vcmask 1043459   ;;  %vm2047_vm12 = vcmask 1044484   ;;  %vm2050_vm13 = vcmask 1045509  }
 0x10e   :  { %s17628_s15 = sld [smem:[#allocation38_spill]]  ;;  %vm2061_vm14 = vcmask 64512   ;;  %vm2053_vm15 = vcmask 1046534   ;;  %s17629_s14 = sld [smem:[#allocation37_spill]] }
 0x10f   :  { %s17631_s10 = sld [smem:[#allocation41_spill]] }
 0x112   :  { %v236_v1 = vld [vmem:[%s17624_s24] sm:$0xff]  ;;  %v237_v2 = vld [vmem:[%s17624_s24 + $0x8] sm:$0xff]  ;;  %v238_v3 = vld [vmem:[%s17624_s24 + $0x10] sm:$0xff] }
 0x113   :  { %12615 = vmatprep.mubr.msk.f32.mxu1 %vm245_vm1, %v236_v1  ;;  %v239_v4 = vld [vmem:[%s17624_s24 + $0x18] sm:$0xff]  ;;  %v455_v5 = vld [vmem:[%s17625_s18] sm:$0xff]  ;;  %v456_v6 = vld [vmem:[%s17625_s18 + $0x8] sm:$0xff]  ;;  %s17626_s24 = sld [smem:[#allocation32_spill]] }
 0x114   :  { %12616 = vmatmul.mubr.msk.f32.vlgmr.msra.gmra.mrb[0].mxu1 %vm245_vm1, %v237_v2  ;;  %v13907_v7 = vpack.c.bf16 %v456_v6, %v455_v5  ;;  %v457_v8 = vld [vmem:[%s17625_s18 + $0x10] sm:$0xff]  ;;  %v458_v9 = vld [vmem:[%s17625_s18 + $0x18] sm:$0xff]  ;;  %v459_v11 = vld [vmem:[%s17625_s18 + $0x20] sm:$0xff] }
 0x115   :  { %12618 = vmatprep.mubr.msk.f32.mxu1 %vm245_vm1, %v238_v3  ;;  %v13911_v10 = vpack.c.bf16 %v458_v9, %v457_v8  ;;  %v460_v12 = vld [vmem:[%s17625_s18 + $0x28] sm:$0xff]  ;;  %v461_v14 = vld [vmem:[%s17625_s18 + $0x30] sm:$0xff]  ;;  %v462_v15 = vld [vmem:[%s17625_s18 + $0x38] sm:$0xff]  ;;  %s17627_s18 = sld [smem:[#allocation36_spill]] }
 0x116   :  { %13908 = vmatprep.subr.bf16.mxu1 %v13907_v7  ;;  %v13915_v13 = vpack.c.bf16 %v460_v12, %v459_v11  ;;  %v13919_v16 = vpack.c.bf16 %v462_v15, %v461_v14 }
 0x117   :  { %13910 = vmatpush3.bf16.msra.mxu1 %v13907_v7 }
 0x118   :  { %12619 = vmatmul.mubr.msk.f32.gmra.mrb[2].mxu1 %vm245_vm1, %v239_v4  ;;  %13912 = vmatprep.subr.bf16.mxu1 %v13911_v10 }
 0x119   :  { %v242_v17 = vld [vmem:[%s17626_s24 + $0x8] sm:$0xff]  ;;  %v241_v18 = vld [vmem:[%s17626_s24] sm:$0xff]  ;;  %v244_v23 = vld [vmem:[%s17626_s24 + $0x18] sm:$0xff] }
 0x11a   :  { %v243_v25 = vld [vmem:[%s17626_s24 + $0x10] sm:$0xff]  ;;  %s17630_s24 = sld [smem:[#allocation40_spill]] }
 0x11b   :  { %13914 = vmatpush3.bf16.msra.mxu1 %v13911_v10 }
 0x11c   :  { %13916 = vmatprep.subr.bf16.mxu1 %v13915_v13 }
 0x11f   :  { %13918 = vmatpush3.bf16.msra.mxu1 %v13915_v13 }
 0x120   :  { %13920 = vmatprep.subr.bf16.mxu1 %v13919_v16 }
 0x123   :  { %13922 = vmatpush3.bf16.msra.mxu1 %v13919_v16 }
 0x1e7   :  { %v12617_v19 = vpop.f32.mrb[0].mxu1 }
 0x1e8   :  { %v15573_v20 = vadd.f32 %v12617_v19, %v242_v17  ;;  %v328_v21 = vpop.f32.mrb[1].mxu1 }
 0x1e9   :  { %v15575_v22 = vadd.f32 %v328_v21, %v241_v18 }
 0x1ea   :  { %v15581_v24 = vmul.f32 0.70710677, %v15573_v20 }
 0x1eb   :  { %v15587_v26 = vmul.f32 0.70710677, %v15575_v22  ;;  %v12620_v27 = vpop.f32.mrb[2].mxu1 }
 0x1ec   :  { %v356_v28 = vand.u32 2147483647, %v15581_v24  ;;  %v15590_v29 = vadd.f32 %v12620_v27, %v244_v23  ;;  %v338_v30 = vpop.f32.mrb[3].mxu1  ;;  %vm436_vm2 = vcmp.ge.f32.partialorder %v15581_v24, 0.0 }
 0x1ed   :  { %v355_v31 = vand.u32 2147483647, %v15587_v26  ;;  %v15593_v32 = vadd.f32 %v338_v30, %v243_v25  ;;  %vm435_vm3 = vcmp.ge.f32.partialorder %v15587_v26, 0.0 }
 0x1ee   :  { %v360_v33 = vmul.f32 0.3275911, %v356_v28  ;;  %v15596_v34 = vmul.f32 0.70710677, %v15590_v29  ;;  %v412_v45 = vsub.f32 0.0, %v356_v28 }
 0x1ef   :  { %v359_v35 = vmul.f32 0.3275911, %v355_v31  ;;  %v15599_v36 = vmul.f32 0.70710677, %v15593_v32  ;;  %v411_v46 = vsub.f32 0.0, %v355_v31 }
 0x1f0   :  { %v364_v37 = vadd.f32 1.0, %v360_v33  ;;  %v358_v38 = vand.u32 2147483647, %v15596_v34  ;;  %v416_v48 = vmul.f32 %v412_v45, %v356_v28  ;;  %vm438_vm4 = vcmp.ge.f32.partialorder %v15596_v34, 0.0 }
 0x1f1   :  { %v363_v39 = vadd.f32 1.0, %v359_v35  ;;  %v357_v40 = vand.u32 2147483647, %v15599_v36  ;;  %v415_v52 = vmul.f32 %v411_v46, %v355_v31  ;;  %vm437_vm6 = vcmp.ge.f32.partialorder %v15599_v36, 0.0  ;;  %v15618_v36 = vld [vmem:[%s17627_s18] sm:$0xff] }
 0x1f2   :  { %14643 = vrcp.f32 %v364_v37  ;;  %v362_v41 = vmul.f32 0.3275911, %v358_v38  ;;  %v414_v49 = vsub.f32 0.0, %v358_v38  ;;  %v421_v57 = vmul.f32 1.442695, %v416_v48  ;;  %12651 = vmatprep.mubr.msk.f32.mxu0 %vm623_vm7, %v15618_v36 }
 0x1f3   :  { %14645 = vrcp.f32 %v363_v39  ;;  %v361_v42 = vmul.f32 0.3275911, %v357_v40  ;;  %v413_v53 = vsub.f32 0.0, %v357_v40  ;;  %v419_v62 = vmul.f32 1.442695, %v415_v52 }
 0x1f4   :  { %v366_v43 = vadd.f32 1.0, %v362_v41  ;;  %v418_v59 = vmul.f32 %v414_v49, %v358_v38 }
 0x1f5   :  { %v365_v44 = vadd.f32 1.0, %v361_v42  ;;  %v417_v0 = vmul.f32 %v413_v53, %v357_v40 }
 0x1f6   :  { %14647 = vrcp.f32 %v366_v43  ;;  %v425_v6 = vmul.f32 1.442695, %v418_v59  ;;  %v347_v59 = vmul.f32 0.5, %v15575_v22  ;;  %v350_v22 = vmul.f32 0.5, %v15590_v29  ;;  %v11804_v29 = vld [vmem:[#allocation6] ss:$0 sm:$0xff] }
 0x1f7   :  { %14649 = vrcp.f32 %v365_v44  ;;  %v423_v10 = vmul.f32 1.442695, %v417_v0 }
 0x1f8   :  { %14651 = vpow2.f32 %v421_v57 }
 0x1f9   :  { %14653 = vpow2.f32 %v419_v62 }
 0x1fa   :  { %14655 = vpow2.f32 %v425_v6 }
 0x1fb   :  { %14657 = vpow2.f32 %v423_v10 }
 0x1fc   :  { %v14644_v47 = vpop.eup %14643 }
 0x1fd   :  { %v14646_v50 = vpop.eup %14645  ;;  %v376_v51 = vmul.f32 1.0614054, %v14644_v47 }
 0x1fe   :  { %v375_v54 = vmul.f32 1.0614054, %v14646_v50 }
 0x1ff   :  { %v380_v55 = vadd.f32 -1.4531521, %v376_v51 }
 0x200   :  { %v14648_v56 = vpop.eup %14647  ;;  %v379_v58 = vadd.f32 -1.4531521, %v375_v54 }
 0x201   :  { %v14650_v60 = vpop.eup %14649  ;;  %v384_v61 = vmul.f32 %v14644_v47, %v380_v55  ;;  %v378_v63 = vmul.f32 1.0614054, %v14648_v56 }
 0x202   :  { %v383_v1 = vmul.f32 %v14646_v50, %v379_v58  ;;  %v377_v2 = vmul.f32 1.0614054, %v14650_v60  ;;  %v14652_v33 = vpop.eup %14651 }
 0x203   :  { %v388_v3 = vadd.f32 1.4214138, %v384_v61  ;;  %v382_v4 = vadd.f32 -1.4531521, %v378_v63  ;;  %v14654_v38 = vpop.eup %14653 }
 0x204   :  { %v387_v5 = vadd.f32 1.4214138, %v383_v1  ;;  %v381_v7 = vadd.f32 -1.4531521, %v377_v2  ;;  %v14656_v45 = vpop.eup %14655  ;;  %v349_v2 = vmul.f32 0.5, %v15593_v32  ;;  %v15219_v32 = vmov 0.0|0.0  }
 0x205   :  { %v392_v8 = vmul.f32 %v14644_v47, %v388_v3  ;;  %v386_v9 = vmul.f32 %v14648_v56, %v382_v4  ;;  %v14658_v49 = vpop.eup %14657  ;;  %13937 = vmatprep.subr.bf16.mxu1 %v15219_v32 }
 0x206   :  { %v391_v11 = vmul.f32 %v14646_v50, %v387_v5  ;;  %v385_v12 = vmul.f32 %v14650_v60, %v381_v7 }
 0x207   :  { %v396_v13 = vadd.f32 -0.28449672, %v392_v8  ;;  %v390_v14 = vadd.f32 1.4214138, %v386_v9 }
 0x208   :  { %v395_v15 = vadd.f32 -0.28449672, %v391_v11  ;;  %v389_v16 = vadd.f32 1.4214138, %v385_v12 }
 0x209   :  { %v400_v17 = vmul.f32 %v14644_v47, %v396_v13  ;;  %v394_v18 = vmul.f32 %v14648_v56, %v390_v14  ;;  %v591_v14 = vld [vmem:[#allocation8] sm:$0xff] }
 0x20a   :  { %v399_v19 = vmul.f32 %v14646_v50, %v395_v15  ;;  %v393_v21 = vmul.f32 %v14650_v60, %v389_v16  ;;  %v592_v15 = vld [vmem:[#allocation8 + $0x8] sm:$0xff] }
 0x20b   :  { %v404_v23 = vadd.f32 0.2548296, %v400_v17  ;;  %v398_v25 = vadd.f32 -0.28449672, %v394_v18  ;;  %v569_v16 = vld [vmem:[%s17627_s18 + $0x8] sm:$0xff]  ;;  %v15646_v17 = vpack.c.bf16 %v592_v15, %v591_v14 }
 0x20c   :  { %v403_v27 = vadd.f32 0.2548296, %v399_v19  ;;  %v397_v28 = vadd.f32 -0.28449672, %v393_v21  ;;  %v595_v18 = vld [vmem:[#allocation8 + $0x20] sm:$0xff]  ;;  %v596_v19 = vld [vmem:[#allocation8 + $0x28] sm:$0xff] }
 0x20d   :  { %v408_v30 = vmul.f32 %v14644_v47, %v404_v23  ;;  %v402_v31 = vmul.f32 %v14648_v56, %v398_v25  ;;  %v15652_v21 = vpack.c.bf16 %v596_v19, %v595_v18  ;;  %v593_v23 = vld [vmem:[#allocation8 + $0x10] sm:$0xff]  ;;  %v594_v25 = vld [vmem:[#allocation8 + $0x18] sm:$0xff]  ;;  %v619_v15 = vld [vmem:[#allocation8 + $0xe0] sm:$0xff] }
 0x20e   :  { %v407_v35 = vmul.f32 %v14646_v50, %v403_v27  ;;  %v401_v37 = vmul.f32 %v14650_v60, %v397_v28  ;;  %v15655_v27 = vpack.c.bf16 %v594_v25, %v593_v23  ;;  %v597_v28 = vld [vmem:[#allocation8 + $0x30] sm:$0xff]  ;;  %v618_v25 = vld [vmem:[#allocation8 + $0xd8] sm:$0xff] }
 0x20f   :  { %v428_v39 = vmul.f32 %v14652_v33, %v408_v30  ;;  %v406_v40 = vadd.f32 0.2548296, %v402_v31  ;;  %v598_v30 = vld [vmem:[#allocation8 + $0x38] sm:$0xff]  ;;  %v15221_v33 = vmov 0.0   ;;  %v617_v23 = vld [vmem:[#allocation8 + $0xd0] sm:$0xff] }
 0x210   :  { %v427_v41 = vmul.f32 %v14654_v38, %v407_v35  ;;  %v405_v42 = vadd.f32 0.2548296, %v401_v37  ;;  %v15659_v31 = vpack.c.bf16 %v598_v30, %v597_v28  ;;  %v15222_v35 = vmov 1966171168  }
 0x211   :  { %v432_v43 = vsub.f32 1.0, %v428_v39  ;;  %v410_v44 = vmul.f32 %v14648_v56, %v406_v40  ;;  %v708_v37 = vunpack.c.l.s4 %v15222_v35  ;;  %v710_v38 = vlaneseq  ;;  %v621_v35 = vld [vmem:[#allocation8 + $0xf0] sm:$0xff] }
 0x212   :  { %v431_v46 = vsub.f32 1.0, %v427_v41  ;;  %v409_v48 = vmul.f32 %v14650_v60, %v405_v42  ;;  %v348_v60 = vmul.f32 0.5, %v15573_v20 }
 0x213   :  { %v440_v51 = vsub.f32 0.0, %v432_v43  ;;  %v430_v52 = vmul.f32 %v14656_v45, %v410_v44  ;;  %v709_v39 = vunpack.c.0.s8 %v708_v37  ;;  %v711_v40 = vshrl.u32 %v710_v38, 7  ;;  %v600_v44 = vld [vmem:[#allocation8 + $0x48] sm:$0xff]  ;;  %v622_v37 = vld [vmem:[#allocation8 + $0xf8] sm:$0xff] }
 0x214   :  { %v439_v47 = vsub.f32 0.0, %v431_v46  ;;  %v429_v53 = vmul.f32 %v14658_v49, %v409_v48  ;;  %v603_v48 = vld [vmem:[#allocation8 + $0x60] sm:$0xff]  ;;  %v604_v49 = vld [vmem:[#allocation8 + $0x68] sm:$0xff]  ;;  %v15728_v38 = vpack.c.bf16 %v618_v25, %v617_v23 }
 0x215   :  { %v444_v54 = vsel %vm436_vm2, %v432_v43, %v440_v51  ;;  %v434_v50 = vsub.f32 1.0, %v430_v52  ;;  %v15668_v41 = vsub.s32 %v709_v39, %v711_v40  ;;  %v599_v43 = vld [vmem:[#allocation8 + $0x40] sm:$0xff]  ;;  %v15735_v39 = vpack.c.bf16 %v622_v37, %v621_v35 }
 0x216   :  { %v448_v55 = vadd.f32 1.0, %v444_v54  ;;  %v443_v57 = vsel %vm435_vm3, %v431_v46, %v439_v47  ;;  %v433_v58 = vsub.f32 1.0, %v429_v53  ;;  %v15673_v51 = vpack.c.bf16 %v600_v44, %v599_v43  ;;  %v601_v53 = vld [vmem:[#allocation8 + $0x50] sm:$0xff]  ;;  %v602_v54 = vld [vmem:[#allocation8 + $0x58] sm:$0xff] }
 0x217   :  { %v447_v56 = vadd.f32 1.0, %v443_v57  ;;  %v442_v61 = vsub.f32 0.0, %v434_v50  ;;  %v605_v57 = vld [vmem:[#allocation8 + $0x70] sm:$0xff]  ;;  %vm2056_vm2 = vcmask 1047559  }
 0x218   :  { %v441_v62 = vsub.f32 0.0, %v433_v58  ;;  %v452_v0 = vmul.f32 %v448_v55, %v348_v60 }
 0x219   :  { %v451_v24 = vmul.f32 %v447_v56, %v347_v59  ;;  %v446_v63 = vsel %vm438_vm4, %v434_v50, %v442_v61  ;;  %v15676_v50 = vpack.c.bf16 %v604_v49, %v603_v48  ;;  %v15681_v59 = vpack.c.bf16 %v602_v54, %v601_v53  ;;  %v607_v56 = vld [vmem:[#allocation8 + $0x80] sm:$0xff]  ;;  %v608_v61 = vld [vmem:[#allocation8 + $0x88] sm:$0xff] }
 0x21a   :  { %v450_v26 = vadd.f32 1.0, %v446_v63  ;;  %v445_v1 = vsel %vm437_vm6, %v433_v58, %v441_v62  ;;  %v606_v58 = vld [vmem:[#allocation8 + $0x78] sm:$0xff]  ;;  %v612_v63 = vld [vmem:[#allocation8 + $0xa8] sm:$0xff] }
 0x21b   :  { %v449_v3 = vadd.f32 1.0, %v445_v1  ;;  %12637 = vmatprep.mubr.msk.f32.mxu1 %vm470_vm5, %v451_v24  ;;  %v15688_v60 = vpack.c.bf16 %v606_v58, %v605_v57  ;;  %v611_v24 = vld [vmem:[#allocation8 + $0xa0] sm:$0xff]  ;;  %v609_v1 = vld [vmem:[#allocation8 + $0x90] sm:$0xff] }
 0x21c   :  { %12638 = vmatmul.mubr.msk.f32.vlgmr.msra.gmra.mrb[4].mxu1 %vm470_vm5, %v452_v0  ;;  %v454_v34 = vmul.f32 %v450_v26, %v350_v22  ;;  %v15694_v0 = vpack.c.bf16 %v608_v61, %v607_v56  ;;  %v11809_v56 = vld [vmem:[%s17627_s18 + $0x10] sm:$0xff]  ;;  %v11810_v61 = vld [vmem:[%s17627_s18 + $0x18] sm:$0xff] }
 0x21d   :  { %v453_v20 = vmul.f32 %v449_v3, %v349_v2  ;;  %13939 = vmatpush3.bf16.msra.mxu1 %v15652_v21  ;;  %v610_v2 = vld [vmem:[#allocation8 + $0x98] sm:$0xff]  ;;  %v15698_v3 = vpack.c.bf16 %v612_v63, %v611_v24 }
 0x21e   :  { %13940 = vmatprep.subr.bf16.mxu1 %v15219_v32 }
 0x21f   :  { %12640 = vmatprep.mubr.msk.f32.mxu1 %vm470_vm5, %v453_v20 }
 0x220   :  { %12641 = vmatmul.mubr.msk.f32.gmra.mrb[6].mxu1 %vm470_vm5, %v454_v34  ;;  %v613_v34 = vld [vmem:[#allocation8 + $0xb0] sm:$0xff] }
 0x221   :  { %13942 = vmatpush3.bf16.msra.mxu1 %v15659_v31  ;;  %12673 = vmatprep.mubr.msk.f32.mxu1 %vm15220_vm8, %v15221_v33 }
 0x222   :  { %13949 = vmatprep.subr.bf16.mxu1 %v15219_v32 }
 0x2ef   :  { %v12639_v4 = vpop.f32.mrb[4].mxu1 }
 0x2f0   :  { %v15623_v5 = vadd.f32 %v12639_v4, %v11804_v29  ;;  %v549_v6 = vpop.f32.mrb[5].mxu1  ;;  %v15704_v4 = vpack.c.bf16 %v610_v2, %v609_v1 }
 0x2f1   :  { %v15625_v7 = vadd.f32 %v11804_v29, %v549_v6  ;;  %v615_v6 = vld [vmem:[#allocation8 + $0xc0] sm:$0xff] }
 0x2f3   :  { %v15629_v8 = vpack.c.bf16 %v15623_v5, %v15625_v7  ;;  %v12642_v9 = vpop.f32.mrb[6].mxu1 }
 0x2f4   :  { %v15631_v10 = vadd.f32 %v12642_v9, %v11804_v29  ;;  %v559_v11 = vpop.f32.mrb[7].mxu1  ;;  %v616_v9 = vld [vmem:[#allocation8 + $0xc8] sm:$0xff] }
 0x2f5   :  { %v15633_v12 = vadd.f32 %v11804_v29, %v559_v11  ;;  %13924 = vmatprep.subr.bf16.mxu0 %v15629_v8  ;;  %v614_v29 = vld [vmem:[#allocation8 + $0xb8] sm:$0xff]  ;;  %v15717_v18 = vpack.c.bf16 %v616_v9, %v615_v6 }
 0x2f6   :  { %13926 = vmatpush3.bf16.msra.mxu0 %v15629_v8  ;;  %v15711_v11 = vpack.c.bf16 %v614_v29, %v613_v34 }
 0x2f7   :  { %v15639_v13 = vpack.c.bf16 %v15631_v10, %v15633_v12 }
 0x2f9   :  { %13928 = vmatprep.subr.bf16.mxu0 %v15639_v13 }
 0x2fa   :  { %13930 = vmatpush3.bf16.msra.mxu0 %v15639_v13 }
 0x2fb   :  { %13931 = vmatprep.subr.bf16.mxu0 %v15219_v32 }
 0x2fd   :  { %12652 = vmatmul.mubr.msk.f32.vlgmr.msra.gmra.mrb[0].mxu0 %vm623_vm7, %v569_v16  ;;  %v620_v16 = vld [vmem:[#allocation8 + $0xe8] sm:$0xff] }
 0x2fe   :  { %13933 = vmatpush3.bf16.msra.mxu0 %v15646_v17  ;;  %12662 = vmatprep.mubr.msk.f32.mxu0 %vm15220_vm8, %v15221_v33  ;;  %v15722_v28 = vpack.c.bf16 %v620_v16, %v619_v15 }
 0x2ff   :  { %13934 = vmatprep.subr.bf16.mxu0 %v15219_v32 }
 0x302   :  { %13936 = vmatpush3.bf16.msra.mxu0 %v15655_v27 }
 0x303   :  { %13943 = vmatprep.subr.bf16.mxu0 %v15219_v32 }
 0x3d0   :  { %v15670_v42 = vpop.f32.mrb[0].mxu0 }
 0x3d1   :  { %v696_v45 = vpop.f32.mrb[1].mxu0  ;;  %v763_v43 = vrot.slane %v15670_v42, %v15668_v41  ;;  %v756_v49 = vcombine.high %v15670_v42, %v15670_v42 }
 0x3d2   :  { %v713_v46 = vrot.slane %v696_v45, %v15668_v41  ;;  %v706_v62 = vcombine.high %v696_v45, %v696_v45 }
 0x3d3   :  { %v771_v45 = vcombine.high %v763_v43, %v763_v43 }
 0x3d4   :  { %v721_v52 = vcombine.high %v713_v46, %v713_v46  ;;  %v729_v47 = vrot.slane %v713_v46, %v15668_v41  ;;  %v720_v22 = vrot.slane %v706_v62, %v15668_v41  ;;  %v779_v46 = vrot.slane %v763_v43, %v15668_v41 }
 0x3d5   :  { %v793_v48 = vrot.slane %v771_v45, %v15668_v41 }
 0x3d6   :  { %v743_v55 = vrot.slane %v721_v52, %v15668_v41  ;;  %12663 = vmatmul.mubr.msk.f32.vlgmr.msra.gmra.mrb[2].mxu0 %vm623_vm7, %v729_v47  ;;  %v751_v26 = vcombine.high %v729_v47, %v729_v47  ;;  %v722_v14 = vcombine.high %v720_v22, %v720_v22  ;;  %v736_v19 = vrot.slane %v720_v22, %v15668_v41 }
 0x3d7   :  { %13945 = vmatpush3.bf16.msra.mxu0 %v15673_v51  ;;  %12684 = vmatprep.mubr.msk.f32.mxu0 %vm15220_vm8, %v15221_v33  ;;  %v801_v52 = vcombine.high %v779_v46, %v779_v46  ;;  %v770_v47 = vrot.slane %v756_v49, %v15668_v41  ;;  %v803_v53 = vcombine.high %v793_v48, %v793_v48 }
 0x3d8   :  { %12674 = vmatmul.mubr.msk.f32.vlgmr.msra.gmra.mrb[8].mxu1 %vm623_vm7, %v743_v55  ;;  %13946 = vmatprep.subr.bf16.mxu0 %v15219_v32  ;;  %v753_v20 = vcombine.high %v743_v55, %v743_v55  ;;  %v750_v30 = vrot.slane %v722_v14, %v15668_v41  ;;  %v752_v40 = vcombine.high %v736_v19, %v736_v19 }
 0x3d9   :  { %13951 = vmatpush3.bf16.msra.mxu1 %v15676_v50  ;;  %12695 = vmatprep.mubr.msk.f32.mxu1 %vm15220_vm8, %v15221_v33  ;;  %v772_v42 = vcombine.high %v770_v47, %v770_v47  ;;  %v786_v54 = vrot.slane %v770_v47, %v15668_v41 }
 0x3da   :  { %13952 = vmatprep.subr.bf16.mxu1 %v15219_v32  ;;  %v754_v44 = vcombine.high %v750_v30, %v750_v30 }
 0x3db   :  { %13948 = vmatpush3.bf16.msra.mxu0 %v15681_v59  ;;  %v800_v55 = vrot.slane %v772_v42, %v15668_v41  ;;  %v802_v57 = vcombine.high %v786_v54, %v786_v54 }
 0x3dc   :  { %13955 = vmatprep.subr.bf16.mxu0 %v15219_v32 }
 0x3dd   :  { %13954 = vmatpush3.bf16.msra.mxu1 %v15688_v60  ;;  %v804_v58 = vcombine.high %v800_v55, %v800_v55 }
 0x3de   :  { %12685 = vmatmul.mubr.msk.f32.vlgmr.msra.gmra.mrb[4].mxu0 %vm623_vm7, %v751_v26  ;;  %13961 = vmatprep.subr.bf16.mxu1 %v15219_v32 }
 0x3df   :  { %13957 = vmatpush3.bf16.msra.mxu0 %v15694_v0  ;;  %12706 = vmatprep.mubr.msk.f32.mxu0 %vm15220_vm8, %v15221_v33 }
 0x3e0   :  { %12696 = vmatmul.mubr.msk.f32.vlgmr.msra.gmra.mrb[10].mxu1 %vm623_vm7, %v753_v20  ;;  %13958 = vmatprep.subr.bf16.mxu0 %v15219_v32 }
 0x3e1   :  { %13963 = vmatpush3.bf16.msra.mxu1 %v15698_v3  ;;  %12717 = vmatprep.mubr.msk.f32.mxu1 %vm15220_vm8, %v15221_v33 }
 0x3e2   :  { %13964 = vmatprep.subr.bf16.mxu1 %v15219_v32 }
 0x3e3   :  { %13960 = vmatpush3.bf16.msra.mxu0 %v15704_v4 }
 0x3e4   :  { %13967 = vmatprep.subr.bf16.mxu0 %v15219_v32 }
 0x3e5   :  { %13966 = vmatpush3.bf16.msra.mxu1 %v15711_v11 }
 0x3e6   :  { %12707 = vmatmul.mubr.msk.f32.vlgmr.msra.gmra.mrb[6].mxu0 %vm623_vm7, %v736_v19  ;;  %13973 = vmatprep.subr.bf16.mxu1 %v15219_v32 }
 0x3e7   :  { %13969 = vmatpush3.bf16.msra.mxu0 %v15717_v18  ;;  %12728 = vmatprep.mubr.msk.f32.mxu0 %vm15220_vm8, %v15221_v33 }
 0x3e8   :  { %12718 = vmatmul.mubr.msk.f32.vlgmr.msra.gmra.mrb[12].mxu1 %vm623_vm7, %v750_v30  ;;  %13970 = vmatprep.subr.bf16.mxu0 %v15219_v32 }
 0x3e9   :  { %13975 = vmatpush3.bf16.msra.mxu1 %v15722_v28  ;;  %12739 = vmatprep.mubr.msk.f32.mxu1 %vm15220_vm8, %v15221_v33 }
 0x3ea   :  { %13976 = vmatprep.subr.bf16.mxu1 %v15219_v32 }
 0x3eb   :  { %13972 = vmatpush3.bf16.msra.mxu0 %v15728_v38 }
 0x3ec   :  { %13979 = vmatprep.subr.bf16.mxu0 %v15219_v32 }
 0x3ed   :  { %13978 = vmatpush3.bf16.msra.mxu1 %v15735_v39 }
 0x3ee   :  { %12729 = vmatmul.mubr.msk.f32.vlgmr.msra.gmra.mrb[8].mxu0 %vm623_vm7, %v752_v40  ;;  %13985 = vmatprep.subr.bf16.mxu1 %v15219_v32 }
 0x3ef   :  { %13981 = vmatpush3.bf16.msra.mxu0 %v15646_v17  ;;  %12750 = vmatprep.mubr.msk.f32.mxu0 %vm15220_vm8, %v15221_v33 }
 0x3f0   :  { %12740 = vmatmul.mubr.msk.f32.vlgmr.msra.gmra.mrb[14].mxu1 %vm623_vm7, %v754_v44  ;;  %13982 = vmatprep.subr.bf16.mxu0 %v15219_v32 }
 0x3f1   :  { %13987 = vmatpush3.bf16.msra.mxu1 %v15652_v21  ;;  %12761 = vmatprep.mubr.msk.f32.mxu1 %vm15220_vm8, %v15221_v33 }
 0x3f2   :  { %13988 = vmatprep.subr.bf16.mxu1 %v15219_v32 }
 0x3f3   :  { %13984 = vmatpush3.bf16.msra.mxu0 %v15655_v27 }
 0x3f4   :  { %13991 = vmatprep.subr.bf16.mxu0 %v15219_v32 }
 0x3f5   :  { %13990 = vmatpush3.bf16.msra.mxu1 %v15659_v31 }
 0x3f6   :  { %12751 = vmatmul.mubr.msk.f32.vlgmr.msra.gmra.mrb[10].mxu0 %vm623_vm7, %v779_v46  ;;  %13997 = vmatprep.subr.bf16.mxu1 %v15219_v32 }
 0x3f7   :  { %13993 = vmatpush3.bf16.msra.mxu0 %v15673_v51  ;;  %12772 = vmatprep.mubr.msk.f32.mxu0 %vm15220_vm8, %v15221_v33 }
 0x3f8   :  { %12762 = vmatmul.mubr.msk.f32.vlgmr.msra.gmra.mrb[16].mxu1 %vm623_vm7, %v793_v48  ;;  %13994 = vmatprep.subr.bf16.mxu0 %v15219_v32 }
 0x3f9   :  { %13999 = vmatpush3.bf16.msra.mxu1 %v15676_v50  ;;  %12783 = vmatprep.mubr.msk.f32.mxu1 %vm15220_vm8, %v15221_v33 }
 0x3fa   :  { %14000 = vmatprep.subr.bf16.mxu1 %v15219_v32 }
 0x3fb   :  { %13996 = vmatpush3.bf16.msra.mxu0 %v15681_v59 }
 0x3fc   :  { %14003 = vmatprep.subr.bf16.mxu0 %v15219_v32 }
 0x3fd   :  { %14002 = vmatpush3.bf16.msra.mxu1 %v15688_v60 }
 0x3fe   :  { %12773 = vmatmul.mubr.msk.f32.vlgmr.msra.gmra.mrb[12].mxu0 %vm623_vm7, %v801_v52  ;;  %14009 = vmatprep.subr.bf16.mxu1 %v15219_v32 }
 0x3ff   :  { %14005 = vmatpush3.bf16.msra.mxu0 %v15694_v0  ;;  %12794 = vmatprep.mubr.msk.f32.mxu0 %vm15220_vm8, %v15221_v33 }
 0x400   :  { %12784 = vmatmul.mubr.msk.f32.vlgmr.msra.gmra.mrb[18].mxu1 %vm623_vm7, %v803_v53  ;;  %14006 = vmatprep.subr.bf16.mxu0 %v15219_v32 }
 0x401   :  { %14011 = vmatpush3.bf16.msra.mxu1 %v15698_v3  ;;  %12805 = vmatprep.mubr.msk.f32.mxu1 %vm15220_vm8, %v15221_v33 }
 0x402   :  { %14012 = vmatprep.subr.bf16.mxu1 %v15219_v32 }
 0x403   :  { %14008 = vmatpush3.bf16.msra.mxu0 %v15704_v4 }
 0x404   :  { %14015 = vmatprep.subr.bf16.mxu0 %v15219_v32 }
 0x405   :  { %14014 = vmatpush3.bf16.msra.mxu1 %v15711_v11 }
 0x406   :  { %12795 = vmatmul.mubr.msk.f32.vlgmr.msra.gmra.mrb[14].mxu0 %vm623_vm7, %v786_v54  ;;  %14021 = vmatprep.subr.bf16.mxu1 %v15219_v32 }
 0x407   :  { %14017 = vmatpush3.bf16.msra.mxu0 %v15717_v18  ;;  %12816 = vmatprep.mubr.msk.f32.mxu0 %vm15220_vm8, %v15221_v33 }
 0x408   :  { %12806 = vmatmul.mubr.msk.f32.vlgmr.msra.gmra.mrb[20].mxu1 %vm623_vm7, %v800_v55  ;;  %14018 = vmatprep.subr.bf16.mxu0 %v15219_v32 }
 0x409   :  { %14023 = vmatpush3.bf16.msra.mxu1 %v15722_v28  ;;  %12827 = vmatprep.mubr.msk.f32.mxu1 %vm15220_vm8, %v15221_v33 }
 0x40a   :  { %14024 = vmatprep.subr.bf16.mxu1 %v15219_v32 }
 0x40b   :  { %14020 = vmatpush3.bf16.msra.mxu0 %v15728_v38 }
 0x40d   :  { %14026 = vmatpush3.bf16.msra.mxu1 %v15735_v39 }
 0x40e   :  { %12817 = vmatmul.mubr.msk.f32.vlgmr.msra.gmra.mrb[16].mxu0 %vm623_vm7, %v802_v57  ;;  %14028 = vmatprep.subr.bf16.mxu1 %v15629_v8 }
 0x410   :  { %12828 = vmatmul.mubr.msk.f32.vlgmr.msra.gmra.mrb[22].mxu1 %vm623_vm7, %v804_v58 }
 0x411   :  { %14030 = vmatpush3.bf16.msra.mxu1 %v15629_v8  ;;  %12854 = vmatprep.mubr.msk.f32.mxu1 %vm623_vm7, %v11809_v56 }
 0x412   :  { %14032 = vmatprep.subr.bf16.mxu1 %v15639_v13 }
 0x415   :  { %14034 = vmatpush3.bf16.msra.mxu1 %v15639_v13 }
 0x416   :  { %14041 = vmatprep.subr.bf16.mxu1 %v15219_v32 }
 0x418   :  { %12855 = vmatmul.mubr.msk.f32.vlgmr.msra.gmra.mrb[24].mxu1 %vm623_vm7, %v11810_v61 }
 0x419   :  { %14043 = vmatpush3.bf16.msra.mxu1 %v15652_v21  ;;  %12876 = vmatprep.mubr.msk.f32.mxu1 %vm15220_vm8, %v15221_v33 }
 0x41a   :  { %14044 = vmatprep.subr.bf16.mxu1 %v15219_v32 }
 0x41d   :  { %14046 = vmatpush3.bf16.msra.mxu1 %v15659_v31 }
 0x41e   :  { %14053 = vmatprep.subr.bf16.mxu1 %v15219_v32 }
 0x4a9   :  { %v15828_v8 = vpop.f32.mrb[2].mxu0 }
 0x4aa   :  { %v12664_v13 = vpop.f32.mrb[3].mxu0 }
 0x4ab   :  { %v15830_v62 = vpop.f32.mrb[8].mxu1 }
 0x4ac   :  { %v12675_v24 = vpop.f32.mrb[9].mxu1 }
 0x4b1   :  { %v15832_v63 = vpop.f32.mrb[4].mxu0 }
 0x4b2   :  { %v12686_v26 = vpop.f32.mrb[5].mxu0 }
 0x4b3   :  { %v15834_v1 = vpop.f32.mrb[10].mxu1 }
 0x4b4   :  { %v12697_v2 = vpop.f32.mrb[11].mxu1 }
 0x4b9   :  { %v15836_v22 = vpop.f32.mrb[6].mxu0 }
 0x4ba   :  { %v12708_v20 = vpop.f32.mrb[7].mxu0 }
 0x4bb   :  { %v15838_v34 = vpop.f32.mrb[12].mxu1 }
 0x4bc   :  { %v12719_v29 = vpop.f32.mrb[13].mxu1 }
 0x4c1   :  { %v15840_v6 = vpop.f32.mrb[8].mxu0 }
 0x4c2   :  { %v12730_v9 = vpop.f32.mrb[9].mxu0 }
 0x4c3   :  { %v15842_v14 = vpop.f32.mrb[14].mxu1 }
 0x4c4   :  { %v12741_v15 = vpop.f32.mrb[15].mxu1 }
 0x4c9   :  { %v1449_v16 = vpop.f32.mrb[10].mxu0 }
 0x4ca   :  { %1997 = vrot.lane.b32.xlu1 %v1449_v16, %s15223_s25  ;;  %v12752_v19 = vpop.f32.mrb[11].mxu0 }
 0x4cb   :  { %v1521_v23 = vpop.f32.mrb[16].mxu1 }
 0x4cc   :  { %1999 = vrot.lane.b32.xlu0 %v1521_v23, %s15223_s25  ;;  %v12763_v25 = vpop.f32.mrb[17].mxu1 }
 0x4d1   :  { %v1593_v30 = vpop.f32.mrb[12].mxu0 }
 0x4d2   :  { %v12774_v35 = vpop.f32.mrb[13].mxu0  ;;  %2001 = vrot.lane.b32.xlu0 %v1593_v30, %s15223_s25 }
 0x4d3   :  { %v1665_v37 = vpop.f32.mrb[18].mxu1 }
 0x4d4   :  { %2003 = vrot.lane.b32.xlu1 %v1665_v37, %s15223_s25  ;;  %v12785_v40 = vpop.f32.mrb[19].mxu1 }
 0x4d9   :  { %v1737_v43 = vpop.f32.mrb[14].mxu0 }
 0x4da   :  { %v12796_v44 = vpop.f32.mrb[15].mxu0  ;;  %2005 = vrot.lane.b32.xlu0 %v1737_v43, %s15223_s25 }
 0x4db   :  { %v1809_v45 = vpop.f32.mrb[20].mxu1 }
 0x4dc   :  { %2007 = vrot.lane.b32.xlu1 %v1809_v45, %s15223_s25  ;;  %v12807_v46 = vpop.f32.mrb[21].mxu1 }
 0x4e1   :  { %v1881_v48 = vpop.f32.mrb[16].mxu0 }
 0x4e2   :  { %v12818_v49 = vpop.f32.mrb[17].mxu0  ;;  %2009 = vrot.lane.b32.xlu0 %v1881_v48, %s15223_s25 }
 0x4e3   :  { %v15851_v52 = vpop.f32.mrb[22].mxu1 }
 0x4e4   :  { %2011 = vrot.lane.b32.xlu1 %v15851_v52, %s15223_s25  ;;  %v12829_v47 = vpop.f32.mrb[23].mxu1 }
 0x4e5   :  { %v582_v47 = vld [vmem:[%s17628_s15] sm:$0xff] }
 0x4e6   :  { %1967 = vrot.lane.b32.xlu0 %v1521_v23, %s15224_s28  ;;  %12832 = vmatprep.mubr.msk.f32.mxu0 %vm2061_vm14, %v582_v47 }
 0x4e8   :  { %1969 = vrot.lane.b32.xlu1 %v1593_v30, %s15224_s28 }
 0x4ea   :  { %1965 = vrot.lane.b32.xlu0 %v1449_v16, %s15224_s28 }
 0x4eb   :  { %v12856_v53 = vpop.f32.mrb[24].mxu1 }
 0x4ec   :  { %1971 = vrot.lane.b32.xlu1 %v1665_v37, %s15224_s28  ;;  %v2351_v42 = vpop.f32.mrb[25].mxu1  ;;  %v15894_v26 = vrot.slane %v12856_v53, %v15668_v41  ;;  %v2411_v9 = vcombine.high %v12856_v53, %v12856_v53 }
 0x4ed   :  { %v15860_v54 = vrot.slane %v2351_v42, %v15668_v41  ;;  %v2361_v58 = vcombine.high %v2351_v42, %v2351_v42 }
 0x4ee   :  { %1973 = vrot.lane.b32.xlu0 %v1737_v43, %s15224_s28  ;;  %v2426_v20 = vcombine.high %v15894_v26, %v15894_v26 }
 0x4ef   :  { %v2376_v55 = vcombine.high %v15860_v54, %v15860_v54  ;;  %v15874_v56 = vrot.slane %v2361_v58, %v15668_v41 }
 0x4f0   :  { %1975 = vrot.lane.b32.xlu1 %v1809_v45, %s15224_s28  ;;  %v2448_v29 = vrot.slane %v2426_v20, %v15668_v41 }
 0x4f1   :  { %v2398_v57 = vrot.slane %v2376_v55, %v15668_v41  ;;  %v2377_v13 = vcombine.high %v15874_v56, %v15874_v56 }
 0x4f2   :  { %v2458_v15 = vcombine.high %v2448_v29, %v2448_v29 }
 0x4f3   :  { %12877 = vmatmul.mubr.msk.f32.vlgmr.msra.gmra.mrb[26].mxu1 %vm623_vm7, %v2398_v57  ;;  %v2408_v61 = vcombine.high %v2398_v57, %v2398_v57  ;;  %v2405_v24 = vrot.slane %v2377_v13, %v15668_v41 }
 0x4f4   :  { %1977 = vrot.lane.b32.xlu1 %v1881_v48, %s15224_s28  ;;  %14055 = vmatpush3.bf16.msra.mxu1 %v15676_v50 }
 0x4f5   :  { %14056 = vmatprep.subr.bf16.mxu1 %v15219_v32  ;;  %12898 = vmatprep.mubr.msk.f32.mxu1 %vm15220_vm8, %v15221_v33  ;;  %v2409_v2 = vcombine.high %v2405_v24, %v2405_v24 }
 0x4f8   :  { %14058 = vmatpush3.bf16.msra.mxu1 %v15688_v60 }
 0x4f9   :  { %14065 = vmatprep.subr.bf16.mxu1 %v15219_v32 }
 0x4fb   :  { %12899 = vmatmul.mubr.msk.f32.vlgmr.msra.gmra.mrb[28].mxu1 %vm623_vm7, %v2408_v61 }
 0x4fc   :  { %14067 = vmatpush3.bf16.msra.mxu1 %v15698_v3  ;;  %12920 = vmatprep.mubr.msk.f32.mxu1 %vm15220_vm8, %v15221_v33 }
 0x4fd   :  { %14068 = vmatprep.subr.bf16.mxu1 %v15219_v32 }
 0x500   :  { %14070 = vmatpush3.bf16.msra.mxu1 %v15711_v11 }
 0x501   :  { %14077 = vmatprep.subr.bf16.mxu1 %v15219_v32 }
 0x503   :  { %12921 = vmatmul.mubr.msk.f32.vlgmr.msra.gmra.mrb[30].mxu1 %vm623_vm7, %v2405_v24 }
 0x504   :  { %14079 = vmatpush3.bf16.msra.mxu1 %v15722_v28  ;;  %12942 = vmatprep.mubr.msk.f32.mxu1 %vm15220_vm8, %v15221_v33 }
 0x505   :  { %14080 = vmatprep.subr.bf16.mxu1 %v15219_v32 }
 0x508   :  { %14082 = vmatpush3.bf16.msra.mxu1 %v15735_v39 }
 0x509   :  { %14089 = vmatprep.subr.bf16.mxu1 %v15219_v32 }
 0x50b   :  { %12943 = vmatmul.mubr.msk.f32.vlgmr.msra.gmra.mrb[32].mxu1 %vm623_vm7, %v2409_v2 }
 0x50c   :  { %14091 = vmatpush3.bf16.msra.mxu1 %v15652_v21  ;;  %12964 = vmatprep.mubr.msk.f32.mxu1 %vm15220_vm8, %v15221_v33  ;;  %v15914_v21 = vrot.slane %v2411_v9, %v15668_v41 }
 0x50d   :  { %14092 = vmatprep.subr.bf16.mxu1 %v15219_v32 }
 0x510   :  { %14094 = vmatpush3.bf16.msra.mxu1 %v15659_v31  ;;  %v2427_v31 = vcombine.high %v15914_v21, %v15914_v21 }
 0x511   :  { %14101 = vmatprep.subr.bf16.mxu1 %v15219_v32 }
 0x513   :  { %12965 = vmatmul.mubr.msk.f32.vlgmr.msra.gmra.mrb[34].mxu1 %vm623_vm7, %v2448_v29 }
 0x514   :  { %14103 = vmatpush3.bf16.msra.mxu1 %v15676_v50  ;;  %12986 = vmatprep.mubr.msk.f32.mxu1 %vm15220_vm8, %v15221_v33  ;;  %v2455_v50 = vrot.slane %v2427_v31, %v15668_v41 }
 0x515   :  { %14104 = vmatprep.subr.bf16.mxu1 %v15219_v32 }
 0x518   :  { %14106 = vmatpush3.bf16.msra.mxu1 %v15688_v60  ;;  %v2459_v60 = vcombine.high %v2455_v50, %v2455_v50 }
 0x519   :  { %14113 = vmatprep.subr.bf16.mxu1 %v15219_v32 }
 0x51b   :  { %12987 = vmatmul.mubr.msk.f32.vlgmr.msra.gmra.mrb[36].mxu1 %vm623_vm7, %v2458_v15 }
 0x51c   :  { %14115 = vmatpush3.bf16.msra.mxu1 %v15698_v3  ;;  %13008 = vmatprep.mubr.msk.f32.mxu1 %vm15220_vm8, %v15221_v33 }
 0x51d   :  { %14116 = vmatprep.subr.bf16.mxu1 %v15219_v32 }
 0x520   :  { %14118 = vmatpush3.bf16.msra.mxu1 %v15711_v11 }
 0x521   :  { %14125 = vmatprep.subr.bf16.mxu1 %v15219_v32 }
 0x523   :  { %13009 = vmatmul.mubr.msk.f32.vlgmr.msra.gmra.mrb[38].mxu1 %vm623_vm7, %v2455_v50 }
 0x524   :  { %14127 = vmatpush3.bf16.msra.mxu1 %v15722_v28  ;;  %13030 = vmatprep.mubr.msk.f32.mxu1 %vm15220_vm8, %v15221_v33 }
 0x525   :  { %14128 = vmatprep.subr.bf16.mxu1 %v15219_v32 }
 0x528   :  { %14130 = vmatpush3.bf16.msra.mxu1 %v15735_v39 }
 0x52b   :  { %13031 = vmatmul.mubr.msk.f32.vlgmr.msra.gmra.mrb[40].mxu1 %vm623_vm7, %v2459_v60 }
 0x52c   :  { %13071 = vmatprep.mubr.msk.f32.mxu1 %vm623_vm7, %v15618_v36 }
 0x53c   :  { %v1998_v3 = vpop.permute.xlu1 %1997 }
 0x53d   :  { %v2021_v28 = vadd.f32 %v1998_v3, %v15828_v8 }
 0x53e   :  { %v2000_v11 = vpop.permute.xlu0 %1999 }
 0x53f   :  { %v2022_v16 = vadd.f32 %v2000_v11, %v15830_v62 }
 0x541   :  { %v2037_v19 = vrot.slane %v2022_v16, 7 }
 0x543   :  { %v2039_v23 = vsel %vm2038_vm9, %v2037_v19, %v2021_v28 }
 0x544   :  { %v2002_v25 = vpop.permute.xlu0 %2001 }
 0x545   :  { %v2023_v30 = vadd.f32 %v2002_v25, %v15832_v63 }
 0x546   :  { %v2004_v39 = vpop.permute.xlu1 %2003 }
 0x547   :  { %v2040_v35 = vrot.slane %v2023_v30, 6  ;;  %v2024_v37 = vadd.f32 %v2004_v39, %v15834_v1 }
 0x549   :  { %v2042_v36 = vsel %vm2041_vm10, %v2040_v35, %v2039_v23  ;;  %v2043_v40 = vrot.slane %v2024_v37, 5 }
 0x54b   :  { %v2045_v43 = vsel %vm2044_vm11, %v2043_v40, %v2042_v36 }
 0x54c   :  { %v2006_v44 = vpop.permute.xlu0 %2005 }
 0x54d   :  { %v2025_v45 = vadd.f32 %v2006_v44, %v15836_v22 }
 0x54e   :  { %v2008_v46 = vpop.permute.xlu1 %2007 }
 0x54f   :  { %v2046_v48 = vrot.slane %v2025_v45, 4  ;;  %v2026_v49 = vadd.f32 %v2008_v46, %v15838_v34 }
 0x551   :  { %v2048_v53 = vsel %vm2047_vm12, %v2046_v48, %v2045_v43  ;;  %v2049_v42 = vrot.slane %v2026_v49, 3  ;;  %v583_v49 = vld [vmem:[%s17628_s15 + $0x8] sm:$0xff] }
 0x553   :  { %v2051_v55 = vsel %vm2050_vm13, %v2049_v42, %v2048_v53  ;;  %v585_v42 = vld [vmem:[%s17628_s15 + $0x18] sm:$0xff] }
 0x554   :  { %v2010_v57 = vpop.permute.xlu0 %2009 }
 0x555   :  { %v2027_v58 = vadd.f32 %v2010_v57, %v15840_v6  ;;  %v573_v57 = vld [vmem:[%s17629_s14] sm:$0xff] }
 0x556   :  { %v2012_v61 = vpop.permute.xlu1 %2011 }
 0x557   :  { %v2052_v13 = vrot.slane %v2027_v58, 2  ;;  %v2028_v24 = vadd.f32 %v2012_v61, %v15842_v14 }
 0x558   :  { %v1968_v2 = vpop.permute.xlu0 %1967 }
 0x559   :  { %v2055_v20 = vrot.slane %v2028_v24, 1  ;;  %v1990_v29 = vsub.f32 %v15830_v62, %v1968_v2  ;;  %v2054_v9 = vsel %vm2053_vm15, %v2052_v13, %v2051_v55  ;;  %v574_v24 = vld [vmem:[%s17629_s14 + $0x8] sm:$0xff] }
 0x55a   :  { %v1970_v15 = vpop.permute.xlu1 %1969 }
 0x55b   :  { %v1991_v31 = vsub.f32 %v15832_v63, %v1970_v15  ;;  %v2057_v50 = vsel %vm2056_vm2, %v2055_v20, %v2054_v9  ;;  %v2167_v3 = vrot.slane %v1990_v29, 7  ;;  %v576_v20 = vld [vmem:[%s17629_s14 + $0x18] sm:$0xff]  ;;  %v2384_v29 = vrot.slane %v15860_v54, %v15668_v41 }
 0x55c   :  { %v1966_v60 = vpop.permute.xlu0 %1965  ;;  %2058 = vrot.lane.b32.xlu0 %v2057_v50, %s15224_s28 }
 0x55d   :  { %v2169_v11 = vrot.slane %v1991_v31, 6  ;;  %v1989_v16 = vsub.f32 %v15828_v8, %v1966_v60  ;;  %v2406_v50 = vcombine.high %v2384_v29, %v2384_v29 }
 0x55e   :  { %v1972_v28 = vpop.permute.xlu1 %1971 }
 0x55f   :  { %v2168_v19 = vsel %vm2038_vm9, %v2167_v3, %v1989_v16  ;;  %v1992_v23 = vsub.f32 %v15834_v1, %v1972_v28 }
 0x560   :  { %v2170_v62 = vsel %vm2041_vm10, %v2169_v11, %v2168_v19  ;;  %v1974_v25 = vpop.permute.xlu0 %1973  ;;  %1979 = vrot.lane.b32.xlu0 %v15851_v52, %s15224_s28  ;;  %v2391_v11 = vrot.slane %v15874_v56, %v15668_v41  ;;  %v2434_v56 = vrot.slane %v15894_v26, %v15668_v41 }
 0x561   :  { %v2171_v63 = vrot.slane %v1992_v23, 5  ;;  %v1993_v30 = vsub.f32 %v15836_v22, %v1974_v25 }
 0x562   :  { %v1976_v39 = vpop.permute.xlu1 %1975  ;;  %v2407_v16 = vcombine.high %v2391_v11, %v2391_v11 }
 0x563   :  { %v2172_v35 = vsel %vm2044_vm11, %v2171_v63, %v2170_v62  ;;  %v2173_v37 = vrot.slane %v1993_v30, 4  ;;  %v1994_v8 = vsub.f32 %v15838_v34, %v1976_v39 }
 0x565   :  { %v2174_v36 = vsel %vm2047_vm12, %v2173_v37, %v2172_v35  ;;  %v2175_v40 = vrot.slane %v1994_v8, 3 }
 0x566   :  { %v1978_v43 = vpop.permute.xlu1 %1977 }
 0x567   :  { %v1995_v1 = vsub.f32 %v15840_v6, %v1978_v43  ;;  %v2176_v44 = vsel %vm2050_vm13, %v2175_v40, %v2174_v36  ;;  %v584_v6 = vld [vmem:[%s17628_s15 + $0x10] sm:$0xff]  ;;  %v11811_v43 = vld [vmem:[%s17629_s14 + $0x20] sm:$0xff] }
 0x569   :  { %v2177_v45 = vrot.slane %v1995_v1, 2 }
 0x56b   :  { %v2178_v52 = vsel %vm2053_vm15, %v2177_v45, %v2176_v44 }
 0x5c6   :  { %v15972_v46 = vpop.f32.mrb[26].mxu1 }
 0x5c7   :  { %v12878_v22 = vpop.f32.mrb[27].mxu1 }
 0x5ce   :  { %v2059_v48 = vpop.permute.xlu0 %2058  ;;  %v15977_v34 = vpop.f32.mrb[28].mxu1 }
 0x5cf   :  { %12830 = vmatprep.subr.mxu0 %v2059_v48  ;;  %v12900_v47 = vpop.f32.mrb[29].mxu1 }
 0x5d0   :  { %12831 = vmatpush3.msra.mxu0 %v2059_v48 }
 0x5d1   :  { %12833 = vmatmul.mubr.msk.f32.vlgmr.msra.gmra.mrb[18].mxu0 %vm2061_vm14, %v583_v49 }
 0x5d2   :  { %v1980_v53 = vpop.permute.xlu0 %1979  ;;  %12835 = vmatprep.mubr.msk.f32.mxu0 %vm2061_vm14, %v584_v6 }
 0x5d3   :  { %v1996_v55 = vsub.f32 %v15842_v14, %v1980_v53  ;;  %v575_v14 = vld [vmem:[%s17629_s14 + $0x10] sm:$0xff] }
 0x5d5   :  { %v2179_v58 = vrot.slane %v1996_v55, 1  ;;  %12836 = vmatmul.mubr.msk.f32.gmra.mrb[20].mxu0 %vm2061_vm14, %v585_v42 }
 0x5d6   :  { %12840 = vmatprep.mubr.msk.f32.mxu0 %vm2061_vm14, %v573_v57  ;;  %v15993_v61 = vpop.f32.mrb[30].mxu1 }
 0x5d7   :  { %v2180_v13 = vsel %vm2056_vm2, %v2179_v58, %v2178_v52  ;;  %v12922_v2 = vpop.f32.mrb[31].mxu1 }
 0x5d8   :  { %12838 = vmatprep.subr.mxu0 %v2180_v13 }
 0x5d9   :  { %12839 = vmatpush3.msra.mxu0 %v2180_v13 }
 0x5da   :  { %12841 = vmatmul.mubr.msk.f32.vlgmr.msra.gmra.mrb[18].mxu0 %vm2061_vm14, %v574_v24  ;;  %14035 = vmatprep.subr.bf16.mxu0 %v15219_v32 }
 0x5db   :  { %14037 = vmatpush3.bf16.msra.mxu0 %v15646_v17  ;;  %12843 = vmatprep.mubr.msk.f32.mxu0 %vm2061_vm14, %v575_v14 }
 0x5dc   :  { %14038 = vmatprep.subr.bf16.mxu0 %v15219_v32 }
 0x5de   :  { %12844 = vmatmul.mubr.msk.f32.gmra.mrb[20].mxu0 %vm2061_vm14, %v576_v20  ;;  %v16013_v9 = vpop.f32.mrb[32].mxu1 }
 0x5df   :  { %14040 = vmatpush3.bf16.msra.mxu0 %v15655_v27  ;;  %12865 = vmatprep.mubr.msk.f32.mxu0 %vm15220_vm8, %v15221_v33  ;;  %v12944_v15 = vpop.f32.mrb[33].mxu1 }
 0x5e0   :  { %14047 = vmatprep.subr.bf16.mxu0 %v15219_v32 }
 0x5e2   :  { %12866 = vmatmul.mubr.msk.f32.vlgmr.msra.gmra.mrb[22].mxu0 %vm623_vm7, %v2384_v29 }
 0x5e3   :  { %14049 = vmatpush3.bf16.msra.mxu0 %v15673_v51  ;;  %12887 = vmatprep.mubr.msk.f32.mxu0 %vm15220_vm8, %v15221_v33 }
 0x5e4   :  { %14050 = vmatprep.subr.bf16.mxu0 %v15219_v32 }
 0x5e6   :  { %v16024_v54 = vpop.f32.mrb[34].mxu1 }
 0x5e7   :  { %14052 = vmatpush3.bf16.msra.mxu0 %v15681_v59  ;;  %3654 = vrot.lane.b32.xlu1 %v16024_v54, %s15223_s25  ;;  %v12966_v31 = vpop.f32.mrb[35].mxu1 }
 0x5e8   :  { %14059 = vmatprep.subr.bf16.mxu0 %v15219_v32 }
 0x5ea   :  { %12888 = vmatmul.mubr.msk.f32.vlgmr.msra.gmra.mrb[24].mxu0 %vm623_vm7, %v2406_v50 }
 0x5eb   :  { %14061 = vmatpush3.bf16.msra.mxu0 %v15694_v0  ;;  %12909 = vmatprep.mubr.msk.f32.mxu0 %vm15220_vm8, %v15221_v33 }
 0x5ec   :  { %14062 = vmatprep.subr.bf16.mxu0 %v15219_v32 }
 0x5ee   :  { %v16035_v60 = vpop.f32.mrb[36].mxu1 }
 0x5ef   :  { %14064 = vmatpush3.bf16.msra.mxu0 %v15704_v4  ;;  %3658 = vrot.lane.b32.xlu0 %v16035_v60, %s15223_s25  ;;  %v12988_v3 = vpop.f32.mrb[37].mxu1 }
 0x5f0   :  { %14071 = vmatprep.subr.bf16.mxu0 %v15219_v32 }
 0x5f2   :  { %12910 = vmatmul.mubr.msk.f32.vlgmr.msra.gmra.mrb[26].mxu0 %vm623_vm7, %v2391_v11 }
 0x5f3   :  { %14073 = vmatpush3.bf16.msra.mxu0 %v15717_v18  ;;  %12931 = vmatprep.mubr.msk.f32.mxu0 %vm15220_vm8, %v15221_v33 }
 0x5f4   :  { %14074 = vmatprep.subr.bf16.mxu0 %v15219_v32 }
 0x5f7   :  { %14076 = vmatpush3.bf16.msra.mxu0 %v15728_v38 }
 0x5f8   :  { %14083 = vmatprep.subr.bf16.mxu0 %v15219_v32 }
 0x5fa   :  { %12932 = vmatmul.mubr.msk.f32.vlgmr.msra.gmra.mrb[28].mxu0 %vm623_vm7, %v2407_v16 }
 0x5fb   :  { %14085 = vmatpush3.bf16.msra.mxu0 %v15646_v17  ;;  %12953 = vmatprep.mubr.msk.f32.mxu0 %vm15220_vm8, %v15221_v33  ;;  %v2456_v17 = vcombine.high %v2434_v56, %v2434_v56 }
 0x5fc   :  { %14086 = vmatprep.subr.bf16.mxu0 %v15219_v32 }
 0x5ff   :  { %14088 = vmatpush3.bf16.msra.mxu0 %v15655_v27  ;;  %v2441_v27 = vrot.slane %v15914_v21, %v15668_v41 }
 0x600   :  { %14095 = vmatprep.subr.bf16.mxu0 %v15219_v32 }
 0x602   :  { %12954 = vmatmul.mubr.msk.f32.vlgmr.msra.gmra.mrb[30].mxu0 %vm623_vm7, %v2434_v56 }
 0x603   :  { %14097 = vmatpush3.bf16.msra.mxu0 %v15673_v51  ;;  %12975 = vmatprep.mubr.msk.f32.mxu0 %vm15220_vm8, %v15221_v33  ;;  %v2457_v51 = vcombine.high %v2441_v27, %v2441_v27 }
 0x604   :  { %14098 = vmatprep.subr.bf16.mxu0 %v15219_v32 }
 0x607   :  { %14100 = vmatpush3.bf16.msra.mxu0 %v15681_v59  ;;  %v3464_v59 = vpop.f32.mrb[38].mxu1 }
 0x608   :  { %14107 = vmatprep.subr.bf16.mxu0 %v15219_v32 }
 0x60a   :  { %12976 = vmatmul.mubr.msk.f32.vlgmr.msra.gmra.mrb[32].mxu0 %vm623_vm7, %v2456_v17 }
 0x60b   :  { %14109 = vmatpush3.bf16.msra.mxu0 %v15694_v0  ;;  %12997 = vmatprep.mubr.msk.f32.mxu0 %vm15220_vm8, %v15221_v33  ;;  %v13010_v0 = vpop.f32.mrb[39].mxu1 }
 0x60c   :  { %14110 = vmatprep.subr.bf16.mxu0 %v15219_v32 }
 0x60f   :  { %14112 = vmatpush3.bf16.msra.mxu0 %v15704_v4  ;;  %v3608_v4 = vpop.f32.mrb[40].mxu1 }
 0x610   :  { %14119 = vmatprep.subr.bf16.mxu0 %v15219_v32  ;;  %v13032_v26 = vpop.f32.mrb[41].mxu1 }
 0x612   :  { %12998 = vmatmul.mubr.msk.f32.vlgmr.msra.gmra.mrb[34].mxu0 %vm623_vm7, %v2441_v27 }
 0x613   :  { %14121 = vmatpush3.bf16.msra.mxu0 %v15717_v18  ;;  %13019 = vmatprep.mubr.msk.f32.mxu0 %vm15220_vm8, %v15221_v33 }
 0x614   :  { %14122 = vmatprep.subr.bf16.mxu0 %v15219_v32 }
 0x617   :  { %14124 = vmatpush3.bf16.msra.mxu0 %v15728_v38 }
 0x61a   :  { %13020 = vmatmul.mubr.msk.f32.vlgmr.msra.gmra.mrb[36].mxu0 %vm623_vm7, %v2457_v51 }
 0x61b   :  { %13035 = vmatprep.mubr.msk.f32.mxu0 %vm2061_vm14, %v11811_v43 }
 0x659   :  { %v3655_v1 = vpop.permute.xlu1 %3654 }
 0x65a   :  { %v3677_v44 = vadd.f32 %v3655_v1, %v15972_v46 }
 0x65c   :  { %v3816_v52 = vrot.slane %v3677_v44, 7 }
 0x661   :  { %v3659_v49 = vpop.permute.xlu0 %3658 }
 0x662   :  { %v3679_v6 = vadd.f32 %v3659_v49, %v15977_v34  ;;  %v11815_v49 = vld [vmem:[%s17628_s15 + $0x20] sm:$0xff] }
 0x664   :  { %v3820_v55 = vrot.slane %v3679_v6, 5  ;;  %v3934_v6 = vld [vmem:[%s17630_s24] sm:$0xff] }
 0x6b5   :  { %v16082_v21 = vpop.f32.mrb[22].mxu0 }
 0x6b6   :  { %v12867_v28 = vpop.f32.mrb[23].mxu0 }
 0x6bd   :  { %v16084_v19 = vpop.f32.mrb[24].mxu0 }
 0x6be   :  { %v12889_v18 = vpop.f32.mrb[25].mxu0 }
 0x6c5   :  { %v16086_v23 = vpop.f32.mrb[26].mxu0 }
 0x6c6   :  { %v12911_v62 = vpop.f32.mrb[27].mxu0 }
 0x6cd   :  { %v16088_v25 = vpop.f32.mrb[28].mxu0 }
 0x6ce   :  { %v12933_v63 = vpop.f32.mrb[29].mxu0 }
 0x6d5   :  { %v3104_v38 = vpop.f32.mrb[30].mxu0 }
 0x6d6   :  { %v12955_v30 = vpop.f32.mrb[31].mxu0  ;;  %3652 = vrot.lane.b32.xlu1 %v3104_v38, %s15223_s25 }
 0x6dd   :  { %v3248_v39 = vpop.f32.mrb[32].mxu0 }
 0x6de   :  { %v12977_v35 = vpop.f32.mrb[33].mxu0  ;;  %3656 = vrot.lane.b32.xlu0 %v3248_v39, %s15223_s25 }
 0x6e2   :  { %3662 = vrot.lane.b32.xlu0 %v3464_v59, %s15223_s25 }
 0x6e5   :  { %v3392_v37 = vpop.f32.mrb[34].mxu0 }
 0x6e6   :  { %v12999_v8 = vpop.f32.mrb[35].mxu0  ;;  %3660 = vrot.lane.b32.xlu1 %v3392_v37, %s15223_s25  ;;  %3666 = vrot.lane.b32.xlu0 %v3608_v4, %s15223_s25 }
 0x6ea   :  { %3624 = vrot.lane.b32.xlu0 %v3248_v39, %s15224_s28 }
 0x6ed   :  { %v3536_v36 = vpop.f32.mrb[36].mxu0 }
 0x6ee   :  { %v13021_v40 = vpop.f32.mrb[37].mxu0  ;;  %3664 = vrot.lane.b32.xlu1 %v3536_v36, %s15223_s25  ;;  %3626 = vrot.lane.b32.xlu0 %v16035_v60, %s15224_s28 }
 0x6f2   :  { %3622 = vrot.lane.b32.xlu1 %v16024_v54, %s15224_s28  ;;  %3630 = vrot.lane.b32.xlu0 %v3464_v59, %s15224_s28 }
 0x6f6   :  { %3620 = vrot.lane.b32.xlu1 %v3104_v38, %s15224_s28  ;;  %3634 = vrot.lane.b32.xlu0 %v3608_v4, %s15224_s28 }
 0x6fa   :  { %3628 = vrot.lane.b32.xlu1 %v3392_v37, %s15224_s28 }
 0x6fe   :  { %3632 = vrot.lane.b32.xlu1 %v3536_v36, %s15224_s28 }
 0x748   :  { %v3653_v45 = vpop.permute.xlu1 %3652 }
 0x749   :  { %v3676_v22 = vadd.f32 %v3653_v45, %v16082_v21 }
 0x74b   :  { %v3817_v48 = vsel %vm2038_vm9, %v3816_v52, %v3676_v22 }
 0x750   :  { %v3657_v47 = vpop.permute.xlu0 %3656 }
 0x751   :  { %v3678_v53 = vadd.f32 %v3657_v47, %v16084_v19  ;;  %v3935_v47 = vld [vmem:[%s17630_s24 + $0x8] sm:$0xff] }
 0x753   :  { %v3818_v42 = vrot.slane %v3678_v53, 6  ;;  %v3936_v53 = vld [vmem:[%s17630_s24 + $0x10] sm:$0xff] }
 0x754   :  { %v3663_v57 = vpop.permute.xlu0 %3662 }
 0x755   :  { %v3819_v58 = vsel %vm2041_vm10, %v3818_v42, %v3817_v48  ;;  %v3681_v24 = vadd.f32 %v3663_v57, %v15993_v61  ;;  %v3937_v42 = vld [vmem:[%s17630_s24 + $0x18] sm:$0xff] }
 0x756   :  { %v3821_v13 = vsel %vm2044_vm11, %v3820_v55, %v3819_v58  ;;  %v14131_v55 = vpack.c.bf16 %v3935_v47, %v3934_v6  ;;  %v11816_v58 = vld [vmem:[%s17628_s15 + $0x28] sm:$0xff] }
 0x757   :  { %v3824_v15 = vrot.slane %v3681_v24, 3  ;;  %v14135_v24 = vpack.c.bf16 %v3937_v42, %v3936_v53 }
 0x758   :  { %v3661_v2 = vpop.permute.xlu1 %3660  ;;  %v3667_v14 = vpop.permute.xlu0 %3666 }
 0x759   :  { %v3680_v20 = vadd.f32 %v3661_v2, %v16086_v23  ;;  %v3683_v60 = vadd.f32 %v3667_v14, %v16013_v9  ;;  %v11818_v2 = vld [vmem:[%s17628_s15 + $0x38] sm:$0xff]  ;;  %v11875_v14 = vld [vmem:[#allocation9] ss:$0 sm:$0xff] }
 0x75b   :  { %v3822_v29 = vrot.slane %v3680_v20, 4  ;;  %v3828_v17 = vrot.slane %v3683_v60, 1 }
 0x75c   :  { %v3625_v54 = vpop.permute.xlu0 %3624 }
 0x75d   :  { %v3823_v31 = vsel %vm2047_vm12, %v3822_v29, %v3821_v13  ;;  %v3646_v0 = vsub.f32 %v16084_v19, %v3625_v54  ;;  %v11817_v13 = vld [vmem:[%s17628_s15 + $0x30] sm:$0xff] }
 0x75e   :  { %v3825_v50 = vsel %vm2050_vm13, %v3824_v15, %v3823_v31 }
 0x75f   :  { %v3694_v38 = vrot.slane %v3646_v0, 6 }
 0x760   :  { %v3665_v3 = vpop.permute.xlu1 %3664  ;;  %v3627_v16 = vpop.permute.xlu0 %3626 }
 0x761   :  { %v3682_v11 = vadd.f32 %v3665_v3, %v16088_v25  ;;  %v3647_v26 = vsub.f32 %v15977_v34, %v3627_v16 }
 0x763   :  { %v3826_v56 = vrot.slane %v3682_v11, 2  ;;  %v3696_v30 = vrot.slane %v3647_v26, 5 }
 0x764   :  { %v3623_v27 = vpop.permute.xlu1 %3622  ;;  %v3631_v28 = vpop.permute.xlu0 %3630 }
 0x765   :  { %v3645_v51 = vsub.f32 %v15972_v46, %v3623_v27  ;;  %v3827_v59 = vsel %vm2053_vm15, %v3826_v56, %v3825_v50  ;;  %v3649_v46 = vsub.f32 %v15993_v61, %v3631_v28 }
 0x766   :  { %v3829_v4 = vsel %vm2056_vm2, %v3828_v17, %v3827_v59 }
 0x767   :  { %3830 = vrot.lane.b32.xlu1 %v3829_v4, %s15224_s28  ;;  %v3692_v62 = vrot.slane %v3645_v51, 7  ;;  %v3700_v40 = vrot.slane %v3649_v46, 3 }
 0x768   :  { %v3621_v18 = vpop.permute.xlu1 %3620  ;;  %v3635_v37 = vpop.permute.xlu0 %3634 }
 0x769   :  { %v3644_v63 = vsub.f32 %v16082_v21, %v3621_v18  ;;  %v3651_v43 = vsub.f32 %v16013_v9, %v3635_v37  ;;  %v11813_v9 = vld [vmem:[%s17629_s14 + $0x30] sm:$0xff] }
 0x76b   :  { %v3693_v39 = vsel %vm2038_vm9, %v3692_v62, %v3644_v63  ;;  %v3704_v52 = vrot.slane %v3651_v43, 1 }
 0x76c   :  { %v3695_v35 = vsel %vm2041_vm10, %v3694_v38, %v3693_v39  ;;  %v3629_v19 = vpop.permute.xlu1 %3628 }
 0x76d   :  { %v3648_v8 = vsub.f32 %v16086_v23, %v3629_v19  ;;  %v3697_v34 = vsel %vm2044_vm11, %v3696_v30, %v3695_v35  ;;  %v11812_v23 = vld [vmem:[%s17629_s14 + $0x28] sm:$0xff] }
 0x76f   :  { %v3698_v36 = vrot.slane %v3648_v8, 4 }
 0x770   :  { %v3633_v1 = vpop.permute.xlu1 %3632 }
 0x771   :  { %v3699_v21 = vsel %vm2047_vm12, %v3698_v36, %v3697_v34  ;;  %v3650_v44 = vsub.f32 %v16088_v25, %v3633_v1  ;;  %v11814_v25 = vld [vmem:[%s17629_s14 + $0x38] sm:$0xff] }
 0x772   :  { %v3701_v45 = vsel %vm2050_vm13, %v3700_v40, %v3699_v21 }
 0x773   :  { %v3702_v61 = vrot.slane %v3650_v44, 2 }
 0x775   :  { %v3703_v22 = vsel %vm2053_vm15, %v3702_v61, %v3701_v45 }
 0x776   :  { %v3705_v48 = vsel %vm2056_vm2, %v3704_v52, %v3703_v22 }
 0x777   :  { %13033 = vmatprep.subr.mxu0 %v3705_v48 }
 0x778   :  { %13034 = vmatpush3.msra.mxu0 %v3705_v48 }
 0x779   :  { %13036 = vmatmul.mubr.msk.f32.vlgmr.msra.gmra.mrb[18].mxu0 %vm2061_vm14, %v11812_v23 }
 0x77a   :  { %13038 = vmatprep.mubr.msk.f32.mxu0 %vm2061_vm14, %v11813_v9 }
 0x77d   :  { %13039 = vmatmul.mubr.msk.f32.gmra.mrb[20].mxu0 %vm2061_vm14, %v11814_v25 }
 0x77e   :  { %13043 = vmatprep.mubr.msk.f32.mxu0 %vm2061_vm14, %v11815_v49 }
 0x7d9   :  { %v3831_v57 = vpop.permute.xlu1 %3830 }
 0x7da   :  { %13041 = vmatprep.subr.mxu0 %v3831_v57 }
 0x7db   :  { %13042 = vmatpush3.msra.mxu0 %v3831_v57 }
 0x7dc   :  { %13044 = vmatmul.mubr.msk.f32.vlgmr.msra.gmra.mrb[18].mxu0 %vm2061_vm14, %v11816_v58  ;;  %14132 = vmatprep.subr.bf16.mxu0 %v14131_v55 }
 0x7dd   :  { %14134 = vmatpush3.bf16.msra.mxu0 %v14131_v55  ;;  %13046 = vmatprep.mubr.msk.f32.mxu0 %vm2061_vm14, %v11817_v13 }
 0x7de   :  { %14136 = vmatprep.subr.bf16.mxu0 %v14135_v24 }
 0x7e0   :  { %13047 = vmatmul.mubr.msk.f32.gmra.mrb[20].mxu0 %vm2061_vm14, %v11818_v2 }
 0x7e1   :  { %14138 = vmatpush3.bf16.msra.mxu0 %v14135_v24  ;;  %13057 = vmatprep.mubr.msk.f32.mxu0 %vm623_vm7, %v15625_v7 }
 0x7e2   :  { %14159 = vmatprep.subr.bf16.mxu0 %v15219_v32 }
 0x7e4   :  { %13058 = vmatmul.mubr.msk.f32.vlgmr.msra.gmra.mrb[18].mxu0 %vm623_vm7, %v15623_v5 }
 0x7e5   :  { %13060 = vmatprep.mubr.msk.f32.mxu0 %vm623_vm7, %v15633_v12 }
 0x7e8   :  { %13061 = vmatmul.mubr.msk.f32.gmra.mrb[20].mxu0 %vm623_vm7, %v15631_v10 }
 0x7e9   :  { %13104 = vmatprep.mubr.msk.f32.mxu0 %vm15220_vm8, %v15221_v33 }
 0x8b7   :  { %v13059_v20 = vpop.f32.mrb[18].mxu0 }
 0x8b8   :  { %v16192_v29 = vadd.f32 %v13059_v20, %v11875_v14  ;;  %v4016_v15 = vpop.f32.mrb[19].mxu0 }
 0x8b9   :  { %v16194_v7 = vadd.f32 %v11875_v14, %v4016_v15 }
 0x8ba   :  { %v16197_v54 = vmul.f32 0.70710677, %v16192_v29 }
 0x8bb   :  { %v16200_v5 = vmul.f32 0.70710677, %v16194_v7  ;;  %v13062_v12 = vpop.f32.mrb[20].mxu0 }
 0x8bc   :  { %v4059_v31 = vand.u32 2147483647, %v16197_v54  ;;  %v16203_v10 = vadd.f32 %v13062_v12, %v11875_v14  ;;  %v4026_v50 = vpop.f32.mrb[21].mxu0  ;;  %vm4139_vm3 = vcmp.ge.f32.partialorder %v16197_v54, 0.0 }
 0x8bd   :  { %v4058_v60 = vand.u32 2147483647, %v16200_v5  ;;  %v16206_v3 = vadd.f32 %v11875_v14, %v4026_v50  ;;  %vm4138_vm4 = vcmp.ge.f32.partialorder %v16200_v5, 0.0 }
 0x8be   :  { %v4063_v11 = vmul.f32 0.3275911, %v4059_v31  ;;  %v16209_v16 = vmul.f32 0.70710677, %v16203_v10  ;;  %v4115_v62 = vsub.f32 0.0, %v4059_v31  ;;  %v4053_v5 = vmul.f32 0.5, %v16203_v10 }
 0x8bf   :  { %v4062_v56 = vmul.f32 0.3275911, %v4058_v60  ;;  %v16212_v17 = vmul.f32 0.70710677, %v16206_v3  ;;  %v4114_v63 = vsub.f32 0.0, %v4058_v60 }
 0x8c0   :  { %v4067_v27 = vadd.f32 1.0, %v4063_v11  ;;  %v4061_v51 = vand.u32 2147483647, %v16209_v16  ;;  %v4119_v30 = vmul.f32 %v4115_v62, %v4059_v31  ;;  %vm4141_vm6 = vcmp.ge.f32.partialorder %v16209_v16, 0.0 }
 0x8c1   :  { %v4066_v59 = vadd.f32 1.0, %v4062_v56  ;;  %v4060_v0 = vand.u32 2147483647, %v16212_v17  ;;  %v4118_v19 = vmul.f32 %v4114_v63, %v4058_v60 }
 0x8c2   :  { %14659 = vrcp.f32 %v4067_v27  ;;  %v4065_v4 = vmul.f32 0.3275911, %v4061_v51  ;;  %v4117_v39 = vsub.f32 0.0, %v4061_v51  ;;  %v4124_v40 = vmul.f32 1.442695, %v4119_v30 }
 0x8c3   :  { %14661 = vrcp.f32 %v4066_v59  ;;  %v4064_v26 = vmul.f32 0.3275911, %v4060_v0  ;;  %v4116_v37 = vsub.f32 0.0, %v4060_v0  ;;  %v4122_v45 = vmul.f32 1.442695, %v4118_v19 }
 0x8c4   :  { %v4069_v28 = vadd.f32 1.0, %v4065_v4  ;;  %v4121_v1 = vmul.f32 %v4117_v39, %v4061_v51 }
 0x8c5   :  { %v4068_v18 = vadd.f32 1.0, %v4064_v26  ;;  %v4120_v52 = vmul.f32 %v4116_v37, %v4060_v0 }
 0x8c6   :  { %14663 = vrcp.f32 %v4069_v28  ;;  %v4128_v49 = vmul.f32 1.442695, %v4121_v1  ;;  %v4051_v1 = vmul.f32 0.5, %v16192_v29 }
 0x8c7   :  { %14665 = vrcp.f32 %v4068_v18  ;;  %v4126_v42 = vmul.f32 1.442695, %v4120_v52 }
 0x8c8   :  { %14667 = vpow2.f32 %v4124_v40 }
 0x8c9   :  { %14669 = vpow2.f32 %v4122_v45 }
 0x8ca   :  { %14671 = vpow2.f32 %v4128_v49 }
 0x8cb   :  { %14673 = vpow2.f32 %v4126_v42  ;;  %v4167_v42 = vld [vmem:[#allocation8 + $0x140] sm:$0xff] }
 0x8cc   :  { %v14660_v38 = vpop.eup %14659 }
 0x8cd   :  { %v14662_v46 = vpop.eup %14661  ;;  %v4079_v35 = vmul.f32 1.0614054, %v14660_v38 }
 0x8ce   :  { %v4078_v8 = vmul.f32 1.0614054, %v14662_v46 }
 0x8cf   :  { %v4083_v34 = vadd.f32 -1.4531521, %v4079_v35 }
 0x8d0   :  { %v14664_v36 = vpop.eup %14663  ;;  %v4082_v43 = vadd.f32 -1.4531521, %v4078_v8 }
 0x8d1   :  { %v14666_v21 = vpop.eup %14665  ;;  %v4087_v44 = vmul.f32 %v14660_v38, %v4083_v34  ;;  %v4081_v61 = vmul.f32 1.0614054, %v14664_v36 }
 0x8d2   :  { %v4086_v22 = vmul.f32 %v14662_v46, %v4082_v43  ;;  %v4080_v48 = vmul.f32 1.0614054, %v14666_v21  ;;  %v14668_v51 = vpop.eup %14667 }
 0x8d3   :  { %v4091_v23 = vadd.f32 1.4214138, %v4087_v44  ;;  %v4085_v9 = vadd.f32 -1.4531521, %v4081_v61  ;;  %v14670_v4 = vpop.eup %14669 }
 0x8d4   :  { %v4090_v25 = vadd.f32 1.4214138, %v4086_v22  ;;  %v4084_v6 = vadd.f32 -1.4531521, %v4080_v48  ;;  %v14672_v39 = vpop.eup %14671 }
 0x8d5   :  { %v4095_v47 = vmul.f32 %v14660_v38, %v4091_v23  ;;  %v4089_v53 = vmul.f32 %v14664_v36, %v4085_v9  ;;  %v14674_v37 = vpop.eup %14673 }
 0x8d6   :  { %v4094_v55 = vmul.f32 %v14662_v46, %v4090_v25  ;;  %v4088_v57 = vmul.f32 %v14666_v21, %v4084_v6 }
 0x8d7   :  { %v4099_v58 = vadd.f32 -0.28449672, %v4095_v47  ;;  %v4093_v13 = vadd.f32 1.4214138, %v4089_v53  ;;  %v4160_v47 = vld [vmem:[#allocation8 + $0x108] sm:$0xff] }
 0x8d8   :  { %v4098_v24 = vadd.f32 -0.28449672, %v4094_v55  ;;  %v4092_v2 = vadd.f32 1.4214138, %v4088_v57  ;;  %v14883_v53 = vld [vmem:[%s17627_s18 + $0x8] sm:$0xff] }
 0x8d9   :  { %v4103_v14 = vmul.f32 %v14660_v38, %v4099_v58  ;;  %v4097_v20 = vmul.f32 %v14664_v36, %v4093_v13  ;;  %v4168_v55 = vld [vmem:[#allocation8 + $0x148] sm:$0xff]  ;;  %v4161_v58 = vld [vmem:[#allocation8 + $0x110] sm:$0xff]  ;;  %v4162_v13 = vld [vmem:[#allocation8 + $0x118] sm:$0xff] }
 0x8da   :  { %v4102_v15 = vmul.f32 %v14662_v46, %v4098_v24  ;;  %v4096_v12 = vmul.f32 %v14666_v21, %v4092_v2  ;;  %v16255_v57 = vpack.c.bf16 %v4168_v55, %v4167_v42  ;;  %v16258_v24 = vpack.c.bf16 %v4162_v13, %v4161_v58  ;;  %v4169_v2 = vld [vmem:[#allocation8 + $0x150] sm:$0xff] }
 0x8db   :  { %v4107_v31 = vadd.f32 0.2548296, %v4103_v14  ;;  %v4101_v50 = vadd.f32 -0.28449672, %v4097_v20  ;;  %v4170_v14 = vld [vmem:[#allocation8 + $0x158] sm:$0xff]  ;;  %v4189_v13 = vld [vmem:[#allocation8 + $0x1f0] sm:$0xff] }
 0x8dc   :  { %v4106_v60 = vadd.f32 0.2548296, %v4102_v15  ;;  %v4100_v11 = vadd.f32 -0.28449672, %v4096_v12  ;;  %14161 = vmatpush3.bf16.msra.mxu0 %v16255_v57  ;;  %v16262_v20 = vpack.c.bf16 %v4170_v14, %v4169_v2  ;;  %v4163_v12 = vld [vmem:[#allocation8 + $0x120] sm:$0xff]  ;;  %v4190_v2 = vld [vmem:[#allocation8 + $0x1f8] sm:$0xff] }
 0x8dd   :  { %v4111_v56 = vmul.f32 %v14660_v38, %v4107_v31  ;;  %v4105_v27 = vmul.f32 %v14664_v36, %v4101_v50  ;;  %14162 = vmatprep.subr.bf16.mxu0 %v15219_v32  ;;  %v4164_v31 = vld [vmem:[#allocation8 + $0x128] sm:$0xff] }
 0x8de   :  { %v4110_v59 = vmul.f32 %v14662_v46, %v4106_v60  ;;  %v4104_v0 = vmul.f32 %v14666_v21, %v4100_v11  ;;  %v4175_v11 = vld [vmem:[#allocation8 + $0x180] sm:$0xff] }
 0x8df   :  { %v4131_v26 = vmul.f32 %v14668_v51, %v4111_v56  ;;  %v4109_v28 = vadd.f32 0.2548296, %v4105_v27  ;;  %v4176_v56 = vld [vmem:[#allocation8 + $0x188] sm:$0xff]  ;;  %v16270_v27 = vpack.c.bf16 %v4164_v31, %v4163_v12  ;;  %v16344_v12 = vpack.c.bf16 %v4190_v2, %v4189_v13 }
 0x8e0   :  { %v4130_v18 = vmul.f32 %v14670_v4, %v4110_v59  ;;  %v4108_v62 = vadd.f32 0.2548296, %v4104_v0  ;;  %14164 = vmatpush3.bf16.msra.mxu0 %v16262_v20  ;;  %v4165_v59 = vld [vmem:[#allocation8 + $0x130] sm:$0xff]  ;;  %v4166_v0 = vld [vmem:[#allocation8 + $0x138] sm:$0xff]  ;;  %v16273_v4 = vpack.c.bf16 %v4176_v56, %v4175_v11 }
 0x8e1   :  { %v4135_v63 = vsub.f32 1.0, %v4131_v26  ;;  %v4113_v30 = vmul.f32 %v14664_v36, %v4109_v28  ;;  %v4050_v36 = vmul.f32 0.5, %v16194_v7  ;;  %v4052_v7 = vmul.f32 0.5, %v16206_v3  ;;  %14171 = vmatprep.subr.bf16.mxu0 %v15219_v32 }
 0x8e2   :  { %v4134_v35 = vsub.f32 1.0, %v4130_v18  ;;  %v4112_v19 = vmul.f32 %v14666_v21, %v4108_v62  ;;  %v4177_v18 = vld [vmem:[#allocation8 + $0x190] sm:$0xff]  ;;  %v4178_v62 = vld [vmem:[#allocation8 + $0x198] sm:$0xff] }
 0x8e3   :  { %v4143_v8 = vsub.f32 0.0, %v4135_v63  ;;  %v4133_v34 = vmul.f32 %v14672_v39, %v4113_v30  ;;  %v4171_v39 = vld [vmem:[#allocation8 + $0x160] sm:$0xff] }
 0x8e4   :  { %v4142_v38 = vsub.f32 0.0, %v4134_v35  ;;  %v4132_v40 = vmul.f32 %v14674_v37, %v4112_v19  ;;  %v16284_v19 = vpack.c.bf16 %v4178_v62, %v4177_v18 }
 0x8e5   :  { %v4147_v43 = vsel %vm4139_vm3, %v4135_v63, %v4143_v8  ;;  %v4137_v46 = vsub.f32 1.0, %v4133_v34  ;;  %vm4140_vm3 = vcmp.ge.f32.partialorder %v16212_v17, 0.0  ;;  %v4159_v17 = vld [vmem:[#allocation8 + $0x100] sm:$0xff]  ;;  %v16277_v63 = vpack.c.bf16 %v4166_v0, %v4165_v59  ;;  %v4184_v34 = vld [vmem:[#allocation8 + $0x1c8] sm:$0xff] }
 0x8e6   :  { %v4151_v44 = vadd.f32 1.0, %v4147_v43  ;;  %v4146_v45 = vsel %vm4138_vm4, %v4134_v35, %v4142_v38  ;;  %v4136_v61 = vsub.f32 1.0, %v4132_v40  ;;  %v16244_v3 = vpack.c.bf16 %v4160_v47, %v4159_v17  ;;  %v4172_v35 = vld [vmem:[#allocation8 + $0x168] sm:$0xff]  ;;  %v4183_v8 = vld [vmem:[#allocation8 + $0x1c0] sm:$0xff]  ;;  %v4173_v43 = vld [vmem:[#allocation8 + $0x170] sm:$0xff] }
 0x8e7   :  { %v4150_v52 = vadd.f32 1.0, %v4146_v45  ;;  %v4145_v21 = vsub.f32 0.0, %v4137_v46  ;;  %v16291_v38 = vpack.c.bf16 %v4172_v35, %v4171_v39  ;;  %v4185_v45 = vld [vmem:[#allocation8 + $0x1d0] sm:$0xff]  ;;  %v4187_v47 = vld [vmem:[#allocation8 + $0x1e0] sm:$0xff] }
 0x8e8   :  { %v16220_v22 = vmul.f32 %v4151_v44, %v4051_v1  ;;  %v4144_v54 = vsub.f32 0.0, %v4136_v61  ;;  %v16296_v1 = vpack.c.bf16 %v4184_v34, %v4183_v8  ;;  %v14886_v39 = vld [vmem:[%s17627_s18 + $0x18] sm:$0xff] }
 0x8e9   :  { %v16223_v48 = vmul.f32 %v4150_v52, %v4050_v36  ;;  %v4149_v23 = vsel %vm4141_vm6, %v4137_v46, %v4145_v21  ;;  %v4174_v46 = vld [vmem:[#allocation8 + $0x178] sm:$0xff]  ;;  %v4179_v52 = vld [vmem:[#allocation8 + $0x1a0] sm:$0xff]  ;;  %v4180_v21 = vld [vmem:[#allocation8 + $0x1a8] sm:$0xff] }
 0x8ea   :  { %v4153_v29 = vadd.f32 1.0, %v4149_v23  ;;  %v4148_v9 = vsel %vm4140_vm3, %v4136_v61, %v4144_v54  ;;  %v4186_v61 = vld [vmem:[#allocation8 + $0x1d8] sm:$0xff]  ;;  %v16302_v36 = vpack.c.bf16 %v4174_v46, %v4173_v43  ;;  %v16315_v23 = vpack.c.bf16 %v4180_v21, %v4179_v52 }
 0x8eb   :  { %v16229_v25 = vpack.c.bf16 %v16220_v22, %v16223_v48  ;;  %v4152_v49 = vadd.f32 1.0, %v4148_v9  ;;  %v16309_v54 = vpack.c.bf16 %v4186_v61, %v4185_v45  ;;  %v4182_v9 = vld [vmem:[#allocation8 + $0x1b8] sm:$0xff] }
 0x8ec   :  { %v16232_v6 = vmul.f32 %v4153_v29, %v4053_v5  ;;  %v4181_v29 = vld [vmem:[#allocation8 + $0x1b0] sm:$0xff] }
 0x8ed   :  { %v16234_v16 = vmul.f32 %v4152_v49, %v4052_v7  ;;  %14140 = vmatprep.subr.bf16.mxu1 %v16229_v25  ;;  %v16322_v49 = vpack.c.bf16 %v4182_v9, %v4181_v29 }
 0x8ee   :  { %14142 = vmatpush3.bf16.msra.mxu1 %v16229_v25 }
 0x8ef   :  { %v16240_v10 = vpack.c.bf16 %v16232_v6, %v16234_v16 }
 0x8f1   :  { %14144 = vmatprep.subr.bf16.mxu1 %v16240_v10 }
 0x8f2   :  { %14146 = vmatpush3.bf16.msra.mxu1 %v16240_v10 }
 0x8f3   :  { %14147 = vmatprep.subr.bf16.mxu1 %v15219_v32 }
 0x8f5   :  { %13072 = vmatmul.mubr.msk.f32.vlgmr.msra.gmra.mrb[42].mxu1 %vm623_vm7, %v14883_v53  ;;  %v4188_v53 = vld [vmem:[#allocation8 + $0x1e8] sm:$0xff] }
 0x8f6   :  { %14149 = vmatpush3.bf16.msra.mxu1 %v16244_v3  ;;  %13082 = vmatprep.mubr.msk.f32.mxu1 %vm15220_vm8, %v15221_v33  ;;  %v16335_v55 = vpack.c.bf16 %v4188_v53, %v4187_v47 }
 0x8f7   :  { %14150 = vmatprep.subr.bf16.mxu1 %v15219_v32 }
 0x8fa   :  { %14152 = vmatpush3.bf16.msra.mxu1 %v16258_v24 }
 0x8fb   :  { %14153 = vmatprep.subr.bf16.mxu1 %v15219_v32 }
 0x9c8   :  { %v16267_v15 = vpop.f32.mrb[42].mxu1 }
 0x9c9   :  { %v4257_v50 = vpop.f32.mrb[43].mxu1  ;;  %v4324_v42 = vrot.slane %v16267_v15, %v15668_v41 }
 0x9ca   :  { %v4274_v60 = vrot.slane %v4257_v50, %v15668_v41  ;;  %v4267_v26 = vcombine.high %v4257_v50, %v4257_v50  ;;  %v4317_v50 = vcombine.high %v16267_v15, %v16267_v15 }
 0x9cb   :  { %v4340_v14 = vrot.slane %v4324_v42, %v15668_v41  ;;  %v4332_v11 = vcombine.high %v4324_v42, %v4324_v42 }
 0x9cc   :  { %v4290_v51 = vrot.slane %v4274_v60, %v15668_v41  ;;  %v4282_v30 = vcombine.high %v4274_v60, %v4274_v60  ;;  %v4281_v37 = vrot.slane %v4267_v26, %v15668_v41  ;;  %v4331_v15 = vrot.slane %v4317_v50, %v15668_v41 }
 0x9cd   :  { %v4362_v60 = vcombine.high %v4340_v14, %v4340_v14  ;;  %v4354_v56 = vrot.slane %v4332_v11, %v15668_v41 }
 0x9ce   :  { %v4312_v28 = vcombine.high %v4290_v51, %v4290_v51  ;;  %13083 = vmatmul.mubr.msk.f32.vlgmr.msra.gmra.mrb[44].mxu1 %vm623_vm7, %v4290_v51  ;;  %v4304_v40 = vrot.slane %v4282_v30, %v15668_v41  ;;  %v4297_v44 = vrot.slane %v4281_v37, %v15668_v41  ;;  %v4283_v17 = vcombine.high %v4281_v37, %v4281_v37  ;;  %v14885_v30 = vld [vmem:[%s17627_s18 + $0x10] sm:$0xff] }
 0x9cf   :  { %14155 = vmatpush3.bf16.msra.mxu1 %v16270_v27  ;;  %13093 = vmatprep.mubr.msk.f32.mxu1 %vm15220_vm8, %v15221_v33  ;;  %v4347_v51 = vrot.slane %v4331_v15, %v15668_v41  ;;  %v4364_v59 = vcombine.high %v4354_v56, %v4354_v56  ;;  %v4333_v26 = vcombine.high %v4331_v15, %v4331_v15 }
 0x9d0   :  { %13105 = vmatmul.mubr.msk.f32.vlgmr.msra.gmra.mrb[38].mxu0 %vm623_vm7, %v4312_v28  ;;  %14156 = vmatprep.subr.bf16.mxu1 %v15219_v32  ;;  %v4314_v5 = vcombine.high %v4304_v40, %v4304_v40  ;;  %v4313_v7 = vcombine.high %v4297_v44, %v4297_v44  ;;  %v4311_v58 = vrot.slane %v4283_v17, %v15668_v41  ;;  %v14884_v28 = vld [vmem:[%s17628_s15] sm:$0xff] }
 0x9d1   :  { %14173 = vmatpush3.bf16.msra.mxu0 %v16273_v4  ;;  %13126 = vmatprep.mubr.msk.f32.mxu0 %vm15220_vm8, %v15221_v33  ;;  %v4363_v0 = vcombine.high %v4347_v51, %v4347_v51  ;;  %v4361_v18 = vrot.slane %v4333_v26, %v15668_v41 }
 0x9d2   :  { %14174 = vmatprep.subr.bf16.mxu0 %v15219_v32  ;;  %v4315_v31 = vcombine.high %v4311_v58, %v4311_v58 }
 0x9d3   :  { %14158 = vmatpush3.bf16.msra.mxu1 %v16277_v63  ;;  %v4365_v62 = vcombine.high %v4361_v18, %v4361_v18 }
 0x9d4   :  { %14165 = vmatprep.subr.bf16.mxu1 %v15219_v32 }
 0x9d5   :  { %14176 = vmatpush3.bf16.msra.mxu0 %v16284_v19 }
 0x9d6   :  { %13094 = vmatmul.mubr.msk.f32.vlgmr.msra.gmra.mrb[46].mxu1 %vm623_vm7, %v4304_v40  ;;  %14183 = vmatprep.subr.bf16.mxu0 %v15219_v32 }
 0x9d7   :  { %14167 = vmatpush3.bf16.msra.mxu1 %v16291_v38  ;;  %13115 = vmatprep.mubr.msk.f32.mxu1 %vm15220_vm8, %v15221_v33 }
 0x9d8   :  { %13127 = vmatmul.mubr.msk.f32.vlgmr.msra.gmra.mrb[40].mxu0 %vm623_vm7, %v4297_v44  ;;  %14168 = vmatprep.subr.bf16.mxu1 %v15219_v32 }
 0x9d9   :  { %14185 = vmatpush3.bf16.msra.mxu0 %v16296_v1  ;;  %13148 = vmatprep.mubr.msk.f32.mxu0 %vm15220_vm8, %v15221_v33 }
 0x9da   :  { %14186 = vmatprep.subr.bf16.mxu0 %v15219_v32 }
 0x9db   :  { %14170 = vmatpush3.bf16.msra.mxu1 %v16302_v36 }
 0x9dc   :  { %14177 = vmatprep.subr.bf16.mxu1 %v15219_v32 }
 0x9dd   :  { %14188 = vmatpush3.bf16.msra.mxu0 %v16309_v54 }
 0x9de   :  { %13116 = vmatmul.mubr.msk.f32.vlgmr.msra.gmra.mrb[48].mxu1 %vm623_vm7, %v4314_v5  ;;  %14195 = vmatprep.subr.bf16.mxu0 %v15219_v32 }
 0x9df   :  { %14179 = vmatpush3.bf16.msra.mxu1 %v16315_v23  ;;  %13137 = vmatprep.mubr.msk.f32.mxu1 %vm15220_vm8, %v15221_v33 }
 0x9e0   :  { %13149 = vmatmul.mubr.msk.f32.vlgmr.msra.gmra.mrb[42].mxu0 %vm623_vm7, %v4313_v7  ;;  %14180 = vmatprep.subr.bf16.mxu1 %v15219_v32 }
 0x9e1   :  { %14197 = vmatpush3.bf16.msra.mxu0 %v16244_v3  ;;  %13170 = vmatprep.mubr.msk.f32.mxu0 %vm15220_vm8, %v15221_v33 }
 0x9e2   :  { %14198 = vmatprep.subr.bf16.mxu0 %v15219_v32 }
 0x9e3   :  { %14182 = vmatpush3.bf16.msra.mxu1 %v16322_v49 }
 0x9e4   :  { %14189 = vmatprep.subr.bf16.mxu1 %v15219_v32 }
 0x9e5   :  { %14200 = vmatpush3.bf16.msra.mxu0 %v16258_v24 }
 0x9e6   :  { %13138 = vmatmul.mubr.msk.f32.vlgmr.msra.gmra.mrb[50].mxu1 %vm623_vm7, %v4311_v58  ;;  %14207 = vmatprep.subr.bf16.mxu0 %v15219_v32 }
 0x9e7   :  { %14191 = vmatpush3.bf16.msra.mxu1 %v16335_v55  ;;  %13159 = vmatprep.mubr.msk.f32.mxu1 %vm15220_vm8, %v15221_v33 }
 0x9e8   :  { %13171 = vmatmul.mubr.msk.f32.vlgmr.msra.gmra.mrb[44].mxu0 %vm623_vm7, %v4340_v14  ;;  %14192 = vmatprep.subr.bf16.mxu1 %v15219_v32 }
 0x9e9   :  { %14209 = vmatpush3.bf16.msra.mxu0 %v16255_v57  ;;  %13192 = vmatprep.mubr.msk.f32.mxu0 %vm15220_vm8, %v15221_v33 }
 0x9ea   :  { %14210 = vmatprep.subr.bf16.mxu0 %v15219_v32 }
 0x9eb   :  { %14194 = vmatpush3.bf16.msra.mxu1 %v16344_v12 }
 0x9ec   :  { %14201 = vmatprep.subr.bf16.mxu1 %v15219_v32 }
 0x9ed   :  { %14212 = vmatpush3.bf16.msra.mxu0 %v16262_v20 }
 0x9ee   :  { %13160 = vmatmul.mubr.msk.f32.vlgmr.msra.gmra.mrb[52].mxu1 %vm623_vm7, %v4315_v31  ;;  %14219 = vmatprep.subr.bf16.mxu0 %v15219_v32 }
 0x9ef   :  { %14203 = vmatpush3.bf16.msra.mxu1 %v16270_v27  ;;  %13181 = vmatprep.mubr.msk.f32.mxu1 %vm15220_vm8, %v15221_v33 }
 0x9f0   :  { %13193 = vmatmul.mubr.msk.f32.vlgmr.msra.gmra.mrb[46].mxu0 %vm623_vm7, %v4362_v60  ;;  %14204 = vmatprep.subr.bf16.mxu1 %v15219_v32 }
 0x9f1   :  { %14221 = vmatpush3.bf16.msra.mxu0 %v16273_v4  ;;  %13214 = vmatprep.mubr.msk.f32.mxu0 %vm15220_vm8, %v15221_v33 }
 0x9f2   :  { %14222 = vmatprep.subr.bf16.mxu0 %v15219_v32 }
 0x9f3   :  { %14206 = vmatpush3.bf16.msra.mxu1 %v16277_v63 }
 0x9f4   :  { %14213 = vmatprep.subr.bf16.mxu1 %v15219_v32 }
 0x9f5   :  { %14224 = vmatpush3.bf16.msra.mxu0 %v16284_v19 }
 0x9f6   :  { %13182 = vmatmul.mubr.msk.f32.vlgmr.msra.gmra.mrb[54].mxu1 %vm623_vm7, %v4354_v56  ;;  %14231 = vmatprep.subr.bf16.mxu0 %v15219_v32 }
 0x9f7   :  { %14215 = vmatpush3.bf16.msra.mxu1 %v16291_v38  ;;  %13203 = vmatprep.mubr.msk.f32.mxu1 %vm15220_vm8, %v15221_v33 }
 0x9f8   :  { %13215 = vmatmul.mubr.msk.f32.vlgmr.msra.gmra.mrb[48].mxu0 %vm623_vm7, %v4347_v51  ;;  %14216 = vmatprep.subr.bf16.mxu1 %v15219_v32 }
 0x9f9   :  { %14233 = vmatpush3.bf16.msra.mxu0 %v16296_v1  ;;  %13236 = vmatprep.mubr.msk.f32.mxu0 %vm15220_vm8, %v15221_v33 }
 0x9fa   :  { %14234 = vmatprep.subr.bf16.mxu0 %v15219_v32 }
 0x9fb   :  { %14218 = vmatpush3.bf16.msra.mxu1 %v16302_v36 }
 0x9fc   :  { %14225 = vmatprep.subr.bf16.mxu1 %v15219_v32 }
 0x9fd   :  { %14236 = vmatpush3.bf16.msra.mxu0 %v16309_v54 }
 0x9fe   :  { %13204 = vmatmul.mubr.msk.f32.vlgmr.msra.gmra.mrb[56].mxu1 %vm623_vm7, %v4364_v59 }
 0x9ff   :  { %14227 = vmatpush3.bf16.msra.mxu1 %v16315_v23  ;;  %13225 = vmatprep.mubr.msk.f32.mxu1 %vm15220_vm8, %v15221_v33 }
 0xa00   :  { %13237 = vmatmul.mubr.msk.f32.vlgmr.msra.gmra.mrb[50].mxu0 %vm623_vm7, %v4363_v0  ;;  %14228 = vmatprep.subr.bf16.mxu1 %v15219_v32 }
 0xa01   :  { %13252 = vmatprep.mubr.msk.f32.mxu0 %vm2061_vm14, %v14884_v28 }
 0xa03   :  { %14230 = vmatpush3.bf16.msra.mxu1 %v16322_v49 }
 0xa04   :  { %14237 = vmatprep.subr.bf16.mxu1 %v15219_v32 }
 0xa06   :  { %13226 = vmatmul.mubr.msk.f32.vlgmr.msra.gmra.mrb[58].mxu1 %vm623_vm7, %v4361_v18 }
 0xa07   :  { %14239 = vmatpush3.bf16.msra.mxu1 %v16335_v55  ;;  %13247 = vmatprep.mubr.msk.f32.mxu1 %vm15220_vm8, %v15221_v33 }
 0xa08   :  { %14240 = vmatprep.subr.bf16.mxu1 %v15219_v32 }
 0xa0b   :  { %14242 = vmatpush3.bf16.msra.mxu1 %v16344_v12 }
 0xa0c   :  { %14244 = vmatprep.subr.bf16.mxu1 %v16229_v25 }
 0xa0e   :  { %13248 = vmatmul.mubr.msk.f32.vlgmr.msra.gmra.mrb[60].mxu1 %vm623_vm7, %v4365_v62 }
 0xa0f   :  { %14246 = vmatpush3.bf16.msra.mxu1 %v16229_v25  ;;  %13274 = vmatprep.mubr.msk.f32.mxu1 %vm623_vm7, %v14885_v30 }
 0xa10   :  { %14248 = vmatprep.subr.bf16.mxu1 %v16240_v10 }
 0xa13   :  { %14250 = vmatpush3.bf16.msra.mxu1 %v16240_v10 }
 0xa14   :  { %14257 = vmatprep.subr.bf16.mxu1 %v15219_v32 }
 0xa16   :  { %13275 = vmatmul.mubr.msk.f32.vlgmr.msra.gmra.mrb[62].mxu1 %vm623_vm7, %v14886_v39 }
 0xa17   :  { %14259 = vmatpush3.bf16.msra.mxu1 %v16270_v27  ;;  %13296 = vmatprep.mubr.msk.f32.mxu1 %vm15220_vm8, %v15221_v33 }
 0xa18   :  { %14260 = vmatprep.subr.bf16.mxu1 %v15219_v32 }
 0xa1b   :  { %14262 = vmatpush3.bf16.msra.mxu1 %v16277_v63 }
 0xa1c   :  { %14269 = vmatprep.subr.bf16.mxu1 %v15219_v32 }
 0xaa1   :  { %v16429_v25 = vpop.f32.mrb[44].mxu1 }
 0xaa2   :  { %v13084_v10 = vpop.f32.mrb[45].mxu1 }
 0xaa3   :  { %v16431_v35 = vpop.f32.mrb[38].mxu0 }
 0xaa4   :  { %v13106_v37 = vpop.f32.mrb[39].mxu0 }
 0xaa9   :  { %v16433_v8 = vpop.f32.mrb[46].mxu1 }
 0xaaa   :  { %v13095_v34 = vpop.f32.mrb[47].mxu1 }
 0xaab   :  { %v16435_v40 = vpop.f32.mrb[40].mxu0 }
 0xaac   :  { %v13128_v43 = vpop.f32.mrb[41].mxu0 }
 0xab1   :  { %v16437_v46 = vpop.f32.mrb[48].mxu1 }
 0xab2   :  { %v13117_v44 = vpop.f32.mrb[49].mxu1 }
 0xab3   :  { %v16439_v45 = vpop.f32.mrb[42].mxu0 }
 0xab4   :  { %v13150_v61 = vpop.f32.mrb[43].mxu0 }
 0xab9   :  { %v16441_v52 = vpop.f32.mrb[50].mxu1 }
 0xaba   :  { %v13139_v21 = vpop.f32.mrb[51].mxu1 }
 0xabb   :  { %v5010_v5 = vpop.f32.mrb[44].mxu0 }
 0xabc   :  { %5558 = vrot.lane.b32.xlu0 %v5010_v5, %s15223_s25  ;;  %v13172_v29 = vpop.f32.mrb[45].mxu0 }
 0xac1   :  { %v16444_v9 = vpop.f32.mrb[52].mxu1 }
 0xac2   :  { %v13161_v7 = vpop.f32.mrb[53].mxu1 }
 0xac3   :  { %v5154_v17 = vpop.f32.mrb[46].mxu0 }
 0xac4   :  { %5562 = vrot.lane.b32.xlu1 %v5154_v17, %s15223_s25  ;;  %v13194_v47 = vpop.f32.mrb[47].mxu0 }
 0xac9   :  { %v5082_v53 = vpop.f32.mrb[54].mxu1 }
 0xaca   :  { %5560 = vrot.lane.b32.xlu0 %v5082_v53, %s15223_s25  ;;  %v13183_v42 = vpop.f32.mrb[55].mxu1 }
 0xacb   :  { %v5298_v58 = vpop.f32.mrb[48].mxu0 }
 0xacc   :  { %v13216_v13 = vpop.f32.mrb[49].mxu0 }
 0xace   :  { %5566 = vrot.lane.b32.xlu0 %v5298_v58, %s15223_s25 }
 0xad1   :  { %v5226_v2 = vpop.f32.mrb[56].mxu1 }
 0xad2   :  { %5564 = vrot.lane.b32.xlu1 %v5226_v2, %s15223_s25  ;;  %v13205_v14 = vpop.f32.mrb[57].mxu1 }
 0xad3   :  { %v5442_v31 = vpop.f32.mrb[50].mxu0 }
 0xad4   :  { %v13238_v50 = vpop.f32.mrb[51].mxu0  ;;  %5570 = vrot.lane.b32.xlu0 %v5442_v31, %s15223_s25 }
 0xad8   :  { %5528 = vrot.lane.b32.xlu0 %v5082_v53, %s15224_s28 }
 0xad9   :  { %v5370_v60 = vpop.f32.mrb[58].mxu1 }
 0xada   :  { %5568 = vrot.lane.b32.xlu1 %v5370_v60, %s15223_s25  ;;  %v13227_v11 = vpop.f32.mrb[59].mxu1 }
 0xadc   :  { %5526 = vrot.lane.b32.xlu0 %v5010_v5, %s15224_s28 }
 0xae0   :  { %5534 = vrot.lane.b32.xlu0 %v5298_v58, %s15224_s28 }
 0xae1   :  { %v16455_v15 = vpop.f32.mrb[60].mxu1 }
 0xae2   :  { %5572 = vrot.lane.b32.xlu1 %v16455_v15, %s15223_s25  ;;  %v13249_v56 = vpop.f32.mrb[61].mxu1 }
 0xae6   :  { %5530 = vrot.lane.b32.xlu1 %v5154_v17, %s15224_s28 }
 0xae9   :  { %v13276_v51 = vpop.f32.mrb[62].mxu1 }
 0xaea   :  { %5532 = vrot.lane.b32.xlu1 %v5226_v2, %s15224_s28  ;;  %v5874_v59 = vpop.f32.mrb[63].mxu1  ;;  %v16495_v37 = vrot.slane %v13276_v51, %v15668_v41  ;;  %v5934_v61 = vcombine.high %v13276_v51, %v13276_v51 }
 0xaeb   :  { %v16462_v0 = vrot.slane %v5874_v59, %v15668_v41  ;;  %v5884_v18 = vcombine.high %v5874_v59, %v5874_v59 }
 0xaec   :  { %v5949_v43 = vcombine.high %v16495_v37, %v16495_v37 }
 0xaed   :  { %v5899_v26 = vcombine.high %v16462_v0, %v16462_v0  ;;  %v16475_v62 = vrot.slane %v5884_v18, %v15668_v41 }
 0xaee   :  { %5536 = vrot.lane.b32.xlu1 %v5370_v60, %s15224_s28  ;;  %v5971_v44 = vrot.slane %v5949_v43, %v15668_v41 }
 0xaef   :  { %v5921_v28 = vrot.slane %v5899_v26, %v15668_v41  ;;  %v5900_v39 = vcombine.high %v16475_v62, %v16475_v62 }
 0xaf0   :  { %v5981_v21 = vcombine.high %v5971_v44, %v5971_v44 }
 0xaf1   :  { %13297 = vmatmul.mubr.msk.f32.vlgmr.msra.gmra.mrb[64].mxu1 %vm623_vm7, %v5921_v28  ;;  %v5931_v30 = vcombine.high %v5921_v28, %v5921_v28  ;;  %v5928_v10 = vrot.slane %v5900_v39, %v15668_v41 }
 0xaf2   :  { %5538 = vrot.lane.b32.xlu1 %v5442_v31, %s15224_s28  ;;  %14271 = vmatpush3.bf16.msra.mxu1 %v16291_v38 }
 0xaf3   :  { %14272 = vmatprep.subr.bf16.mxu1 %v15219_v32  ;;  %13318 = vmatprep.mubr.msk.f32.mxu1 %vm15220_vm8, %v15221_v33  ;;  %v5932_v34 = vcombine.high %v5928_v10, %v5928_v10 }
 0xaf6   :  { %14274 = vmatpush3.bf16.msra.mxu1 %v16302_v36 }
 0xaf7   :  { %14281 = vmatprep.subr.bf16.mxu1 %v15219_v32 }
 0xaf9   :  { %13319 = vmatmul.mubr.msk.f32.vlgmr.msra.gmra.mrb[66].mxu1 %vm623_vm7, %v5931_v30 }
 0xafa   :  { %14283 = vmatpush3.bf16.msra.mxu1 %v16315_v23  ;;  %13340 = vmatprep.mubr.msk.f32.mxu1 %vm15220_vm8, %v15221_v33 }
 0xafb   :  { %14284 = vmatprep.subr.bf16.mxu1 %v15219_v32 }
 0xafe   :  { %14286 = vmatpush3.bf16.msra.mxu1 %v16322_v49 }
 0xaff   :  { %14293 = vmatprep.subr.bf16.mxu1 %v15219_v32 }
 0xb01   :  { %13341 = vmatmul.mubr.msk.f32.vlgmr.msra.gmra.mrb[68].mxu1 %vm623_vm7, %v5928_v10 }
 0xb02   :  { %14295 = vmatpush3.bf16.msra.mxu1 %v16335_v55  ;;  %13362 = vmatprep.mubr.msk.f32.mxu1 %vm15220_vm8, %v15221_v33 }
 0xb03   :  { %14296 = vmatprep.subr.bf16.mxu1 %v15219_v32 }
 0xb06   :  { %14298 = vmatpush3.bf16.msra.mxu1 %v16344_v12 }
 0xb07   :  { %14305 = vmatprep.subr.bf16.mxu1 %v15219_v32 }
 0xb09   :  { %13363 = vmatmul.mubr.msk.f32.vlgmr.msra.gmra.mrb[70].mxu1 %vm623_vm7, %v5932_v34 }
 0xb0a   :  { %14307 = vmatpush3.bf16.msra.mxu1 %v16270_v27  ;;  %13384 = vmatprep.mubr.msk.f32.mxu1 %vm15220_vm8, %v15221_v33  ;;  %v16515_v27 = vrot.slane %v5934_v61, %v15668_v41 }
 0xb0b   :  { %14308 = vmatprep.subr.bf16.mxu1 %v15219_v32 }
 0xb0e   :  { %14310 = vmatpush3.bf16.msra.mxu1 %v16277_v63  ;;  %v5950_v63 = vcombine.high %v16515_v27, %v16515_v27 }
 0xb0f   :  { %14317 = vmatprep.subr.bf16.mxu1 %v15219_v32 }
 0xb11   :  { %13385 = vmatmul.mubr.msk.f32.vlgmr.msra.gmra.mrb[72].mxu1 %vm623_vm7, %v5971_v44 }
 0xb12   :  { %14319 = vmatpush3.bf16.msra.mxu1 %v16291_v38  ;;  %13406 = vmatprep.mubr.msk.f32.mxu1 %vm15220_vm8, %v15221_v33  ;;  %v5978_v38 = vrot.slane %v5950_v63, %v15668_v41 }
 0xb13   :  { %14320 = vmatprep.subr.bf16.mxu1 %v15219_v32 }
 0xb16   :  { %14322 = vmatpush3.bf16.msra.mxu1 %v16302_v36  ;;  %v5982_v36 = vcombine.high %v5978_v38, %v5978_v38 }
 0xb17   :  { %14329 = vmatprep.subr.bf16.mxu1 %v15219_v32 }
 0xb19   :  { %13407 = vmatmul.mubr.msk.f32.vlgmr.msra.gmra.mrb[74].mxu1 %vm623_vm7, %v5981_v21 }
 0xb1a   :  { %14331 = vmatpush3.bf16.msra.mxu1 %v16315_v23  ;;  %13428 = vmatprep.mubr.msk.f32.mxu1 %vm15220_vm8, %v15221_v33 }
 0xb1b   :  { %14332 = vmatprep.subr.bf16.mxu1 %v15219_v32 }
 0xb1e   :  { %14334 = vmatpush3.bf16.msra.mxu1 %v16322_v49 }
 0xb1f   :  { %14341 = vmatprep.subr.bf16.mxu1 %v15219_v32 }
 0xb21   :  { %13429 = vmatmul.mubr.msk.f32.vlgmr.msra.gmra.mrb[76].mxu1 %vm623_vm7, %v5978_v38 }
 0xb22   :  { %14343 = vmatpush3.bf16.msra.mxu1 %v16335_v55  ;;  %13450 = vmatprep.mubr.msk.f32.mxu1 %vm15220_vm8, %v15221_v33 }
 0xb23   :  { %14344 = vmatprep.subr.bf16.mxu1 %v15219_v32 }
 0xb26   :  { %14346 = vmatpush3.bf16.msra.mxu1 %v16344_v12 }
 0xb29   :  { %13451 = vmatmul.mubr.msk.f32.vlgmr.msra.gmra.mrb[78].mxu1 %vm623_vm7, %v5982_v36 }
 0xb2e   :  { %v5559_v23 = vpop.permute.xlu0 %5558 }
 0xb2f   :  { %v5582_v17 = vadd.f32 %v5559_v23, %v16429_v25 }
 0xb36   :  { %v5563_v5 = vpop.permute.xlu1 %5562 }
 0xb37   :  { %v5584_v49 = vadd.f32 %v5563_v5, %v16431_v35 }
 0xb39   :  { %v5600_v47 = vrot.slane %v5584_v49, 6 }
 0xb3c   :  { %v5561_v29 = vpop.permute.xlu0 %5560 }
 0xb3d   :  { %v5583_v7 = vadd.f32 %v5561_v29, %v16433_v8 }
 0xb3f   :  { %v5598_v55 = vrot.slane %v5583_v7, 7 }
 0xb40   :  { %v5567_v42 = vpop.permute.xlu0 %5566 }
 0xb41   :  { %v5599_v53 = vsel %vm2038_vm9, %v5598_v55, %v5582_v17  ;;  %v5586_v12 = vadd.f32 %v5567_v42, %v16435_v40 }
 0xb42   :  { %v5601_v58 = vsel %vm2041_vm10, %v5600_v47, %v5599_v53 }
 0xb43   :  { %v5604_v50 = vrot.slane %v5586_v12, 4 }
 0xb44   :  { %v5565_v13 = vpop.permute.xlu1 %5564 }
 0xb45   :  { %v5585_v2 = vadd.f32 %v5565_v13, %v16437_v46 }
 0xb46   :  { %v5571_v14 = vpop.permute.xlu0 %5570 }
 0xb47   :  { %v5602_v31 = vrot.slane %v5585_v2, 5  ;;  %v5588_v59 = vadd.f32 %v5571_v14, %v16439_v45 }
 0xb49   :  { %v5603_v60 = vsel %vm2044_vm11, %v5602_v31, %v5601_v58  ;;  %v5608_v34 = vrot.slane %v5588_v59, 2 }
 0xb4a   :  { %v5529_v11 = vpop.permute.xlu0 %5528  ;;  %v5605_v56 = vsel %vm2047_vm12, %v5604_v50, %v5603_v60 }
 0xb4b   :  { %v5551_v51 = vsub.f32 %v16433_v8, %v5529_v11 }
 0xb4c   :  { %v5569_v26 = vpop.permute.xlu1 %5568 }
 0xb4d   :  { %v5587_v28 = vadd.f32 %v5569_v26, %v16441_v52  ;;  %v5708_v30 = vrot.slane %v5551_v51, 7  ;;  %v14889_v26 = vld [vmem:[%s17628_s15 + $0x18] sm:$0xff] }
 0xb4e   :  { %v5527_v18 = vpop.permute.xlu0 %5526 }
 0xb4f   :  { %v5606_v39 = vrot.slane %v5587_v28, 3  ;;  %v5550_v10 = vsub.f32 %v16429_v25, %v5527_v18  ;;  %v14890_v28 = vld [vmem:[%s17629_s14] sm:$0xff] }
 0xb51   :  { %v5709_v43 = vsel %vm2038_vm9, %v5708_v30, %v5550_v10  ;;  %v5607_v44 = vsel %vm2050_vm13, %v5606_v39, %v5605_v56  ;;  %v14888_v56 = vld [vmem:[%s17628_s15 + $0x10] sm:$0xff] }
 0xb52   :  { %v5609_v61 = vsel %vm2053_vm15, %v5608_v34, %v5607_v44  ;;  %v5535_v36 = vpop.permute.xlu0 %5534  ;;  %v14892_v10 = vld [vmem:[%s17629_s14 + $0x10] sm:$0xff]  ;;  %v5907_v34 = vrot.slane %v16462_v0, %v15668_v41 }
 0xb53   :  { %v5554_v49 = vsub.f32 %v16435_v40, %v5535_v36  ;;  %v5914_v36 = vrot.slane %v16475_v62, %v15668_v41  ;;  %v5957_v62 = vrot.slane %v16495_v37, %v15668_v41 }
 0xb54   :  { %v5573_v21 = vpop.permute.xlu1 %5572 }
 0xb55   :  { %v5589_v8 = vadd.f32 %v5573_v21, %v16444_v9  ;;  %v5714_v47 = vrot.slane %v5554_v49, 4 }
 0xb57   :  { %v5610_v63 = vrot.slane %v5589_v8, 1  ;;  %v5929_v8 = vcombine.high %v5907_v34, %v5907_v34 }
 0xb58   :  { %v5531_v38 = vpop.permute.xlu1 %5530 }
 0xb59   :  { %v5552_v23 = vsub.f32 %v16431_v35, %v5531_v38  ;;  %v5611_v5 = vsel %vm2056_vm2, %v5610_v63, %v5609_v61 }
 0xb5a   :  { %5612 = vrot.lane.b32.xlu0 %v5611_v5, %s15224_s28 }
 0xb5b   :  { %v5710_v25 = vrot.slane %v5552_v23, 6  ;;  %v5930_v23 = vcombine.high %v5914_v36, %v5914_v36 }
 0xb5c   :  { %v5533_v29 = vpop.permute.xlu1 %5532 }
 0xb5d   :  { %v5711_v7 = vsel %vm2041_vm10, %v5710_v25, %v5709_v43  ;;  %v5553_v17 = vsub.f32 %v16437_v46, %v5533_v29  ;;  %v14893_v43 = vld [vmem:[%s17629_s14 + $0x18] sm:$0xff] }
 0xb5e   :  { %5540 = vrot.lane.b32.xlu0 %v16455_v15, %s15224_s28 }
 0xb5f   :  { %v5712_v55 = vrot.slane %v5553_v17, 5 }
 0xb60   :  { %v5537_v53 = vpop.permute.xlu1 %5536 }
 0xb61   :  { %v5713_v35 = vsel %vm2044_vm11, %v5712_v55, %v5711_v7  ;;  %v5555_v42 = vsub.f32 %v16441_v52, %v5537_v53  ;;  %v14887_v52 = vld [vmem:[%s17628_s15 + $0x8] sm:$0xff] }
 0xb62   :  { %v5715_v58 = vsel %vm2047_vm12, %v5714_v47, %v5713_v35 }
 0xb63   :  { %v5716_v12 = vrot.slane %v5555_v42, 3 }
 0xb64   :  { %v5539_v13 = vpop.permute.xlu1 %5538 }
 0xb65   :  { %v5556_v40 = vsub.f32 %v16439_v45, %v5539_v13  ;;  %v5717_v2 = vsel %vm2050_vm13, %v5716_v12, %v5715_v58 }
 0xb67   :  { %v5718_v14 = vrot.slane %v5556_v40, 2 }
 0xb69   :  { %v5719_v46 = vsel %vm2053_vm15, %v5718_v14, %v5717_v2 }
 0xbc4   :  { %v16567_v31 = vpop.f32.mrb[64].mxu1 }
 0xbc5   :  { %v13298_v15 = vpop.f32.mrb[65].mxu1 }
 0xbcc   :  { %v5613_v50 = vpop.permute.xlu0 %5612  ;;  %v16569_v60 = vpop.f32.mrb[66].mxu1 }
 0xbcd   :  { %13250 = vmatprep.subr.mxu0 %v5613_v50  ;;  %v13320_v11 = vpop.f32.mrb[67].mxu1 }
 0xbce   :  { %13251 = vmatpush3.msra.mxu0 %v5613_v50 }
 0xbcf   :  { %13253 = vmatmul.mubr.msk.f32.vlgmr.msra.gmra.mrb[52].mxu0 %vm2061_vm14, %v14887_v52 }
 0xbd0   :  { %v5541_v45 = vpop.permute.xlu0 %5540  ;;  %13255 = vmatprep.mubr.msk.f32.mxu0 %vm2061_vm14, %v14888_v56 }
 0xbd1   :  { %v5557_v51 = vsub.f32 %v16444_v9, %v5541_v45  ;;  %v14891_v9 = vld [vmem:[%s17629_s14 + $0x8] sm:$0xff] }
 0xbd3   :  { %v5720_v59 = vrot.slane %v5557_v51, 1  ;;  %13256 = vmatmul.mubr.msk.f32.gmra.mrb[54].mxu0 %vm2061_vm14, %v14889_v26 }
 0xbd4   :  { %13260 = vmatprep.mubr.msk.f32.mxu0 %vm2061_vm14, %v14890_v28  ;;  %v16588_v18 = vpop.f32.mrb[68].mxu1 }
 0xbd5   :  { %v5721_v30 = vsel %vm2056_vm2, %v5720_v59, %v5719_v46  ;;  %v13342_v39 = vpop.f32.mrb[69].mxu1 }
 0xbd6   :  { %13258 = vmatprep.subr.mxu0 %v5721_v30 }
 0xbd7   :  { %13259 = vmatpush3.msra.mxu0 %v5721_v30 }
 0xbd8   :  { %13261 = vmatmul.mubr.msk.f32.vlgmr.msra.gmra.mrb[52].mxu0 %vm2061_vm14, %v14891_v9  ;;  %14251 = vmatprep.subr.bf16.mxu0 %v15219_v32 }
 0xbd9   :  { %14253 = vmatpush3.bf16.msra.mxu0 %v16244_v3  ;;  %13263 = vmatprep.mubr.msk.f32.mxu0 %vm2061_vm14, %v14892_v10 }
 0xbda   :  { %14254 = vmatprep.subr.bf16.mxu0 %v15219_v32 }
 0xbdc   :  { %13264 = vmatmul.mubr.msk.f32.gmra.mrb[54].mxu0 %vm2061_vm14, %v14893_v43  ;;  %v16608_v44 = vpop.f32.mrb[70].mxu1 }
 0xbdd   :  { %14256 = vmatpush3.bf16.msra.mxu0 %v16258_v24  ;;  %13285 = vmatprep.mubr.msk.f32.mxu0 %vm15220_vm8, %v15221_v33  ;;  %v13364_v61 = vpop.f32.mrb[71].mxu1 }
 0xbde   :  { %14263 = vmatprep.subr.bf16.mxu0 %v15219_v32 }
 0xbe0   :  { %13286 = vmatmul.mubr.msk.f32.vlgmr.msra.gmra.mrb[56].mxu0 %vm623_vm7, %v5907_v34 }
 0xbe1   :  { %14265 = vmatpush3.bf16.msra.mxu0 %v16255_v57  ;;  %13307 = vmatprep.mubr.msk.f32.mxu0 %vm15220_vm8, %v15221_v33 }
 0xbe2   :  { %14266 = vmatprep.subr.bf16.mxu0 %v15219_v32 }
 0xbe4   :  { %v16619_v0 = vpop.f32.mrb[72].mxu1 }
 0xbe5   :  { %14268 = vmatpush3.bf16.msra.mxu0 %v16262_v20  ;;  %7177 = vrot.lane.b32.xlu1 %v16619_v0, %s15223_s25  ;;  %v13386_v21 = vpop.f32.mrb[73].mxu1 }
 0xbe6   :  { %14275 = vmatprep.subr.bf16.mxu0 %v15219_v32 }
 0xbe8   :  { %13308 = vmatmul.mubr.msk.f32.vlgmr.msra.gmra.mrb[58].mxu0 %vm623_vm7, %v5929_v8 }
 0xbe9   :  { %14277 = vmatpush3.bf16.msra.mxu0 %v16273_v4  ;;  %13329 = vmatprep.mubr.msk.f32.mxu0 %vm15220_vm8, %v15221_v33 }
 0xbea   :  { %14278 = vmatprep.subr.bf16.mxu0 %v15219_v32 }
 0xbec   :  { %v16630_v63 = vpop.f32.mrb[74].mxu1 }
 0xbed   :  { %14280 = vmatpush3.bf16.msra.mxu0 %v16284_v19  ;;  %7181 = vrot.lane.b32.xlu0 %v16630_v63, %s15223_s25  ;;  %v13408_v38 = vpop.f32.mrb[75].mxu1 }
 0xbee   :  { %14287 = vmatprep.subr.bf16.mxu0 %v15219_v32 }
 0xbf0   :  { %13330 = vmatmul.mubr.msk.f32.vlgmr.msra.gmra.mrb[60].mxu0 %vm623_vm7, %v5914_v36 }
 0xbf1   :  { %14289 = vmatpush3.bf16.msra.mxu0 %v16296_v1  ;;  %13351 = vmatprep.mubr.msk.f32.mxu0 %vm15220_vm8, %v15221_v33 }
 0xbf2   :  { %14290 = vmatprep.subr.bf16.mxu0 %v15219_v32 }
 0xbf5   :  { %14292 = vmatpush3.bf16.msra.mxu0 %v16309_v54 }
 0xbf6   :  { %14299 = vmatprep.subr.bf16.mxu0 %v15219_v32 }
 0xbf8   :  { %13352 = vmatmul.mubr.msk.f32.vlgmr.msra.gmra.mrb[62].mxu0 %vm623_vm7, %v5930_v23 }
 0xbf9   :  { %14301 = vmatpush3.bf16.msra.mxu0 %v16244_v3  ;;  %13373 = vmatprep.mubr.msk.f32.mxu0 %vm15220_vm8, %v15221_v33  ;;  %v5979_v3 = vcombine.high %v5957_v62, %v5957_v62 }
 0xbfa   :  { %14302 = vmatprep.subr.bf16.mxu0 %v15219_v32 }
 0xbfd   :  { %14304 = vmatpush3.bf16.msra.mxu0 %v16258_v24 }
 0xbfe   :  { %14311 = vmatprep.subr.bf16.mxu0 %v15219_v32 }
 0xc00   :  { %13374 = vmatmul.mubr.msk.f32.vlgmr.msra.gmra.mrb[64].mxu0 %vm623_vm7, %v5957_v62 }
 0xc01   :  { %14313 = vmatpush3.bf16.msra.mxu0 %v16255_v57  ;;  %13395 = vmatprep.mubr.msk.f32.mxu0 %vm15220_vm8, %v15221_v33  ;;  %v5964_v57 = vrot.slane %v16515_v27, %v15668_v41  ;;  %v14894_v41 = vld [vmem:[%s17629_s14 + $0x20] sm:$0xff] }
 0xc02   :  { %14314 = vmatprep.subr.bf16.mxu0 %v15219_v32 }
 0xc03   :  { %v5980_v24 = vcombine.high %v5964_v57, %v5964_v57 }
 0xc05   :  { %14316 = vmatpush3.bf16.msra.mxu0 %v16262_v20  ;;  %v6987_v20 = vpop.f32.mrb[76].mxu1 }
 0xc06   :  { %14323 = vmatprep.subr.bf16.mxu0 %v15219_v32 }
 0xc08   :  { %13396 = vmatmul.mubr.msk.f32.vlgmr.msra.gmra.mrb[66].mxu0 %vm623_vm7, %v5979_v3 }
 0xc09   :  { %14325 = vmatpush3.bf16.msra.mxu0 %v16273_v4  ;;  %13417 = vmatprep.mubr.msk.f32.mxu0 %vm15220_vm8, %v15221_v33  ;;  %v13430_v4 = vpop.f32.mrb[77].mxu1 }
 0xc0a   :  { %14326 = vmatprep.subr.bf16.mxu0 %v15219_v32 }
 0xc0d   :  { %14328 = vmatpush3.bf16.msra.mxu0 %v16284_v19  ;;  %v7131_v19 = vpop.f32.mrb[78].mxu1 }
 0xc0e   :  { %14335 = vmatprep.subr.bf16.mxu0 %v15219_v32 }
 0xc10   :  { %13418 = vmatmul.mubr.msk.f32.vlgmr.msra.gmra.mrb[68].mxu0 %vm623_vm7, %v5964_v57 }
 0xc11   :  { %14337 = vmatpush3.bf16.msra.mxu0 %v16296_v1  ;;  %13439 = vmatprep.mubr.msk.f32.mxu0 %vm15220_vm8, %v15221_v33  ;;  %v13452_v1 = vpop.f32.mrb[79].mxu1 }
 0xc12   :  { %14338 = vmatprep.subr.bf16.mxu0 %v15219_v32 }
 0xc15   :  { %14340 = vmatpush3.bf16.msra.mxu0 %v16309_v54 }
 0xc18   :  { %13440 = vmatmul.mubr.msk.f32.vlgmr.msra.gmra.mrb[70].mxu0 %vm623_vm7, %v5980_v24 }
 0xc19   :  { %13455 = vmatprep.mubr.msk.f32.mxu0 %vm2061_vm14, %v14894_v41 }
 0xc57   :  { %v7178_v13 = vpop.permute.xlu1 %7177 }
 0xc58   :  { %v7200_v40 = vadd.f32 %v7178_v13, %v16567_v31 }
 0xc5a   :  { %v7327_v14 = vrot.slane %v7200_v40, 7 }
 0xc5f   :  { %v7182_v50 = vpop.permute.xlu0 %7181 }
 0xc60   :  { %v7202_v11 = vadd.f32 %v7182_v50, %v16569_v60 }
 0xc62   :  { %v7331_v51 = vrot.slane %v7202_v11, 5 }
 0xcb3   :  { %v16681_v37 = vpop.f32.mrb[56].mxu0 }
 0xcb4   :  { %v13287_v27 = vpop.f32.mrb[57].mxu0 }
 0xcb5   :  { %v7551_v27 = vld [vmem:[%s17584_s11] sm:$0xff] }
 0xcbb   :  { %v16683_v5 = vpop.f32.mrb[58].mxu0 }
 0xcbc   :  { %v13309_v25 = vpop.f32.mrb[59].mxu0 }
 0xcc3   :  { %v16685_v54 = vpop.f32.mrb[60].mxu0 }
 0xcc4   :  { %v13331_v49 = vpop.f32.mrb[61].mxu0 }
 0xccb   :  { %v16687_v29 = vpop.f32.mrb[62].mxu0 }
 0xccc   :  { %v13353_v7 = vpop.f32.mrb[63].mxu0 }
 0xcd3   :  { %v6627_v17 = vpop.f32.mrb[64].mxu0 }
 0xcd4   :  { %v13375_v55 = vpop.f32.mrb[65].mxu0  ;;  %7175 = vrot.lane.b32.xlu1 %v6627_v17, %s15223_s25 }
 0xcdb   :  { %v6771_v47 = vpop.f32.mrb[66].mxu0 }
 0xcdc   :  { %v13397_v53 = vpop.f32.mrb[67].mxu0  ;;  %7179 = vrot.lane.b32.xlu0 %v6771_v47, %s15223_s25 }
 0xce0   :  { %7185 = vrot.lane.b32.xlu0 %v6987_v20, %s15223_s25 }
 0xce3   :  { %v6915_v35 = vpop.f32.mrb[68].mxu0 }
 0xce4   :  { %v13419_v42 = vpop.f32.mrb[69].mxu0  ;;  %7183 = vrot.lane.b32.xlu1 %v6915_v35, %s15223_s25  ;;  %7189 = vrot.lane.b32.xlu0 %v7131_v19, %s15223_s25 }
 0xce8   :  { %7147 = vrot.lane.b32.xlu0 %v6771_v47, %s15224_s28 }
 0xceb   :  { %v7059_v58 = vpop.f32.mrb[70].mxu0 }
 0xcec   :  { %v13441_v12 = vpop.f32.mrb[71].mxu0  ;;  %7187 = vrot.lane.b32.xlu1 %v7059_v58, %s15223_s25  ;;  %7149 = vrot.lane.b32.xlu0 %v16630_v63, %s15224_s28 }
 0xcf0   :  { %7145 = vrot.lane.b32.xlu1 %v16619_v0, %s15224_s28  ;;  %7153 = vrot.lane.b32.xlu0 %v6987_v20, %s15224_s28 }
 0xcf4   :  { %7143 = vrot.lane.b32.xlu1 %v6627_v17, %s15224_s28  ;;  %7157 = vrot.lane.b32.xlu0 %v7131_v19, %s15224_s28 }
 0xcf8   :  { %7151 = vrot.lane.b32.xlu1 %v6915_v35, %s15224_s28 }
 0xcfc   :  { %7155 = vrot.lane.b32.xlu1 %v7059_v58, %s15224_s28 }
 0xd46   :  { %v7176_v2 = vpop.permute.xlu1 %7175 }
 0xd47   :  { %v7199_v46 = vadd.f32 %v7176_v2, %v16681_v37 }
 0xd49   :  { %v7328_v15 = vsel %vm2038_vm9, %v7327_v14, %v7199_v46 }
 0xd4e   :  { %v7180_v52 = vpop.permute.xlu0 %7179 }
 0xd4f   :  { %v7201_v45 = vadd.f32 %v7180_v52, %v16683_v5  ;;  %v14898_v52 = vld [vmem:[%s17628_s15 + $0x20] sm:$0xff] }
 0xd51   :  { %v7329_v56 = vrot.slane %v7201_v45, 6  ;;  %v11928_v45 = vld [vmem:[%s17630_s24 + $0x20] sm:$0xff] }
 0xd52   :  { %v7186_v59 = vpop.permute.xlu0 %7185 }
 0xd53   :  { %v7330_v26 = vsel %vm2041_vm10, %v7329_v56, %v7328_v15  ;;  %v7204_v30 = vadd.f32 %v7186_v59, %v16588_v18  ;;  %v11929_v56 = vld [vmem:[%s17630_s24 + $0x28] sm:$0xff]  ;;  %v11931_v59 = vld [vmem:[%s17630_s24 + $0x38] sm:$0xff] }
 0xd54   :  { %v7332_v28 = vsel %vm2044_vm11, %v7331_v51, %v7330_v26  ;;  %v11930_v51 = vld [vmem:[%s17630_s24 + $0x30] sm:$0xff]  ;;  %v14347_v26 = vpack.c.bf16 %v11929_v56, %v11928_v45 }
 0xd55   :  { %v7335_v43 = vrot.slane %v7204_v30, 3  ;;  %v14351_v30 = vpack.c.bf16 %v11931_v59, %v11930_v51 }
 0xd56   :  { %v7184_v39 = vpop.permute.xlu1 %7183  ;;  %v7190_v9 = vpop.permute.xlu0 %7189 }
 0xd57   :  { %v7203_v10 = vadd.f32 %v7184_v39, %v16685_v54  ;;  %v7206_v8 = vadd.f32 %v7190_v9, %v16608_v44  ;;  %v14899_v39 = vld [vmem:[%s17628_s15 + $0x28] sm:$0xff]  ;;  %v14900_v9 = vld [vmem:[%s17628_s15 + $0x30] sm:$0xff] }
 0xd59   :  { %v7333_v34 = vrot.slane %v7203_v10, 4  ;;  %v7339_v62 = vrot.slane %v7206_v8, 1  ;;  %v14901_v10 = vld [vmem:[%s17628_s15 + $0x38] sm:$0xff] }
 0xd5a   :  { %v7148_v61 = vpop.permute.xlu0 %7147 }
 0xd5b   :  { %v7334_v0 = vsel %vm2047_vm12, %v7333_v34, %v7332_v28  ;;  %v7169_v41 = vsub.f32 %v16683_v5, %v7148_v61  ;;  %v7553_v34 = vld [vmem:[%s17584_s11 + $0x10] sm:$0xff] }
 0xd5c   :  { %v7336_v21 = vsel %vm2050_vm13, %v7335_v43, %v7334_v0  ;;  %v7554_v43 = vld [vmem:[%s17584_s11 + $0x18] sm:$0xff] }
 0xd5d   :  { %v7217_v7 = vrot.slane %v7169_v41, 6  ;;  %v14359_v61 = vpack.c.bf16 %v7554_v43, %v7553_v34  ;;  %v7771_v41 = vld [vmem:[%s17586_s13 + $0x20] sm:$0xff] }
 0xd5e   :  { %v7188_v63 = vpop.permute.xlu1 %7187  ;;  %v7150_v36 = vpop.permute.xlu0 %7149 }
 0xd5f   :  { %v7205_v38 = vadd.f32 %v7188_v63, %v16687_v29  ;;  %v7170_v4 = vsub.f32 %v16569_v60, %v7150_v36  ;;  %v7767_v36 = vld [vmem:[%s17586_s13] sm:$0xff] }
 0xd61   :  { %v7337_v23 = vrot.slane %v7205_v38, 2  ;;  %v7219_v17 = vrot.slane %v7170_v4, 5 }
 0xd62   :  { %v7146_v3 = vpop.permute.xlu1 %7145  ;;  %v7154_v19 = vpop.permute.xlu0 %7153 }
 0xd63   :  { %v7168_v57 = vsub.f32 %v16567_v31, %v7146_v3  ;;  %v7338_v24 = vsel %vm2053_vm15, %v7337_v23, %v7336_v21  ;;  %v7552_v31 = vld [vmem:[%s17584_s11 + $0x8] sm:$0xff]  ;;  %v7172_v55 = vsub.f32 %v16588_v18, %v7154_v19  ;;  %v7769_v3 = vld [vmem:[%s17586_s13 + $0x10] sm:$0xff] }
 0xd64   :  { %v7340_v20 = vsel %vm2056_vm2, %v7339_v62, %v7338_v24  ;;  %v14355_v5 = vpack.c.bf16 %v7552_v31, %v7551_v27  ;;  %v7768_v23 = vld [vmem:[%s17586_s13 + $0x8] sm:$0xff]  ;;  %v7773_v19 = vld [vmem:[%s17586_s13 + $0x30] sm:$0xff] }
 0xd65   :  { %7341 = vrot.lane.b32.xlu1 %v7340_v20, %s15224_s28  ;;  %v7215_v25 = vrot.slane %v7168_v57, 7  ;;  %v7223_v13 = vrot.slane %v7172_v55, 3  ;;  %v14363_v62 = vpack.c.bf16 %v7768_v23, %v7767_v36  ;;  %v7770_v57 = vld [vmem:[%s17586_s13 + $0x18] sm:$0xff]  ;;  %v7772_v20 = vld [vmem:[%s17586_s13 + $0x28] sm:$0xff] }
 0xd66   :  { %v7144_v1 = vpop.permute.xlu1 %7143  ;;  %14356 = vmatprep.subr.bf16.mxu1 %v14355_v5  ;;  %v7158_v35 = vpop.permute.xlu0 %7157  ;;  %v14367_v24 = vpack.c.bf16 %v7770_v57, %v7769_v3  ;;  %v14371_v4 = vpack.c.bf16 %v7772_v20, %v7771_v41  ;;  %v11937_v31 = vld [vmem:[#allocation11] ss:$0 sm:$0xff] }
 0xd67   :  { %v7167_v49 = vsub.f32 %v16681_v37, %v7144_v1  ;;  %14358 = vmatpush3.bf16.msra.mxu1 %v14355_v5  ;;  %v7174_v37 = vsub.f32 %v16608_v44, %v7158_v35  ;;  %v14896_v44 = vld [vmem:[%s17629_s14 + $0x30] sm:$0xff]  ;;  %v7774_v1 = vld [vmem:[%s17586_s13 + $0x38] sm:$0xff] }
 0xd68   :  { %14360 = vmatprep.subr.bf16.mxu1 %v14359_v61  ;;  %v14375_v27 = vpack.c.bf16 %v7774_v1, %v7773_v19 }
 0xd69   :  { %v7216_v60 = vsel %vm2038_vm9, %v7215_v25, %v7167_v49  ;;  %v7227_v15 = vrot.slane %v7174_v37, 1 }
 0xd6a   :  { %v7218_v47 = vsel %vm2041_vm10, %v7217_v7, %v7216_v60  ;;  %v7152_v53 = vpop.permute.xlu1 %7151 }
 0xd6b   :  { %v7171_v42 = vsub.f32 %v16685_v54, %v7152_v53  ;;  %v7220_v58 = vsel %vm2044_vm11, %v7219_v17, %v7218_v47  ;;  %v14895_v54 = vld [vmem:[%s17629_s14 + $0x28] sm:$0xff]  ;;  %14362 = vmatpush3.bf16.msra.mxu1 %v14359_v61 }
 0xd6c   :  { %14364 = vmatprep.subr.bf16.mxu1 %v14363_v62 }
 0xd6d   :  { %v7221_v12 = vrot.slane %v7171_v42, 4 }
 0xd6e   :  { %v7156_v40 = vpop.permute.xlu1 %7155 }
 0xd6f   :  { %v7222_v2 = vsel %vm2047_vm12, %v7221_v12, %v7220_v58  ;;  %v7173_v14 = vsub.f32 %v16687_v29, %v7156_v40  ;;  %v14897_v29 = vld [vmem:[%s17629_s14 + $0x38] sm:$0xff] }
 0xd70   :  { %v7224_v18 = vsel %vm2050_vm13, %v7223_v13, %v7222_v2  ;;  %vm8329_vm13 = vcmask 259076  }
 0xd71   :  { %v7225_v46 = vrot.slane %v7173_v14, 2 }
 0xd73   :  { %v7226_v50 = vsel %vm2053_vm15, %v7225_v46, %v7224_v18 }
 0xd74   :  { %v7228_v11 = vsel %vm2056_vm2, %v7227_v15, %v7226_v50 }
 0xd75   :  { %13453 = vmatprep.subr.mxu0 %v7228_v11 }
 0xd76   :  { %13454 = vmatpush3.msra.mxu0 %v7228_v11 }
 0xd77   :  { %13456 = vmatmul.mubr.msk.f32.vlgmr.msra.gmra.mrb[52].mxu0 %vm2061_vm14, %v14895_v54 }
 0xd78   :  { %13458 = vmatprep.mubr.msk.f32.mxu0 %vm2061_vm14, %v14896_v44 }
 0xd7b   :  { %13459 = vmatmul.mubr.msk.f32.gmra.mrb[54].mxu0 %vm2061_vm14, %v14897_v29 }
 0xd7c   :  { %13463 = vmatprep.mubr.msk.f32.mxu0 %vm2061_vm14, %v14898_v52 }
 0xdd7   :  { %v7342_v28 = vpop.permute.xlu1 %7341 }
 0xdd8   :  { %13461 = vmatprep.subr.mxu0 %v7342_v28 }
 0xdd9   :  { %13462 = vmatpush3.msra.mxu0 %v7342_v28 }
 0xdda   :  { %13464 = vmatmul.mubr.msk.f32.vlgmr.msra.gmra.mrb[52].mxu0 %vm2061_vm14, %v14899_v39  ;;  %14348 = vmatprep.subr.bf16.mxu0 %v14347_v26 }
 0xddb   :  { %14350 = vmatpush3.bf16.msra.mxu0 %v14347_v26  ;;  %13466 = vmatprep.mubr.msk.f32.mxu0 %vm2061_vm14, %v14900_v9 }
 0xddc   :  { %14352 = vmatprep.subr.bf16.mxu0 %v14351_v30 }
 0xdde   :  { %13467 = vmatmul.mubr.msk.f32.gmra.mrb[54].mxu0 %vm2061_vm14, %v14901_v10 }
 0xddf   :  { %14354 = vmatpush3.bf16.msra.mxu0 %v14351_v30  ;;  %13477 = vmatprep.mubr.msk.f32.mxu0 %vm623_vm7, %v16223_v48  ;;  %v11936_v48 = vld [vmem:[#allocation9 + $0x1] ss:$0 sm:$0xff] }
 0xde2   :  { %13478 = vmatmul.mubr.msk.f32.vlgmr.msra.gmra.mrb[52].mxu0 %vm623_vm7, %v16220_v22 }
 0xde3   :  { %13480 = vmatprep.mubr.msk.f32.mxu0 %vm623_vm7, %v16234_v16 }
 0xde6   :  { %13481 = vmatmul.mubr.msk.f32.gmra.mrb[54].mxu0 %vm623_vm7, %v16232_v6 }
 0xeb5   :  { %v13479_v0 = vpop.f32.mrb[52].mxu0 }
 0xeb6   :  { %v7516_v22 = vpop.f32.mrb[53].mxu0  ;;  %v7548_v8 = vadd.f32 %v13479_v0, %v11936_v48 }
 0xeb7   :  { %v7547_v21 = vadd.f32 %v11936_v48, %v7516_v22 }
 0xeb9   :  { %v13482_v16 = vpop.f32.mrb[54].mxu0  ;;  %13491 = vmatprep.mubr.msk.f32.mxu1 %vm623_vm7, %v7547_v21 }
 0xeba   :  { %v7526_v6 = vpop.f32.mrb[55].mxu0  ;;  %13492 = vmatmul.mubr.msk.f32.vlgmr.msra.gmra.mrb[80].mxu1 %vm623_vm7, %v7548_v8  ;;  %v7550_v38 = vadd.f32 %v13482_v16, %v11936_v48 }
 0xebb   :  { %v7549_v63 = vadd.f32 %v11936_v48, %v7526_v6  ;;  %14366 = vmatpush3.bf16.msra.mxu1 %v14363_v62 }
 0xebc   :  { %14368 = vmatprep.subr.bf16.mxu1 %v14367_v24 }
 0xebd   :  { %13494 = vmatprep.mubr.msk.f32.mxu1 %vm623_vm7, %v7549_v63 }
 0xebe   :  { %13495 = vmatmul.mubr.msk.f32.gmra.mrb[82].mxu1 %vm623_vm7, %v7550_v38 }
 0xebf   :  { %14370 = vmatpush3.bf16.msra.mxu1 %v14367_v24 }
 0xec0   :  { %14372 = vmatprep.subr.bf16.mxu1 %v14371_v4 }
 0xec3   :  { %14374 = vmatpush3.bf16.msra.mxu1 %v14371_v4 }
 0xec4   :  { %14376 = vmatprep.subr.bf16.mxu1 %v14375_v27 }
 0xec7   :  { %14378 = vmatpush3.bf16.msra.mxu1 %v14375_v27 }
 0xec8   :  { %14379 = vmatprep.subr.bf16.mxu1 %v15219_v32 }
 0xf8d   :  { %v13493_v25 = vpop.f32.mrb[80].mxu1 }
 0xf8e   :  { %v16825_v49 = vadd.f32 %v13493_v25, %v11937_v31  ;;  %v7640_v5 = vpop.f32.mrb[81].mxu1 }
 0xf8f   :  { %v16827_v7 = vadd.f32 %v11937_v31, %v7640_v5 }
 0xf90   :  { %v16830_v17 = vmul.f32 0.70710677, %v16825_v49 }
 0xf91   :  { %v16833_v60 = vmul.f32 0.70710677, %v16827_v7  ;;  %v13496_v55 = vpop.f32.mrb[82].mxu1 }
 0xf92   :  { %v7668_v47 = vand.u32 2147483647, %v16830_v17  ;;  %v16836_v53 = vadd.f32 %v13496_v55, %v11937_v31  ;;  %v7650_v35 = vpop.f32.mrb[83].mxu1  ;;  %vm7748_vm9 = vcmp.ge.f32.partialorder %v16830_v17, 0.0 }
 0xf93   :  { %v7667_v42 = vand.u32 2147483647, %v16833_v60  ;;  %v16839_v58 = vadd.f32 %v11937_v31, %v7650_v35  ;;  %vm7747_vm10 = vcmp.ge.f32.partialorder %v16833_v60, 0.0 }
 0xf94   :  { %v7672_v12 = vmul.f32 0.3275911, %v7668_v47  ;;  %v16842_v13 = vmul.f32 0.70710677, %v16836_v53  ;;  %v7724_v44 = vsub.f32 0.0, %v7668_v47 }
 0xf95   :  { %v7671_v37 = vmul.f32 0.3275911, %v7667_v42  ;;  %v16845_v40 = vmul.f32 0.70710677, %v16839_v58  ;;  %v7723_v29 = vsub.f32 0.0, %v7667_v42 }
 0xf96   :  { %v7676_v2 = vadd.f32 1.0, %v7672_v12  ;;  %v7670_v14 = vand.u32 2147483647, %v16842_v13  ;;  %v7728_v45 = vmul.f32 %v7724_v44, %v7668_v47  ;;  %vm7750_vm11 = vcmp.ge.f32.partialorder %v16842_v13, 0.0 }
 0xf97   :  { %v7675_v18 = vadd.f32 1.0, %v7671_v37  ;;  %v7669_v46 = vand.u32 2147483647, %v16845_v40  ;;  %v7727_v26 = vmul.f32 %v7723_v29, %v7667_v42  ;;  %vm7749_vm12 = vcmp.ge.f32.partialorder %v16845_v40, 0.0 }
 0xf98   :  { %14675 = vrcp.f32 %v7676_v2  ;;  %v7674_v15 = vmul.f32 0.3275911, %v7670_v14  ;;  %v7726_v56 = vsub.f32 0.0, %v7670_v14  ;;  %v7733_v10 = vmul.f32 1.442695, %v7728_v45 }
 0xf99   :  { %14677 = vrcp.f32 %v7675_v18  ;;  %v7673_v50 = vmul.f32 0.3275911, %v7669_v46  ;;  %v7725_v28 = vsub.f32 0.0, %v7669_v46  ;;  %v7731_v0 = vmul.f32 1.442695, %v7727_v26 }
 0xf9a   :  { %v7678_v11 = vadd.f32 1.0, %v7674_v15  ;;  %v7730_v43 = vmul.f32 %v7726_v56, %v7670_v14  ;;  %v7661_v13 = vmul.f32 0.5, %v16839_v58  ;;  %v7662_v40 = vmul.f32 0.5, %v16836_v53  ;;  %v7879_v53 = vld [vmem:[#allocation14] sm:$0xf] }
 0xf9b   :  { %v7677_v54 = vadd.f32 1.0, %v7673_v50  ;;  %v7729_v21 = vmul.f32 %v7725_v28, %v7669_v46  ;;  %13519 = vmatprep.subr.msk.mxu0 %vm258_vm0, %v7879_v53  ;;  %v11953_v58 = vld [vmem:[#allocation17] ss:$0 sm:$0xff] }
 0xf9c   :  { %14679 = vrcp.f32 %v7678_v11  ;;  %v7737_v36 = vmul.f32 1.442695, %v7730_v43  ;;  %13520 = vmatpush3.msk.msra.mxu0 %vm258_vm0, %v7879_v53  ;;  %vm8104_vm0 = vcmask 254976  }
 0xf9d   :  { %14681 = vrcp.f32 %v7677_v54  ;;  %v7735_v57 = vmul.f32 1.442695, %v7729_v21  ;;  %v7660_v21 = vmul.f32 0.5, %v16825_v49  ;;  %v7990_v49 = vld [vmem:[%s17590_s17 + $0x18] sm:$0xff]  ;;  %14385 = vmatprep.subr.bf16.mxu0 %v15219_v32 }
 0xf9e   :  { %14683 = vpow2.f32 %v7733_v10 }
 0xf9f   :  { %14685 = vpow2.f32 %v7731_v0  ;;  %v7659_v0 = vmul.f32 0.5, %v16827_v7  ;;  %v7989_v7 = vld [vmem:[%s17590_s17 + $0x10] sm:$0xff] }
 0xfa0   :  { %14687 = vpow2.f32 %v7737_v36 }
 0xfa1   :  { %14689 = vpow2.f32 %v7735_v57 }
 0xfa2   :  { %v14676_v52 = vpop.eup %14675 }
 0xfa3   :  { %v14678_v51 = vpop.eup %14677  ;;  %v7688_v59 = vmul.f32 1.0614054, %v14676_v52 }
 0xfa4   :  { %v7687_v30 = vmul.f32 1.0614054, %v14678_v51 }
 0xfa5   :  { %v7692_v39 = vadd.f32 -1.4531521, %v7688_v59 }
 0xfa6   :  { %v14680_v9 = vpop.eup %14679  ;;  %v7691_v34 = vadd.f32 -1.4531521, %v7687_v30 }
 0xfa7   :  { %v14682_v61 = vpop.eup %14681  ;;  %v7696_v48 = vmul.f32 %v14676_v52, %v7692_v39  ;;  %v7690_v22 = vmul.f32 1.0614054, %v14680_v9 }
 0xfa8   :  { %v7695_v8 = vmul.f32 %v14678_v51, %v7691_v34  ;;  %v7689_v16 = vmul.f32 1.0614054, %v14682_v61  ;;  %v14684_v2 = vpop.eup %14683 }
 0xfa9   :  { %v7700_v6 = vadd.f32 1.4214138, %v7696_v48  ;;  %v7694_v63 = vadd.f32 -1.4531521, %v7690_v22  ;;  %v14686_v46 = vpop.eup %14685 }
 0xfaa   :  { %v7699_v38 = vadd.f32 1.4214138, %v7695_v8  ;;  %v7693_v23 = vadd.f32 -1.4531521, %v7689_v16  ;;  %v14688_v45 = vpop.eup %14687 }
 0xfab   :  { %v7704_v62 = vmul.f32 %v14676_v52, %v7700_v6  ;;  %v7698_v3 = vmul.f32 %v14680_v9, %v7694_v63  ;;  %v14690_v26 = vpop.eup %14689 }
 0xfac   :  { %v7703_v24 = vmul.f32 %v14678_v51, %v7699_v38  ;;  %v7697_v41 = vmul.f32 %v14682_v61, %v7693_v23 }
 0xfad   :  { %v7708_v20 = vadd.f32 -0.28449672, %v7704_v62  ;;  %v7702_v4 = vadd.f32 1.4214138, %v7698_v3  ;;  %v16874_v3 = vpack.c.bf16 %v7990_v49, %v7989_v7 }
 0xfae   :  { %v7707_v19 = vadd.f32 -0.28449672, %v7703_v24  ;;  %v7701_v1 = vadd.f32 1.4214138, %v7697_v41  ;;  %v11942_v24 = vld [vmem:[#allocation12] ss:$0 sm:$0xff] }
 0xfaf   :  { %v7712_v27 = vmul.f32 %v14676_v52, %v7708_v20  ;;  %v7706_v31 = vmul.f32 %v14680_v9, %v7702_v4 }
 0xfb0   :  { %v7711_v25 = vmul.f32 %v14678_v51, %v7707_v19  ;;  %v7705_v5 = vmul.f32 %v14682_v61, %v7701_v1 }
 0xfb1   :  { %v7716_v55 = vadd.f32 0.2548296, %v7712_v27  ;;  %v7710_v47 = vadd.f32 -0.28449672, %v7706_v31 }
 0xfb2   :  { %v7715_v35 = vadd.f32 0.2548296, %v7711_v25  ;;  %v7709_v42 = vadd.f32 -0.28449672, %v7705_v5 }
 0xfb3   :  { %v7720_v12 = vmul.f32 %v14676_v52, %v7716_v55  ;;  %v7714_v37 = vmul.f32 %v14680_v9, %v7710_v47 }
 0xfb4   :  { %v7719_v14 = vmul.f32 %v14678_v51, %v7715_v35  ;;  %v7713_v18 = vmul.f32 %v14682_v61, %v7709_v42  ;;  %v11947_v42 = vld [vmem:[#allocation15] ss:$0 sm:$0xff] }
 0xfb5   :  { %v7740_v15 = vmul.f32 %v14684_v2, %v7720_v12  ;;  %v7718_v50 = vadd.f32 0.2548296, %v7714_v37 }
 0xfb6   :  { %v7739_v11 = vmul.f32 %v14686_v46, %v7719_v14  ;;  %v7717_v54 = vadd.f32 0.2548296, %v7713_v18 }
 0xfb7   :  { %v7744_v44 = vsub.f32 1.0, %v7740_v15  ;;  %v7722_v29 = vmul.f32 %v14680_v9, %v7718_v50  ;;  %v7987_v9 = vld [vmem:[%s17590_s17] sm:$0xff] }
 0xfb8   :  { %v7743_v56 = vsub.f32 1.0, %v7739_v11  ;;  %v7721_v59 = vmul.f32 %v14682_v61, %v7717_v54  ;;  %v7988_v61 = vld [vmem:[%s17590_s17 + $0x8] sm:$0xff]  ;;  %s15225_s17 = smov 64  }
 0xfb9   :  { %v7752_v28 = vsub.f32 0.0, %v7744_v44  ;;  %v7742_v30 = vmul.f32 %v14688_v45, %v7722_v29  ;;  %v16861_v6 = vpack.c.bf16 %v7988_v61, %v7987_v9  ;;  %8077 = vrot.lane.b32.xlu0 %v11953_v58, %s15225_s17 }
 0xfba   :  { %v7751_v52 = vsub.f32 0.0, %v7743_v56  ;;  %v7741_v39 = vmul.f32 %v14690_v26, %v7721_v59 }
 0xfbb   :  { %v7756_v10 = vsel %vm7748_vm9, %v7744_v44, %v7752_v28  ;;  %v7746_v51 = vsub.f32 1.0, %v7742_v30 }
 0xfbc   :  { %v7760_v34 = vadd.f32 1.0, %v7756_v10  ;;  %v7755_v43 = vsel %vm7747_vm10, %v7743_v56, %v7751_v52  ;;  %v7745_v48 = vsub.f32 1.0, %v7741_v39 }
 0xfbd   :  { %v7759_v17 = vadd.f32 1.0, %v7755_v43  ;;  %v7754_v22 = vsub.f32 0.0, %v7746_v51 }
 0xfbe   :  { %v7753_v60 = vsub.f32 0.0, %v7745_v48  ;;  %v7764_v63 = vmul.f32 %v7760_v34, %v7660_v21 }
 0xfbf   :  { %v7763_v8 = vmul.f32 %v7759_v17, %v7659_v0  ;;  %v7758_v16 = vsel %vm7750_vm11, %v7746_v51, %v7754_v22 }
 0xfc0   :  { %v7762_v38 = vadd.f32 1.0, %v7758_v16  ;;  %v7757_v36 = vsel %vm7749_vm12, %v7745_v48, %v7753_v60 }
 0xfc1   :  { %v7761_v23 = vadd.f32 1.0, %v7757_v36  ;;  %13513 = vmatprep.mubr.msk.f32.mxu1 %vm470_vm5, %v7763_v8 }
 0xfc2   :  { %13514 = vmatmul.mubr.msk.f32.vlgmr.msra.gmra.mrb[84].mxu1 %vm470_vm5, %v7764_v63  ;;  %v7766_v57 = vmul.f32 %v7762_v38, %v7662_v40 }
 0xfc3   :  { %v7765_v62 = vmul.f32 %v7761_v23, %v7661_v13  ;;  %14381 = vmatpush3.bf16.msra.mxu1 %v16861_v6 }
 0xfc4   :  { %14382 = vmatprep.subr.bf16.mxu1 %v15219_v32 }
 0xfc5   :  { %13516 = vmatprep.mubr.msk.f32.mxu1 %vm470_vm5, %v7765_v62 }
 0xfc6   :  { %13517 = vmatmul.mubr.msk.f32.gmra.mrb[86].mxu1 %vm470_vm5, %v7766_v57  ;;  %vm8443_vm5 = vcmask 261126  }
 0xfc7   :  { %14384 = vmatpush3.bf16.msra.mxu1 %v16874_v3  ;;  %13535 = vmatprep.mubr.msk.f32.mxu1 %vm15220_vm8, %v15221_v33 }
 0xfc8   :  { %14391 = vmatprep.subr.bf16.mxu1 %v15219_v32 }
 0xfca   :  { %13536 = vmatmul.mubr.f32.vlgmr.msra.gmra.mrb[88].mxu1 %v15221_v33 }
 0xfcb   :  { %14393 = vmatpush3.bf16.msra.mxu1 %v16861_v6  ;;  %13557 = vmatprep.mubr.msk.f32.mxu1 %vm15220_vm8, %v15221_v33 }
 0xfcc   :  { %14394 = vmatprep.subr.bf16.mxu1 %v15219_v32 }
 0xfcf   :  { %14396 = vmatpush3.bf16.msra.mxu1 %v16874_v3 }
 0xfd0   :  { %14403 = vmatprep.subr.bf16.mxu1 %v15219_v32 }
0x102b   :  { %v16896_v25 = vpop.permute.xlu0 %8077 }
0x1095   :  { %v13515_v41 = vpop.f32.mrb[84].mxu1 }
0x1096   :  { %v7860_v20 = vpop.f32.mrb[85].mxu1  ;;  %v7866_v19 = vadd.f32 %v13515_v41, %v11942_v24 }
0x1097   :  { %v7861_v4 = vadd.f32 %v11942_v24, %v7860_v20 }
0x1099   :  { %v13518_v1 = vpop.f32.mrb[86].mxu1  ;;  %13521 = vmatprep.mubr.msk.f32.mxu0 %vm245_vm1, %v7861_v4 }
0x109a   :  { %v7870_v27 = vpop.f32.mrb[87].mxu1  ;;  %13522 = vmatmul.mubr.msk.f32.vlgmr.msra.gmra.mrb[72].mxu0 %vm245_vm1, %v7866_v19  ;;  %v7876_v5 = vadd.f32 %v13518_v1, %v11942_v24 }
0x109b   :  { %v7871_v31 = vadd.f32 %v11942_v24, %v7870_v27  ;;  %14387 = vmatpush3.bf16.msra.mxu0 %v16861_v6 }
0x109c   :  { %14388 = vmatprep.subr.bf16.mxu0 %v15219_v32 }
0x109d   :  { %13524 = vmatprep.mubr.msk.f32.mxu0 %vm245_vm1, %v7871_v31  ;;  %v8061_v55 = vpop.f32.mrb[88].mxu1 }
0x109e   :  { %13525 = vmatmul.mubr.msk.f32.gmra.mrb[74].mxu0 %vm245_vm1, %v7876_v5  ;;  %v8080_v47 = vadd.f32 %v16896_v25, %v8061_v55  ;;  %v13537_v35 = vpop.f32.mrb[89].mxu1  ;;  %vm8215_vm1 = vcmask 257026  }
0x109f   :  { %14390 = vmatpush3.bf16.msra.mxu0 %v16874_v3  ;;  %13546 = vmatprep.mubr.msk.f32.mxu0 %vm15220_vm8, %v15221_v33 }
0x10a0   :  { %8082 = vrot.lane.b32.xlu1 %v8080_v47, %s15225_s17  ;;  %14397 = vmatprep.subr.bf16.mxu0 %v15219_v32 }
0x1112   :  { %v8083_v56 = vpop.permute.xlu1 %8082 }
0x116d   :  { %v13523_v12 = vpop.f32.mrb[72].mxu0 }
0x116e   :  { %v16908_v37 = vadd.f32 %v13523_v12, %v11947_v42  ;;  %v7968_v2 = vpop.f32.mrb[73].mxu0 }
0x116f   :  { %v16910_v14 = vadd.f32 %v11947_v42, %v7968_v2 }
0x1171   :  { %v13526_v18 = vpop.f32.mrb[74].mxu0  ;;  %v8065_v46 = vadd.f32 %v8061_v55, %v16910_v14 }
0x1172   :  { %v16913_v15 = vadd.f32 %v13526_v18, %v11947_v42  ;;  %v7978_v50 = vpop.f32.mrb[75].mxu0 }
0x1173   :  { %v16915_v11 = vadd.f32 %v11947_v42, %v7978_v50  ;;  %v8066_v54 = vsub.f32 0.0, %v8065_v46 }
0x1175   :  { %v8067_v44 = vmul.f32 1.442695, %v8066_v54 }
0x1177   :  { %14691 = vpow2.f32 %v8067_v44 }
0x1181   :  { %v14692_v29 = vpop.eup %14691 }
0x1182   :  { %v8069_v45 = vadd.f32 1.0, %v14692_v29 }
0x1184   :  { %14693 = vrcp.f32 %v8069_v45 }
0x118e   :  { %v14694_v59 = vpop.eup %14693 }
0x118f   :  { %v8085_v26 = vmul.f32 %v14694_v59, %v8083_v56  ;;  %v8092_v39 = vsub.f32 1.0, %v14694_v59  ;;  %v8098_v51 = vmul.f32 0.0, %v14694_v59 }
0x1191   :  { %8087 = vrot.lane.b32.xlu0 %v8085_v26, %s15225_s17 }
0x1203   :  { %v8088_v28 = vpop.permute.xlu0 %8087 }
0x1204   :  { %v8090_v30 = vadd.f32 %v8088_v28, %v16910_v14 }
0x1206   :  { %14695 = vtanh.f32 %v8090_v30 }
0x1210   :  { %v14696_v52 = vpop.eup %14695 }
0x1211   :  { %8094 = vrot.lane.b32.xlu1 %v14696_v52, %s15224_s28 }
0x1283   :  { %v8095_v10 = vpop.permute.xlu1 %8094 }
0x1284   :  { %v8097_v34 = vmul.f32 %v8095_v10, %v8092_v39 }
0x1286   :  { %v8099_v43 = vadd.f32 %v8098_v51, %v8097_v34 }
0x1288   :  { %8101 = vrot.lane.b32.xlu0 %v8099_v43, %s15224_s28  ;;  %v8207_v40 = vrot.slane %v8099_v43, 6 }
0x12fa   :  { %v8102_v48 = vpop.permute.xlu0 %8101 }
0x12fb   :  { %8105 = vst.msk [vmem:[#allocation2] sm:$0x3] %vm8104_vm0, %v8102_v48  ;;  %13547 = vmatmul.mubr.msk.f32.vlgmr.msra.gmra.mrb[76].mxu0 %vm623_vm7, %v8102_v48 }
0x12fc   :  { %14399 = vmatpush3.bf16.msra.mxu0 %v16861_v6  ;;  %13568 = vmatprep.mubr.msk.f32.mxu0 %vm15220_vm8, %v15221_v33 }
0x12fd   :  { %14400 = vmatprep.subr.bf16.mxu0 %v15219_v32 }
0x1300   :  { %14402 = vmatpush3.bf16.msra.mxu0 %v16874_v3 }
0x1301   :  { %14409 = vmatprep.subr.bf16.mxu0 %v15219_v32 }
0x13ce   :  { %v8174_v9 = vpop.f32.mrb[76].mxu0 }
0x13cf   :  { %v8188_v61 = vadd.f32 %v8174_v9, %v16896_v25  ;;  %v13548_v0 = vpop.f32.mrb[77].mxu0  ;;  %v8179_v22 = vrot.slane %v8174_v9, 6 }
0x13d1   :  { %v8190_v17 = vrot.slane %v8188_v61, 6  ;;  %v8181_v21 = vadd.f32 %v8179_v22, %v16910_v14 }
0x13d3   :  { %8191 = vrot.lane.b32.xlu1 %v8190_v17, %s15225_s17  ;;  %v8182_v60 = vsub.f32 0.0, %v8181_v21 }
0x13d5   :  { %v8183_v8 = vmul.f32 1.442695, %v8182_v60 }
0x13d7   :  { %14697 = vpow2.f32 %v8183_v8 }
0x13e1   :  { %v14698_v16 = vpop.eup %14697 }
0x13e2   :  { %v8185_v63 = vadd.f32 1.0, %v14698_v16 }
0x13e4   :  { %14699 = vrcp.f32 %v8185_v63 }
0x13ee   :  { %v14700_v38 = vpop.eup %14699 }
0x13ef   :  { %v8201_v62 = vsub.f32 1.0, %v14700_v38  ;;  %v8209_v58 = vmul.f32 %v14700_v38, %v8207_v40 }
0x1445   :  { %v8192_v36 = vpop.permute.xlu1 %8191 }
0x1446   :  { %v8194_v7 = vmul.f32 %v14700_v38, %v8192_v36 }
0x1448   :  { %8196 = vrot.lane.b32.xlu0 %v8194_v7, %s15225_s17 }
0x14ba   :  { %v8197_v49 = vpop.permute.xlu0 %8196 }
0x14bb   :  { %v8199_v13 = vadd.f32 %v8197_v49, %v16910_v14 }
0x14bd   :  { %14701 = vtanh.f32 %v8199_v13 }
0x14c7   :  { %v14702_v23 = vpop.eup %14701 }
0x14c8   :  { %8203 = vrot.lane.b32.xlu1 %v14702_v23, %s15224_s28 }
0x153a   :  { %v8204_v57 = vpop.permute.xlu1 %8203 }
0x153b   :  { %v8206_v53 = vmul.f32 %v8204_v57, %v8201_v62 }
0x153d   :  { %v16935_v24 = vadd.f32 %v8209_v58, %v8206_v53 }
0x153f   :  { %v8217_v41 = vrot.slane %v16935_v24, 2  ;;  %v8321_v29 = vrot.slane %v16935_v24, 6 }
0x1541   :  { %8218 = vrot.lane.b32.xlu0 %v8217_v41, %s15224_s28 }
0x15b3   :  { %v8219_v20 = vpop.permute.xlu0 %8218 }
0x15b4   :  { %13558 = vmatmul.mubr.msk.f32.vlgmr.msra.gmra.mrb[90].mxu1 %vm623_vm7, %v8219_v20 }
0x15b5   :  { %14405 = vmatpush3.bf16.msra.mxu1 %v16861_v6  ;;  %13579 = vmatprep.mubr.msk.f32.mxu1 %vm15220_vm8, %v15221_v33 }
0x15b6   :  { %14406 = vmatprep.subr.bf16.mxu1 %v15219_v32 }
0x15b9   :  { %14408 = vmatpush3.bf16.msra.mxu1 %v16874_v3 }
0x15ba   :  { %14415 = vmatprep.subr.bf16.mxu1 %v15219_v32 }
0x1687   :  { %v8288_v4 = vpop.f32.mrb[90].mxu1 }
0x1688   :  { %v8302_v19 = vadd.f32 %v8288_v4, %v16896_v25  ;;  %v13559_v1 = vpop.f32.mrb[91].mxu1  ;;  %v8293_v31 = vrot.slane %v8288_v4, 4 }
0x168a   :  { %v8304_v27 = vrot.slane %v8302_v19, 4  ;;  %v8295_v5 = vadd.f32 %v8293_v31, %v16910_v14 }
0x168c   :  { %8305 = vrot.lane.b32.xlu1 %v8304_v27, %s15225_s17  ;;  %v8296_v55 = vsub.f32 0.0, %v8295_v5 }
0x168e   :  { %v8297_v47 = vmul.f32 1.442695, %v8296_v55 }
0x1690   :  { %14703 = vpow2.f32 %v8297_v47 }
0x169a   :  { %v14704_v35 = vpop.eup %14703 }
0x169b   :  { %v8299_v42 = vadd.f32 1.0, %v14704_v35 }
0x169d   :  { %14705 = vrcp.f32 %v8299_v42 }
0x16a7   :  { %v14706_v12 = vpop.eup %14705 }
0x16a8   :  { %v8315_v44 = vsub.f32 1.0, %v14706_v12  ;;  %v8323_v56 = vmul.f32 %v14706_v12, %v8321_v29 }
0x16fe   :  { %v8306_v2 = vpop.permute.xlu1 %8305 }
0x16ff   :  { %v8308_v18 = vmul.f32 %v14706_v12, %v8306_v2 }
0x1701   :  { %8310 = vrot.lane.b32.xlu0 %v8308_v18, %s15225_s17 }
0x1773   :  { %v8311_v46 = vpop.permute.xlu0 %8310 }
0x1774   :  { %v8313_v50 = vadd.f32 %v8311_v46, %v16910_v14 }
0x1776   :  { %14707 = vtanh.f32 %v8313_v50 }
0x1780   :  { %v14708_v54 = vpop.eup %14707 }
0x1781   :  { %8317 = vrot.lane.b32.xlu1 %v14708_v54, %s15224_s28 }
0x17f3   :  { %v8318_v45 = vpop.permute.xlu1 %8317 }
0x17f4   :  { %v8320_v59 = vmul.f32 %v8318_v45, %v8315_v44 }
0x17f6   :  { %v16953_v26 = vadd.f32 %v8323_v56, %v8320_v59 }
0x17f8   :  { %v8331_v28 = vrot.slane %v16953_v26, 4  ;;  %v8435_v38 = vrot.slane %v16953_v26, 6 }
0x17fa   :  { %8332 = vrot.lane.b32.xlu0 %v8331_v28, %s15224_s28 }
0x186c   :  { %v8333_v30 = vpop.permute.xlu0 %8332 }
0x186d   :  { %13569 = vmatmul.mubr.msk.f32.vlgmr.msra.gmra.mrb[78].mxu0 %vm623_vm7, %v8333_v30 }
0x186e   :  { %14411 = vmatpush3.bf16.msra.mxu0 %v16861_v6  ;;  %13590 = vmatprep.mubr.msk.f32.mxu0 %vm15220_vm8, %v15221_v33 }
0x186f   :  { %14412 = vmatprep.subr.bf16.mxu0 %v15219_v32 }
0x1872   :  { %14414 = vmatpush3.bf16.msra.mxu0 %v16874_v3 }
0x1873   :  { %14421 = vmatprep.subr.bf16.mxu0 %v15219_v32 }
0x1940   :  { %v8402_v52 = vpop.f32.mrb[78].mxu0 }
0x1941   :  { %v8416_v39 = vadd.f32 %v8402_v52, %v16896_v25  ;;  %v13570_v10 = vpop.f32.mrb[79].mxu0  ;;  %v8407_v34 = vrot.slane %v8402_v52, 2 }
0x1943   :  { %v8418_v51 = vrot.slane %v8416_v39, 2  ;;  %v8409_v43 = vadd.f32 %v8407_v34, %v16910_v14 }
0x1945   :  { %8419 = vrot.lane.b32.xlu1 %v8418_v51, %s15225_s17  ;;  %v8410_v48 = vsub.f32 0.0, %v8409_v43 }
0x1947   :  { %v8411_v9 = vmul.f32 1.442695, %v8410_v48 }
0x1949   :  { %14709 = vpow2.f32 %v8411_v9 }
0x1953   :  { %v14710_v61 = vpop.eup %14709 }
0x1954   :  { %v8413_v0 = vadd.f32 1.0, %v14710_v61 }
0x1956   :  { %14711 = vrcp.f32 %v8413_v0 }
0x1960   :  { %v14712_v17 = vpop.eup %14711 }
0x1961   :  { %v8429_v63 = vsub.f32 1.0, %v14712_v17  ;;  %v8437_v7 = vmul.f32 %v14712_v17, %v8435_v38 }
0x19b7   :  { %v8420_v22 = vpop.permute.xlu1 %8419 }
0x19b8   :  { %v8422_v21 = vmul.f32 %v14712_v17, %v8420_v22 }
0x19ba   :  { %8424 = vrot.lane.b32.xlu0 %v8422_v21, %s15225_s17 }
0x1a2c   :  { %v8425_v60 = vpop.permute.xlu0 %8424 }
0x1a2d   :  { %v8427_v8 = vadd.f32 %v8425_v60, %v16910_v14 }
0x1a2f   :  { %14713 = vtanh.f32 %v8427_v8 }
0x1a39   :  { %v14714_v16 = vpop.eup %14713 }
0x1a3a   :  { %8431 = vrot.lane.b32.xlu1 %v14714_v16, %s15224_s28 }
0x1aac   :  { %v8432_v36 = vpop.permute.xlu1 %8431 }
0x1aad   :  { %v8434_v49 = vmul.f32 %v8432_v36, %v8429_v63 }
0x1aaf   :  { %v16971_v13 = vadd.f32 %v8437_v7, %v8434_v49 }
0x1ab1   :  { %v8445_v23 = vrot.slane %v16971_v13, 6 }
0x1ab3   :  { %8446 = vrot.lane.b32.xlu0 %v8445_v23, %s15224_s28 }
0x1b25   :  { %v8447_v40 = vpop.permute.xlu0 %8446 }
0x1b26   :  { %13580 = vmatmul.mubr.msk.f32.vlgmr.msra.gmra.mrb[92].mxu1 %vm623_vm7, %v8447_v40 }
0x1b27   :  { %14417 = vmatpush3.bf16.msra.mxu1 %v16861_v6  ;;  %13601 = vmatprep.mubr.msk.f32.mxu1 %vm15220_vm8, %v15221_v33 }
0x1b28   :  { %14418 = vmatprep.subr.bf16.mxu1 %v15219_v32 }
0x1b2b   :  { %14420 = vmatpush3.bf16.msra.mxu1 %v16874_v3 }
0x1b2c   :  { %14427 = vmatprep.subr.bf16.mxu1 %v15219_v32 }
0x1bf9   :  { %v8516_v14 = vpop.f32.mrb[92].mxu1 }
0x1bfa   :  { %v8527_v62 = vadd.f32 %v8516_v14, %v16896_v25  ;;  %v13581_v57 = vpop.f32.mrb[93].mxu1  ;;  %v8520_v53 = vadd.f32 %v8516_v14, %v16908_v37 }
0x1bfc   :  { %8529 = vrot.lane.b32.xlu1 %v8527_v62, %s15225_s17  ;;  %v8521_v58 = vsub.f32 0.0, %v8520_v53 }
0x1bfe   :  { %v8522_v41 = vmul.f32 1.442695, %v8521_v58 }
0x1c00   :  { %14715 = vpow2.f32 %v8522_v41 }
0x1c0a   :  { %v14716_v20 = vpop.eup %14715 }
0x1c0b   :  { %v8524_v4 = vadd.f32 1.0, %v14716_v20 }
0x1c0d   :  { %14717 = vrcp.f32 %v8524_v4 }
0x1c17   :  { %v14718_v19 = vpop.eup %14717 }
0x1c18   :  { %v8539_v47 = vsub.f32 1.0, %v14718_v19  ;;  %v8546_v42 = vmul.f32 %v14718_v19, %v8445_v23 }
0x1c6e   :  { %v8530_v1 = vpop.permute.xlu1 %8529 }
0x1c6f   :  { %v8532_v27 = vmul.f32 %v14718_v19, %v8530_v1 }
0x1c71   :  { %8534 = vrot.lane.b32.xlu0 %v8532_v27, %s15225_s17 }
0x1ce3   :  { %v8535_v31 = vpop.permute.xlu0 %8534 }
0x1ce4   :  { %v8537_v5 = vadd.f32 %v8535_v31, %v16908_v37 }
0x1ce6   :  { %14719 = vtanh.f32 %v8537_v5 }
0x1cf0   :  { %v14720_v55 = vpop.eup %14719 }
0x1cf1   :  { %8541 = vrot.lane.b32.xlu1 %v14720_v55, %s15224_s28 }
0x1d63   :  { %v8542_v35 = vpop.permute.xlu1 %8541 }
0x1d64   :  { %v8544_v12 = vmul.f32 %v8542_v35, %v8539_v47 }
0x1d66   :  { %v8547_v2 = vadd.f32 %v8546_v42, %v8544_v12 }
0x1d68   :  { %8549 = vrot.lane.b32.xlu0 %v8547_v2, %s15224_s28  ;;  %v8654_v48 = vrot.slane %v8547_v2, 6 }
0x1dda   :  { %v8550_v18 = vpop.permute.xlu0 %8549 }
0x1ddb   :  { %8552 = vst.msk [vmem:[#allocation2 + $0x8] sm:$0x3] %vm8104_vm0, %v8550_v18  ;;  %13591 = vmatmul.mubr.msk.f32.vlgmr.msra.gmra.mrb[80].mxu0 %vm623_vm7, %v8550_v18 }
0x1ddc   :  { %14423 = vmatpush3.bf16.msra.mxu0 %v16861_v6  ;;  %13612 = vmatprep.mubr.msk.f32.mxu0 %vm15220_vm8, %v15221_v33 }
0x1ddd   :  { %14424 = vmatprep.subr.bf16.mxu0 %v15219_v32 }
0x1de0   :  { %14426 = vmatpush3.bf16.msra.mxu0 %v16874_v3 }
0x1de1   :  { %14433 = vmatprep.subr.bf16.mxu0 %v15219_v32 }
0x1eae   :  { %v8621_v46 = vpop.f32.mrb[80].mxu0 }
0x1eaf   :  { %v8635_v50 = vadd.f32 %v8621_v46, %v16896_v25  ;;  %v13592_v54 = vpop.f32.mrb[81].mxu0  ;;  %v8626_v29 = vrot.slane %v8621_v46, 6 }
0x1eb1   :  { %v8637_v44 = vrot.slane %v8635_v50, 6  ;;  %v8628_v45 = vadd.f32 %v8626_v29, %v16908_v37 }
0x1eb3   :  { %8638 = vrot.lane.b32.xlu1 %v8637_v44, %s15225_s17  ;;  %v8629_v56 = vsub.f32 0.0, %v8628_v45 }
0x1eb5   :  { %v8630_v59 = vmul.f32 1.442695, %v8629_v56 }
0x1eb7   :  { %14721 = vpow2.f32 %v8630_v59 }
0x1ec1   :  { %v14722_v28 = vpop.eup %14721 }
0x1ec2   :  { %v8632_v30 = vadd.f32 1.0, %v14722_v28 }
0x1ec4   :  { %14723 = vrcp.f32 %v8632_v30 }
0x1ece   :  { %v14724_v52 = vpop.eup %14723 }
0x1ecf   :  { %v8648_v9 = vsub.f32 1.0, %v14724_v52  ;;  %v8656_v17 = vmul.f32 %v14724_v52, %v8654_v48 }
0x1f25   :  { %v8639_v39 = vpop.permute.xlu1 %8638 }
0x1f26   :  { %v8641_v10 = vmul.f32 %v14724_v52, %v8639_v39 }
0x1f28   :  { %8643 = vrot.lane.b32.xlu0 %v8641_v10, %s15225_s17 }
0x1f9a   :  { %v8644_v51 = vpop.permute.xlu0 %8643 }
0x1f9b   :  { %v8646_v34 = vadd.f32 %v8644_v51, %v16908_v37 }
0x1f9d   :  { %14725 = vtanh.f32 %v8646_v34 }
0x1fa7   :  { %v14726_v43 = vpop.eup %14725 }
0x1fa8   :  { %8650 = vrot.lane.b32.xlu1 %v14726_v43, %s15224_s28 }
0x201a   :  { %v8651_v61 = vpop.permute.xlu1 %8650 }
0x201b   :  { %v8653_v0 = vmul.f32 %v8651_v61, %v8648_v9 }
0x201d   :  { %v17003_v22 = vadd.f32 %v8656_v17, %v8653_v0 }
0x201f   :  { %v8663_v21 = vrot.slane %v17003_v22, 2  ;;  %v8767_v19 = vrot.slane %v17003_v22, 6 }
0x2021   :  { %8664 = vrot.lane.b32.xlu0 %v8663_v21, %s15224_s28 }
0x2093   :  { %v8665_v60 = vpop.permute.xlu0 %8664 }
0x2094   :  { %13602 = vmatmul.mubr.msk.f32.vlgmr.msra.gmra.mrb[94].mxu1 %vm623_vm7, %v8665_v60 }
0x2095   :  { %14429 = vmatpush3.bf16.msra.mxu1 %v16861_v6  ;;  %13623 = vmatprep.mubr.msk.f32.mxu1 %vm15220_vm8, %v15221_v33 }
0x2096   :  { %14430 = vmatprep.subr.bf16.mxu1 %v15219_v32 }
0x2099   :  { %14432 = vmatpush3.bf16.msra.mxu1 %v16874_v3 }
0x209a   :  { %14439 = vmatprep.subr.bf16.mxu1 %v15219_v32 }
0x2167   :  { %v8734_v8 = vpop.f32.mrb[94].mxu1 }
0x2168   :  { %v8748_v16 = vadd.f32 %v8734_v8, %v16896_v25  ;;  %v13603_v63 = vpop.f32.mrb[95].mxu1  ;;  %v8739_v36 = vrot.slane %v8734_v8, 4 }
0x216a   :  { %v8750_v38 = vrot.slane %v8748_v16, 4  ;;  %v8741_v7 = vadd.f32 %v8739_v36, %v16908_v37 }
0x216c   :  { %8751 = vrot.lane.b32.xlu1 %v8750_v38, %s15225_s17  ;;  %v8742_v49 = vsub.f32 0.0, %v8741_v7 }
0x216e   :  { %v8743_v23 = vmul.f32 1.442695, %v8742_v49 }
0x2170   :  { %14727 = vpow2.f32 %v8743_v23 }
0x217a   :  { %v14728_v40 = vpop.eup %14727 }
0x217b   :  { %v8745_v14 = vadd.f32 1.0, %v14728_v40 }
0x217d   :  { %14729 = vrcp.f32 %v8745_v14 }
0x2187   :  { %v14730_v62 = vpop.eup %14729 }
0x2188   :  { %v8761_v4 = vsub.f32 1.0, %v14730_v62  ;;  %v8769_v27 = vmul.f32 %v14730_v62, %v8767_v19 }
0x21de   :  { %v8752_v57 = vpop.permute.xlu1 %8751 }
0x21df   :  { %v8754_v53 = vmul.f32 %v14730_v62, %v8752_v57 }
0x21e1   :  { %8756 = vrot.lane.b32.xlu0 %v8754_v53, %s15225_s17 }
0x2253   :  { %v8757_v58 = vpop.permute.xlu0 %8756 }
0x2254   :  { %v8759_v41 = vadd.f32 %v8757_v58, %v16908_v37 }
0x2256   :  { %14731 = vtanh.f32 %v8759_v41 }
0x2260   :  { %v14732_v20 = vpop.eup %14731 }
0x2261   :  { %8763 = vrot.lane.b32.xlu1 %v14732_v20, %s15224_s28 }
0x22d3   :  { %v8764_v1 = vpop.permute.xlu1 %8763 }
0x22d4   :  { %v8766_v31 = vmul.f32 %v8764_v1, %v8761_v4 }
0x22d6   :  { %v17021_v5 = vadd.f32 %v8769_v27, %v8766_v31 }
0x22d8   :  { %v8776_v55 = vrot.slane %v17021_v5, 4  ;;  %v8880_v10 = vrot.slane %v17021_v5, 6 }
0x22da   :  { %8777 = vrot.lane.b32.xlu0 %v8776_v55, %s15224_s28 }
0x234c   :  { %v8778_v47 = vpop.permute.xlu0 %8777 }
0x234d   :  { %13613 = vmatmul.mubr.msk.f32.vlgmr.msra.gmra.mrb[82].mxu0 %vm623_vm7, %v8778_v47 }
0x234e   :  { %14435 = vmatpush3.bf16.msra.mxu0 %v16861_v6  ;;  %13634 = vmatprep.mubr.msk.f32.mxu0 %vm15220_vm8, %v15221_v33 }
0x234f   :  { %14436 = vmatprep.subr.bf16.mxu0 %v15219_v32 }
0x2352   :  { %14438 = vmatpush3.bf16.msra.mxu0 %v16874_v3 }
0x2353   :  { %14445 = vmatprep.subr.bf16.mxu0 %v15219_v32 }
0x2420   :  { %v8847_v35 = vpop.f32.mrb[82].mxu0 }
0x2421   :  { %v8861_v42 = vadd.f32 %v8847_v35, %v16896_v25  ;;  %v13614_v12 = vpop.f32.mrb[83].mxu0  ;;  %v8852_v18 = vrot.slane %v8847_v35, 2 }
0x2423   :  { %v8863_v2 = vrot.slane %v8861_v42, 2  ;;  %v8854_v46 = vadd.f32 %v8852_v18, %v16908_v37 }
0x2425   :  { %8864 = vrot.lane.b32.xlu1 %v8863_v2, %s15225_s17  ;;  %v8855_v50 = vsub.f32 0.0, %v8854_v46 }
0x2427   :  { %v8856_v54 = vmul.f32 1.442695, %v8855_v50 }
0x2429   :  { %14733 = vpow2.f32 %v8856_v54 }
0x2433   :  { %v14734_v44 = vpop.eup %14733 }
0x2434   :  { %v8858_v29 = vadd.f32 1.0, %v14734_v44 }
0x2436   :  { %14735 = vrcp.f32 %v8858_v29 }
0x2440   :  { %v14736_v45 = vpop.eup %14735 }
0x2441   :  { %v8874_v39 = vsub.f32 1.0, %v14736_v45  ;;  %v8882_v34 = vmul.f32 %v14736_v45, %v8880_v10 }
0x2497   :  { %v8865_v56 = vpop.permute.xlu1 %8864 }
0x2498   :  { %v8867_v59 = vmul.f32 %v14736_v45, %v8865_v56 }
0x249a   :  { %8869 = vrot.lane.b32.xlu0 %v8867_v59, %s15225_s17 }
0x250c   :  { %v8870_v28 = vpop.permute.xlu0 %8869 }
0x250d   :  { %v8872_v30 = vadd.f32 %v8870_v28, %v16908_v37 }
0x250f   :  { %14737 = vtanh.f32 %v8872_v30 }
0x2519   :  { %v14738_v52 = vpop.eup %14737 }
0x251a   :  { %8876 = vrot.lane.b32.xlu1 %v14738_v52, %s15224_s28 }
0x258c   :  { %v8877_v51 = vpop.permute.xlu1 %8876 }
0x258d   :  { %v8879_v43 = vmul.f32 %v8877_v51, %v8874_v39 }
0x258f   :  { %v17039_v48 = vadd.f32 %v8882_v34, %v8879_v43 }
0x2591   :  { %v8889_v9 = vrot.slane %v17039_v48, 6 }
0x2593   :  { %8890 = vrot.lane.b32.xlu0 %v8889_v9, %s15224_s28 }
0x2605   :  { %v8891_v61 = vpop.permute.xlu0 %8890 }
0x2606   :  { %13624 = vmatmul.mubr.msk.f32.vlgmr.msra.gmra.mrb[96].mxu1 %vm623_vm7, %v8891_v61 }
0x2607   :  { %14441 = vmatpush3.bf16.msra.mxu1 %v16861_v6  ;;  %13645 = vmatprep.mubr.msk.f32.mxu1 %vm15220_vm8, %v15221_v33 }
0x2608   :  { %14442 = vmatprep.subr.bf16.mxu1 %v15219_v32 }
0x260b   :  { %14444 = vmatpush3.bf16.msra.mxu1 %v16874_v3 }
0x260c   :  { %14451 = vmatprep.subr.bf16.mxu1 %v15219_v32 }
0x26d9   :  { %v8960_v37 = vpop.f32.mrb[96].mxu1 }
0x26da   :  { %v8971_v0 = vadd.f32 %v8960_v37, %v16896_v25  ;;  %v13625_v17 = vpop.f32.mrb[97].mxu1  ;;  %v8964_v21 = vadd.f32 %v8960_v37, %v16915_v11 }
0x26dc   :  { %8973 = vrot.lane.b32.xlu1 %v8971_v0, %s15225_s17  ;;  %v8965_v60 = vsub.f32 0.0, %v8964_v21 }
0x26de   :  { %v8966_v8 = vmul.f32 1.442695, %v8965_v60 }
0x26e0   :  { %14739 = vpow2.f32 %v8966_v8 }
0x26ea   :  { %v14740_v16 = vpop.eup %14739 }
0x26eb   :  { %v8968_v63 = vadd.f32 1.0, %v14740_v16 }
0x26ed   :  { %14741 = vrcp.f32 %v8968_v63 }
0x26f7   :  { %v14742_v38 = vpop.eup %14741 }
0x26f8   :  { %v8983_v14 = vsub.f32 1.0, %v14742_v38  ;;  %v8990_v57 = vmul.f32 %v14742_v38, %v8889_v9 }
0x274e   :  { %v8974_v36 = vpop.permute.xlu1 %8973 }
0x274f   :  { %v8976_v7 = vmul.f32 %v14742_v38, %v8974_v36 }
0x2751   :  { %8978 = vrot.lane.b32.xlu0 %v8976_v7, %s15225_s17 }
0x27c3   :  { %v8979_v49 = vpop.permute.xlu0 %8978 }
0x27c4   :  { %v8981_v23 = vadd.f32 %v8979_v49, %v16915_v11 }
0x27c6   :  { %14743 = vtanh.f32 %v8981_v23 }
0x27d0   :  { %v14744_v40 = vpop.eup %14743 }
0x27d1   :  { %8985 = vrot.lane.b32.xlu1 %v14744_v40, %s15224_s28 }
0x2843   :  { %v8986_v62 = vpop.permute.xlu1 %8985 }
0x2844   :  { %v8988_v53 = vmul.f32 %v8986_v62, %v8983_v14 }
0x2846   :  { %v8991_v58 = vadd.f32 %v8990_v57, %v8988_v53 }
0x2848   :  { %8993 = vrot.lane.b32.xlu0 %v8991_v58, %s15224_s28  ;;  %v9098_v44 = vrot.slane %v8991_v58, 6 }
0x28ba   :  { %v8994_v41 = vpop.permute.xlu0 %8993 }
0x28bb   :  { %8996 = vst.msk [vmem:[#allocation2 + $0x10] sm:$0x3] %vm8104_vm0, %v8994_v41  ;;  %13635 = vmatmul.mubr.msk.f32.vlgmr.msra.gmra.mrb[84].mxu0 %vm623_vm7, %v8994_v41 }
0x28bc   :  { %14447 = vmatpush3.bf16.msra.mxu0 %v16861_v6  ;;  %13656 = vmatprep.mubr.msk.f32.mxu0 %vm15220_vm8, %v15221_v33 }
0x28bd   :  { %14448 = vmatprep.subr.bf16.mxu0 %v15219_v32 }
0x28c0   :  { %14450 = vmatpush3.bf16.msra.mxu0 %v16874_v3 }
0x28c1   :  { %14457 = vmatprep.subr.bf16.mxu0 %v15219_v32 }
0x298e   :  { %v9065_v20 = vpop.f32.mrb[84].mxu0 }
0x298f   :  { %v9079_v4 = vadd.f32 %v9065_v20, %v16896_v25  ;;  %v13636_v19 = vpop.f32.mrb[85].mxu0  ;;  %v9070_v27 = vrot.slane %v9065_v20, 6 }
0x2991   :  { %v9081_v1 = vrot.slane %v9079_v4, 6  ;;  %v9072_v31 = vadd.f32 %v9070_v27, %v16915_v11 }
0x2993   :  { %9082 = vrot.lane.b32.xlu1 %v9081_v1, %s15225_s17  ;;  %v9073_v55 = vsub.f32 0.0, %v9072_v31 }
0x2995   :  { %v9074_v47 = vmul.f32 1.442695, %v9073_v55 }
0x2997   :  { %14745 = vpow2.f32 %v9074_v47 }
0x29a1   :  { %v14746_v35 = vpop.eup %14745 }
0x29a2   :  { %v9076_v42 = vadd.f32 1.0, %v14746_v35 }
0x29a4   :  { %14747 = vrcp.f32 %v9076_v42 }
0x29ae   :  { %v14748_v12 = vpop.eup %14747 }
0x29af   :  { %v9092_v29 = vsub.f32 1.0, %v14748_v12  ;;  %v9100_v59 = vmul.f32 %v14748_v12, %v9098_v44 }
0x2a05   :  { %v9083_v2 = vpop.permute.xlu1 %9082 }
0x2a06   :  { %v9085_v18 = vmul.f32 %v14748_v12, %v9083_v2 }
0x2a08   :  { %9087 = vrot.lane.b32.xlu0 %v9085_v18, %s15225_s17 }
0x2a7a   :  { %v9088_v46 = vpop.permute.xlu0 %9087 }
0x2a7b   :  { %v9090_v50 = vadd.f32 %v9088_v46, %v16915_v11 }
0x2a7d   :  { %14749 = vtanh.f32 %v9090_v50 }
0x2a87   :  { %v14750_v54 = vpop.eup %14749 }
0x2a88   :  { %9094 = vrot.lane.b32.xlu1 %v14750_v54, %s15224_s28 }
0x2afa   :  { %v9095_v45 = vpop.permute.xlu1 %9094 }
0x2afb   :  { %v9097_v56 = vmul.f32 %v9095_v45, %v9092_v29 }
0x2afd   :  { %v17071_v28 = vadd.f32 %v9100_v59, %v9097_v56 }
0x2aff   :  { %v9107_v30 = vrot.slane %v17071_v28, 2  ;;  %v9211_v7 = vrot.slane %v17071_v28, 6 }
0x2b01   :  { %9108 = vrot.lane.b32.xlu0 %v9107_v30, %s15224_s28 }
0x2b73   :  { %v9109_v52 = vpop.permute.xlu0 %9108 }
0x2b74   :  { %13646 = vmatmul.mubr.msk.f32.vlgmr.msra.gmra.mrb[98].mxu1 %vm623_vm7, %v9109_v52 }
0x2b75   :  { %14453 = vmatpush3.bf16.msra.mxu1 %v16861_v6  ;;  %13667 = vmatprep.mubr.msk.f32.mxu1 %vm15220_vm8, %v15221_v33 }
0x2b76   :  { %14454 = vmatprep.subr.bf16.mxu1 %v15219_v32 }
0x2b79   :  { %14456 = vmatpush3.bf16.msra.mxu1 %v16874_v3 }
0x2b7a   :  { %14463 = vmatprep.subr.bf16.mxu1 %v15219_v32 }
0x2c47   :  { %v9178_v39 = vpop.f32.mrb[98].mxu1 }
0x2c48   :  { %v9192_v10 = vadd.f32 %v9178_v39, %v16896_v25  ;;  %v13647_v51 = vpop.f32.mrb[99].mxu1  ;;  %v9183_v43 = vrot.slane %v9178_v39, 4 }
0x2c4a   :  { %v9194_v34 = vrot.slane %v9192_v10, 4  ;;  %v9185_v9 = vadd.f32 %v9183_v43, %v16915_v11 }
0x2c4c   :  { %9195 = vrot.lane.b32.xlu1 %v9194_v34, %s15225_s17  ;;  %v9186_v61 = vsub.f32 0.0, %v9185_v9 }
0x2c4e   :  { %v9187_v37 = vmul.f32 1.442695, %v9186_v61 }
0x2c50   :  { %14751 = vpow2.f32 %v9187_v37 }
0x2c5a   :  { %v14752_v0 = vpop.eup %14751 }
0x2c5b   :  { %v9189_v17 = vadd.f32 1.0, %v14752_v0 }
0x2c5d   :  { %14753 = vrcp.f32 %v9189_v17 }
0x2c67   :  { %v14754_v21 = vpop.eup %14753 }
0x2c68   :  { %v9205_v36 = vsub.f32 1.0, %v14754_v21  ;;  %v9213_v23 = vmul.f32 %v14754_v21, %v9211_v7 }
0x2cbe   :  { %v9196_v60 = vpop.permute.xlu1 %9195 }
0x2cbf   :  { %v9198_v8 = vmul.f32 %v14754_v21, %v9196_v60 }
0x2cc1   :  { %9200 = vrot.lane.b32.xlu0 %v9198_v8, %s15225_s17 }
0x2d33   :  { %v9201_v16 = vpop.permute.xlu0 %9200 }
0x2d34   :  { %v9203_v63 = vadd.f32 %v9201_v16, %v16915_v11 }
0x2d36   :  { %14755 = vtanh.f32 %v9203_v63 }
0x2d40   :  { %v14756_v38 = vpop.eup %14755 }
0x2d41   :  { %9207 = vrot.lane.b32.xlu1 %v14756_v38, %s15224_s28 }
0x2db3   :  { %v9208_v49 = vpop.permute.xlu1 %9207 }
0x2db4   :  { %v9210_v40 = vmul.f32 %v9208_v49, %v9205_v36 }
0x2db6   :  { %v17089_v14 = vadd.f32 %v9213_v23, %v9210_v40 }
0x2db8   :  { %v9220_v62 = vrot.slane %v17089_v14, 4  ;;  %v9324_v50 = vrot.slane %v17089_v14, 6 }
0x2dba   :  { %9221 = vrot.lane.b32.xlu0 %v9220_v62, %s15224_s28 }
0x2e2c   :  { %v9222_v57 = vpop.permute.xlu0 %9221 }
0x2e2d   :  { %13657 = vmatmul.mubr.msk.f32.vlgmr.msra.gmra.mrb[86].mxu0 %vm623_vm7, %v9222_v57 }
0x2e2e   :  { %14459 = vmatpush3.bf16.msra.mxu0 %v16861_v6  ;;  %13678 = vmatprep.mubr.msk.f32.mxu0 %vm15220_vm8, %v15221_v33 }
0x2e2f   :  { %14460 = vmatprep.subr.bf16.mxu0 %v15219_v32 }
0x2e32   :  { %14462 = vmatpush3.bf16.msra.mxu0 %v16874_v3 }
0x2e33   :  { %14469 = vmatprep.subr.bf16.mxu0 %v15219_v32 }
0x2f00   :  { %v9291_v53 = vpop.f32.mrb[86].mxu0 }
0x2f01   :  { %v9305_v58 = vadd.f32 %v9291_v53, %v16896_v25  ;;  %v13658_v41 = vpop.f32.mrb[87].mxu0  ;;  %v9296_v4 = vrot.slane %v9291_v53, 2 }
0x2f03   :  { %v9307_v20 = vrot.slane %v9305_v58, 2  ;;  %v9298_v19 = vadd.f32 %v9296_v4, %v16915_v11 }
0x2f05   :  { %9308 = vrot.lane.b32.xlu1 %v9307_v20, %s15225_s17  ;;  %v9299_v1 = vsub.f32 0.0, %v9298_v19 }
0x2f07   :  { %v9300_v27 = vmul.f32 1.442695, %v9299_v1 }
0x2f09   :  { %14757 = vpow2.f32 %v9300_v27 }
0x2f13   :  { %v14758_v31 = vpop.eup %14757 }
0x2f14   :  { %v9302_v55 = vadd.f32 1.0, %v14758_v31 }
0x2f16   :  { %14759 = vrcp.f32 %v9302_v55 }
0x2f20   :  { %v14760_v47 = vpop.eup %14759 }
0x2f21   :  { %v9318_v46 = vsub.f32 1.0, %v14760_v47  ;;  %v9326_v44 = vmul.f32 %v14760_v47, %v9324_v50 }
0x2f77   :  { %v9309_v35 = vpop.permute.xlu1 %9308 }
0x2f78   :  { %v9311_v42 = vmul.f32 %v14760_v47, %v9309_v35 }
0x2f7a   :  { %9313 = vrot.lane.b32.xlu0 %v9311_v42, %s15225_s17 }
0x2fec   :  { %v9314_v12 = vpop.permute.xlu0 %9313 }
0x2fed   :  { %v9316_v2 = vadd.f32 %v9314_v12, %v16915_v11 }
0x2fef   :  { %14761 = vtanh.f32 %v9316_v2 }
0x2ff9   :  { %v14762_v18 = vpop.eup %14761 }
0x2ffa   :  { %9320 = vrot.lane.b32.xlu1 %v14762_v18, %s15224_s28 }
0x306c   :  { %v9321_v54 = vpop.permute.xlu1 %9320 }
0x306d   :  { %v9323_v29 = vmul.f32 %v9321_v54, %v9318_v46 }
0x306f   :  { %v17107_v45 = vadd.f32 %v9326_v44, %v9323_v29 }
0x3071   :  { %v9333_v56 = vrot.slane %v17107_v45, 6 }
0x3073   :  { %9334 = vrot.lane.b32.xlu0 %v9333_v56, %s15224_s28 }
0x30e5   :  { %v9335_v59 = vpop.permute.xlu0 %9334 }
0x30e6   :  { %13668 = vmatmul.mubr.msk.f32.vlgmr.msra.gmra.mrb[100].mxu1 %vm623_vm7, %v9335_v59 }
0x30e7   :  { %14465 = vmatpush3.bf16.msra.mxu1 %v16861_v6  ;;  %13689 = vmatprep.mubr.msk.f32.mxu1 %vm15220_vm8, %v15221_v33 }
0x30e8   :  { %14466 = vmatprep.subr.bf16.mxu1 %v15219_v32 }
0x30eb   :  { %14468 = vmatpush3.bf16.msra.mxu1 %v16874_v3 }
0x31b9   :  { %v9404_v11 = vpop.f32.mrb[100].mxu1 }
0x31ba   :  { %v9415_v30 = vadd.f32 %v9404_v11, %v16896_v25  ;;  %v13669_v52 = vpop.f32.mrb[101].mxu1  ;;  %v9408_v39 = vadd.f32 %v9404_v11, %v16913_v15 }
0x31bc   :  { %9417 = vrot.lane.b32.xlu1 %v9415_v30, %s15225_s17  ;;  %v9409_v10 = vsub.f32 0.0, %v9408_v39 }
0x31be   :  { %v9410_v51 = vmul.f32 1.442695, %v9409_v10 }
0x31c0   :  { %14763 = vpow2.f32 %v9410_v51 }
0x31ca   :  { %v14764_v34 = vpop.eup %14763 }
0x31cb   :  { %v9412_v43 = vadd.f32 1.0, %v14764_v34 }
0x31cd   :  { %14765 = vrcp.f32 %v9412_v43 }
0x31d7   :  { %v14766_v9 = vpop.eup %14765 }
0x31d8   :  { %v9427_v60 = vsub.f32 1.0, %v14766_v9  ;;  %v9434_v16 = vmul.f32 %v14766_v9, %v9333_v56 }
0x322e   :  { %v9418_v61 = vpop.permute.xlu1 %9417 }
0x322f   :  { %v9420_v37 = vmul.f32 %v14766_v9, %v9418_v61 }
0x3231   :  { %9422 = vrot.lane.b32.xlu0 %v9420_v37, %s15225_s17 }
0x32a3   :  { %v9423_v0 = vpop.permute.xlu0 %9422 }
0x32a4   :  { %v9425_v17 = vadd.f32 %v9423_v0, %v16913_v15 }
0x32a6   :  { %14767 = vtanh.f32 %v9425_v17 }
0x32b0   :  { %v14768_v21 = vpop.eup %14767 }
0x32b1   :  { %9429 = vrot.lane.b32.xlu1 %v14768_v21, %s15224_s28 }
0x3323   :  { %v9430_v8 = vpop.permute.xlu1 %9429 }
0x3324   :  { %v9432_v63 = vmul.f32 %v9430_v8, %v9427_v60 }
0x3326   :  { %v9435_v38 = vadd.f32 %v9434_v16, %v9432_v63  ;;  %v9783_v63 = vld [vmem:[%s17592_s19 + $0x10] sm:$0xff] }
0x3328   :  { %9437 = vrot.lane.b32.xlu0 %v9435_v38, %s15224_s28  ;;  %v9542_v31 = vrot.slane %v9435_v38, 6  ;;  %v9784_v38 = vld [vmem:[%s17592_s19 + $0x18] sm:$0xff] }
0x339a   :  { %v9438_v36 = vpop.permute.xlu0 %9437 }
0x339b   :  { %9440 = vst.msk [vmem:[#allocation2 + $0x18] sm:$0x3] %vm8104_vm0, %v9438_v36  ;;  %13679 = vmatmul.mubr.msk.f32.vlgmr.msra.gmra.mrb[88].mxu0 %vm623_vm7, %v9438_v36  ;;  %v14479_v36 = vpack.c.bf16 %v9784_v38, %v9783_v63 }
0x339c   :  { %14471 = vmatpush3.bf16.msra.mxu0 %v16861_v6  ;;  %13700 = vmatprep.mubr.msk.f32.mxu0 %vm15220_vm8, %v15221_v33 }
0x339d   :  { %14472 = vmatprep.subr.bf16.mxu0 %v15219_v32 }
0x33a0   :  { %14474 = vmatpush3.bf16.msra.mxu0 %v16874_v3 }
0x33a1   :  { %14483 = vmatprep.subr.bf16.mxu0 %v15219_v32 }
0x346e   :  { %v9509_v7 = vpop.f32.mrb[88].mxu0 }
0x346f   :  { %v9523_v49 = vadd.f32 %v9509_v7, %v16896_v25  ;;  %v13680_v23 = vpop.f32.mrb[89].mxu0  ;;  %v9514_v62 = vrot.slane %v9509_v7, 6 }
0x3470   :  { %v11974_v23 = vld [vmem:[#allocation20] ss:$0 sm:$0xff] }
0x3471   :  { %v9525_v40 = vrot.slane %v9523_v49, 6  ;;  %v9516_v57 = vadd.f32 %v9514_v62, %v16913_v15 }
0x3473   :  { %9526 = vrot.lane.b32.xlu1 %v9525_v40, %s15225_s17  ;;  %v9517_v6 = vsub.f32 0.0, %v9516_v57  ;;  %v9889_v40 = vld [vmem:[%s17594_s21] sm:$0xff]  ;;  %v9891_v57 = vld [vmem:[%s17594_s21 + $0x10] sm:$0xff] }
0x3475   :  { %v9518_v53 = vmul.f32 1.442695, %v9517_v6 }
0x3477   :  { %14769 = vpow2.f32 %v9518_v53 }
0x3481   :  { %v14770_v58 = vpop.eup %14769 }
0x3482   :  { %v9520_v41 = vadd.f32 1.0, %v14770_v58 }
0x3484   :  { %14771 = vrcp.f32 %v9520_v41 }
0x348e   :  { %v14772_v20 = vpop.eup %14771 }
0x348f   :  { %v9536_v55 = vsub.f32 1.0, %v14772_v20  ;;  %v9544_v42 = vmul.f32 %v14772_v20, %v9542_v31 }
0x34e5   :  { %v9527_v3 = vpop.permute.xlu1 %9526 }
0x34e6   :  { %v9529_v4 = vmul.f32 %v14772_v20, %v9527_v3 }
0x34e8   :  { %9531 = vrot.lane.b32.xlu0 %v9529_v4, %s15225_s17 }
0x355a   :  { %v9532_v19 = vpop.permute.xlu0 %9531 }
0x355b   :  { %v9534_v1 = vadd.f32 %v9532_v19, %v16913_v15 }
0x355d   :  { %14773 = vtanh.f32 %v9534_v1 }
0x3567   :  { %v14774_v27 = vpop.eup %14773 }
0x3568   :  { %9538 = vrot.lane.b32.xlu1 %v14774_v27, %s15224_s28 }
0x35da   :  { %v9539_v47 = vpop.permute.xlu1 %9538 }
0x35db   :  { %v9541_v35 = vmul.f32 %v9539_v47, %v9536_v55 }
0x35dd   :  { %v17138_v12 = vadd.f32 %v9544_v42, %v9541_v35 }
0x35df   :  { %v9551_v2 = vrot.slane %v17138_v12, 2  ;;  %v9655_v37 = vrot.slane %v17138_v12, 6 }
0x35e1   :  { %9552 = vrot.lane.b32.xlu0 %v9551_v2, %s15224_s28 }
0x3653   :  { %v9553_v18 = vpop.permute.xlu0 %9552 }
0x3654   :  { %13690 = vmatmul.mubr.msk.f32.vlgmr.msra.gmra.mrb[102].mxu1 %vm623_vm7, %v9553_v18 }
0x3727   :  { %v9622_v46 = vpop.f32.mrb[102].mxu1 }
0x3728   :  { %v9636_v50 = vadd.f32 %v9622_v46, %v16896_v25  ;;  %v13691_v54 = vpop.f32.mrb[103].mxu1  ;;  %v9627_v29 = vrot.slane %v9622_v46, 4  ;;  %v17230_v46 = vld [vmem:[#allocation18] ss:$0 sm:$0xff] }
0x372a   :  { %v9638_v44 = vrot.slane %v9636_v50, 4  ;;  %v9629_v56 = vadd.f32 %v9627_v29, %v16913_v15 }
0x372c   :  { %9639 = vrot.lane.b32.xlu1 %v9638_v44, %s15225_s17  ;;  %v9630_v59 = vsub.f32 0.0, %v9629_v56 }
0x372e   :  { %v9631_v11 = vmul.f32 1.442695, %v9630_v59 }
0x3730   :  { %14775 = vpow2.f32 %v9631_v11 }
0x373a   :  { %v14776_v30 = vpop.eup %14775 }
0x373b   :  { %v9633_v52 = vadd.f32 1.0, %v14776_v30 }
0x373d   :  { %14777 = vrcp.f32 %v9633_v52 }
0x3747   :  { %v14778_v39 = vpop.eup %14777 }
0x3748   :  { %v9649_v61 = vsub.f32 1.0, %v14778_v39  ;;  %v9657_v17 = vmul.f32 %v14778_v39, %v9655_v37 }
0x379e   :  { %v9640_v10 = vpop.permute.xlu1 %9639 }
0x379f   :  { %v9642_v51 = vmul.f32 %v14778_v39, %v9640_v10 }
0x37a1   :  { %9644 = vrot.lane.b32.xlu0 %v9642_v51, %s15225_s17 }
0x3813   :  { %v9645_v34 = vpop.permute.xlu0 %9644 }
0x3814   :  { %v9647_v43 = vadd.f32 %v9645_v34, %v16913_v15 }
0x3816   :  { %14779 = vtanh.f32 %v9647_v43 }
0x3820   :  { %v14780_v9 = vpop.eup %14779 }
0x3821   :  { %9651 = vrot.lane.b32.xlu1 %v14780_v9, %s15224_s28 }
0x3825   :  { %8212 = vrot.lane.b32.xlu1 %v16935_v24, %s15224_s28  ;;  %v9781_v24 = vld [vmem:[%s17592_s19] sm:$0xff] }
0x3829   :  { %8440 = vrot.lane.b32.xlu1 %v16971_v13, %s15224_s28  ;;  %v9782_v13 = vld [vmem:[%s17592_s19 + $0x8] sm:$0xff] }
0x382a   :  { %v14475_v16 = vpack.c.bf16 %v9782_v13, %v9781_v24 }
0x382c   :  { %14476 = vmatprep.subr.bf16.mxu1 %v14475_v16 }
0x382d   :  { %8772 = vrot.lane.b32.xlu1 %v17021_v5, %s15224_s28  ;;  %14478 = vmatpush3.bf16.msra.mxu1 %v14475_v16 }
0x382e   :  { %14480 = vmatprep.subr.bf16.mxu1 %v14479_v36 }
0x3831   :  { %14482 = vmatpush3.bf16.msra.mxu1 %v14479_v36  ;;  %9976 = vrot.lane.b32.xlu1 %v11974_v23, %s15225_s17 }
0x3832   :  { %14489 = vmatprep.subr.bf16.mxu1 %v15219_v32 }
0x3893   :  { %v9652_v0 = vpop.permute.xlu1 %9651 }
0x3894   :  { %v9654_v21 = vmul.f32 %v9652_v0, %v9649_v61 }
0x3896   :  { %v17156_v60 = vadd.f32 %v9657_v17, %v9654_v21 }
0x3897   :  { %v8213_v8 = vpop.permute.xlu1 %8212 }
0x3898   :  { %v9664_v5 = vrot.slane %v17156_v60, 4  ;;  %8216 = vst.msk [vmem:[#allocation2] sm:$0xc] %vm8215_vm1, %v8213_v8  ;;  %v9768_v13 = vrot.slane %v17156_v60, 6 }
0x389a   :  { %9665 = vrot.lane.b32.xlu0 %v9664_v5, %s15224_s28 }
0x389b   :  { %v8441_v7 = vpop.permute.xlu1 %8440 }
0x389c   :  { %8444 = vst.msk [vmem:[#allocation2] sm:$0xc0] %vm8443_vm5, %v8441_v7 }
0x389e   :  { %8326 = vrot.lane.b32.xlu0 %v16953_v26, %s15224_s28  ;;  %v9890_v26 = vld [vmem:[%s17594_s21 + $0x8] sm:$0xff] }
0x389f   :  { %v8773_v49 = vpop.permute.xlu1 %8772  ;;  %v17189_v62 = vpack.c.bf16 %v9890_v26, %v9889_v40 }
0x38a0   :  { %8775 = vst.msk [vmem:[#allocation2 + $0x8] sm:$0x30] %vm8329_vm13, %v8773_v49 }
0x38a2   :  { %8659 = vrot.lane.b32.xlu0 %v17003_v22, %s15224_s28  ;;  %v9892_v22 = vld [vmem:[%s17594_s21 + $0x18] sm:$0xff] }
0x38a3   :  { %v17224_v31 = vpop.permute.xlu1 %9976 }
0x38a6   :  { %8885 = vrot.lane.b32.xlu0 %v17039_v48, %s15224_s28  ;;  %v17199_v48 = vpack.c.bf16 %v9892_v22, %v9891_v57 }
0x390c   :  { %v9666_v6 = vpop.permute.xlu0 %9665 }
0x390d   :  { %13701 = vmatmul.mubr.msk.f32.vlgmr.msra.gmra.mrb[90].mxu0 %vm623_vm7, %v9666_v6 }
0x390e   :  { %14485 = vmatpush3.bf16.msra.mxu0 %v17189_v62  ;;  %13725 = vmatprep.mubr.msk.f32.mxu0 %vm15220_vm8, %v15221_v33 }
0x390f   :  { %14486 = vmatprep.subr.bf16.mxu0 %v15219_v32 }
0x3910   :  { %v8327_v53 = vpop.permute.xlu0 %8326 }
0x3911   :  { %8330 = vst.msk [vmem:[#allocation2] sm:$0x30] %vm8329_vm13, %v8327_v53 }
0x3912   :  { %14488 = vmatpush3.bf16.msra.mxu0 %v17199_v48 }
0x3913   :  { %14495 = vmatprep.subr.bf16.mxu0 %v15219_v32 }
0x3914   :  { %v8660_v58 = vpop.permute.xlu0 %8659 }
0x3915   :  { %13726 = vmatmul.mubr.f32.vlgmr.msra.gmra.mrb[92].mxu0 %v15221_v33  ;;  %8662 = vst.msk [vmem:[#allocation2 + $0x8] sm:$0xc] %vm8215_vm1, %v8660_v58 }
0x3916   :  { %14497 = vmatpush3.bf16.msra.mxu0 %v17189_v62  ;;  %13747 = vmatprep.mubr.msk.f32.mxu0 %vm15220_vm8, %v15221_v33 }
0x3917   :  { %14498 = vmatprep.subr.bf16.mxu0 %v15219_v32 }
0x3918   :  { %v8886_v41 = vpop.permute.xlu0 %8885  ;;  %v9777_v20 = vld [vmem:[#allocation2] sm:$0xff] }
0x3919   :  { %8888 = vst.msk [vmem:[#allocation2 + $0x8] sm:$0xc0] %vm8443_vm5, %v8886_v41  ;;  %13711 = vmatprep.mubr.msk.f32.mxu1 %vm623_vm7, %v9777_v20 }
0x391a   :  { %14500 = vmatpush3.bf16.msra.mxu0 %v17199_v48 }
0x391b   :  { %14507 = vmatprep.subr.bf16.mxu0 %v15219_v32 }
0x3920   :  { %v9778_v3 = vld [vmem:[#allocation2 + $0x8] sm:$0xff] }
0x3921   :  { %13712 = vmatmul.mubr.msk.f32.vlgmr.msra.gmra.mrb[104].mxu1 %vm623_vm7, %v9778_v3 }
0x3922   :  { %14491 = vmatpush3.bf16.msra.mxu1 %v17189_v62 }
0x3923   :  { %14492 = vmatprep.subr.bf16.mxu1 %v15219_v32 }
0x3926   :  { %14494 = vmatpush3.bf16.msra.mxu1 %v17199_v48 }
0x3927   :  { %14501 = vmatprep.subr.bf16.mxu1 %v15219_v32 }
0x39e0   :  { %v9735_v4 = vpop.f32.mrb[90].mxu0 }
0x39e1   :  { %v9749_v19 = vadd.f32 %v9735_v4, %v16896_v25  ;;  %v13702_v1 = vpop.f32.mrb[91].mxu0  ;;  %v9740_v18 = vrot.slane %v9735_v4, 2 }
0x39e3   :  { %v9751_v27 = vrot.slane %v9749_v19, 2  ;;  %v9742_v25 = vadd.f32 %v9740_v18, %v16913_v15 }
0x39e5   :  { %9752 = vrot.lane.b32.xlu0 %v9751_v27, %s15225_s17  ;;  %v9743_v54 = vsub.f32 0.0, %v9742_v25 }
0x39e7   :  { %v9744_v29 = vmul.f32 1.442695, %v9743_v54 }
0x39e8   :  { %v9960_v55 = vpop.f32.mrb[92].mxu0 }
0x39e9   :  { %v9979_v47 = vadd.f32 %v17224_v31, %v9960_v55  ;;  %v13727_v35 = vpop.f32.mrb[93].mxu0  ;;  %14781 = vpow2.f32 %v9744_v29 }
0x39eb   :  { %9981 = vrot.lane.b32.xlu1 %v9979_v47, %s15225_s17 }
0x39f3   :  { %v14782_v11 = vpop.eup %14781 }
0x39f4   :  { %v17228_v42 = vpop.f32.mrb[104].mxu1  ;;  %v9746_v30 = vadd.f32 1.0, %v14782_v11 }
0x39f5   :  { %v9870_v2 = vpop.f32.mrb[105].mxu1 }
0x39f6   :  { %v17234_v50 = vadd.f32 %v17230_v46, %v9870_v2 }
0x39f8   :  { %v9964_v44 = vadd.f32 %v9960_v55, %v17234_v50 }
0x39fa   :  { %v9965_v56 = vsub.f32 0.0, %v9964_v44 }
0x39fc   :  { %v9966_v59 = vmul.f32 1.442695, %v9965_v56 }
0x39fe   :  { %14783 = vpow2.f32 %v9966_v59 }
0x39ff   :  { %14785 = vrcp.f32 %v9746_v30 }
0x3a08   :  { %v14784_v52 = vpop.eup %14783 }
0x3a09   :  { %v9968_v39 = vadd.f32 1.0, %v14784_v52  ;;  %v14786_v10 = vpop.eup %14785 }
0x3a0b   :  { %14787 = vrcp.f32 %v9968_v39 }
0x3a15   :  { %v14788_v43 = vpop.eup %14787 }
0x3a16   :  { %v9997_v36 = vmul.f32 0.0, %v14788_v43 }
0x3a57   :  { %v9753_v51 = vpop.permute.xlu0 %9752 }
0x3a58   :  { %v9755_v34 = vmul.f32 %v14786_v10, %v9753_v51 }
0x3a5a   :  { %9757 = vrot.lane.b32.xlu0 %v9755_v34, %s15225_s17 }
0x3a5d   :  { %v9982_v9 = vpop.permute.xlu1 %9981 }
0x3a5e   :  { %v9984_v61 = vmul.f32 %v14788_v43, %v9982_v9 }
0x3a60   :  { %9986 = vrot.lane.b32.xlu1 %v9984_v61, %s15225_s17 }
0x3acc   :  { %v9758_v37 = vpop.permute.xlu0 %9757 }
0x3acd   :  { %v9760_v0 = vadd.f32 %v9758_v37, %v16913_v15  ;;  %v9762_v15 = vsub.f32 1.0, %v14786_v10 }
0x3acf   :  { %14789 = vtanh.f32 %v9760_v0 }
0x3ad2   :  { %v9987_v17 = vpop.permute.xlu1 %9986 }
0x3ad3   :  { %v9989_v21 = vadd.f32 %v9987_v17, %v17234_v50 }
0x3ad5   :  { %14791 = vtanh.f32 %v9989_v21 }
0x3ad9   :  { %v14790_v8 = vpop.eup %14789 }
0x3ada   :  { %9764 = vrot.lane.b32.xlu0 %v14790_v8, %s15224_s28 }
0x3ade   :  { %9103 = vrot.lane.b32.xlu0 %v17071_v28, %s15224_s28  ;;  %v9770_v28 = vmul.f32 %v14786_v10, %v9768_v13 }
0x3adf   :  { %v14792_v24 = vpop.eup %14791 }
0x3ae0   :  { %9993 = vrot.lane.b32.xlu1 %v14792_v24, %s15224_s28 }
0x3ae2   :  { %9329 = vrot.lane.b32.xlu0 %v17107_v45, %s15224_s28  ;;  %v9991_v45 = vsub.f32 1.0, %v14788_v43 }
0x3ae4   :  { %9216 = vrot.lane.b32.xlu1 %v17089_v14, %s15224_s28 }
0x3ae6   :  { %9660 = vrot.lane.b32.xlu0 %v17156_v60, %s15224_s28 }
0x3ae8   :  { %9547 = vrot.lane.b32.xlu1 %v17138_v12, %s15224_s28 }
0x3b4c   :  { %v9765_v5 = vpop.permute.xlu0 %9764 }
0x3b4d   :  { %v9767_v16 = vmul.f32 %v9765_v5, %v9762_v15 }
0x3b4f   :  { %v9771_v63 = vadd.f32 %v9770_v28, %v9767_v16 }
0x3b50   :  { %v9104_v38 = vpop.permute.xlu0 %9103 }
0x3b51   :  { %9106 = vst.msk [vmem:[#allocation2 + $0x10] sm:$0xc] %vm8215_vm1, %v9104_v38  ;;  %9773 = vrot.lane.b32.xlu1 %v9771_v63, %s15224_s28 }
0x3b52   :  { %v9994_v14 = vpop.permute.xlu1 %9993 }
0x3b53   :  { %v9996_v7 = vmul.f32 %v9994_v14, %v9991_v45 }
0x3b54   :  { %v9330_v49 = vpop.permute.xlu0 %9329 }
0x3b55   :  { %v9998_v23 = vadd.f32 %v9997_v36, %v9996_v7  ;;  %9332 = vst.msk [vmem:[#allocation2 + $0x10] sm:$0xc0] %vm8443_vm5, %v9330_v49 }
0x3b56   :  { %v9217_v12 = vpop.permute.xlu1 %9216 }
0x3b57   :  { %9219 = vst.msk [vmem:[#allocation2 + $0x10] sm:$0x30] %vm8329_vm13, %v9217_v12  ;;  %10000 = vrot.lane.b32.xlu0 %v9998_v23, %s15224_s28  ;;  %v10105_v56 = vrot.slane %v9998_v23, 6 }
0x3b58   :  { %v9661_v60 = vpop.permute.xlu0 %9660 }
0x3b59   :  { %9663 = vst.msk [vmem:[#allocation2 + $0x18] sm:$0x30] %vm8329_vm13, %v9661_v60 }
0x3b5a   :  { %v9548_v40 = vpop.permute.xlu1 %9547 }
0x3b5b   :  { %9550 = vst.msk [vmem:[#allocation2 + $0x18] sm:$0xc] %vm8215_vm1, %v9548_v40 }
0x3b5e   :  { %v9779_v26 = vld [vmem:[#allocation2 + $0x10] sm:$0xff] }
0x3b5f   :  { %13714 = vmatprep.mubr.msk.f32.mxu1 %vm623_vm7, %v9779_v26 }
0x3bc3   :  { %v9774_v57 = vpop.permute.xlu1 %9773 }
0x3bc4   :  { %9776 = vst.msk [vmem:[#allocation2 + $0x18] sm:$0xc0] %vm8443_vm5, %v9774_v57 }
0x3bc9   :  { %v10001_v22 = vpop.permute.xlu0 %10000 }
0x3bca   :  { %10003 = vst.msk [vmem:[#allocation3] sm:$0x3] %vm8104_vm0, %v10001_v22 }
0x3bcb   :  { %v9780_v6 = vld [vmem:[#allocation2 + $0x18] sm:$0xff] }
0x3bcc   :  { %13715 = vmatmul.mubr.msk.f32.gmra.mrb[106].mxu1 %vm623_vm7, %v9780_v6 }
0x3bcd   :  { %13736 = vmatprep.mubr.msk.f32.mxu1 %vm15220_vm8, %v15221_v33 }
0x3bd0   :  { %13737 = vmatmul.mubr.msk.f32.vlgmr.msra.gmra.mrb[108].mxu1 %vm623_vm7, %v10001_v22 }
0x3bd1   :  { %14503 = vmatpush3.bf16.msra.mxu1 %v17189_v62  ;;  %13758 = vmatprep.mubr.msk.f32.mxu1 %vm15220_vm8, %v15221_v33 }
0x3bd2   :  { %14504 = vmatprep.subr.bf16.mxu1 %v15219_v32 }
0x3bd5   :  { %14506 = vmatpush3.bf16.msra.mxu1 %v17199_v48 }
0x3bd6   :  { %14513 = vmatprep.subr.bf16.mxu1 %v15219_v32 }
0x3c9f   :  { %v17274_v53 = vpop.f32.mrb[106].mxu1 }
0x3ca0   :  { %v17276_v58 = vpop.f32.mrb[107].mxu1 }
0x3ca3   :  { %v10072_v41 = vpop.f32.mrb[108].mxu1 }
0x3ca4   :  { %v10086_v20 = vadd.f32 %v10072_v41, %v17224_v31  ;;  %v13738_v3 = vpop.f32.mrb[109].mxu1  ;;  %v10077_v19 = vrot.slane %v10072_v41, 6 }
0x3ca6   :  { %v10088_v4 = vrot.slane %v10086_v20, 6  ;;  %v10079_v1 = vadd.f32 %v10077_v19, %v17234_v50 }
0x3ca8   :  { %10089 = vrot.lane.b32.xlu1 %v10088_v4, %s15225_s17  ;;  %v10080_v27 = vsub.f32 0.0, %v10079_v1 }
0x3caa   :  { %v10081_v55 = vmul.f32 1.442695, %v10080_v27 }
0x3cac   :  { %14793 = vpow2.f32 %v10081_v55 }
0x3cb6   :  { %v14794_v47 = vpop.eup %14793 }
0x3cb7   :  { %v10083_v35 = vadd.f32 1.0, %v14794_v47 }
0x3cb9   :  { %14795 = vrcp.f32 %v10083_v35 }
0x3cc3   :  { %v14796_v2 = vpop.eup %14795 }
0x3cc4   :  { %v10099_v59 = vsub.f32 1.0, %v14796_v2  ;;  %v10107_v30 = vmul.f32 %v14796_v2, %v10105_v56 }
0x3d1a   :  { %v10090_v18 = vpop.permute.xlu1 %10089 }
0x3d1b   :  { %v10092_v25 = vmul.f32 %v14796_v2, %v10090_v18 }
0x3d1d   :  { %10094 = vrot.lane.b32.xlu0 %v10092_v25, %s15225_s17 }
0x3d8f   :  { %v10095_v54 = vpop.permute.xlu0 %10094 }
0x3d90   :  { %v10097_v44 = vadd.f32 %v10095_v54, %v17234_v50 }
0x3d92   :  { %14797 = vtanh.f32 %v10097_v44 }
0x3d9c   :  { %v14798_v29 = vpop.eup %14797 }
0x3d9d   :  { %10101 = vrot.lane.b32.xlu1 %v14798_v29, %s15224_s28 }
0x3e0f   :  { %v10102_v11 = vpop.permute.xlu1 %10101 }
0x3e10   :  { %v10104_v52 = vmul.f32 %v10102_v11, %v10099_v59 }
0x3e12   :  { %v17284_v39 = vadd.f32 %v10107_v30, %v10104_v52  ;;  %v17335_v52 = vadd.f32 %v17228_v42, %v17230_v46 }
0x3e14   :  { %v10114_v10 = vrot.slane %v17284_v39, 2  ;;  %v10218_v45 = vrot.slane %v17284_v39, 6 }
0x3e16   :  { %10115 = vrot.lane.b32.xlu0 %v10114_v10, %s15224_s28 }
0x3e88   :  { %v10116_v51 = vpop.permute.xlu0 %10115 }
0x3e89   :  { %13748 = vmatmul.mubr.msk.f32.vlgmr.msra.gmra.mrb[94].mxu0 %vm623_vm7, %v10116_v51 }
0x3e8a   :  { %14509 = vmatpush3.bf16.msra.mxu0 %v17189_v62  ;;  %13769 = vmatprep.mubr.msk.f32.mxu0 %vm15220_vm8, %v15221_v33 }
0x3e8b   :  { %14510 = vmatprep.subr.bf16.mxu0 %v15219_v32 }
0x3e8e   :  { %14512 = vmatpush3.bf16.msra.mxu0 %v17199_v48 }
0x3e8f   :  { %14519 = vmatprep.subr.bf16.mxu0 %v15219_v32 }
0x3f5c   :  { %v10185_v34 = vpop.f32.mrb[94].mxu0 }
0x3f5d   :  { %v10199_v43 = vadd.f32 %v10185_v34, %v17224_v31  ;;  %v13749_v9 = vpop.f32.mrb[95].mxu0  ;;  %v10190_v37 = vrot.slane %v10185_v34, 4 }
0x3f5f   :  { %v10201_v61 = vrot.slane %v10199_v43, 4  ;;  %v10192_v0 = vadd.f32 %v10190_v37, %v17234_v50 }
0x3f61   :  { %10202 = vrot.lane.b32.xlu1 %v10201_v61, %s15225_s17  ;;  %v10193_v17 = vsub.f32 0.0, %v10192_v0 }
0x3f63   :  { %v10194_v21 = vmul.f32 1.442695, %v10193_v17 }
0x3f65   :  { %14799 = vpow2.f32 %v10194_v21 }
0x3f6f   :  { %v14800_v8 = vpop.eup %14799 }
0x3f70   :  { %v10196_v24 = vadd.f32 1.0, %v14800_v8 }
0x3f72   :  { %14801 = vrcp.f32 %v10196_v24 }
0x3f7c   :  { %v14802_v15 = vpop.eup %14801 }
0x3f7d   :  { %v10212_v38 = vsub.f32 1.0, %v14802_v15  ;;  %v10220_v36 = vmul.f32 %v14802_v15, %v10218_v45 }
0x3fd3   :  { %v10203_v13 = vpop.permute.xlu1 %10202 }
0x3fd4   :  { %v10205_v5 = vmul.f32 %v14802_v15, %v10203_v13 }
0x3fd6   :  { %10207 = vrot.lane.b32.xlu0 %v10205_v5, %s15225_s17 }
0x4048   :  { %v10208_v28 = vpop.permute.xlu0 %10207 }
0x4049   :  { %v10210_v16 = vadd.f32 %v10208_v28, %v17234_v50 }
0x404b   :  { %14803 = vtanh.f32 %v10210_v16 }
0x4055   :  { %v14804_v63 = vpop.eup %14803 }
0x4056   :  { %10214 = vrot.lane.b32.xlu1 %v14804_v63, %s15224_s28 }
0x40c8   :  { %v10215_v14 = vpop.permute.xlu1 %10214 }
0x40c9   :  { %v10217_v7 = vmul.f32 %v10215_v14, %v10212_v38 }
0x40cb   :  { %v17302_v49 = vadd.f32 %v10220_v36, %v10217_v7 }
0x40cd   :  { %v10227_v23 = vrot.slane %v17302_v49, 4  ;;  %v10331_v18 = vrot.slane %v17302_v49, 6 }
0x40cf   :  { %10228 = vrot.lane.b32.xlu0 %v10227_v23, %s15224_s28 }
0x4141   :  { %v10229_v12 = vpop.permute.xlu0 %10228 }
0x4142   :  { %13759 = vmatmul.mubr.msk.f32.vlgmr.msra.gmra.mrb[110].mxu1 %vm623_vm7, %v10229_v12 }
0x4143   :  { %14515 = vmatpush3.bf16.msra.mxu1 %v17189_v62  ;;  %13780 = vmatprep.mubr.msk.f32.mxu1 %vm15220_vm8, %v15221_v33 }
0x4144   :  { %14516 = vmatprep.subr.bf16.mxu1 %v15219_v32 }
0x4147   :  { %14518 = vmatpush3.bf16.msra.mxu1 %v17199_v48 }
0x4148   :  { %14525 = vmatprep.subr.bf16.mxu1 %v15219_v32 }
0x4215   :  { %v10298_v60 = vpop.f32.mrb[110].mxu1 }
0x4216   :  { %v10312_v40 = vadd.f32 %v10298_v60, %v17224_v31  ;;  %v13760_v26 = vpop.f32.mrb[111].mxu1  ;;  %v10303_v22 = vrot.slane %v10298_v60, 2 }
0x4218   :  { %v10314_v57 = vrot.slane %v10312_v40, 2  ;;  %v10305_v6 = vadd.f32 %v10303_v22, %v17234_v50 }
0x421a   :  { %10315 = vrot.lane.b32.xlu1 %v10314_v57, %s15225_s17  ;;  %v10306_v41 = vsub.f32 0.0, %v10305_v6 }
0x421c   :  { %v10307_v20 = vmul.f32 1.442695, %v10306_v41 }
0x421e   :  { %14805 = vpow2.f32 %v10307_v20 }
0x4228   :  { %v14806_v3 = vpop.eup %14805 }
0x4229   :  { %v10309_v4 = vadd.f32 1.0, %v14806_v3 }
0x422b   :  { %14807 = vrcp.f32 %v10309_v4 }
0x4235   :  { %v14808_v19 = vpop.eup %14807 }
0x4236   :  { %v10325_v2 = vsub.f32 1.0, %v14808_v19  ;;  %v10333_v54 = vmul.f32 %v14808_v19, %v10331_v18 }
0x428c   :  { %v10316_v1 = vpop.permute.xlu1 %10315 }
0x428d   :  { %v10318_v27 = vmul.f32 %v14808_v19, %v10316_v1 }
0x428f   :  { %10320 = vrot.lane.b32.xlu0 %v10318_v27, %s15225_s17 }
0x4301   :  { %v10321_v55 = vpop.permute.xlu0 %10320 }
0x4302   :  { %v10323_v47 = vadd.f32 %v10321_v55, %v17234_v50 }
0x4304   :  { %14809 = vtanh.f32 %v10323_v47 }
0x430e   :  { %v14810_v35 = vpop.eup %14809 }
0x430f   :  { %10327 = vrot.lane.b32.xlu1 %v14810_v35, %s15224_s28 }
0x4381   :  { %v10328_v25 = vpop.permute.xlu1 %10327 }
0x4382   :  { %v10330_v44 = vmul.f32 %v10328_v25, %v10325_v2 }
0x4384   :  { %v17320_v29 = vadd.f32 %v10333_v54, %v10330_v44 }
0x4386   :  { %v10340_v56 = vrot.slane %v17320_v29, 6 }
0x4388   :  { %10341 = vrot.lane.b32.xlu0 %v10340_v56, %s15224_s28 }
0x43fa   :  { %v10342_v59 = vpop.permute.xlu0 %10341 }
0x43fb   :  { %13770 = vmatmul.mubr.msk.f32.vlgmr.msra.gmra.mrb[96].mxu0 %vm623_vm7, %v10342_v59 }
0x43fc   :  { %14521 = vmatpush3.bf16.msra.mxu0 %v17189_v62  ;;  %13791 = vmatprep.mubr.msk.f32.mxu0 %vm15220_vm8, %v15221_v33 }
0x43fd   :  { %14522 = vmatprep.subr.bf16.mxu0 %v15219_v32 }
0x4400   :  { %14524 = vmatpush3.bf16.msra.mxu0 %v17199_v48 }
0x4401   :  { %14531 = vmatprep.subr.bf16.mxu0 %v15219_v32 }
0x44ce   :  { %v10411_v50 = vpop.f32.mrb[96].mxu0 }
0x44cf   :  { %v10422_v11 = vadd.f32 %v10411_v50, %v17224_v31  ;;  %v13771_v30 = vpop.f32.mrb[97].mxu0  ;;  %v10415_v10 = vadd.f32 %v10411_v50, %v17335_v52 }
0x44d1   :  { %10424 = vrot.lane.b32.xlu1 %v10422_v11, %s15225_s17  ;;  %v10416_v51 = vsub.f32 0.0, %v10415_v10 }
0x44d3   :  { %v10417_v34 = vmul.f32 1.442695, %v10416_v51 }
0x44d5   :  { %14811 = vpow2.f32 %v10417_v34 }
0x44df   :  { %v14812_v43 = vpop.eup %14811 }
0x44e0   :  { %v10419_v9 = vadd.f32 1.0, %v14812_v43 }
0x44e2   :  { %14813 = vrcp.f32 %v10419_v9 }
0x44ec   :  { %v14814_v61 = vpop.eup %14813 }
0x44ed   :  { %v10434_v42 = vsub.f32 1.0, %v14814_v61  ;;  %v10441_v15 = vmul.f32 %v14814_v61, %v10340_v56 }
0x4543   :  { %v10425_v37 = vpop.permute.xlu1 %10424 }
0x4544   :  { %v10427_v0 = vmul.f32 %v14814_v61, %v10425_v37 }
0x4546   :  { %10429 = vrot.lane.b32.xlu0 %v10427_v0, %s15225_s17 }
0x45b8   :  { %v10430_v17 = vpop.permute.xlu0 %10429 }
0x45b9   :  { %v10432_v21 = vadd.f32 %v10430_v17, %v17335_v52 }
0x45bb   :  { %14815 = vtanh.f32 %v10432_v21 }
0x45c5   :  { %v14816_v8 = vpop.eup %14815 }
0x45c6   :  { %10436 = vrot.lane.b32.xlu1 %v14816_v8, %s15224_s28 }
0x4638   :  { %v10437_v24 = vpop.permute.xlu1 %10436 }
0x4639   :  { %v10439_v13 = vmul.f32 %v10437_v24, %v10434_v42 }
0x463b   :  { %v10442_v5 = vadd.f32 %v10441_v15, %v10439_v13 }
0x463d   :  { %10444 = vrot.lane.b32.xlu0 %v10442_v5, %s15224_s28  ;;  %v10549_v20 = vrot.slane %v10442_v5, 6 }
0x46af   :  { %v10445_v28 = vpop.permute.xlu0 %10444 }
0x46b0   :  { %10447 = vst.msk [vmem:[#allocation3 + $0x8] sm:$0x3] %vm8104_vm0, %v10445_v28  ;;  %13781 = vmatmul.mubr.msk.f32.vlgmr.msra.gmra.mrb[112].mxu1 %vm623_vm7, %v10445_v28 }
0x46b1   :  { %14527 = vmatpush3.bf16.msra.mxu1 %v17189_v62  ;;  %13802 = vmatprep.mubr.msk.f32.mxu1 %vm15220_vm8, %v15221_v33 }
0x46b2   :  { %14528 = vmatprep.subr.bf16.mxu1 %v15219_v32 }
0x46b5   :  { %14530 = vmatpush3.bf16.msra.mxu1 %v17199_v48 }
0x46b6   :  { %14537 = vmatprep.subr.bf16.mxu1 %v15219_v32 }
0x4783   :  { %v10516_v16 = vpop.f32.mrb[112].mxu1 }
0x4784   :  { %v10530_v63 = vadd.f32 %v10516_v16, %v17224_v31  ;;  %v13782_v38 = vpop.f32.mrb[113].mxu1  ;;  %v10521_v14 = vrot.slane %v10516_v16, 6 }
0x4786   :  { %v10532_v45 = vrot.slane %v10530_v63, 6  ;;  %v10523_v36 = vadd.f32 %v10521_v14, %v17335_v52 }
0x4788   :  { %10533 = vrot.lane.b32.xlu1 %v10532_v45, %s15225_s17  ;;  %v10524_v7 = vsub.f32 0.0, %v10523_v36 }
0x478a   :  { %v10525_v23 = vmul.f32 1.442695, %v10524_v7 }
0x478c   :  { %14817 = vpow2.f32 %v10525_v23 }
0x4796   :  { %v14818_v12 = vpop.eup %14817 }
0x4797   :  { %v10527_v60 = vadd.f32 1.0, %v14818_v12 }
0x4799   :  { %14819 = vrcp.f32 %v10527_v60 }
0x47a3   :  { %v14820_v40 = vpop.eup %14819 }
0x47a4   :  { %v10543_v3 = vsub.f32 1.0, %v14820_v40  ;;  %v10551_v19 = vmul.f32 %v14820_v40, %v10549_v20 }
0x47fa   :  { %v10534_v26 = vpop.permute.xlu1 %10533 }
0x47fb   :  { %v10536_v57 = vmul.f32 %v14820_v40, %v10534_v26 }
0x47fd   :  { %10538 = vrot.lane.b32.xlu0 %v10536_v57, %s15225_s17 }
0x486f   :  { %v10539_v22 = vpop.permute.xlu0 %10538 }
0x4870   :  { %v10541_v6 = vadd.f32 %v10539_v22, %v17335_v52 }
0x4872   :  { %14821 = vtanh.f32 %v10541_v6 }
0x487c   :  { %v14822_v41 = vpop.eup %14821 }
0x487d   :  { %10545 = vrot.lane.b32.xlu1 %v14822_v41, %s15224_s28 }
0x48ef   :  { %v10546_v4 = vpop.permute.xlu1 %10545 }
0x48f0   :  { %v10548_v1 = vmul.f32 %v10546_v4, %v10543_v3 }
0x48f2   :  { %v17356_v27 = vadd.f32 %v10551_v19, %v10548_v1 }
0x48f4   :  { %v10558_v55 = vrot.slane %v17356_v27, 2  ;;  %v10662_v37 = vrot.slane %v17356_v27, 6 }
0x48f6   :  { %10559 = vrot.lane.b32.xlu0 %v10558_v55, %s15224_s28 }
0x4968   :  { %v10560_v47 = vpop.permute.xlu0 %10559 }
0x4969   :  { %13792 = vmatmul.mubr.msk.f32.vlgmr.msra.gmra.mrb[98].mxu0 %vm623_vm7, %v10560_v47  ;;  %v17407_v47 = vadd.f32 %v17230_v46, %v17276_v58 }
0x496a   :  { %14533 = vmatpush3.bf16.msra.mxu0 %v17189_v62  ;;  %13813 = vmatprep.mubr.msk.f32.mxu0 %vm15220_vm8, %v15221_v33 }
0x496b   :  { %14534 = vmatprep.subr.bf16.mxu0 %v15219_v32 }
0x496e   :  { %14536 = vmatpush3.bf16.msra.mxu0 %v17199_v48 }
0x496f   :  { %14543 = vmatprep.subr.bf16.mxu0 %v15219_v32 }
0x4a3c   :  { %v10629_v35 = vpop.f32.mrb[98].mxu0 }
0x4a3d   :  { %v10643_v2 = vadd.f32 %v10629_v35, %v17224_v31  ;;  %v13793_v18 = vpop.f32.mrb[99].mxu0  ;;  %v10634_v54 = vrot.slane %v10629_v35, 4 }
0x4a3f   :  { %v10645_v25 = vrot.slane %v10643_v2, 4  ;;  %v10636_v44 = vadd.f32 %v10634_v54, %v17335_v52 }
0x4a41   :  { %10646 = vrot.lane.b32.xlu1 %v10645_v25, %s15225_s17  ;;  %v10637_v56 = vsub.f32 0.0, %v10636_v44 }
0x4a43   :  { %v10638_v59 = vmul.f32 1.442695, %v10637_v56 }
0x4a45   :  { %14823 = vpow2.f32 %v10638_v59 }
0x4a4f   :  { %v14824_v50 = vpop.eup %14823 }
0x4a50   :  { %v10640_v11 = vadd.f32 1.0, %v14824_v50 }
0x4a52   :  { %14825 = vrcp.f32 %v10640_v11 }
0x4a5c   :  { %v14826_v30 = vpop.eup %14825 }
0x4a5d   :  { %v10656_v61 = vsub.f32 1.0, %v14826_v30  ;;  %v10664_v17 = vmul.f32 %v14826_v30, %v10662_v37 }
0x4ab3   :  { %v10647_v10 = vpop.permute.xlu1 %10646 }
0x4ab4   :  { %v10649_v51 = vmul.f32 %v14826_v30, %v10647_v10 }
0x4ab6   :  { %10651 = vrot.lane.b32.xlu0 %v10649_v51, %s15225_s17 }
0x4b28   :  { %v10652_v34 = vpop.permute.xlu0 %10651 }
0x4b29   :  { %v10654_v43 = vadd.f32 %v10652_v34, %v17335_v52 }
0x4b2b   :  { %14827 = vtanh.f32 %v10654_v43 }
0x4b35   :  { %v14828_v9 = vpop.eup %14827 }
0x4b36   :  { %10658 = vrot.lane.b32.xlu1 %v14828_v9, %s15224_s28 }
0x4ba8   :  { %v10659_v0 = vpop.permute.xlu1 %10658 }
0x4ba9   :  { %v10661_v21 = vmul.f32 %v10659_v0, %v10656_v61 }
0x4bab   :  { %v17374_v8 = vadd.f32 %v10664_v17, %v10661_v21 }
0x4bad   :  { %v10671_v42 = vrot.slane %v17374_v8, 4  ;;  %v10775_v22 = vrot.slane %v17374_v8, 6 }
0x4baf   :  { %10672 = vrot.lane.b32.xlu0 %v10671_v42, %s15224_s28 }
0x4c21   :  { %v10673_v24 = vpop.permute.xlu0 %10672 }
0x4c22   :  { %13803 = vmatmul.mubr.msk.f32.vlgmr.msra.gmra.mrb[114].mxu1 %vm623_vm7, %v10673_v24 }
0x4c23   :  { %14539 = vmatpush3.bf16.msra.mxu1 %v17189_v62  ;;  %13824 = vmatprep.mubr.msk.f32.mxu1 %vm15220_vm8, %v15221_v33 }
0x4c24   :  { %14540 = vmatprep.subr.bf16.mxu1 %v15219_v32 }
0x4c27   :  { %14542 = vmatpush3.bf16.msra.mxu1 %v17199_v48 }
0x4c28   :  { %14549 = vmatprep.subr.bf16.mxu1 %v15219_v32 }
0x4cf5   :  { %v10742_v15 = vpop.f32.mrb[114].mxu1 }
0x4cf6   :  { %v10756_v13 = vadd.f32 %v10742_v15, %v17224_v31  ;;  %v13804_v5 = vpop.f32.mrb[115].mxu1  ;;  %v10747_v16 = vrot.slane %v10742_v15, 2 }
0x4cf8   :  { %v10758_v28 = vrot.slane %v10756_v13, 2  ;;  %v10749_v63 = vadd.f32 %v10747_v16, %v17335_v52 }
0x4cfa   :  { %10759 = vrot.lane.b32.xlu1 %v10758_v28, %s15225_s17  ;;  %v10750_v38 = vsub.f32 0.0, %v10749_v63 }
0x4cfc   :  { %v10751_v45 = vmul.f32 1.442695, %v10750_v38 }
0x4cfe   :  { %14829 = vpow2.f32 %v10751_v45 }
0x4d08   :  { %v14830_v14 = vpop.eup %14829 }
0x4d09   :  { %v10753_v36 = vadd.f32 1.0, %v14830_v14 }
0x4d0b   :  { %14831 = vrcp.f32 %v10753_v36 }
0x4d15   :  { %v14832_v7 = vpop.eup %14831 }
0x4d16   :  { %v10769_v57 = vsub.f32 1.0, %v14832_v7  ;;  %v10777_v41 = vmul.f32 %v14832_v7, %v10775_v22 }
0x4d6c   :  { %v10760_v23 = vpop.permute.xlu1 %10759 }
0x4d6d   :  { %v10762_v12 = vmul.f32 %v14832_v7, %v10760_v23 }
0x4d6f   :  { %10764 = vrot.lane.b32.xlu0 %v10762_v12, %s15225_s17 }
0x4de1   :  { %v10765_v60 = vpop.permute.xlu0 %10764 }
0x4de2   :  { %v10767_v40 = vadd.f32 %v10765_v60, %v17335_v52 }
0x4de4   :  { %14833 = vtanh.f32 %v10767_v40 }
0x4dee   :  { %v14834_v26 = vpop.eup %14833 }
0x4def   :  { %10771 = vrot.lane.b32.xlu1 %v14834_v26, %s15224_s28 }
0x4e61   :  { %v10772_v6 = vpop.permute.xlu1 %10771 }
0x4e62   :  { %v10774_v20 = vmul.f32 %v10772_v6, %v10769_v57 }
0x4e64   :  { %v17392_v3 = vadd.f32 %v10777_v41, %v10774_v20 }
0x4e66   :  { %v10784_v4 = vrot.slane %v17392_v3, 6 }
0x4e68   :  { %10785 = vrot.lane.b32.xlu0 %v10784_v4, %s15224_s28 }
0x4eda   :  { %v10786_v19 = vpop.permute.xlu0 %10785 }
0x4edb   :  { %13814 = vmatmul.mubr.msk.f32.vlgmr.msra.gmra.mrb[100].mxu0 %vm623_vm7, %v10786_v19 }
0x4edc   :  { %14545 = vmatpush3.bf16.msra.mxu0 %v17189_v62  ;;  %13835 = vmatprep.mubr.msk.f32.mxu0 %vm15220_vm8, %v15221_v33 }
0x4edd   :  { %14546 = vmatprep.subr.bf16.mxu0 %v15219_v32 }
0x4ee0   :  { %14548 = vmatpush3.bf16.msra.mxu0 %v17199_v48 }
0x4ee1   :  { %14555 = vmatprep.subr.bf16.mxu0 %v15219_v32 }
0x4fae   :  { %v10855_v52 = vpop.f32.mrb[100].mxu0 }
0x4faf   :  { %v10866_v1 = vadd.f32 %v10855_v52, %v17224_v31  ;;  %v13815_v55 = vpop.f32.mrb[101].mxu0  ;;  %v10859_v35 = vadd.f32 %v10855_v52, %v17407_v47 }
0x4fb1   :  { %10868 = vrot.lane.b32.xlu1 %v10866_v1, %s15225_s17  ;;  %v10860_v2 = vsub.f32 0.0, %v10859_v35 }
0x4fb3   :  { %v10861_v18 = vmul.f32 1.442695, %v10860_v2 }
0x4fb5   :  { %14835 = vpow2.f32 %v10861_v18 }
0x4fbf   :  { %v14836_v25 = vpop.eup %14835 }
0x4fc0   :  { %v10863_v54 = vadd.f32 1.0, %v14836_v25 }
0x4fc2   :  { %14837 = vrcp.f32 %v10863_v54 }
0x4fcc   :  { %v14838_v44 = vpop.eup %14837 }
0x4fcd   :  { %v10878_v58 = vsub.f32 1.0, %v14838_v44  ;;  %v10885_v51 = vmul.f32 %v14838_v44, %v10784_v4 }
0x5023   :  { %v10869_v56 = vpop.permute.xlu1 %10868 }
0x5024   :  { %v10871_v59 = vmul.f32 %v14838_v44, %v10869_v56 }
0x5026   :  { %10873 = vrot.lane.b32.xlu0 %v10871_v59, %s15225_s17 }
0x5098   :  { %v10874_v50 = vpop.permute.xlu0 %10873 }
0x5099   :  { %v10876_v11 = vadd.f32 %v10874_v50, %v17407_v47 }
0x509b   :  { %14839 = vtanh.f32 %v10876_v11 }
0x50a5   :  { %v14840_v30 = vpop.eup %14839 }
0x50a6   :  { %10880 = vrot.lane.b32.xlu1 %v14840_v30, %s15224_s28 }
0x5118   :  { %v10881_v10 = vpop.permute.xlu1 %10880 }
0x5119   :  { %v10883_v34 = vmul.f32 %v10881_v10, %v10878_v58 }
0x511b   :  { %v10886_v43 = vadd.f32 %v10885_v51, %v10883_v34 }
0x511d   :  { %10888 = vrot.lane.b32.xlu0 %v10886_v43, %s15224_s28  ;;  %v10993_v36 = vrot.slane %v10886_v43, 6 }
0x518f   :  { %v10889_v9 = vpop.permute.xlu0 %10888 }
0x5190   :  { %10891 = vst.msk [vmem:[#allocation3 + $0x10] sm:$0x3] %vm8104_vm0, %v10889_v9  ;;  %13825 = vmatmul.mubr.msk.f32.vlgmr.msra.gmra.mrb[116].mxu1 %vm623_vm7, %v10889_v9 }
0x5191   :  { %14551 = vmatpush3.bf16.msra.mxu1 %v17189_v62  ;;  %13846 = vmatprep.mubr.msk.f32.mxu1 %vm15220_vm8, %v15221_v33 }
0x5192   :  { %14552 = vmatprep.subr.bf16.mxu1 %v15219_v32 }
0x5195   :  { %14554 = vmatpush3.bf16.msra.mxu1 %v17199_v48 }
0x5196   :  { %14561 = vmatprep.subr.bf16.mxu1 %v15219_v32 }
0x5263   :  { %v10960_v61 = vpop.f32.mrb[116].mxu1 }
0x5264   :  { %v10974_v37 = vadd.f32 %v10960_v61, %v17224_v31  ;;  %v13826_v0 = vpop.f32.mrb[117].mxu1  ;;  %v10965_v21 = vrot.slane %v10960_v61, 6 }
0x5266   :  { %v10976_v17 = vrot.slane %v10974_v37, 6  ;;  %v10967_v42 = vadd.f32 %v10965_v21, %v17407_v47 }
0x5268   :  { %10977 = vrot.lane.b32.xlu1 %v10976_v17, %s15225_s17  ;;  %v10968_v24 = vsub.f32 0.0, %v10967_v42 }
0x526a   :  { %v10969_v15 = vmul.f32 1.442695, %v10968_v24 }
0x526c   :  { %14841 = vpow2.f32 %v10969_v15 }
0x5276   :  { %v14842_v13 = vpop.eup %14841 }
0x5277   :  { %v10971_v5 = vadd.f32 1.0, %v14842_v13 }
0x5279   :  { %14843 = vrcp.f32 %v10971_v5 }
0x5283   :  { %v14844_v28 = vpop.eup %14843 }
0x5284   :  { %v10987_v7 = vsub.f32 1.0, %v14844_v28  ;;  %v10995_v60 = vmul.f32 %v14844_v28, %v10993_v36 }
0x52da   :  { %v10978_v16 = vpop.permute.xlu1 %10977 }
0x52db   :  { %v10980_v63 = vmul.f32 %v14844_v28, %v10978_v16 }
0x52dd   :  { %10982 = vrot.lane.b32.xlu0 %v10980_v63, %s15225_s17 }
0x534f   :  { %v10983_v38 = vpop.permute.xlu0 %10982 }
0x5350   :  { %v10985_v45 = vadd.f32 %v10983_v38, %v17407_v47 }
0x5352   :  { %14845 = vtanh.f32 %v10985_v45 }
0x535c   :  { %v14846_v14 = vpop.eup %14845 }
0x535d   :  { %10989 = vrot.lane.b32.xlu1 %v14846_v14, %s15224_s28 }
0x53cf   :  { %v10990_v23 = vpop.permute.xlu1 %10989 }
0x53d0   :  { %v10992_v12 = vmul.f32 %v10990_v23, %v10987_v7 }
0x53d2   :  { %v17428_v40 = vadd.f32 %v10995_v60, %v10992_v12 }
0x53d4   :  { %v11002_v26 = vrot.slane %v17428_v40, 2  ;;  %v11106_v50 = vrot.slane %v17428_v40, 6 }
0x53d6   :  { %11003 = vrot.lane.b32.xlu0 %v11002_v26, %s15224_s28 }
0x5448   :  { %v11004_v57 = vpop.permute.xlu0 %11003 }
0x5449   :  { %13836 = vmatmul.mubr.msk.f32.vlgmr.msra.gmra.mrb[102].mxu0 %vm623_vm7, %v11004_v57 }
0x544a   :  { %14557 = vmatpush3.bf16.msra.mxu0 %v17189_v62  ;;  %13857 = vmatprep.mubr.msk.f32.mxu0 %vm15220_vm8, %v15221_v33 }
0x544b   :  { %14558 = vmatprep.subr.bf16.mxu0 %v15219_v32 }
0x544e   :  { %14560 = vmatpush3.bf16.msra.mxu0 %v17199_v48 }
0x544f   :  { %14567 = vmatprep.subr.bf16.mxu0 %v15219_v32 }
0x551c   :  { %v11073_v22 = vpop.f32.mrb[102].mxu0 }
0x551d   :  { %v11087_v6 = vadd.f32 %v11073_v22, %v17224_v31  ;;  %v13837_v41 = vpop.f32.mrb[103].mxu0  ;;  %v11078_v4 = vrot.slane %v11073_v22, 4 }
0x551f   :  { %v11089_v20 = vrot.slane %v11087_v6, 4  ;;  %v11080_v19 = vadd.f32 %v11078_v4, %v17407_v47  ;;  %v17478_v6 = vadd.f32 %v17274_v53, %v17230_v46 }
0x5521   :  { %11090 = vrot.lane.b32.xlu1 %v11089_v20, %s15225_s17  ;;  %v11081_v52 = vsub.f32 0.0, %v11080_v19 }
0x5523   :  { %v11082_v1 = vmul.f32 1.442695, %v11081_v52 }
0x5525   :  { %14847 = vpow2.f32 %v11082_v1 }
0x552f   :  { %v14848_v55 = vpop.eup %14847 }
0x5530   :  { %v11084_v35 = vadd.f32 1.0, %v14848_v55 }
0x5532   :  { %14849 = vrcp.f32 %v11084_v35 }
0x553c   :  { %v14850_v2 = vpop.eup %14849 }
0x553d   :  { %v11100_v59 = vsub.f32 1.0, %v14850_v2  ;;  %v11108_v30 = vmul.f32 %v14850_v2, %v11106_v50 }
0x5593   :  { %v11091_v18 = vpop.permute.xlu1 %11090 }
0x5594   :  { %v11093_v25 = vmul.f32 %v14850_v2, %v11091_v18 }
0x5596   :  { %11095 = vrot.lane.b32.xlu0 %v11093_v25, %s15225_s17 }
0x5608   :  { %v11096_v54 = vpop.permute.xlu0 %11095 }
0x5609   :  { %v11098_v44 = vadd.f32 %v11096_v54, %v17407_v47 }
0x560b   :  { %14851 = vtanh.f32 %v11098_v44 }
0x5615   :  { %v14852_v56 = vpop.eup %14851 }
0x5616   :  { %11102 = vrot.lane.b32.xlu1 %v14852_v56, %s15224_s28 }
0x5688   :  { %v11103_v11 = vpop.permute.xlu1 %11102 }
0x5689   :  { %v11105_v58 = vmul.f32 %v11103_v11, %v11100_v59 }
0x568b   :  { %v17446_v10 = vadd.f32 %v11108_v30, %v11105_v58 }
0x568d   :  { %v11115_v51 = vrot.slane %v17446_v10, 4  ;;  %v11219_v14 = vrot.slane %v17446_v10, 6 }
0x568f   :  { %11116 = vrot.lane.b32.xlu0 %v11115_v51, %s15224_s28 }
0x5701   :  { %v11117_v34 = vpop.permute.xlu0 %11116 }
0x5702   :  { %13847 = vmatmul.mubr.msk.f32.vlgmr.msra.gmra.mrb[118].mxu1 %vm623_vm7, %v11117_v34 }
0x5703   :  { %14563 = vmatpush3.bf16.msra.mxu1 %v17189_v62  ;;  %13868 = vmatprep.mubr.msk.f32.mxu1 %vm15220_vm8, %v15221_v33 }
0x5704   :  { %14564 = vmatprep.subr.bf16.mxu1 %v15219_v32 }
0x5707   :  { %14566 = vmatpush3.bf16.msra.mxu1 %v17199_v48 }
0x5708   :  { %14573 = vmatprep.subr.bf16.mxu1 %v15219_v32 }
0x57d5   :  { %v11186_v43 = vpop.f32.mrb[118].mxu1 }
0x57d6   :  { %v11200_v9 = vadd.f32 %v11186_v43, %v17224_v31  ;;  %v13848_v61 = vpop.f32.mrb[119].mxu1  ;;  %v11191_v0 = vrot.slane %v11186_v43, 2 }
0x57d8   :  { %v11202_v37 = vrot.slane %v11200_v9, 2  ;;  %v11193_v17 = vadd.f32 %v11191_v0, %v17407_v47 }
0x57da   :  { %11203 = vrot.lane.b32.xlu1 %v11202_v37, %s15225_s17  ;;  %v11194_v21 = vsub.f32 0.0, %v11193_v17 }
0x57dc   :  { %v11195_v42 = vmul.f32 1.442695, %v11194_v21 }
0x57de   :  { %14853 = vpow2.f32 %v11195_v42 }
0x57e8   :  { %v14854_v24 = vpop.eup %14853 }
0x57e9   :  { %v11197_v15 = vadd.f32 1.0, %v14854_v24 }
0x57eb   :  { %14855 = vrcp.f32 %v11197_v15 }
0x57f5   :  { %v14856_v13 = vpop.eup %14855 }
0x57f6   :  { %v11213_v45 = vsub.f32 1.0, %v14856_v13  ;;  %v11221_v7 = vmul.f32 %v14856_v13, %v11219_v14 }
0x584c   :  { %v11204_v5 = vpop.permute.xlu1 %11203 }
0x584d   :  { %v11206_v28 = vmul.f32 %v14856_v13, %v11204_v5 }
0x584f   :  { %11208 = vrot.lane.b32.xlu0 %v11206_v28, %s15225_s17 }
0x58c1   :  { %v11209_v16 = vpop.permute.xlu0 %11208 }
0x58c2   :  { %v11211_v63 = vadd.f32 %v11209_v16, %v17407_v47 }
0x58c4   :  { %14857 = vtanh.f32 %v11211_v63 }
0x58ce   :  { %v14858_v38 = vpop.eup %14857 }
0x58cf   :  { %11215 = vrot.lane.b32.xlu1 %v14858_v38, %s15224_s28 }
0x5941   :  { %v11216_v36 = vpop.permute.xlu1 %11215 }
0x5942   :  { %v11218_v23 = vmul.f32 %v11216_v36, %v11213_v45 }
0x5944   :  { %v17464_v12 = vadd.f32 %v11221_v7, %v11218_v23 }
0x5946   :  { %v11228_v60 = vrot.slane %v17464_v12, 6 }
0x5948   :  { %11229 = vrot.lane.b32.xlu0 %v11228_v60, %s15224_s28 }
0x59ba   :  { %v11230_v26 = vpop.permute.xlu0 %11229 }
0x59bb   :  { %13858 = vmatmul.mubr.msk.f32.vlgmr.msra.gmra.mrb[104].mxu0 %vm623_vm7, %v11230_v26 }
0x59bc   :  { %14569 = vmatpush3.bf16.msra.mxu0 %v17189_v62  ;;  %13879 = vmatprep.mubr.msk.f32.mxu0 %vm15220_vm8, %v15221_v33 }
0x59bd   :  { %14570 = vmatprep.subr.bf16.mxu0 %v15219_v32 }
0x59c0   :  { %14572 = vmatpush3.bf16.msra.mxu0 %v17199_v48 }
0x5a8e   :  { %v11299_v47 = vpop.f32.mrb[104].mxu0 }
0x5a8f   :  { %v11310_v57 = vadd.f32 %v11299_v47, %v17224_v31  ;;  %v13859_v22 = vpop.f32.mrb[105].mxu0  ;;  %v11303_v41 = vadd.f32 %v11299_v47, %v17478_v6 }
0x5a91   :  { %11312 = vrot.lane.b32.xlu1 %v11310_v57, %s15225_s17  ;;  %v11304_v20 = vsub.f32 0.0, %v11303_v41 }
0x5a93   :  { %v11305_v4 = vmul.f32 1.442695, %v11304_v20 }
0x5a95   :  { %14859 = vpow2.f32 %v11305_v4 }
0x5a9f   :  { %v14860_v19 = vpop.eup %14859 }
0x5aa0   :  { %v11307_v52 = vadd.f32 1.0, %v14860_v19 }
0x5aa2   :  { %14861 = vrcp.f32 %v11307_v52 }
0x5aac   :  { %v14862_v1 = vpop.eup %14861 }
0x5aad   :  { %v11322_v46 = vsub.f32 1.0, %v14862_v1  ;;  %v11329_v54 = vmul.f32 %v14862_v1, %v11228_v60 }
0x5b03   :  { %v11313_v55 = vpop.permute.xlu1 %11312 }
0x5b04   :  { %v11315_v35 = vmul.f32 %v14862_v1, %v11313_v55 }
0x5b06   :  { %11317 = vrot.lane.b32.xlu0 %v11315_v35, %s15225_s17 }
0x5b78   :  { %v11318_v2 = vpop.permute.xlu0 %11317 }
0x5b79   :  { %v11320_v18 = vadd.f32 %v11318_v2, %v17478_v6 }
0x5b7b   :  { %14863 = vtanh.f32 %v11320_v18 }
0x5b85   :  { %v14864_v25 = vpop.eup %14863 }
0x5b86   :  { %11324 = vrot.lane.b32.xlu1 %v14864_v25, %s15224_s28 }
0x5bf8   :  { %v11325_v53 = vpop.permute.xlu1 %11324 }
0x5bf9   :  { %v11327_v44 = vmul.f32 %v11325_v53, %v11322_v46 }
0x5bfb   :  { %v11330_v56 = vadd.f32 %v11329_v54, %v11327_v44 }
0x5bfd   :  { %11332 = vrot.lane.b32.xlu0 %v11330_v56, %s15224_s28  ;;  %v11437_v21 = vrot.slane %v11330_v56, 6 }
0x5c6f   :  { %v11333_v59 = vpop.permute.xlu0 %11332 }
0x5c70   :  { %11335 = vst.msk [vmem:[#allocation3 + $0x18] sm:$0x3] %vm8104_vm0, %v11333_v59  ;;  %13869 = vmatmul.mubr.msk.f32.vlgmr.msra.gmra.mrb[120].mxu1 %vm623_vm7, %v11333_v59 }
0x5c71   :  { %14575 = vmatpush3.bf16.msra.mxu1 %v17189_v62  ;;  %13890 = vmatprep.mubr.msk.f32.mxu1 %vm15220_vm8, %v15221_v33 }
0x5c72   :  { %14576 = vmatprep.subr.bf16.mxu1 %v15219_v32 }
0x5c75   :  { %14578 = vmatpush3.bf16.msra.mxu1 %v17199_v48 }
0x5d43   :  { %v11404_v50 = vpop.f32.mrb[120].mxu1 }
0x5d44   :  { %v11418_v11 = vadd.f32 %v11404_v50, %v17224_v31  ;;  %v13870_v30 = vpop.f32.mrb[121].mxu1  ;;  %v11409_v51 = vrot.slane %v11404_v50, 6 }
0x5d46   :  { %v11420_v58 = vrot.slane %v11418_v11, 6  ;;  %v11411_v34 = vadd.f32 %v11409_v51, %v17478_v6 }
0x5d48   :  { %11421 = vrot.lane.b32.xlu1 %v11420_v58, %s15225_s17  ;;  %v11412_v43 = vsub.f32 0.0, %v11411_v34 }
0x5d4a   :  { %v11413_v9 = vmul.f32 1.442695, %v11412_v43 }
0x5d4c   :  { %14865 = vpow2.f32 %v11413_v9 }
0x5d56   :  { %v14866_v62 = vpop.eup %14865 }
0x5d57   :  { %v11415_v61 = vadd.f32 1.0, %v14866_v62 }
0x5d59   :  { %14867 = vrcp.f32 %v11415_v61  ;;  %v11677_v61 = vld [vmem:[#allocation21 + $0x8] sm:$0xff] }
0x5d63   :  { %v14868_v33 = vpop.eup %14867 }
0x5d64   :  { %v11431_v42 = vsub.f32 1.0, %v14868_v33  ;;  %v11439_v13 = vmul.f32 %v14868_v33, %v11437_v21 }
0x5dba   :  { %v11422_v32 = vpop.permute.xlu1 %11421 }
0x5dbb   :  { %v11424_v37 = vmul.f32 %v14868_v33, %v11422_v32 }
0x5dbd   :  { %11426 = vrot.lane.b32.xlu0 %v11424_v37, %s15225_s17 }
0x5e2f   :  { %v11427_v48 = vpop.permute.xlu0 %11426 }
0x5e30   :  { %v11429_v0 = vadd.f32 %v11427_v48, %v17478_v6 }
0x5e32   :  { %14869 = vtanh.f32 %v11429_v0 }
0x5e3c   :  { %v14870_v17 = vpop.eup %14869 }
0x5e3d   :  { %11433 = vrot.lane.b32.xlu1 %v14870_v17, %s15224_s28 }
0x5eaf   :  { %v11434_v24 = vpop.permute.xlu1 %11433 }
0x5eb0   :  { %v11436_v15 = vmul.f32 %v11434_v24, %v11431_v42 }
0x5eb2   :  { %v17498_v5 = vadd.f32 %v11439_v13, %v11436_v15 }
0x5eb4   :  { %v11446_v28 = vrot.slane %v17498_v5, 2  ;;  %v11550_v1 = vrot.slane %v17498_v5, 6 }
0x5eb6   :  { %11447 = vrot.lane.b32.xlu0 %v11446_v28, %s15224_s28 }
0x5f28   :  { %v11448_v16 = vpop.permute.xlu0 %11447 }
0x5f29   :  { %13880 = vmatmul.mubr.msk.f32.vlgmr.msra.gmra.mrb[106].mxu0 %vm623_vm7, %v11448_v16 }
0x5ffc   :  { %v11517_v63 = vpop.f32.mrb[106].mxu0 }
0x5ffd   :  { %v11531_v38 = vadd.f32 %v11517_v63, %v17224_v31  ;;  %v13881_v45 = vpop.f32.mrb[107].mxu0  ;;  %v11522_v36 = vrot.slane %v11517_v63, 4 }
0x5fff   :  { %v11533_v14 = vrot.slane %v11531_v38, 4  ;;  %v11524_v7 = vadd.f32 %v11522_v36, %v17478_v6  ;;  %v11990_v36 = vld [vmem:[#allocation23] ss:$0 sm:$0xff] }
0x6001   :  { %11534 = vrot.lane.b32.xlu1 %v11533_v14, %s15225_s17  ;;  %v11525_v23 = vsub.f32 0.0, %v11524_v7 }
0x6003   :  { %v11526_v60 = vmul.f32 1.442695, %v11525_v23 }
0x6005   :  { %14871 = vpow2.f32 %v11526_v60 }
0x600f   :  { %v14872_v26 = vpop.eup %14871 }
0x6010   :  { %v11528_v47 = vadd.f32 1.0, %v14872_v26 }
0x6012   :  { %14873 = vrcp.f32 %v11528_v47 }
0x601c   :  { %v14874_v57 = vpop.eup %14873 }
0x601d   :  { %v11544_v52 = vsub.f32 1.0, %v14874_v57  ;;  %v11552_v35 = vmul.f32 %v14874_v57, %v11550_v1 }
0x6073   :  { %v11535_v22 = vpop.permute.xlu1 %11534 }
0x6074   :  { %v11537_v41 = vmul.f32 %v14874_v57, %v11535_v22 }
0x6076   :  { %11539 = vrot.lane.b32.xlu0 %v11537_v41, %s15225_s17 }
0x60e8   :  { %v11540_v20 = vpop.permute.xlu0 %11539 }
0x60e9   :  { %v11542_v4 = vadd.f32 %v11540_v20, %v17478_v6 }
0x60eb   :  { %14875 = vtanh.f32 %v11542_v4 }
0x60f5   :  { %v14876_v19 = vpop.eup %14875 }
0x60f6   :  { %11546 = vrot.lane.b32.xlu1 %v14876_v19, %s15224_s28 }
0x6168   :  { %v11547_v55 = vpop.permute.xlu1 %11546 }
0x6169   :  { %v11549_v2 = vmul.f32 %v11547_v55, %v11544_v52 }
0x616b   :  { %v17510_v18 = vadd.f32 %v11552_v35, %v11549_v2 }
0x616d   :  { %v11559_v25 = vrot.slane %v17510_v18, 4  ;;  %v11663_v21 = vrot.slane %v17510_v18, 6 }
0x616f   :  { %11560 = vrot.lane.b32.xlu0 %v11559_v25, %s15224_s28 }
0x61e1   :  { %v11561_v46 = vpop.permute.xlu0 %11560 }
0x61e2   :  { %13891 = vmatmul.mubr.msk.f32.vlgmr.msra.gmra.mrb[122].mxu1 %vm623_vm7, %v11561_v46 }
0x62b5   :  { %v11630_v53 = vpop.f32.mrb[122].mxu1 }
0x62b6   :  { %v11644_v54 = vadd.f32 %v11630_v53, %v17224_v31  ;;  %v13892_v44 = vpop.f32.mrb[123].mxu1  ;;  %v11635_v59 = vrot.slane %v11630_v53, 2 }
0x62b8   :  { %v11646_v56 = vrot.slane %v11644_v54, 2  ;;  %v11637_v50 = vadd.f32 %v11635_v59, %v17478_v6 }
0x62ba   :  { %11647 = vrot.lane.b32.xlu1 %v11646_v56, %s15225_s17  ;;  %v11638_v11 = vsub.f32 0.0, %v11637_v50 }
0x62bc   :  { %v11639_v30 = vmul.f32 1.442695, %v11638_v11 }
0x62be   :  { %14877 = vpow2.f32 %v11639_v30 }
0x62c8   :  { %v14878_v58 = vpop.eup %14877 }
0x62c9   :  { %v11641_v51 = vadd.f32 1.0, %v14878_v58 }
0x62cb   :  { %14879 = vrcp.f32 %v11641_v51 }
0x62d5   :  { %v14880_v34 = vpop.eup %14879 }
0x62d6   :  { %v11665_v24 = vmul.f32 %v14880_v34, %v11663_v21 }
0x632c   :  { %v11648_v43 = vpop.permute.xlu1 %11647 }
0x632d   :  { %v11650_v9 = vmul.f32 %v14880_v34, %v11648_v43 }
0x632f   :  { %11652 = vrot.lane.b32.xlu0 %v11650_v9, %s15225_s17 }
0x6333   :  { %10110 = vrot.lane.b32.xlu0 %v17284_v39, %s15224_s28 }
0x6337   :  { %10336 = vrot.lane.b32.xlu0 %v17320_v29, %s15224_s28 }
0x633b   :  { %10667 = vrot.lane.b32.xlu0 %v17374_v8, %s15224_s28  ;;  %v11676_v8 = vld [vmem:[#allocation21] sm:$0xff] }
0x633f   :  { %10998 = vrot.lane.b32.xlu0 %v17428_v40, %s15224_s28  ;;  %v14579_v40 = vpack.c.bf16 %v11677_v61, %v11676_v8 }
0x6341   :  { %14580 = vmatprep.subr.bf16.mxu0 %v14579_v40 }
0x6342   :  { %14582 = vmatpush3.bf16.msra.mxu0 %v14579_v40 }
0x6343   :  { %11224 = vrot.lane.b32.xlu0 %v17464_v12, %s15224_s28  ;;  %v11678_v12 = vld [vmem:[#allocation21 + $0x10] sm:$0xff] }
0x6347   :  { %11555 = vrot.lane.b32.xlu0 %v17510_v18, %s15224_s28 }
0x63a1   :  { %v11653_v31 = vpop.permute.xlu0 %11652 }
0x63a2   :  { %v11655_v62 = vadd.f32 %v11653_v31, %v17478_v6  ;;  %v11679_v6 = vld [vmem:[#allocation21 + $0x18] sm:$0xff] }
0x63a3   :  { %v14583_v48 = vpack.c.bf16 %v11679_v6, %v11678_v12 }
0x63a4   :  { %14881 = vtanh.f32 %v11655_v62 }
0x63a5   :  { %v10111_v39 = vpop.permute.xlu0 %10110  ;;  %14584 = vmatprep.subr.bf16.mxu0 %v14583_v48 }
0x63a6   :  { %10113 = vst.msk [vmem:[#allocation3] sm:$0xc] %vm8215_vm1, %v10111_v39  ;;  %14586 = vmatpush3.bf16.msra.mxu0 %v14583_v48 }
0x63a9   :  { %v10337_v29 = vpop.permute.xlu0 %10336 }
0x63aa   :  { %10339 = vst.msk [vmem:[#allocation3] sm:$0xc0] %vm8443_vm5, %v10337_v29 }
0x63ad   :  { %v10668_v33 = vpop.permute.xlu0 %10667 }
0x63ae   :  { %v14882_v32 = vpop.eup %14881  ;;  %10670 = vst.msk [vmem:[#allocation3 + $0x8] sm:$0x30] %vm8329_vm13, %v10668_v33 }
0x63af   :  { %11659 = vrot.lane.b32.xlu1 %v14882_v32, %s15224_s28 }
0x63b1   :  { %v10999_v37 = vpop.permute.xlu0 %10998 }
0x63b2   :  { %11001 = vst.msk [vmem:[#allocation3 + $0x10] sm:$0xc] %vm8215_vm1, %v10999_v37 }
0x63b3   :  { %10223 = vrot.lane.b32.xlu1 %v17302_v49, %s15224_s28  ;;  %v11657_v49 = vsub.f32 1.0, %v14880_v34 }
0x63b5   :  { %v11225_v0 = vpop.permute.xlu0 %11224 }
0x63b6   :  { %11227 = vst.msk [vmem:[#allocation3 + $0x10] sm:$0xc0] %vm8443_vm5, %v11225_v0 }
0x63b7   :  { %10554 = vrot.lane.b32.xlu1 %v17356_v27, %s15224_s28 }
0x63b9   :  { %v11556_v17 = vpop.permute.xlu0 %11555 }
0x63ba   :  { %11558 = vst.msk [vmem:[#allocation3 + $0x18] sm:$0x30] %vm8329_vm13, %v11556_v17 }
0x63bb   :  { %10780 = vrot.lane.b32.xlu1 %v17392_v3, %s15224_s28 }
0x63bf   :  { %11111 = vrot.lane.b32.xlu1 %v17446_v10, %s15224_s28 }
0x63c3   :  { %11442 = vrot.lane.b32.xlu1 %v17498_v5, %s15224_s28 }
0x6421   :  { %v11660_v42 = vpop.permute.xlu1 %11659 }
0x6422   :  { %v11662_v15 = vmul.f32 %v11660_v42, %v11657_v49 }
0x6424   :  { %v11666_v13 = vadd.f32 %v11665_v24, %v11662_v15 }
0x6425   :  { %v10224_v27 = vpop.permute.xlu1 %10223 }
0x6426   :  { %10226 = vst.msk [vmem:[#allocation3] sm:$0x30] %vm8329_vm13, %v10224_v27  ;;  %11668 = vrot.lane.b32.xlu1 %v11666_v13, %s15224_s28 }
0x6429   :  { %v10555_v28 = vpop.permute.xlu1 %10554 }
0x642a   :  { %10557 = vst.msk [vmem:[#allocation3 + $0x8] sm:$0xc] %vm8215_vm1, %v10555_v28 }
0x642d   :  { %v10781_v3 = vpop.permute.xlu1 %10780  ;;  %v11672_v10 = vld [vmem:[#allocation3] sm:$0xff] }
0x642e   :  { %10783 = vst.msk [vmem:[#allocation3 + $0x8] sm:$0xc0] %vm8443_vm5, %v10781_v3  ;;  %13901 = vmatprep.mubr.msk.f32.mxu0 %vm623_vm7, %v11672_v10 }
0x6431   :  { %v11112_v5 = vpop.permute.xlu1 %11111 }
0x6432   :  { %11114 = vst.msk [vmem:[#allocation3 + $0x10] sm:$0x30] %vm8329_vm13, %v11112_v5 }
0x6435   :  { %v11443_v16 = vpop.permute.xlu1 %11442  ;;  %v11673_v63 = vld [vmem:[#allocation3 + $0x8] sm:$0xff] }
0x6436   :  { %11445 = vst.msk [vmem:[#allocation3 + $0x18] sm:$0xc] %vm8215_vm1, %v11443_v16  ;;  %13902 = vmatmul.mubr.msk.f32.vlgmr.msra.gmra.mrb[108].mxu0 %vm623_vm7, %v11673_v63 }
0x6439   :  { %v11674_v38 = vld [vmem:[#allocation3 + $0x10] sm:$0xff] }
0x643a   :  { %13904 = vmatprep.mubr.msk.f32.mxu0 %vm623_vm7, %v11674_v38 }
0x6498   :  { %v11669_v45 = vpop.permute.xlu1 %11668 }
0x6499   :  { %11671 = vst.msk [vmem:[#allocation3 + $0x18] sm:$0xc0] %vm8443_vm5, %v11669_v45 }
0x64a0   :  { %v11675_v14 = vld [vmem:[#allocation3 + $0x18] sm:$0xff] }
0x64a1   :  { %13905 = vmatmul.mubr.msk.f32.gmra.mrb[110].mxu0 %vm623_vm7, %v11675_v14 }
0x6509   :  { %v13903_v7 = vpop.f32.mrb[108].mxu0 }
0x650a   :  { %v11771_v23 = vadd.f32 %v13903_v7, %v11990_v36  ;;  %v11765_v60 = vpop.f32.mrb[109].mxu0 }
0x650b   :  { %v11766_v26 = vadd.f32 %v11990_v36, %v11765_v60 }
0x650c   :  { %11785 = vst [vmem:[%s17631_s10 + $0x8] sm:$0xff] %v11771_v23 }
0x650d   :  { %11784 = vst [vmem:[%s17631_s10] sm:$0xff] %v11766_v26 }
0x6574   :  { %v13906_v47 = vpop.f32.mrb[110].mxu0 }
0x6575   :  { %v11781_v57 = vadd.f32 %v13906_v47, %v11990_v36  ;;  %v11775_v22 = vpop.f32.mrb[111].mxu0 }
0x6576   :  { %v11776_v41 = vadd.f32 %v11990_v36, %v11775_v22 }
0x6577   :  { %11787 = vst [vmem:[%s17631_s10 + $0x18] sm:$0xff] %v11781_v57 }
0x6578   :  { %11786 = vst [vmem:[%s17631_s10 + $0x10] sm:$0xff] %v11776_v41 }
0x6579   :  { %11792 = vsyncpa [#allocation5], 1 }
0x657a   :  { %11793 = vsyncpa [#allocation7], 1 }
0x657b   :  { %11794 = vsyncpa [#allocation10], 1 }
0x657c   :  { %11795 = vsyncpa [#allocation13], 1 }
0x657d   :  { %11796 = vsyncpa [#allocation16], 1 }
0x657e   :  { %11797 = vsyncpa [#allocation19], 1 }
0x657f   :  { %11798 = vsyncpa [#allocation22], 1 }

</bundles_post_ra>
